<compile_context>
chip_gen: v7x
topology: tpu7x:2x2x1
jax: 0.10.0
libtpu: 0.0.40
codegen_flags: <defaults>
</compile_context>

<pallas_src>
import functools

import jax
import jax.numpy as jnp
from jax.experimental import pallas as pl
from jax.experimental.pallas import tpu as pltpu


def _pointnet_kernel(pts_ref, w1_ref, b1_ref, w2_ref, b2_ref, w3_ref, b3_ref,
                     out_ref, gmax_ref, *, compute_dtype):
    """One grid step: per-point MLP + running max-pool for a (tb, tn) tile.

    pts_ref : (tb, C, tn)   channel-first point tile (point axis lane-dense)
    w1_ref  : (64, C)   b1_ref: (64, 1)      -- layer 1 (VPU path, f32)
    w2_ref  : (128, 64) b2_ref: (128, 1)     -- layer 2 (MXU)
    w3_ref  : (256, 128) b3_ref: (256, 1)    -- layer 3 (MXU)
    out_ref : (tb, 256)  pooled features (written on the last point tile)
    gmax_ref: (tb, 256)  f32 running max over point tiles
    """
    tb, c, tn = pts_ref.shape
    n_idx = pl.program_id(1)

    # ---- init running max over the point-tile (reduction) axis --------------
    @pl.when(n_idx == 0)
    def _init():
        gmax_ref[...] = jnp.full(gmax_ref.shape, -jnp.inf, dtype=gmax_ref.dtype)

    x = pts_ref[...].astype(jnp.float32)                  # (tb, C, tn)
    w1 = w1_ref[...].astype(jnp.float32)                  # (64, C)
    b1 = b1_ref[...].astype(jnp.float32)                  # (64, 1)

    # ---- layer 1 (K = C, tiny): VPU broadcast FMAs, feature-major -----------
    # h1[b, f, n] = relu( sum_c w1[f, c] * x[b, c, n] + b1[f] )
    h1 = w1[:, 0:1] * x[:, 0:1, :]                        # (tb, 64, tn)
    for ci in range(1, c):
        h1 = h1 + w1[:, ci:ci + 1] * x[:, ci:ci + 1, :]
    h1 = jnp.maximum(h1 + b1, 0.0).astype(compute_dtype)  # (tb, 64, tn)

    w2 = w2_ref[...]                                      # (128, 64)  compute dtype
    w3 = w3_ref[...]                                      # (256, 128) compute dtype
    b2 = b2_ref[...].astype(jnp.float32)                  # (128, 1)
    b3 = b3_ref[...].astype(jnp.float32)                  # (256, 1)

    # ---- layers 2/3 on the MXU, per batch row (2D dots, lane-dense tn) ------
    tile_max = []
    for b in range(tb):                                   # tb is small & static
        a2 = jnp.dot(w2, h1[b], preferred_element_type=jnp.float32)   # (128, tn)
        a2 = jnp.maximum(a2 + b2, 0.0).astype(compute_dtype)
        a3 = jnp.dot(w3, a2, preferred_element_type=jnp.float32)      # (256, tn)
        a3 = a3 + b3                                                   # f32
        tile_max.append(jnp.max(a3, axis=-1))             # (256,) max over points
    tmax = jnp.stack(tile_max, axis=0)                    # (tb, 256)
    gmax_ref[...] = jnp.maximum(gmax_ref[...], tmax)

    # ---- dense, lane-wide store of the pooled feature on the last tile ------
    @pl.when(n_idx == pl.num_programs(1) - 1)
    def _finalize():
        out_ref[...] = gmax_ref[...].astype(out_ref.dtype)


def _round_up(x, m):
    return ((x + m - 1) // m) * m


def pointnet_forward(points, params, *, tb=8, tn=512,
                     compute_dtype=jnp.bfloat16):
    """points: [B, N, C] float32 -> [B, output_dim] float32."""
    B, N, C = points.shape
    (w1, b1, w2, b2, w3, b3, w4, b4, w5, b5) = params
    d3 = w3.shape[1]                                      # 256

    # Defensive tile rounding (sublane / lane alignment), no over-padding.
    tb = max(8, _round_up(tb, 8))
    tn = max(128, _round_up(tn, 128))
    tb = min(tb, _round_up(B, 8))
    tn = min(tn, _round_up(N, 128))
    b_pad = _round_up(B, tb)
    n_pad = _round_up(N, tn)

    # Channel-first [B, C, N]; edge-pad so padded points replicate a real
    # point (max-pool neutral -> no in-kernel masking) and padded batch rows
    # are harmless duplicates sliced off at the end.
    pts_cf = jnp.transpose(points, (0, 2, 1))
    if (b_pad, n_pad) != (B, N):
        pts_cf = jnp.pad(pts_cf, ((0, b_pad - B), (0, 0), (0, n_pad - N)),
                         mode='edge')

    # Weights pre-transposed for the feature-major kernel; biases as columns.
    w1_t = w1.T                                           # (64, C)  f32 (VPU)
    b1_c = b1.reshape(-1, 1)                              # (64, 1)
    w2_t = w2.T.astype(compute_dtype)                     # (128, 64)
    b2_c = b2.reshape(-1, 1)                              # (128, 1) f32
    w3_t = w3.T.astype(compute_dtype)                     # (256, 128)
    b3_c = b3.reshape(-1, 1)                              # (256, 1) f32

    def _full(a):                                         # grid-invariant block
        return pl.BlockSpec(a.shape, lambda bi, ni: (0,) * a.ndim)

    in_specs = [
        pl.BlockSpec((tb, C, tn), lambda bi, ni: (bi, 0, ni)),
        _full(w1_t), _full(b1_c),
        _full(w2_t), _full(b2_c),
        _full(w3_t), _full(b3_c),
    ]
    # Pooled-feature output block: resident across the point-tile axis,
    # lane-dense (256) last dim.
    out_specs = pl.BlockSpec((tb, d3), lambda bi, ni: (bi, 0))

    kernel = functools.partial(_pointnet_kernel, compute_dtype=compute_dtype)

    pooled = pl.pallas_call(
        kernel,
        out_shape=jax.ShapeDtypeStruct((b_pad, d3), jnp.float32),
        grid_spec=pltpu.PrefetchScalarGridSpec(
            num_scalar_prefetch=0,
            grid=(b_pad // tb, n_pad // tn),
            in_specs=in_specs,
            out_specs=out_specs,
            scratch_shapes=[pltpu.VMEM((tb, d3), jnp.float32)],
        ),
        compiler_params=pltpu.CompilerParams(
            dimension_semantics=("parallel", "arbitrary"),
            vmem_limit_bytes=48 * 1024 * 1024,
        ),
    )(pts_cf, w1_t, b1_c, w2_t, b2_c, w3_t, b3_c)

    # fc head (256 -> 128 -> out_dim) hoisted to XLA on all B rows at once.
    feat = pooled[:B]
    h = jnp.maximum(feat @ w4 + b4, 0.0)
    return h @ w5 + b5


def init_params(key, input_dim=3, output_dim=64):
    """PyTorch-Linear-style init: U(-1/sqrt(fan_in), 1/sqrt(fan_in)).

    Weights stored transposed relative to PyTorch ([in, out]); biases [1, out].
    """
    dims = [(input_dim, 64), (64, 128), (128, 256), (256, 128), (128, output_dim)]
    params = []
    for (fan_in, fan_out) in dims:
        key, kw, kb = jax.random.split(key, 3)
        bound = 1.0 / jnp.sqrt(jnp.float32(fan_in))
        w = jax.random.uniform(kw, (fan_in, fan_out), jnp.float32, -bound, bound)
        b = jax.random.uniform(kb, (1, fan_out), jnp.float32, -bound, bound)
        params += [w, b]
    return tuple(params)


def pointnet_reference(points, params):
    """Pure-JAX reference of the PyTorch forward, for verification."""
    (w1, b1, w2, b2, w3, b3, w4, b4, w5, b5) = params
    x = jnp.maximum(points @ w1 + b1, 0.0)
    x = jnp.maximum(x @ w2 + b2, 0.0)
    x = x @ w3 + b3                       # [B, N, 256]
    x = jnp.max(x, axis=1)                # AdaptiveMaxPool1d(1) over N -> [B, 256]
    x = jnp.maximum(x @ w4 + b4, 0.0)
    x = x @ w5 + b5                       # [B, output_dim]
    return x


if __name__ == "__main__":
    key = jax.random.PRNGKey(0)
    k_pts1, k_pts2, k_par = jax.random.split(key, 3)

    input_dim, output_dim = 3, 64
    params = init_params(k_par, input_dim=input_dim, output_dim=output_dim)

    # Case 1: small shape matching the module docstring ([B, N, 3]), f32 path.
    B1, N1 = 2, 8
    pts1 = jax.random.normal(k_pts1, (B1, N1, input_dim), jnp.float32)
    out1 = jax.block_until_ready(
        pointnet_forward(pts1, params, compute_dtype=jnp.float32))
    ref1 = pointnet_reference(pts1, params)
    assert out1.shape == (B1, output_dim), out1.shape
    assert jnp.allclose(out1, ref1, atol=1e-4, rtol=1e-4), "f32 mismatch (case 1)"

    # Case 2: ragged shapes exercising batch padding, point (edge) padding and
    # the multi-tile running-max accumulator (N=300 with tn=128 -> 3 tiles).
    B2, N2 = 3, 300
    pts2 = jax.random.normal(k_pts2, (B2, N2, input_dim), jnp.float32)
    out2 = jax.block_until_ready(
        pointnet_forward(pts2, params, tn=128, compute_dtype=jnp.float32))
    ref2 = pointnet_reference(pts2, params)
    assert out2.shape == (B2, output_dim), out2.shape
    assert jnp.allclose(out2, ref2, atol=1e-4, rtol=1e-4), "f32 mismatch (case 2)"

    # Case 3: default bf16 MXU path (f32 accumulation), looser tolerance.
    out3 = jax.block_until_ready(pointnet_forward(pts1, params))
    assert out3.shape == (B1, output_dim), out3.shape
    assert float(jnp.max(jnp.abs(out3 - ref1))) < 1e-1, "bf16 mismatch"

    print("KERNEL_OK")
</pallas_src>

<mosaic_0001>
module attributes {stable_mosaic.version = 11 : i64} {
  func.func @_pointnet_kernel(%arg0: i32, %arg1: i32, %arg2: memref<8x3x128xf32, #tpu.memory_space<vmem>>, %arg3: memref<64x3xf32, #tpu.memory_space<vmem>>, %arg4: memref<64x1xf32, #tpu.memory_space<vmem>>, %arg5: memref<128x64xf32, #tpu.memory_space<vmem>>, %arg6: memref<128x1xf32, #tpu.memory_space<vmem>>, %arg7: memref<256x128xf32, #tpu.memory_space<vmem>>, %arg8: memref<256x1xf32, #tpu.memory_space<vmem>>, %arg9: memref<8x256xf32, #tpu.memory_space<vmem>>, %arg10: memref<8x256xf32, #tpu.memory_space<vmem>>) attributes {dimension_semantics = [#tpu.dimension_semantics<parallel>, #tpu.dimension_semantics<arbitrary>], iteration_bounds = array<i64: 1, 1>, scalar_prefetch = 0 : i64, scratch_operands = 1 : i64, tpu.core_type = #tpu.core_type<tc>, window_params = [{transform_indices = @transform_0, window_bounds = array<i64: 8, 3, 128>}, {pipeline_mode = #tpu.pipeline_mode<synchronous>, transform_indices = @transform_1, window_bounds = array<i64: 64, 3>}, {pipeline_mode = #tpu.pipeline_mode<synchronous>, transform_indices = @transform_2, window_bounds = array<i64: 64, 1>}, {pipeline_mode = #tpu.pipeline_mode<synchronous>, transform_indices = @transform_3, window_bounds = array<i64: 128, 64>}, {pipeline_mode = #tpu.pipeline_mode<synchronous>, transform_indices = @transform_4, window_bounds = array<i64: 128, 1>}, {pipeline_mode = #tpu.pipeline_mode<synchronous>, transform_indices = @transform_5, window_bounds = array<i64: 256, 128>}, {pipeline_mode = #tpu.pipeline_mode<synchronous>, transform_indices = @transform_6, window_bounds = array<i64: 256, 1>}, {transform_indices = @transform_7, window_bounds = array<i64: 8, 256>}]} {
    %c0_i32 = arith.constant 0 : i32
    %0 = arith.cmpi eq, %arg1, %c0_i32 : i32
    %1 = arith.extui %0 : i1 to i32
    %c0_i32_0 = arith.constant 0 : i32
    %2 = arith.cmpi ne, %1, %c0_i32_0 : i32
    scf.if %2 {
      %cst_53 = arith.constant 0xFF800000 : f32
      %138 = vector.broadcast %cst_53 : f32 to vector<8x256xf32>
      %c0_54 = arith.constant 0 : index
      %c0_55 = arith.constant 0 : index
      %139 = vector.load %arg10[%c0_54, %c0_55] : memref<8x256xf32, #tpu.memory_space<vmem>>, vector<8x256xf32>
      tpu.vector_store %arg10[%c0_54, %c0_55], %138 {strides = array<i32>} : memref<8x256xf32, #tpu.memory_space<vmem>>, vector<8x256xf32>,
    } else {
    }
    %c0 = arith.constant 0 : index
    %c0_1 = arith.constant 0 : index
    %c0_2 = arith.constant 0 : index
    %3 = vector.load %arg2[%c0, %c0_1, %c0_2] : memref<8x3x128xf32, #tpu.memory_space<vmem>>, vector<8x3x128xf32>
    %c0_3 = arith.constant 0 : index
    %c0_4 = arith.constant 0 : index
    %4 = vector.load %arg3[%c0_3, %c0_4] : memref<64x3xf32, #tpu.memory_space<vmem>>, vector<64x3xf32>
    %c0_5 = arith.constant 0 : index
    %c0_6 = arith.constant 0 : index
    %5 = vector.load %arg4[%c0_5, %c0_6] : memref<64x1xf32, #tpu.memory_space<vmem>>, vector<64x1xf32>
    %6 = vector.extract_strided_slice %4 {offsets = [0, 0], sizes = [64, 1], strides = [1, 1]} : vector<64x3xf32> to vector<64x1xf32>
    %7 = vector.extract_strided_slice %3 {offsets = [0, 0, 0], sizes = [8, 1, 128], strides = [1, 1, 1]} : vector<8x3x128xf32> to vector<8x1x128xf32>
    %8 = vector.shape_cast %6 : vector<64x1xf32> to vector<1x64x1xf32>
    %9 = vector.broadcast %8 : vector<1x64x1xf32> to vector<8x64x128xf32>
    %10 = vector.broadcast %7 : vector<8x1x128xf32> to vector<8x64x128xf32>
    %11 = arith.mulf %9, %10 : vector<8x64x128xf32>
    %12 = vector.extract_strided_slice %4 {offsets = [0, 1], sizes = [64, 1], strides = [1, 1]} : vector<64x3xf32> to vector<64x1xf32>
    %13 = vector.extract_strided_slice %3 {offsets = [0, 1, 0], sizes = [8, 1, 128], strides = [1, 1, 1]} : vector<8x3x128xf32> to vector<8x1x128xf32>
    %14 = vector.shape_cast %12 : vector<64x1xf32> to vector<1x64x1xf32>
    %15 = vector.broadcast %14 : vector<1x64x1xf32> to vector<8x64x128xf32>
    %16 = vector.broadcast %13 : vector<8x1x128xf32> to vector<8x64x128xf32>
    %17 = arith.mulf %15, %16 : vector<8x64x128xf32>
    %18 = arith.addf %11, %17 : vector<8x64x128xf32>
    %19 = vector.extract_strided_slice %4 {offsets = [0, 2], sizes = [64, 1], strides = [1, 1]} : vector<64x3xf32> to vector<64x1xf32>
    %20 = vector.extract_strided_slice %3 {offsets = [0, 2, 0], sizes = [8, 1, 128], strides = [1, 1, 1]} : vector<8x3x128xf32> to vector<8x1x128xf32>
    %21 = vector.shape_cast %19 : vector<64x1xf32> to vector<1x64x1xf32>
    %22 = vector.broadcast %21 : vector<1x64x1xf32> to vector<8x64x128xf32>
    %23 = vector.broadcast %20 : vector<8x1x128xf32> to vector<8x64x128xf32>
    %24 = arith.mulf %22, %23 : vector<8x64x128xf32>
    %25 = arith.addf %18, %24 : vector<8x64x128xf32>
    %26 = vector.shape_cast %5 : vector<64x1xf32> to vector<1x64x1xf32>
    %27 = vector.broadcast %26 : vector<1x64x1xf32> to vector<8x64x128xf32>
    %28 = arith.addf %25, %27 : vector<8x64x128xf32>
    %cst = arith.constant 0.000000e+00 : f32
    %29 = vector.broadcast %cst : f32 to vector<8x64x128xf32>
    %30 = arith.maximumf %28, %29 : vector<8x64x128xf32>
    %c0_7 = arith.constant 0 : index
    %c0_8 = arith.constant 0 : index
    %31 = vector.load %arg5[%c0_7, %c0_8] : memref<128x64xf32, #tpu.memory_space<vmem>>, vector<128x64xf32>
    %c0_9 = arith.constant 0 : index
    %c0_10 = arith.constant 0 : index
    %32 = vector.load %arg7[%c0_9, %c0_10] : memref<256x128xf32, #tpu.memory_space<vmem>>, vector<256x128xf32>
    %c0_11 = arith.constant 0 : index
    %c0_12 = arith.constant 0 : index
    %33 = vector.load %arg6[%c0_11, %c0_12] : memref<128x1xf32, #tpu.memory_space<vmem>>, vector<128x1xf32>
    %c0_13 = arith.constant 0 : index
    %c0_14 = arith.constant 0 : index
    %34 = vector.load %arg8[%c0_13, %c0_14] : memref<256x1xf32, #tpu.memory_space<vmem>>, vector<256x1xf32>
    %35 = vector.extract_strided_slice %30 {offsets = [0, 0, 0], sizes = [1, 64, 128], strides = [1, 1, 1]} : vector<8x64x128xf32> to vector<1x64x128xf32>
    %36 = vector.shape_cast %35 : vector<1x64x128xf32> to vector<64x128xf32>
    %cst_15 = arith.constant dense<0.000000e+00> : vector<128x128xf32>
    %37 = tpu.matmul %31, %36, %cst_15 {dimension_numbers = #tpu.dot_dimension_numbers<[1], [0], [0], [1], [0, 0, 1, 1], [], []>} : vector<128x64xf32>, vector<64x128xf32>, vector<128x128xf32> -> vector<128x128xf32>
    %38 = vector.broadcast %33 : vector<128x1xf32> to vector<128x128xf32>
    %39 = arith.addf %37, %38 : vector<128x128xf32>
    %cst_16 = arith.constant 0.000000e+00 : f32
    %40 = vector.broadcast %cst_16 : f32 to vector<128x128xf32>
    %41 = arith.maximumf %39, %40 : vector<128x128xf32>
    %cst_17 = arith.constant dense<0.000000e+00> : vector<256x128xf32>
    %42 = tpu.matmul %32, %41, %cst_17 {dimension_numbers = #tpu.dot_dimension_numbers<[1], [0], [0], [1], [0, 0, 1, 1], [], []>} : vector<256x128xf32>, vector<128x128xf32>, vector<256x128xf32> -> vector<256x128xf32>
    %43 = vector.broadcast %34 : vector<256x1xf32> to vector<256x128xf32>
    %44 = arith.addf %42, %43 : vector<256x128xf32>
    %cst_18 = arith.constant dense<0xFF800000> : vector<256xf32>
    %45 = vector.multi_reduction <maximumf>, %44, %cst_18 [1] : vector<256x128xf32> to vector<256xf32>
    %46 = vector.extract_strided_slice %30 {offsets = [1, 0, 0], sizes = [1, 64, 128], strides = [1, 1, 1]} : vector<8x64x128xf32> to vector<1x64x128xf32>
    %47 = vector.shape_cast %46 : vector<1x64x128xf32> to vector<64x128xf32>
    %cst_19 = arith.constant dense<0.000000e+00> : vector<128x128xf32>
    %48 = tpu.matmul %31, %47, %cst_19 {dimension_numbers = #tpu.dot_dimension_numbers<[1], [0], [0], [1], [0, 0, 1, 1], [], []>} : vector<128x64xf32>, vector<64x128xf32>, vector<128x128xf32> -> vector<128x128xf32>
    %49 = vector.broadcast %33 : vector<128x1xf32> to vector<128x128xf32>
    %50 = arith.addf %48, %49 : vector<128x128xf32>
    %cst_20 = arith.constant 0.000000e+00 : f32
    %51 = vector.broadcast %cst_20 : f32 to vector<128x128xf32>
    %52 = arith.maximumf %50, %51 : vector<128x128xf32>
    %cst_21 = arith.constant dense<0.000000e+00> : vector<256x128xf32>
    %53 = tpu.matmul %32, %52, %cst_21 {dimension_numbers = #tpu.dot_dimension_numbers<[1], [0], [0], [1], [0, 0, 1, 1], [], []>} : vector<256x128xf32>, vector<128x128xf32>, vector<256x128xf32> -> vector<256x128xf32>
    %54 = vector.broadcast %34 : vector<256x1xf32> to vector<256x128xf32>
    %55 = arith.addf %53, %54 : vector<256x128xf32>
    %cst_22 = arith.constant dense<0xFF800000> : vector<256xf32>
    %56 = vector.multi_reduction <maximumf>, %55, %cst_22 [1] : vector<256x128xf32> to vector<256xf32>
    %57 = vector.extract_strided_slice %30 {offsets = [2, 0, 0], sizes = [1, 64, 128], strides = [1, 1, 1]} : vector<8x64x128xf32> to vector<1x64x128xf32>
    %58 = vector.shape_cast %57 : vector<1x64x128xf32> to vector<64x128xf32>
    %cst_23 = arith.constant dense<0.000000e+00> : vector<128x128xf32>
    %59 = tpu.matmul %31, %58, %cst_23 {dimension_numbers = #tpu.dot_dimension_numbers<[1], [0], [0], [1], [0, 0, 1, 1], [], []>} : vector<128x64xf32>, vector<64x128xf32>, vector<128x128xf32> -> vector<128x128xf32>
    %60 = vector.broadcast %33 : vector<128x1xf32> to vector<128x128xf32>
    %61 = arith.addf %59, %60 : vector<128x128xf32>
    %cst_24 = arith.constant 0.000000e+00 : f32
    %62 = vector.broadcast %cst_24 : f32 to vector<128x128xf32>
    %63 = arith.maximumf %61, %62 : vector<128x128xf32>
    %cst_25 = arith.constant dense<0.000000e+00> : vector<256x128xf32>
    %64 = tpu.matmul %32, %63, %cst_25 {dimension_numbers = #tpu.dot_dimension_numbers<[1], [0], [0], [1], [0, 0, 1, 1], [], []>} : vector<256x128xf32>, vector<128x128xf32>, vector<256x128xf32> -> vector<256x128xf32>
    %65 = vector.broadcast %34 : vector<256x1xf32> to vector<256x128xf32>
    %66 = arith.addf %64, %65 : vector<256x128xf32>
    %cst_26 = arith.constant dense<0xFF800000> : vector<256xf32>
    %67 = vector.multi_reduction <maximumf>, %66, %cst_26 [1] : vector<256x128xf32> to vector<256xf32>
    %68 = vector.extract_strided_slice %30 {offsets = [3, 0, 0], sizes = [1, 64, 128], strides = [1, 1, 1]} : vector<8x64x128xf32> to vector<1x64x128xf32>
    %69 = vector.shape_cast %68 : vector<1x64x128xf32> to vector<64x128xf32>
    %cst_27 = arith.constant dense<0.000000e+00> : vector<128x128xf32>
    %70 = tpu.matmul %31, %69, %cst_27 {dimension_numbers = #tpu.dot_dimension_numbers<[1], [0], [0], [1], [0, 0, 1, 1], [], []>} : vector<128x64xf32>, vector<64x128xf32>, vector<128x128xf32> -> vector<128x128xf32>
    %71 = vector.broadcast %33 : vector<128x1xf32> to vector<128x128xf32>
    %72 = arith.addf %70, %71 : vector<128x128xf32>
    %cst_28 = arith.constant 0.000000e+00 : f32
    %73 = vector.broadcast %cst_28 : f32 to vector<128x128xf32>
    %74 = arith.maximumf %72, %73 : vector<128x128xf32>
    %cst_29 = arith.constant dense<0.000000e+00> : vector<256x128xf32>
    %75 = tpu.matmul %32, %74, %cst_29 {dimension_numbers = #tpu.dot_dimension_numbers<[1], [0], [0], [1], [0, 0, 1, 1], [], []>} : vector<256x128xf32>, vector<128x128xf32>, vector<256x128xf32> -> vector<256x128xf32>
    %76 = vector.broadcast %34 : vector<256x1xf32> to vector<256x128xf32>
    %77 = arith.addf %75, %76 : vector<256x128xf32>
    %cst_30 = arith.constant dense<0xFF800000> : vector<256xf32>
    %78 = vector.multi_reduction <maximumf>, %77, %cst_30 [1] : vector<256x128xf32> to vector<256xf32>
    %79 = vector.extract_strided_slice %30 {offsets = [4, 0, 0], sizes = [1, 64, 128], strides = [1, 1, 1]} : vector<8x64x128xf32> to vector<1x64x128xf32>
    %80 = vector.shape_cast %79 : vector<1x64x128xf32> to vector<64x128xf32>
    %cst_31 = arith.constant dense<0.000000e+00> : vector<128x128xf32>
    %81 = tpu.matmul %31, %80, %cst_31 {dimension_numbers = #tpu.dot_dimension_numbers<[1], [0], [0], [1], [0, 0, 1, 1], [], []>} : vector<128x64xf32>, vector<64x128xf32>, vector<128x128xf32> -> vector<128x128xf32>
    %82 = vector.broadcast %33 : vector<128x1xf32> to vector<128x128xf32>
    %83 = arith.addf %81, %82 : vector<128x128xf32>
    %cst_32 = arith.constant 0.000000e+00 : f32
    %84 = vector.broadcast %cst_32 : f32 to vector<128x128xf32>
    %85 = arith.maximumf %83, %84 : vector<128x128xf32>
    %cst_33 = arith.constant dense<0.000000e+00> : vector<256x128xf32>
    %86 = tpu.matmul %32, %85, %cst_33 {dimension_numbers = #tpu.dot_dimension_numbers<[1], [0], [0], [1], [0, 0, 1, 1], [], []>} : vector<256x128xf32>, vector<128x128xf32>, vector<256x128xf32> -> vector<256x128xf32>
    %87 = vector.broadcast %34 : vector<256x1xf32> to vector<256x128xf32>
    %88 = arith.addf %86, %87 : vector<256x128xf32>
    %cst_34 = arith.constant dense<0xFF800000> : vector<256xf32>
    %89 = vector.multi_reduction <maximumf>, %88, %cst_34 [1] : vector<256x128xf32> to vector<256xf32>
    %90 = vector.extract_strided_slice %30 {offsets = [5, 0, 0], sizes = [1, 64, 128], strides = [1, 1, 1]} : vector<8x64x128xf32> to vector<1x64x128xf32>
    %91 = vector.shape_cast %90 : vector<1x64x128xf32> to vector<64x128xf32>
    %cst_35 = arith.constant dense<0.000000e+00> : vector<128x128xf32>
    %92 = tpu.matmul %31, %91, %cst_35 {dimension_numbers = #tpu.dot_dimension_numbers<[1], [0], [0], [1], [0, 0, 1, 1], [], []>} : vector<128x64xf32>, vector<64x128xf32>, vector<128x128xf32> -> vector<128x128xf32>
    %93 = vector.broadcast %33 : vector<128x1xf32> to vector<128x128xf32>
    %94 = arith.addf %92, %93 : vector<128x128xf32>
    %cst_36 = arith.constant 0.000000e+00 : f32
    %95 = vector.broadcast %cst_36 : f32 to vector<128x128xf32>
    %96 = arith.maximumf %94, %95 : vector<128x128xf32>
    %cst_37 = arith.constant dense<0.000000e+00> : vector<256x128xf32>
    %97 = tpu.matmul %32, %96, %cst_37 {dimension_numbers = #tpu.dot_dimension_numbers<[1], [0], [0], [1], [0, 0, 1, 1], [], []>} : vector<256x128xf32>, vector<128x128xf32>, vector<256x128xf32> -> vector<256x128xf32>
    %98 = vector.broadcast %34 : vector<256x1xf32> to vector<256x128xf32>
    %99 = arith.addf %97, %98 : vector<256x128xf32>
    %cst_38 = arith.constant dense<0xFF800000> : vector<256xf32>
    %100 = vector.multi_reduction <maximumf>, %99, %cst_38 [1] : vector<256x128xf32> to vector<256xf32>
    %101 = vector.extract_strided_slice %30 {offsets = [6, 0, 0], sizes = [1, 64, 128], strides = [1, 1, 1]} : vector<8x64x128xf32> to vector<1x64x128xf32>
    %102 = vector.shape_cast %101 : vector<1x64x128xf32> to vector<64x128xf32>
    %cst_39 = arith.constant dense<0.000000e+00> : vector<128x128xf32>
    %103 = tpu.matmul %31, %102, %cst_39 {dimension_numbers = #tpu.dot_dimension_numbers<[1], [0], [0], [1], [0, 0, 1, 1], [], []>} : vector<128x64xf32>, vector<64x128xf32>, vector<128x128xf32> -> vector<128x128xf32>
    %104 = vector.broadcast %33 : vector<128x1xf32> to vector<128x128xf32>
    %105 = arith.addf %103, %104 : vector<128x128xf32>
    %cst_40 = arith.constant 0.000000e+00 : f32
    %106 = vector.broadcast %cst_40 : f32 to vector<128x128xf32>
    %107 = arith.maximumf %105, %106 : vector<128x128xf32>
    %cst_41 = arith.constant dense<0.000000e+00> : vector<256x128xf32>
    %108 = tpu.matmul %32, %107, %cst_41 {dimension_numbers = #tpu.dot_dimension_numbers<[1], [0], [0], [1], [0, 0, 1, 1], [], []>} : vector<256x128xf32>, vector<128x128xf32>, vector<256x128xf32> -> vector<256x128xf32>
    %109 = vector.broadcast %34 : vector<256x1xf32> to vector<256x128xf32>
    %110 = arith.addf %108, %109 : vector<256x128xf32>
    %cst_42 = arith.constant dense<0xFF800000> : vector<256xf32>
    %111 = vector.multi_reduction <maximumf>, %110, %cst_42 [1] : vector<256x128xf32> to vector<256xf32>
    %112 = vector.extract_strided_slice %30 {offsets = [7, 0, 0], sizes = [1, 64, 128], strides = [1, 1, 1]} : vector<8x64x128xf32> to vector<1x64x128xf32>
    %113 = vector.shape_cast %112 : vector<1x64x128xf32> to vector<64x128xf32>
    %cst_43 = arith.constant dense<0.000000e+00> : vector<128x128xf32>
    %114 = tpu.matmul %31, %113, %cst_43 {dimension_numbers = #tpu.dot_dimension_numbers<[1], [0], [0], [1], [0, 0, 1, 1], [], []>} : vector<128x64xf32>, vector<64x128xf32>, vector<128x128xf32> -> vector<128x128xf32>
    %115 = vector.broadcast %33 : vector<128x1xf32> to vector<128x128xf32>
    %116 = arith.addf %114, %115 : vector<128x128xf32>
    %cst_44 = arith.constant 0.000000e+00 : f32
    %117 = vector.broadcast %cst_44 : f32 to vector<128x128xf32>
    %118 = arith.maximumf %116, %117 : vector<128x128xf32>
    %cst_45 = arith.constant dense<0.000000e+00> : vector<256x128xf32>
    %119 = tpu.matmul %32, %118, %cst_45 {dimension_numbers = #tpu.dot_dimension_numbers<[1], [0], [0], [1], [0, 0, 1, 1], [], []>} : vector<256x128xf32>, vector<128x128xf32>, vector<256x128xf32> -> vector<256x128xf32>
    %120 = vector.broadcast %34 : vector<256x1xf32> to vector<256x128xf32>
    %121 = arith.addf %119, %120 : vector<256x128xf32>
    %cst_46 = arith.constant dense<0xFF800000> : vector<256xf32>
    %122 = vector.multi_reduction <maximumf>, %121, %cst_46 [1] : vector<256x128xf32> to vector<256xf32>
    %123 = vector.shape_cast %45 : vector<256xf32> to vector<1x256xf32>
    %124 = vector.shape_cast %56 : vector<256xf32> to vector<1x256xf32>
    %125 = vector.shape_cast %67 : vector<256xf32> to vector<1x256xf32>
    %126 = vector.shape_cast %78 : vector<256xf32> to vector<1x256xf32>
    %127 = vector.shape_cast %89 : vector<256xf32> to vector<1x256xf32>
    %128 = vector.shape_cast %100 : vector<256xf32> to vector<1x256xf32>
    %129 = vector.shape_cast %111 : vector<256xf32> to vector<1x256xf32>
    %130 = vector.shape_cast %122 : vector<256xf32> to vector<1x256xf32>
    %131 = tpu.concatenate %123, %124, %125, %126, %127, %128, %129, %130 in 0 : vector<1x256xf32>, vector<1x256xf32>, vector<1x256xf32>, vector<1x256xf32>, vector<1x256xf32>, vector<1x256xf32>, vector<1x256xf32>, vector<1x256xf32> -> vector<8x256xf32>
    %c0_47 = arith.constant 0 : index
    %c0_48 = arith.constant 0 : index
    %132 = vector.load %arg10[%c0_47, %c0_48] : memref<8x256xf32, #tpu.memory_space<vmem>>, vector<8x256xf32>
    %133 = arith.maximumf %132, %131 : vector<8x256xf32>
    %c0_49 = arith.constant 0 : index
    %c0_50 = arith.constant 0 : index
    %134 = vector.load %arg10[%c0_49, %c0_50] : memref<8x256xf32, #tpu.memory_space<vmem>>, vector<8x256xf32>
    tpu.vector_store %arg10[%c0_49, %c0_50], %133 {strides = array<i32>} : memref<8x256xf32, #tpu.memory_space<vmem>>, vector<8x256xf32>,
    %c0_i32_51 = arith.constant 0 : i32
    %135 = arith.cmpi eq, %arg1, %c0_i32_51 : i32
    %136 = arith.extui %135 : i1 to i32
    %c0_i32_52 = arith.constant 0 : i32
    %137 = arith.cmpi ne, %136, %c0_i32_52 : i32
    scf.if %137 {
      %c0_53 = arith.constant 0 : index
      %c0_54 = arith.constant 0 : index
      %138 = vector.load %arg10[%c0_53, %c0_54] : memref<8x256xf32, #tpu.memory_space<vmem>>, vector<8x256xf32>
      %c0_55 = arith.constant 0 : index
      %c0_56 = arith.constant 0 : index
      %139 = vector.load %arg9[%c0_55, %c0_56] : memref<8x256xf32, #tpu.memory_space<vmem>>, vector<8x256xf32>
      tpu.vector_store %arg9[%c0_55, %c0_56], %138 {strides = array<i32>} : memref<8x256xf32, #tpu.memory_space<vmem>>, vector<8x256xf32>,
    } else {
    }
    return
  }
  func.func @transform_0(%arg0: i32, %arg1: i32) -> (i32, i32, i32) {
    %c0_i32 = arith.constant 0 : i32
    %c0_i32_0 = arith.constant 0 : i32
    return %arg0, %c0_i32, %arg1 : i32, i32, i32
  }
  func.func @transform_1(%arg0: i32, %arg1: i32) -> (i32, i32) {
    %c0_i32 = arith.constant 0 : i32
    %c0_i32_0 = arith.constant 0 : i32
    %c0_i32_1 = arith.constant 0 : i32
    return %c0_i32, %c0_i32_0 : i32, i32
  }
  func.func @transform_2(%arg0: i32, %arg1: i32) -> (i32, i32) {
    %c0_i32 = arith.constant 0 : i32
    %c0_i32_0 = arith.constant 0 : i32
    %c0_i32_1 = arith.constant 0 : i32
    return %c0_i32, %c0_i32_0 : i32, i32
  }
  func.func @transform_3(%arg0: i32, %arg1: i32) -> (i32, i32) {
    %c0_i32 = arith.constant 0 : i32
    %c0_i32_0 = arith.constant 0 : i32
    %c0_i32_1 = arith.constant 0 : i32
    return %c0_i32, %c0_i32_0 : i32, i32
  }
  func.func @transform_4(%arg0: i32, %arg1: i32) -> (i32, i32) {
    %c0_i32 = arith.constant 0 : i32
    %c0_i32_0 = arith.constant 0 : i32
    %c0_i32_1 = arith.constant 0 : i32
    return %c0_i32, %c0_i32_0 : i32, i32
  }
  func.func @transform_5(%arg0: i32, %arg1: i32) -> (i32, i32) {
    %c0_i32 = arith.constant 0 : i32
    %c0_i32_0 = arith.constant 0 : i32
    %c0_i32_1 = arith.constant 0 : i32
    return %c0_i32, %c0_i32_0 : i32, i32
  }
  func.func @transform_6(%arg0: i32, %arg1: i32) -> (i32, i32) {
    %c0_i32 = arith.constant 0 : i32
    %c0_i32_0 = arith.constant 0 : i32
    %c0_i32_1 = arith.constant 0 : i32
    return %c0_i32, %c0_i32_0 : i32, i32
  }
  func.func @transform_7(%arg0: i32, %arg1: i32) -> (i32, i32) {
    %c0_i32 = arith.constant 0 : i32
    %c0_i32_0 = arith.constant 0 : i32
    return %arg0, %c0_i32 : i32, i32
  }
}

</mosaic_0001>

<bundles_post_ra>
// kernel: tpu_custom_call.1
= control target key start
LH: loop header
LB: loop body
LE: loop exit
PB: predicated region body
PF: predicated region fallthrough
CT: control target
= control target key end

     0   :  { %v8517_v1 = vmov 2   ;;  %v8518_v2 = vmov 1   ;;  %v8519_v7 = vmov 0   ;;  %s12439_s0 = inlined_call_operand.vmem [shape: f32[8,3,128], index: 0, kind: input, shape index: {}]   ;;  %s12440_s1 = inlined_call_operand.vmem [shape: f32[64,3], index: 1, kind: input, shape index: {}]   ;;  %s12441_s2 = inlined_call_operand.vmem [shape: f32[64,1], index: 2, kind: input, shape index: {}]   ;;  %s12442_s3 = inlined_call_operand.vmem [shape: f32[128,64], index: 3, kind: input, shape index: {}]   ;;  %s12443_s4 = inlined_call_operand.vmem [shape: f32[128,1], index: 4, kind: input, shape index: {}]   ;;  %s12444_s5 = inlined_call_operand.vmem [shape: f32[256,128], index: 5, kind: input, shape index: {}]   ;;  %s12445_s6 = inlined_call_operand.vmem [shape: f32[256,1], index: 6, kind: input, shape index: {}]   ;;  %s12446_s7 = inlined_call_operand.hbm [shape: f32[8,256], index: 7, kind: output, shape index: {}]  }
   0x1   :  { %v41_v0 = vld [vmem:[%s12440_s1] sm:$0xff]  ;;  %8399 = vset.pattern.permute.xlu0 %v8517_v1  ;;  %8398 = vset.pattern.permute.xlu1 %v8518_v2  ;;  %v43_v3 = vld [vmem:[%s12440_s1 + $0x10] sm:$0xff]  ;;  %v42_v4 = vld [vmem:[%s12440_s1 + $0x8] sm:$0xff] }
   0x2   :  { %386 = vperm.xlu0 %8399, %v41_v0   ;;  %194 = vperm.xlu1 %8398, %v41_v0   ;;  %v46_v5 = vld [vmem:[%s12440_s1 + $0x28] sm:$0xff]  ;;  %v45_v6 = vld [vmem:[%s12440_s1 + $0x20] sm:$0xff]  ;;  %v48_v8 = vld [vmem:[%s12440_s1 + $0x38] sm:$0xff] }
   0x6   :  { %394 = vperm.xlu0 %8399, %v43_v3   ;;  %198 = vperm.xlu1 %8398, %v42_v4  }
   0xa   :  { %406 = vperm.xlu0 %8399, %v46_v5   ;;  %8400 = vset.pattern.permute.xlu1 %v8517_v1 }
   0xb   :  { %390 = vperm.xlu1 %8400, %v42_v4  }
   0xe   :  { %8407 = vset.pattern.permute.xlu0 %v8518_v2 }
   0xf   :  { %210 = vperm.xlu0 %8407, %v45_v6   ;;  %8401 = vset.pattern.permute.xlu1 %v8519_v7 }
  0x10   :  { %69 = vperm.xlu1 %8401, %v43_v3  }
  0x13   :  { %222 = vperm.xlu0 %8407, %v48_v8  }
  0x14   :  { %8402 = vset.pattern.permute.xlu1 %v8518_v2 }
  0x15   :  { %12 = vsyncpa [#allocation4], 0  ;;  %202 = vperm.xlu1 %8402, %v43_v3   ;;  %v44_v9 = vld [vmem:[%s12440_s1 + $0x18] sm:$0xff]  ;;  %v49_v10 = vld [vmem:[%s12441_s2] sm:$0xff]  ;;  %vm921_vm0 = vcmask 523264   ;;  %v12447_v43 = vlaneseq  ;;  %vm4773_vm1 = vcmask 130112  }
  0x16   :  { %v50_v11 = vld [vmem:[%s12441_s2 + $0x8] sm:$0xff]  ;;  %v47_v12 = vld [vmem:[%s12440_s1 + $0x30] sm:$0xff]  ;;  %v53_v13 = vld [vmem:[%s12441_s2 + $0x20] sm:$0xff]  ;;  %vm12704_vm2 = vcmask 195712   ;;  %vm4787_vm3 = vcmask 261312   ;;  %vm12705_vm4 = vcmask 326912  }
  0x17   :  { %8410 = vset.pattern.permute.xlu0 %v8519_v7  ;;  %v56_v14 = vld [vmem:[%s12441_s2 + $0x38] sm:$0xff]  ;;  %v794_v15 = vld [vmem:[%s12443_s4 + $0x8] sm:$0xff]  ;;  %v51_v17 = vld [vmem:[%s12441_s2 + $0x10] sm:$0xff]  ;;  %v8700_v46 = vshrl.u32 %v12447_v43, 7  ;;  %vm4801_vm5 = vcmask 392512   ;;  %vm12708_vm6 = vcmask 458112  }
  0x18   :  { %59 = vperm.xlu0 %8410, %v41_v0   ;;  %v796_v16 = vld [vmem:[%s12443_s4 + $0x18] sm:$0xff]  ;;  %v798_v18 = vld [vmem:[%s12443_s4 + $0x28] sm:$0xff]  ;;  %v55_v28 = vld [vmem:[%s12441_s2 + $0x30] sm:$0xff]  ;;  %vm12706_vm7 = vcmask 523712   ;;  %vm12707_vm8 = vcmask 589312   ;;  %vm12700_vm9 = vcmask 654912  }
  0x19   :  { %206 = vperm.xlu1 %8402, %v44_v9   ;;  %v52_v19 = vld [vmem:[%s12441_s2 + $0x18] sm:$0xff]  ;;  %v802_v21 = vld [vmem:[%s12443_s4 + $0x48] sm:$0xff]  ;;  %v793_v30 = vld [vmem:[%s12443_s4] sm:$0xff]  ;;  %12709 = vst [vmem:[#allocation6_spill] sm:$0xff] %v8700_v46  ;;  %v99_v49 = vsub.s32 0, %v8700_v46  ;;  %v227_v50 = vsub.s32 1, %v8700_v46 }
  0x1a   :  { %v800_v20 = vld [vmem:[%s12443_s4 + $0x38] sm:$0xff]  ;;  %v806_v23 = vld [vmem:[%s12443_s4 + $0x68] sm:$0xff]  ;;  %v795_v32 = vld [vmem:[%s12443_s4 + $0x10] sm:$0xff]  ;;  %v419_v53 = vsub.s32 2, %v8700_v46  ;;  %vm12699_vm10 = vcmask 720512   ;;  %vm12702_vm11 = vcmask 786112  }
  0x1b   :  { %v804_v22 = vld [vmem:[%s12443_s4 + $0x58] sm:$0xff]  ;;  %v810_v25 = vld [vmem:[%s12445_s6 + $0x8] sm:$0xff]  ;;  %v745_v33 = vld [vmem:[%s12442_s3] sm:$0xff]  ;;  %vm12701_vm12 = vcmask 851712   ;;  %vm4857_vm13 = vcmask 917312   ;;  %vm4864_vm14 = vcmask 982912  }
  0x1c   :  { %64 = vperm.xlu0 %8410, %v42_v4   ;;  %v808_v24 = vld [vmem:[%s12443_s4 + $0x78] sm:$0xff]  ;;  %v54_v26 = vld [vmem:[%s12441_s2 + $0x28] sm:$0xff]  ;;  %7066 = vmatprep.mubr.msk.f32.mxu1 %vm921_vm0, %v745_v33  ;;  %v797_v35 = vld [vmem:[%s12443_s4 + $0x20] sm:$0xff]  ;;  %vm4871_vm15 = vcmask 1048512  }
  0x1d   :  { %8403 = vset.pattern.permute.xlu1 %v8517_v1  ;;  %v812_v27 = vld [vmem:[%s12445_s6 + $0x18] sm:$0xff]  ;;  %v814_v29 = vld [vmem:[%s12445_s6 + $0x28] sm:$0xff]  ;;  %7186 = vmatprep.mubr.msk.f32.mxu0 %vm921_vm0, %v745_v33  ;;  %v799_v37 = vld [vmem:[%s12443_s4 + $0x30] sm:$0xff] }
  0x1e   :  { %398 = vperm.xlu1 %8403, %v44_v9   ;;  %v816_v31 = vld [vmem:[%s12445_s6 + $0x38] sm:$0xff]  ;;  %v818_v34 = vld [vmem:[%s12445_s6 + $0x48] sm:$0xff]  ;;  %v801_v39 = vld [vmem:[%s12443_s4 + $0x40] sm:$0xff] }
  0x1f   :  { %v820_v36 = vld [vmem:[%s12445_s6 + $0x58] sm:$0xff]  ;;  %v822_v38 = vld [vmem:[%s12445_s6 + $0x68] sm:$0xff]  ;;  %v803_v41 = vld [vmem:[%s12443_s4 + $0x50] sm:$0xff] }
  0x20   :  { %74 = vperm.xlu0 %8410, %v44_v9   ;;  %v824_v40 = vld [vmem:[%s12445_s6 + $0x78] sm:$0xff]  ;;  %v826_v42 = vld [vmem:[%s12445_s6 + $0x88] sm:$0xff]  ;;  %v805_v44 = vld [vmem:[%s12443_s4 + $0x60] sm:$0xff] }
  0x21   :  { %v828_v45 = vld [vmem:[%s12445_s6 + $0x98] sm:$0xff]  ;;  %v807_v47 = vld [vmem:[%s12443_s4 + $0x70] sm:$0xff]  ;;  %v830_v48 = vld [vmem:[%s12445_s6 + $0xa8] sm:$0xff] }
  0x22   :  { %8404 = vset.pattern.permute.xlu1 %v8519_v7  ;;  %v809_v51 = vld [vmem:[%s12445_s6] sm:$0xff]  ;;  %v35_v55 = vld [vmem:[%s12439_s0 + $0x8] sm:$0x7]  ;;  %v832_v56 = vld [vmem:[%s12445_s6 + $0xb8] sm:$0xff] }
  0x23   :  { %579 = vperm.xlu1 %8404, %v49_v10   ;;  %v33_v52 = vld [vmem:[%s12439_s0] sm:$0x7]  ;;  %v34_v54 = vld [vmem:[%s12439_s0 + $0x4] sm:$0x7]  ;;  %v36_v59 = vld [vmem:[%s12439_s0 + $0xc] sm:$0x7]  ;;  %v8750_v3 = vrot.slane %v35_v55, %v99_v49  ;;  %v8752_v4 = vrot.slane %v35_v55, %v227_v50 }
  0x24   :  { %584 = vperm.xlu0 %8410, %v50_v11   ;;  %v8726_v57 = vrot.slane %v33_v52, %v99_v49  ;;  %v8728_v58 = vrot.slane %v33_v52, %v227_v50  ;;  %v37_v60 = vld [vmem:[%s12439_s0 + $0x10] sm:$0x7]  ;;  %v8739_v62 = vrot.slane %v33_v52, %v419_v53  ;;  %v8741_v63 = vrot.slane %v34_v54, %v99_v49 }
  0x25   :  { %v811_v61 = vld [vmem:[%s12445_s6 + $0x10] sm:$0xff]  ;;  %v8743_v0 = vrot.slane %v34_v54, %v227_v50  ;;  %v8764_v9 = vrot.slane %v36_v59, %v227_v50  ;;  %v8766_v10 = vrot.slane %v36_v59, %v419_v53  ;;  %v8768_v11 = vrot.slane %v37_v60, %v99_v49 }
  0x27   :  { %79 = vperm.xlu1 %8404, %v45_v6  }
  0x28   :  { %89 = vperm.xlu0 %8410, %v47_v12  }
  0x2b   :  { %84 = vperm.xlu1 %8404, %v46_v5  }
  0x2c   :  { %599 = vperm.xlu0 %8410, %v53_v13  }
  0x2f   :  { %8405 = vset.pattern.permute.xlu1 %v8518_v2 }
  0x30   :  { %614 = vperm.xlu0 %8410, %v56_v14   ;;  %214 = vperm.xlu1 %8405, %v46_v5   ;;  %v8754_v5 = vrot.slane %v35_v55, %v419_v53 }
  0x34   :  { %848 = vperm.xlu0 %8410, %v794_v15   ;;  %8406 = vset.pattern.permute.xlu1 %v8517_v1  ;;  %v834_v15 = vld [vmem:[%s12445_s6 + $0xc8] sm:$0xff] }
  0x35   :  { %402 = vperm.xlu1 %8406, %v45_v6   ;;  %v8756_v6 = vrot.slane %v36_v59, %v99_v49 }
  0x38   :  { %858 = vperm.xlu0 %8410, %v796_v16   ;;  %v8775_v16 = vrot.slane %v37_v60, %v419_v53 }
  0x39   :  { %8408 = vset.pattern.permute.xlu1 %v8519_v7 }
  0x3a   :  { %589 = vperm.xlu1 %8408, %v51_v17   ;;  %12710 = vst [vmem:[#allocation7_spill] sm:$0xff] %v8775_v16 }
  0x3c   :  { %868 = vperm.xlu0 %8410, %v798_v18  }
  0x3e   :  { %594 = vperm.xlu1 %8408, %v52_v19  }
  0x40   :  { %878 = vperm.xlu0 %8410, %v800_v20   ;;  %v813_v20 = vld [vmem:[%s12445_s6 + $0x20] sm:$0xff] }
  0x42   :  { %94 = vperm.xlu1 %8408, %v48_v8  }
  0x44   :  { %888 = vperm.xlu0 %8410, %v802_v21  }
  0x46   :  { %8409 = vset.pattern.permute.xlu1 %v8518_v2  ;;  %v38_v2 = vld [vmem:[%s12439_s0 + $0x14] sm:$0x7] }
  0x47   :  { %218 = vperm.xlu1 %8409, %v47_v12   ;;  %v8777_v17 = vrot.slane %v38_v2, %v99_v49  ;;  %v8779_v18 = vrot.slane %v38_v2, %v227_v50  ;;  %v8781_v19 = vrot.slane %v38_v2, %v419_v53 }
  0x48   :  { %898 = vperm.xlu0 %8410, %v804_v22  }
  0x49   :  { %12711 = vst [vmem:[#allocation8_spill] sm:$0xff] %v8779_v18  ;;  %12712 = vst [vmem:[#allocation9_spill] sm:$0xff] %v8781_v19 }
  0x4b   :  { %8411 = vset.pattern.permute.xlu1 %v8517_v1  ;;  %v8745_v1 = vrot.slane %v34_v54, %v419_v53 }
  0x4c   :  { %908 = vperm.xlu0 %8410, %v806_v23   ;;  %410 = vperm.xlu1 %8411, %v47_v12   ;;  %v8770_v12 = vrot.slane %v37_v60, %v227_v50 }
  0x50   :  { %918 = vperm.xlu0 %8410, %v808_v24   ;;  %414 = vperm.xlu1 %8411, %v48_v8   ;;  %v40_v8 = vld [vmem:[%s12439_s0 + $0x1c] sm:$0x7] }
  0x51   :  { %v8792_v24 = vrot.slane %v40_v8, %v227_v50 }
  0x53   :  { %12716 = vst [vmem:[#allocation13_spill] sm:$0xff] %v8792_v24 }
  0x54   :  { %1138 = vperm.xlu0 %8410, %v810_v25   ;;  %8412 = vset.pattern.permute.xlu1 %v8519_v7  ;;  %v39_v7 = vld [vmem:[%s12439_s0 + $0x18] sm:$0x7] }
  0x55   :  { %604 = vperm.xlu1 %8412, %v54_v26   ;;  %v8786_v21 = vrot.slane %v39_v7, %v99_v49  ;;  %v8788_v22 = vrot.slane %v39_v7, %v227_v50  ;;  %v8790_v23 = vrot.slane %v39_v7, %v419_v53 }
  0x57   :  { %12713 = vst [vmem:[#allocation10_spill] sm:$0xff] %v8786_v21  ;;  %12714 = vst [vmem:[#allocation11_spill] sm:$0xff] %v8788_v22 }
  0x58   :  { %1148 = vperm.xlu0 %8410, %v812_v27   ;;  %12715 = vst [vmem:[#allocation12_spill] sm:$0xff] %v8790_v23  ;;  %v8800_v27 = vrot.slane %v40_v8, %v99_v49 }
  0x59   :  { %609 = vperm.xlu1 %8412, %v55_v28   ;;  %v8802_v28 = vrot.slane %v40_v8, %v419_v53  ;;  %v817_v8 = vld [vmem:[%s12445_s6 + $0x40] sm:$0xff] }
  0x5a   :  { %12717 = vst [vmem:[#allocation14_spill] sm:$0xff] %v8800_v27 }
  0x5b   :  { %12718 = vst [vmem:[#allocation15_spill] sm:$0xff] %v8802_v28 }
  0x5c   :  { %1158 = vperm.xlu0 %8410, %v814_v29  }
  0x5d   :  { %843 = vperm.xlu1 %8412, %v793_v30  }
  0x60   :  { %1168 = vperm.xlu0 %8410, %v816_v31  }
  0x61   :  { %853 = vperm.xlu1 %8412, %v795_v32  }
  0x64   :  { %1178 = vperm.xlu0 %8410, %v818_v34  }
  0x65   :  { %863 = vperm.xlu1 %8412, %v797_v35   ;;  %v836_v35 = vld [vmem:[%s12445_s6 + $0xd8] sm:$0xff] }
  0x68   :  { %1188 = vperm.xlu0 %8410, %v820_v36  }
  0x69   :  { %873 = vperm.xlu1 %8412, %v799_v37  }
  0x6c   :  { %1198 = vperm.xlu0 %8410, %v822_v38  }
  0x6d   :  { %883 = vperm.xlu1 %8412, %v801_v39  }
  0x70   :  { %1208 = vperm.xlu0 %8410, %v824_v40   ;;  %v815_v40 = vld [vmem:[%s12445_s6 + $0x30] sm:$0xff] }
  0x71   :  { %893 = vperm.xlu1 %8412, %v803_v41  }
  0x74   :  { %1218 = vperm.xlu0 %8410, %v826_v42  }
  0x75   :  { %903 = vperm.xlu1 %8412, %v805_v44  }
  0x78   :  { %1228 = vperm.xlu0 %8410, %v828_v45  }
  0x79   :  { %913 = vperm.xlu1 %8412, %v807_v47  }
  0x7c   :  { %1238 = vperm.xlu0 %8410, %v830_v48  }
  0x7d   :  { %1133 = vperm.xlu1 %8412, %v809_v51  }
  0x80   :  { %1248 = vperm.xlu0 %8410, %v832_v56   ;;  %v838_v56 = vld [vmem:[%s12445_s6 + $0xe8] sm:$0xff] }
  0x81   :  { %1143 = vperm.xlu1 %8412, %v811_v61   ;;  %v195_v13 = vpop.permute.xlu1 %194  ;;  %v387_v14 = vpop.permute.xlu0 %386 }
  0x82   :  { %v8795_v25 = vmul.f32 %v8728_v58, %v195_v13  ;;  %v8798_v26 = vmul.f32 %v8739_v62, %v387_v14  ;;  %v8805_v29 = vmul.f32 %v8743_v0, %v195_v13  ;;  %v8808_v30 = vmul.f32 %v8745_v1, %v387_v14 }
  0x83   :  { %v8811_v31 = vmul.f32 %v8752_v4, %v195_v13  ;;  %v8814_v32 = vmul.f32 %v8754_v5, %v387_v14  ;;  %v8820_v36 = vmul.f32 %v8764_v9, %v195_v13  ;;  %v8823_v37 = vmul.f32 %v8766_v10, %v387_v14 }
  0x84   :  { %1258 = vperm.xlu0 %8410, %v834_v15   ;;  %v8826_v38 = vmul.f32 %v8770_v12, %v195_v13  ;;  %v8829_v39 = vmul.f32 %v8775_v16, %v387_v14  ;;  %v8835_v41 = vmul.f32 %v8779_v18, %v195_v13  ;;  %v8838_v42 = vmul.f32 %v8781_v19, %v387_v14 }
  0x85   :  { %1153 = vperm.xlu1 %8412, %v813_v20   ;;  %v199_v33 = vpop.permute.xlu1 %198  ;;  %v395_v34 = vpop.permute.xlu0 %394  ;;  %v8841_v44 = vmul.f32 %v8788_v22, %v195_v13  ;;  %v8844_v45 = vmul.f32 %v8790_v23, %v387_v14  ;;  %v8853_v49 = vmul.f32 %v8792_v24, %v195_v13  ;;  %v8856_v50 = vmul.f32 %v8802_v28, %v387_v14 }
  0x86   :  { %12719 = vst [vmem:[#allocation16_spill] sm:$0xff] %v8829_v39  ;;  %12720 = vst [vmem:[#allocation17_spill] sm:$0xff] %v8835_v41  ;;  %v8847_v47 = vmul.f32 %v8728_v58, %v199_v33  ;;  %v8850_v48 = vmul.f32 %v8743_v0, %v199_v33  ;;  %v8859_v51 = vmul.f32 %v8739_v62, %v395_v34 }
  0x87   :  { %12721 = vst [vmem:[#allocation18_spill] sm:$0xff] %v8838_v42  ;;  %12722 = vst [vmem:[#allocation19_spill] sm:$0xff] %v8841_v44  ;;  %v8862_v52 = vmul.f32 %v8745_v1, %v395_v34  ;;  %v8865_v53 = vmul.f32 %v8752_v4, %v199_v33  ;;  %v8868_v54 = vmul.f32 %v8764_v9, %v199_v33 }
  0x88   :  { %12723 = vst [vmem:[#allocation20_spill] sm:$0xff] %v8844_v45  ;;  %12724 = vst [vmem:[#allocation21_spill] sm:$0xff] %v8853_v49  ;;  %1268 = vperm.xlu0 %8410, %v836_v35   ;;  %v8874_v59 = vmul.f32 %v8754_v5, %v395_v34  ;;  %v8877_v60 = vmul.f32 %v8766_v10, %v395_v34  ;;  %v8880_v61 = vmul.f32 %v8770_v12, %v199_v33 }
  0x89   :  { %12725 = vst [vmem:[#allocation22_spill] sm:$0xff] %v8856_v50  ;;  %1163 = vperm.xlu1 %8412, %v815_v40   ;;  %v407_v55 = vpop.permute.xlu0 %406  ;;  %v8883_v2 = vmul.f32 %v8779_v18, %v199_v33  ;;  %v8889_v13 = vmul.f32 %v8775_v16, %v395_v34  ;;  %v8892_v14 = vmul.f32 %v8781_v19, %v395_v34 }
  0x8a   :  { %v391_v7 = vpop.permute.xlu1 %390  ;;  %v8895_v15 = vmul.f32 %v8788_v22, %v199_v33  ;;  %v8898_v20 = vmul.f32 %v8792_v24, %v199_v33  ;;  %v8901_v35 = vmul.f32 %v8739_v62, %v407_v55  ;;  %v8904_v40 = vmul.f32 %v8745_v1, %v407_v55 }
  0x8b   :  { %12726 = vst [vmem:[#allocation23_spill] sm:$0xff] %v8883_v2  ;;  %12727 = vst [vmem:[#allocation24_spill] sm:$0xff] %v8889_v13  ;;  %v8907_v43 = vmul.f32 %v8790_v23, %v395_v34  ;;  %v8910_v46 = vmul.f32 %v8802_v28, %v395_v34  ;;  %v8913_v50 = vmul.f32 %v8739_v62, %v391_v7 }
  0x8c   :  { %12728 = vst [vmem:[#allocation25_spill] sm:$0xff] %v8892_v14  ;;  %12729 = vst [vmem:[#allocation26_spill] sm:$0xff] %v8895_v15  ;;  %1278 = vperm.xlu0 %8410, %v838_v56   ;;  %v8916_v49 = vmul.f32 %v8745_v1, %v391_v7  ;;  %v8919_v33 = vmul.f32 %v8754_v5, %v407_v55  ;;  %v8928_v34 = vmul.f32 %v8754_v5, %v391_v7 }
  0x8d   :  { %12730 = vst [vmem:[#allocation27_spill] sm:$0xff] %v8898_v20  ;;  %12731 = vst [vmem:[#allocation28_spill] sm:$0xff] %v8901_v35  ;;  %v8922_v20 = vmul.f32 %v8766_v10, %v407_v55  ;;  %1173 = vperm.xlu1 %8412, %v817_v8   ;;  %v8931_v56 = vmul.f32 %v8766_v10, %v391_v7  ;;  %v8937_v45 = vmul.f32 %v8781_v19, %v391_v7  ;;  %v819_v8 = vld [vmem:[%s12445_s6 + $0x50] sm:$0xff] }
  0x8e   :  { %12732 = vst [vmem:[#allocation29_spill] sm:$0xff] %v8904_v40  ;;  %12733 = vst [vmem:[#allocation30_spill] sm:$0xff] %v8907_v43  ;;  %v840_v43 = vld [vmem:[%s12445_s6 + $0xf8] sm:$0xff]  ;;  %v211_v15 = vpop.permute.xlu0 %210  ;;  %v8943_v44 = vmul.f32 %v8775_v16, %v407_v55  ;;  %v8946_v14 = vmul.f32 %v8781_v19, %v407_v55  ;;  %v8949_v13 = vmul.f32 %v8790_v23, %v391_v7 }
  0x8f   :  { %12734 = vst [vmem:[#allocation31_spill] sm:$0xff] %v8910_v46  ;;  %12735 = vst [vmem:[#allocation32_spill] sm:$0xff] %v8919_v33  ;;  %v8934_v46 = vmul.f32 %v8775_v16, %v391_v7  ;;  %v8952_v40 = vmul.f32 %v8802_v28, %v391_v7  ;;  %v70_v35 = vpop.permute.xlu1 %69  ;;  %v8958_v33 = vmul.f32 %v8743_v0, %v211_v15 }
  0x90   :  { %12736 = vst [vmem:[#allocation33_spill] sm:$0xff] %v8922_v20  ;;  %12738 = vst [vmem:[#allocation35_spill] sm:$0xff] %v8937_v45  ;;  %v8955_v20 = vmul.f32 %v8728_v58, %v211_v15  ;;  %v8961_v45 = vmul.f32 %v8790_v23, %v407_v55  ;;  %1288 = vperm.xlu0 %8410, %v840_v43   ;;  %v8969_v7 = vmul.f32 %v8752_v4, %v211_v15 }
  0x91   :  { %12737 = vst [vmem:[#allocation34_spill] sm:$0xff] %v8934_v46  ;;  %12739 = vst [vmem:[#allocation36_spill] sm:$0xff] %v8943_v44  ;;  %v8964_v44 = vmul.f32 %v8802_v28, %v407_v55  ;;  %1183 = vperm.xlu1 %8412, %v819_v8   ;;  %v147_v19 = vmul.f32 %v8750_v3, %v70_v35  ;;  %v155_v23 = vmul.f32 %v8756_v6, %v70_v35 }
  0x92   :  { %12740 = vst [vmem:[#allocation37_spill] sm:$0xff] %v8946_v14  ;;  %12741 = vst [vmem:[#allocation38_spill] sm:$0xff] %v8949_v13  ;;  %v131_v14 = vmul.f32 %v8726_v57, %v70_v35  ;;  %v139_v13 = vmul.f32 %v8741_v63, %v70_v35  ;;  %v8980_v43 = vmul.f32 %v8777_v17, %v70_v35  ;;  %v223_v55 = vpop.permute.xlu0 %222 }
  0x93   :  { %12742 = vst [vmem:[#allocation39_spill] sm:$0xff] %v8952_v40  ;;  %12743 = vst [vmem:[#allocation40_spill] sm:$0xff] %v8961_v45  ;;  %v8972_v40 = vmul.f32 %v8764_v9, %v211_v15  ;;  %v8977_v45 = vmul.f32 %v8768_v11, %v70_v35  ;;  %v8986_v28 = vmul.f32 %v8770_v12, %v211_v15 }
  0x94   :  { %12744 = vst [vmem:[#allocation41_spill] sm:$0xff] %v8964_v44  ;;  %12747 = vst [vmem:[#allocation44_spill] sm:$0xff] %v8980_v43  ;;  %v821_v44 = vld [vmem:[%s12445_s6 + $0x60] sm:$0xff]  ;;  %v8989_v8 = vmul.f32 %v8779_v18, %v211_v15  ;;  %v8992_v16 = vmul.f32 %v8786_v21, %v70_v35  ;;  %v8995_v42 = vmul.f32 %v8800_v27, %v70_v35  ;;  %v203_v41 = vpop.permute.xlu1 %202  ;;  %v823_v21 = vld [vmem:[%s12445_s6 + $0x70] sm:$0xff] }
  0x95   :  { %12745 = vst [vmem:[#allocation42_spill] sm:$0xff] %v8972_v40  ;;  %12746 = vst [vmem:[#allocation43_spill] sm:$0xff] %v8977_v45  ;;  %v8998_v45 = vmul.f32 %v8728_v58, %v223_v55  ;;  %v9001_v43 = vmul.f32 %v8743_v0, %v223_v55  ;;  %v9004_v2 = vmul.f32 %v8788_v22, %v211_v15  ;;  %1193 = vperm.xlu1 %8412, %v821_v44  }
  0x96   :  { %12748 = vst [vmem:[#allocation45_spill] sm:$0xff] %v8986_v28  ;;  %12749 = vst [vmem:[#allocation46_spill] sm:$0xff] %v8989_v8  ;;  %v9007_v28 = vmul.f32 %v8792_v24, %v211_v15  ;;  %v9010_v8 = vmul.f32 %v8752_v4, %v223_v55  ;;  %v9016_v35 = vmul.f32 %v8770_v12, %v223_v55 }
  0x97   :  { %12750 = vst [vmem:[#allocation47_spill] sm:$0xff] %v8992_v16  ;;  %12751 = vst [vmem:[#allocation48_spill] sm:$0xff] %v8995_v42  ;;  %v9013_v16 = vmul.f32 %v8764_v9, %v223_v55  ;;  %v9019_v42 = vmul.f32 %v8779_v18, %v223_v55  ;;  %v259_v27 = vmul.f32 %v8728_v58, %v203_v41 }
  0x98   :  { %12752 = vst [vmem:[#allocation49_spill] sm:$0xff] %v8998_v45  ;;  %12753 = vst [vmem:[#allocation50_spill] sm:$0xff] %v9001_v43  ;;  %v275_v15 = vmul.f32 %v8752_v4, %v203_v41  ;;  %v9035_v44 = vmul.f32 %v8788_v22, %v223_v55  ;;  %v9042_v40 = vpop.permute.xlu1 %206 }
  0x99   :  { %12754 = vst [vmem:[#allocation51_spill] sm:$0xff] %v9004_v2  ;;  %12755 = vst [vmem:[#allocation52_spill] sm:$0xff] %v9007_v28  ;;  %v267_v2 = vmul.f32 %v8743_v0, %v203_v41  ;;  %v283_v28 = vmul.f32 %v8764_v9, %v203_v41  ;;  %v323_v43 = vadd.f32 %v259_v27, %v131_v14  ;;  %1203 = vperm.xlu1 %8412, %v823_v21  }
  0x9a   :  { %12756 = vst [vmem:[#allocation53_spill] sm:$0xff] %v9010_v8  ;;  %12757 = vst [vmem:[#allocation54_spill] sm:$0xff] %v9013_v16  ;;  %v9029_v16 = vmul.f32 %v8770_v12, %v203_v41  ;;  %v9040_v8 = vpop.permute.xlu0 %59  ;;  %v339_v46 = vadd.f32 %v275_v15, %v147_v19  ;;  %v260_v27 = vmul.f32 %v8728_v58, %v9042_v40 }
  0x9b   :  { %12758 = vst [vmem:[#allocation55_spill] sm:$0xff] %v9016_v35  ;;  %12759 = vst [vmem:[#allocation56_spill] sm:$0xff] %v9019_v42  ;;  %v9032_v35 = vmul.f32 %v8779_v18, %v203_v41  ;;  %v9038_v42 = vmul.f32 %v8792_v24, %v223_v55  ;;  %v331_v45 = vadd.f32 %v267_v2, %v139_v13  ;;  %v825_v2 = vld [vmem:[%s12445_s6 + $0x80] sm:$0xff] }
  0x9c   :  { %12760 = vst [vmem:[#allocation57_spill] sm:$0xff] %v9029_v16  ;;  %12762 = vst [vmem:[#allocation59_spill] sm:$0xff] %v9035_v44  ;;  %v347_v39 = vadd.f32 %v283_v28, %v155_v23  ;;  %v129_v16 = vmul.f32 %v8726_v57, %v9040_v8  ;;  %v145_v44 = vmul.f32 %v8750_v3, %v9040_v8 }
  0x9d   :  { %12761 = vst [vmem:[#allocation58_spill] sm:$0xff] %v9032_v35  ;;  %12763 = vst [vmem:[#allocation60_spill] sm:$0xff] %v9038_v42  ;;  %v137_v35 = vmul.f32 %v8741_v63, %v9040_v8  ;;  %v153_v55 = vmul.f32 %v8756_v6, %v9040_v8  ;;  %v9055_v19 = vadd.f32 %v8859_v51, %v323_v43  ;;  %1213 = vperm.xlu1 %8412, %v825_v2  }
  0x9e   :  { %12764 = vst [vmem:[#allocation61_spill] sm:$0xff] %v9040_v8  ;;  %v9058_v23 = vmul.f32 %v8788_v22, %v203_v41  ;;  %v9061_v28 = vmul.f32 %v8792_v24, %v203_v41  ;;  %v321_v13 = vadd.f32 %v8795_v25, %v129_v16  ;;  %v337_v14 = vadd.f32 %v8811_v31, %v145_v44  ;;  %v9070_v51 = vpop.permute.xlu0 %64 }
  0x9f   :  { %v329_v21 = vadd.f32 %v8805_v29, %v137_v35  ;;  %v345_v15 = vadd.f32 %v8820_v36, %v153_v55  ;;  %12767 = vst [vmem:[#allocation64_spill] sm:$0xff] %v9070_v51  ;;  %v268_v43 = vmul.f32 %v8743_v0, %v9042_v40  ;;  %v9075_v41 = vadd.f32 %v8862_v52, %v331_v45  ;;  %v9093_v36 = vpop.permute.xlu1 %398 }
  0xa0   :  { %12765 = vst [vmem:[#allocation62_spill] sm:$0xff] %v9058_v23  ;;  %12766 = vst [vmem:[#allocation63_spill] sm:$0xff] %v9061_v28  ;;  %v9078_v42 = vadd.f32 %v8874_v59, %v339_v46  ;;  %v9081_v28 = vadd.f32 %v8877_v60, %v347_v39  ;;  %v130_v16 = vmul.f32 %v8726_v57, %v9070_v51  ;;  %v827_v59 = vld [vmem:[%s12445_s6 + $0x90] sm:$0xff] }
  0xa1   :  { %v138_v25 = vmul.f32 %v8741_v63, %v9070_v51  ;;  %v276_v29 = vmul.f32 %v8752_v4, %v9042_v40  ;;  %v9091_v31 = vmul.f32 %v8764_v9, %v9042_v40  ;;  %v146_v46 = vmul.f32 %v8750_v3, %v9070_v51  ;;  %1223 = vperm.xlu1 %8412, %v827_v59  }
  0xa2   :  { %12768 = vst [vmem:[#allocation65_spill] sm:$0xff] %v9078_v42  ;;  %12769 = vst [vmem:[#allocation66_spill] sm:$0xff] %v9081_v28  ;;  %v529_v39 = vadd.f32 %v8814_v32, %v337_v14  ;;  %v154_v45 = vmul.f32 %v8756_v6, %v9070_v51  ;;  %v537_v52 = vadd.f32 %v8823_v37, %v345_v15  ;;  %v9108_v2 = vpop.permute.xlu0 %74 }
  0xa3   :  { %v322_v60 = vadd.f32 %v8847_v47, %v130_v16  ;;  %v513_v35 = vadd.f32 %v8798_v26, %v321_v13  ;;  %v330_v44 = vadd.f32 %v8850_v48, %v138_v25  ;;  %v521_v55 = vadd.f32 %v8808_v30, %v329_v21  ;;  %v9128_v16 = vpop.permute.xlu1 %579  ;;  %v829_v25 = vld [vmem:[%s12445_s6 + $0xa0] sm:$0xff] }
  0xa4   :  { %v452_v32 = vmul.f32 %v8739_v62, %v9093_v36  ;;  %v460_v37 = vmul.f32 %v8745_v1, %v9093_v36  ;;  %v338_v14 = vadd.f32 %v8865_v53, %v146_v46  ;;  %v346_v15 = vadd.f32 %v8868_v54, %v154_v45 }
  0xa5   :  { %v132_v47 = vmul.f32 %v8726_v57, %v9108_v2  ;;  %v140_v26 = vmul.f32 %v8741_v63, %v9108_v2  ;;  %v468_v30 = vmul.f32 %v8754_v5, %v9093_v36  ;;  %v476_v48 = vmul.f32 %v8766_v10, %v9093_v36  ;;  %1233 = vperm.xlu1 %8412, %v829_v25  }
  0xa6   :  { %v514_v13 = vadd.f32 %v8913_v50, %v322_v60  ;;  %v522_v21 = vadd.f32 %v8916_v49, %v330_v44  ;;  %v530_v53 = vadd.f32 %v8928_v34, %v338_v14  ;;  %v538_v54 = vadd.f32 %v8931_v56, %v346_v15  ;;  %v9137_v59 = vpop.permute.xlu0 %584 }
  0xa7   :  { %v324_v46 = vadd.f32 %v260_v27, %v132_v47  ;;  %v332_v45 = vadd.f32 %v268_v43, %v140_v26  ;;  %v148_v24 = vmul.f32 %v8750_v3, %v9108_v2  ;;  %v156_v50 = vmul.f32 %v8756_v6, %v9108_v2  ;;  %v9150_v26 = vpop.permute.xlu1 %79 }
  0xa8   :  { %v617_v49 = vadd.f32 %v9128_v16, %v513_v35  ;;  %v625_v34 = vadd.f32 %v9128_v16, %v521_v55  ;;  %v633_v56 = vadd.f32 %v9128_v16, %v529_v39  ;;  %v641_v60 = vadd.f32 %v9128_v16, %v537_v52  ;;  %v831_v39 = vld [vmem:[%s12445_s6 + $0xb0] sm:$0xff] }
  0xa9   :  { %v618_v44 = vadd.f32 %v9137_v59, %v514_v13  ;;  %v626_v27 = vadd.f32 %v9137_v59, %v522_v21  ;;  %v161_v43 = vmul.f32 %v8768_v11, %v9040_v8  ;;  %v162_v14 = vmul.f32 %v8768_v11, %v9070_v51  ;;  %1243 = vperm.xlu1 %8412, %v831_v39  }
  0xaa   :  { %v681_v15 = vmax.f32 %v617_v49, 0.0  ;;  %v689_v47 = vmax.f32 %v625_v34, 0.0  ;;  %v634_v35 = vadd.f32 %v9137_v59, %v530_v53  ;;  %v697_v55 = vmax.f32 %v633_v56, 0.0  ;;  %v9160_v34 = vpop.permute.xlu0 %89 }
  0xab   :  { %v682_v52 = vmax.f32 %v618_v44, 0.0  ;;  %v690_v13 = vmax.f32 %v626_v27, 0.0  ;;  %v642_v21 = vadd.f32 %v9137_v59, %v538_v54  ;;  %v705_v23 = vmax.f32 %v641_v60, 0.0  ;;  %12770 = vst [vmem:[#allocation67_spill] sm:$0xff] %v9160_v34 }
  0xac   :  { %v133_v22 = vmul.f32 %v8726_v57, %v9150_v26  ;;  %v141_v25 = vmul.f32 %v8741_v63, %v9150_v26  ;;  %v698_v49 = vmax.f32 %v634_v35, 0.0  ;;  %v340_v53 = vadd.f32 %v276_v29, %v148_v24  ;;  %v9176_v29 = vpop.permute.xlu1 %84 }
  0xad   :  { %v8010_v56 = vpack.c.bf16 %v682_v52, %v681_v15  ;;  %v8058_v18 = vpack.c.bf16 %v690_v13, %v689_v47  ;;  %v9162_v28 = vadd.f32 %v452_v32, %v324_v46  ;;  %v9164_v42 = vadd.f32 %v460_v37, %v332_v45  ;;  %12773 = vst [vmem:[#allocation70_spill] sm:$0xff] %v9176_v29  ;;  %v833_v32 = vld [vmem:[%s12445_s6 + $0xc0] sm:$0xff]  ;;  %v12777_v13 = vld [vmem:[#allocation42_spill] sm:$0xff] }
  0xae   :  { %v9168_v54 = vmul.f32 %v8726_v57, %v9160_v34  ;;  %v9172_v60 = vmul.f32 %v8741_v63, %v9160_v34  ;;  %v9174_v44 = vpack.c.bf16 %v698_v49, %v697_v55  ;;  %v706_v24 = vmax.f32 %v642_v21, 0.0  ;;  %1253 = vperm.xlu1 %8412, %v833_v32   ;;  %v12779_v21 = vld [vmem:[#allocation16_spill] sm:$0xff] }
  0xaf   :  { %8011 = vmatprep.subr.bf16.mxu1 %v8010_v56  ;;  %8059 = vmatprep.subr.bf16.mxu0 %v8058_v18  ;;  %v9181_v37 = vadd.f32 %v468_v30, %v340_v53  ;;  %v348_v46 = vadd.f32 %v9091_v31, %v156_v50  ;;  %v149_v45 = vmul.f32 %v8750_v3, %v9150_v26 }
  0xb0   :  { %12771 = vst [vmem:[#allocation68_spill] sm:$0xff] %v9172_v60  ;;  %12772 = vst [vmem:[#allocation69_spill] sm:$0xff] %v9174_v44  ;;  %8013 = vmatpush3.bf16.msra.mxu1 %v8010_v56  ;;  %8061 = vmatpush3.bf16.msra.mxu0 %v8058_v18  ;;  %v325_v27 = vadd.f32 %v8955_v20, %v133_v22  ;;  %v333_v15 = vadd.f32 %v8958_v33, %v141_v25  ;;  %v9216_v52 = vpop.permute.xlu1 %214 }
  0xb1   :  { %v9188_v47 = vpack.c.bf16 %v706_v24, %v705_v23  ;;  %v134_v35 = vmul.f32 %v8726_v57, %v9176_v29  ;;  %v142_v30 = vmul.f32 %v8741_v63, %v9176_v29  ;;  %v9194_v55 = vadd.f32 %v476_v48, %v348_v46  ;;  %v835_v23 = vld [vmem:[%s12445_s6 + $0xd0] sm:$0xff]  ;;  %12776 = vst [vmem:[#allocation73_spill] sm:$0xff] %v9216_v52 }
  0xb2   :  { %v157_v31 = vmul.f32 %v8756_v6, %v9150_v26  ;;  %v150_v18 = vmul.f32 %v8750_v3, %v9176_v29  ;;  %v341_v22 = vadd.f32 %v8969_v7, %v149_v45  ;;  %v158_v20 = vmul.f32 %v8756_v6, %v9176_v29  ;;  %1263 = vperm.xlu1 %8412, %v835_v23   ;;  %v12780_v24 = vld [vmem:[#allocation34_spill] sm:$0xff]  ;;  %v12781_v45 = vld [vmem:[#allocation17_spill] sm:$0xff] }
  0xb3   :  { %12774 = vst [vmem:[#allocation71_spill] sm:$0xff] %v9188_v47  ;;  %v353_v33 = vadd.f32 %v8826_v38, %v161_v43  ;;  %v9209_v48 = vmul.f32 %v8750_v3, %v9160_v34  ;;  %v354_v50 = vadd.f32 %v8880_v61, %v162_v14  ;;  %v169_v39 = vmul.f32 %v8777_v17, %v9040_v8 }
  0xb4   :  { %v170_v7 = vmul.f32 %v8777_v17, %v9070_v51  ;;  %v349_v38 = vadd.f32 %v12777_v13, %v157_v31  ;;  %v9221_v43 = vmul.f32 %v8756_v6, %v9160_v34  ;;  %v164_v49 = vmul.f32 %v8768_v11, %v9108_v2  ;;  %v12783_v34 = vld [vmem:[#allocation18_spill] sm:$0xff] }
  0xb5   :  { %12775 = vst [vmem:[#allocation72_spill] sm:$0xff] %v9209_v48  ;;  %v545_v25 = vadd.f32 %v12779_v21, %v353_v33  ;;  %v262_v61 = vmul.f32 %v8728_v58, %v9216_v52  ;;  %v270_v14 = vmul.f32 %v8743_v0, %v9216_v52  ;;  %v278_v53 = vmul.f32 %v8752_v4, %v9216_v52  ;;  %v12782_v33 = vld [vmem:[#allocation23_spill] sm:$0xff]  ;;  %v837_v21 = vld [vmem:[%s12445_s6 + $0xe0] sm:$0xff] }
  0xb6   :  { %12778 = vst [vmem:[#allocation42_spill] sm:$0xff] %v9221_v43  ;;  %v286_v56 = vmul.f32 %v8764_v9, %v9216_v52  ;;  %v546_v32 = vadd.f32 %v12780_v24, %v354_v50  ;;  %v361_v31 = vadd.f32 %v12781_v45, %v169_v39  ;;  %v362_v13 = vadd.f32 %v12782_v33, %v170_v7  ;;  %v12784_v24 = vld [vmem:[#allocation35_spill] sm:$0xff]  ;;  %v12786_v39 = vld [vmem:[#allocation57_spill] sm:$0xff]  ;;  %v9248_v7 = vpop.permute.xlu1 %402  ;;  %v12788_v48 = vld [vmem:[#allocation32_spill] sm:$0xff] }
  0xb7   :  { %v649_v46 = vadd.f32 %v9128_v16, %v545_v25  ;;  %v326_v47 = vadd.f32 %v262_v61, %v134_v35  ;;  %v342_v44 = vadd.f32 %v278_v53, %v150_v18  ;;  %v292_v8 = vmul.f32 %v8770_v12, %v9042_v40  ;;  %v12785_v43 = vld [vmem:[#allocation43_spill] sm:$0xff]  ;;  %12787 = vst [vmem:[#allocation16_spill] sm:$0xff] %v9248_v7  ;;  %v12790_v35 = vld [vmem:[#allocation33_spill] sm:$0xff] }
  0xb8   :  { %v350_v51 = vadd.f32 %v286_v56, %v158_v20  ;;  %v650_v23 = vadd.f32 %v9137_v59, %v546_v32  ;;  %v553_v50 = vadd.f32 %v12783_v34, %v361_v31  ;;  %v554_v25 = vadd.f32 %v12784_v24, %v362_v13  ;;  %1273 = vperm.xlu1 %8412, %v837_v21   ;;  %v9272_v21 = vpop.permute.xlu0 %599  ;;  %v12793_v24 = vld [vmem:[#allocation29_spill] sm:$0xff] }
  0xb9   :  { %v355_v45 = vadd.f32 %v12786_v39, %v12785_v43  ;;  %v334_v33 = vadd.f32 %v270_v14, %v142_v30  ;;  %v9251_v60 = vadd.f32 %v12788_v48, %v342_v44  ;;  %v713_v20 = vmax.f32 %v649_v46, 0.0  ;;  %v839_v44 = vld [vmem:[%s12445_s6 + $0xf0] sm:$0xff] }
  0xba   :  { %v9254_v18 = vadd.f32 %v12790_v35, %v350_v51  ;;  %v453_v61 = vmul.f32 %v8739_v62, %v9248_v7  ;;  %v461_v34 = vmul.f32 %v8745_v1, %v9248_v7  ;;  %v469_v43 = vmul.f32 %v8754_v5, %v9248_v7  ;;  %v12792_v51 = vld [vmem:[#allocation28_spill] sm:$0xff] }
  0xbb   :  { %12789 = vst [vmem:[#allocation34_spill] sm:$0xff] %v9251_v60  ;;  %v477_v30 = vmul.f32 %v8766_v10, %v9248_v7  ;;  %v9268_v48 = vadd.f32 %v12792_v51, %v326_v47  ;;  %v714_v14 = vmax.f32 %v650_v23, 0.0  ;;  %v657_v53 = vadd.f32 %v9128_v16, %v553_v50  ;;  %v9279_v47 = vpop.permute.xlu1 %589 }
  0xbc   :  { %12791 = vst [vmem:[#allocation17_spill] sm:$0xff] %v9254_v18  ;;  %v658_v56 = vadd.f32 %v9137_v59, %v554_v25  ;;  %v517_v32 = vadd.f32 %v453_v61, %v325_v27  ;;  %v525_v46 = vadd.f32 %v461_v34, %v333_v15  ;;  %v533_v31 = vadd.f32 %v469_v43, %v341_v22  ;;  %v12795_v22 = vld [vmem:[#allocation7_spill] sm:$0xff] }
  0xbd   :  { %v541_v13 = vadd.f32 %v477_v30, %v349_v38  ;;  %v9275_v39 = vadd.f32 %v12793_v24, %v334_v33  ;;  %v9277_v35 = vpack.c.bf16 %v714_v14, %v713_v20  ;;  %v721_v18 = vmax.f32 %v657_v53, 0.0  ;;  %1283 = vperm.xlu1 %8412, %v839_v44   ;;  %v12797_v33 = vld [vmem:[#allocation66_spill] sm:$0xff] }
  0xbe   :  { %v356_v60 = vadd.f32 %v292_v8, %v164_v49  ;;  %v9282_v23 = vadd.f32 %v9272_v21, %v517_v32  ;;  %v9285_v27 = vadd.f32 %v9272_v21, %v525_v46  ;;  %v722_v15 = vmax.f32 %v658_v56, 0.0  ;;  %v12796_v8 = vld [vmem:[#allocation65_spill] sm:$0xff]  ;;  %v12799_v56 = vld [vmem:[#allocation24_spill] sm:$0xff] }
  0xbf   :  { %12794 = vst [vmem:[#allocation23_spill] sm:$0xff] %v9277_v35  ;;  %v484_v38 = vmul.f32 %v12795_v22, %v9093_v36  ;;  %v619_v50 = vadd.f32 %v9279_v47, %v9055_v19  ;;  %v627_v25 = vadd.f32 %v9279_v47, %v9075_v41  ;;  %v635_v49 = vadd.f32 %v9279_v47, %v12796_v8  ;;  %v9305_v14 = vpop.permute.xlu1 %594  ;;  %v12802_v8 = vld [vmem:[#allocation58_spill] sm:$0xff] }
  0xc0   :  { %v643_v20 = vadd.f32 %v9279_v47, %v12797_v33  ;;  %v9300_v43 = vadd.f32 %v9272_v21, %v533_v31  ;;  %v9303_v30 = vadd.f32 %v9272_v21, %v541_v13  ;;  %v9307_v53 = vpack.c.bf16 %v722_v15, %v721_v18 }
  0xc1   :  { %v683_v19 = vmax.f32 %v619_v50, 0.0  ;;  %v691_v44 = vmax.f32 %v627_v25, 0.0  ;;  %v699_v51 = vmax.f32 %v635_v49, 0.0  ;;  %v547_v32 = vadd.f32 %v12799_v56, %v355_v45 }
  0xc2   :  { %v707_v41 = vmax.f32 %v643_v20, 0.0  ;;  %12798 = vst [vmem:[#allocation18_spill] sm:$0xff] %v9307_v53  ;;  %v548_v46 = vadd.f32 %v484_v38, %v356_v60  ;;  %v172_v24 = vmul.f32 %v8777_v17, %v9108_v2  ;;  %v620_v31 = vadd.f32 %v9305_v14, %v9162_v28  ;;  %v12800_v60 = vld [vmem:[#allocation8_spill] sm:$0xff] }
  0xc3   :  { %v628_v13 = vadd.f32 %v9305_v14, %v9164_v42  ;;  %v636_v50 = vadd.f32 %v9305_v14, %v9181_v37  ;;  %v644_v25 = vadd.f32 %v9305_v14, %v9194_v55  ;;  %v651_v18 = vadd.f32 %v9279_v47, %v547_v32  ;;  %v12801_v38 = vld [vmem:[#allocation44_spill] sm:$0xff]  ;;  %v9326_v56 = vpop.permute.xlu1 %94  ;;  %v12803_v55 = vld [vmem:[#allocation9_spill] sm:$0xff] }
  0xc4   :  { %v652_v45 = vadd.f32 %v9305_v14, %v548_v46  ;;  %v300_v15 = vmul.f32 %v12800_v60, %v9042_v40  ;;  %v363_v49 = vadd.f32 %v12802_v8, %v12801_v38  ;;  %v684_v28 = vmax.f32 %v620_v31, 0.0  ;;  %v12811_v8 = vld [vmem:[#allocation25_spill] sm:$0xff] }
  0xc5   :  { %v692_v33 = vmax.f32 %v628_v13, 0.0  ;;  %v700_v20 = vmax.f32 %v636_v50, 0.0  ;;  %v708_v42 = vmax.f32 %v644_v25, 0.0  ;;  %v715_v37 = vmax.f32 %v651_v18, 0.0  ;;  %v12807_v25 = vld [vmem:[#allocation50_spill] sm:$0xff] }
  0xc6   :  { %v716_v34 = vmax.f32 %v652_v45, 0.0  ;;  %v364_v61 = vadd.f32 %v300_v15, %v172_v24  ;;  %v492_v32 = vmul.f32 %v12803_v55, %v9093_v36  ;;  %v8014_v53 = vpack.c.bf16 %v684_v28, %v683_v19  ;;  %v12806_v19 = vld [vmem:[#allocation49_spill] sm:$0xff] }
  0xc7   :  { %v8062_v46 = vpack.c.bf16 %v692_v33, %v691_v44  ;;  %v136_v35 = vmul.f32 %v8726_v57, %v9326_v56  ;;  %v144_v38 = vmul.f32 %v8741_v63, %v9326_v56  ;;  %v9334_v31 = vpack.c.bf16 %v700_v20, %v699_v51  ;;  %v12809_v51 = vld [vmem:[#allocation53_spill] sm:$0xff]  ;;  %v9351_v28 = vpop.permute.xlu1 %218  ;;  %v12816_v63 = vld [vmem:[#allocation36_spill] sm:$0xff] }
  0xc8   :  { %v9336_v13 = vpack.c.bf16 %v708_v42, %v707_v41  ;;  %v152_v50 = vmul.f32 %v8750_v3, %v9326_v56  ;;  %v160_v24 = vmul.f32 %v8756_v6, %v9326_v56  ;;  %8015 = vmatprep.subr.bf16.mxu1 %v8014_v53  ;;  %v9345_v45 = vpack.c.bf16 %v716_v34, %v715_v37  ;;  %v12810_v3 = vld [vmem:[#allocation54_spill] sm:$0xff] }
  0xc9   :  { %12804 = vst [vmem:[#allocation35_spill] sm:$0xff] %v9334_v31  ;;  %8063 = vmatprep.subr.bf16.mxu0 %v8062_v46  ;;  %v328_v44 = vadd.f32 %v12806_v19, %v136_v35  ;;  %v336_v18 = vadd.f32 %v12807_v25, %v144_v38  ;;  %8017 = vmatpush3.bf16.msra.mxu1 %v8014_v53  ;;  %v12813_v19 = vld [vmem:[#allocation68_spill] sm:$0xff] }
  0xca   :  { %12805 = vst [vmem:[#allocation43_spill] sm:$0xff] %v9336_v13  ;;  %12808 = vst [vmem:[#allocation57_spill] sm:$0xff] %v9345_v45  ;;  %8065 = vmatpush3.bf16.msra.mxu0 %v8062_v46  ;;  %v344_v41 = vadd.f32 %v12809_v51, %v152_v50  ;;  %v352_v15 = vadd.f32 %v12810_v3, %v160_v24  ;;  %v555_v6 = vadd.f32 %v12811_v8, %v363_v49  ;;  %v12812_v46 = vld [vmem:[#allocation45_spill] sm:$0xff]  ;;  %v12814_v25 = vld [vmem:[#allocation72_spill] sm:$0xff] }
  0xcb   :  { %v556_v33 = vadd.f32 %v492_v32, %v364_v61  ;;  %v165_v35 = vmul.f32 %v8768_v11, %v9150_v26  ;;  %v166_v34 = vmul.f32 %v8768_v11, %v9176_v29  ;;  %v294_v53 = vmul.f32 %v8770_v12, %v9216_v52  ;;  %v9377_v57 = vpop.permute.xlu1 %410 }
  0xcc   :  { %v263_v20 = vmul.f32 %v8728_v58, %v9351_v28  ;;  %v271_v42 = vmul.f32 %v8743_v0, %v9351_v28  ;;  %v279_v49 = vmul.f32 %v8752_v4, %v9351_v28  ;;  %v287_v61 = vmul.f32 %v8764_v9, %v9351_v28  ;;  %v12815_v0 = vld [vmem:[#allocation42_spill] sm:$0xff] }
  0xcd   :  { %v659_v37 = vadd.f32 %v9279_v47, %v555_v6  ;;  %v660_v32 = vadd.f32 %v9305_v14, %v556_v33  ;;  %v357_v38 = vadd.f32 %v12812_v46, %v165_v35  ;;  %v358_v50 = vadd.f32 %v294_v53, %v166_v34 }
  0xce   :  { %v327_v24 = vadd.f32 %v263_v20, %v9168_v54  ;;  %v335_v58 = vadd.f32 %v271_v42, %v12813_v19  ;;  %v343_v51 = vadd.f32 %v279_v49, %v12814_v25  ;;  %v351_v3 = vadd.f32 %v287_v61, %v12815_v0 }
  0xcf   :  { %v723_v8 = vmax.f32 %v659_v37, 0.0  ;;  %v724_v4 = vmax.f32 %v660_v32, 0.0  ;;  %v485_v9 = vmul.f32 %v12795_v22, %v9248_v7  ;;  %v550_v6 = vadd.f32 %v12816_v63, %v358_v50  ;;  %v12817_v37 = vld [vmem:[#allocation46_spill] sm:$0xff]  ;;  %v9398_v45 = vpop.permute.xlu1 %414 }
  0xd0   :  { %v173_v33 = vmul.f32 %v8777_v17, %v9150_v26  ;;  %v174_v54 = vmul.f32 %v8777_v17, %v9176_v29  ;;  %v302_v35 = vmul.f32 %v12800_v60, %v9216_v52  ;;  %v493_v34 = vmul.f32 %v12803_v55, %v9248_v7  ;;  %v12818_v7 = vld [vmem:[#allocation37_spill] sm:$0xff]  ;;  %v12819_v29 = vld [vmem:[#allocation67_spill] sm:$0xff] }
  0xd1   :  { %v455_v53 = vmul.f32 %v8739_v62, %v9377_v57  ;;  %v463_v63 = vmul.f32 %v8745_v1, %v9377_v57  ;;  %v471_v20 = vmul.f32 %v8754_v5, %v9377_v57  ;;  %v479_v42 = vmul.f32 %v8766_v10, %v9377_v57 }
  0xd2   :  { %v9395_v49 = vpack.c.bf16 %v724_v4, %v723_v8  ;;  %v549_v61 = vadd.f32 %v485_v9, %v357_v38  ;;  %v365_v32 = vadd.f32 %v12817_v37, %v173_v33  ;;  %v366_v46 = vadd.f32 %v302_v35, %v174_v54  ;;  %v9420_v35 = vpop.permute.xlu0 %614 }
  0xd3   :  { %v519_v50 = vadd.f32 %v455_v53, %v327_v24  ;;  %v527_v19 = vadd.f32 %v463_v63, %v335_v58  ;;  %v535_v25 = vadd.f32 %v471_v20, %v343_v51  ;;  %v543_v0 = vadd.f32 %v479_v42, %v351_v3  ;;  %v12820_v53 = vld [vmem:[#allocation55_spill] sm:$0xff]  ;;  %v12822_v42 = vld [vmem:[#allocation17_spill] sm:$0xff] }
  0xd4   :  { %v9401_v13 = vadd.f32 %v9272_v21, %v549_v61  ;;  %v557_v31 = vadd.f32 %v493_v34, %v365_v32  ;;  %v558_v52 = vadd.f32 %v12818_v7, %v366_v46  ;;  %v167_v8 = vmul.f32 %v8768_v11, %v12819_v29 }
  0xd5   :  { %v456_v38 = vmul.f32 %v8739_v62, %v9398_v45  ;;  %v464_v24 = vmul.f32 %v8745_v1, %v9398_v45  ;;  %v472_v58 = vmul.f32 %v8754_v5, %v9398_v45  ;;  %v480_v51 = vmul.f32 %v8766_v10, %v9398_v45 }
  0xd6   :  { %v717_v3 = vmax.f32 %v9401_v13, 0.0  ;;  %v661_v4 = vadd.f32 %v9272_v21, %v557_v31  ;;  %v168_v7 = vmul.f32 %v8768_v11, %v9326_v56  ;;  %v295_v9 = vmul.f32 %v8770_v12, %v9351_v28  ;;  %v9425_v31 = vpop.permute.xlu1 %604 }
  0xd7   :  { %v520_v62 = vadd.f32 %v456_v38, %v328_v44  ;;  %v528_v33 = vadd.f32 %v464_v24, %v336_v18  ;;  %v536_v54 = vadd.f32 %v472_v58, %v344_v41  ;;  %v544_v1 = vadd.f32 %v480_v51, %v352_v15  ;;  %v12821_v15 = vld [vmem:[#allocation34_spill] sm:$0xff] }
  0xd8   :  { %v725_v5 = vmax.f32 %v661_v4, 0.0  ;;  %v359_v34 = vadd.f32 %v295_v9, %v167_v8  ;;  %v360_v10 = vadd.f32 %v12820_v53, %v168_v7  ;;  %v487_v13 = vmul.f32 %v12795_v22, %v9377_v57 }
  0xd9   :  { %v624_v11 = vadd.f32 %v9420_v35, %v520_v62  ;;  %v632_v63 = vadd.f32 %v9420_v35, %v528_v33  ;;  %v640_v12 = vadd.f32 %v9420_v35, %v536_v54  ;;  %v648_v44 = vadd.f32 %v9420_v35, %v544_v1 }
  0xda   :  { %v622_v18 = vadd.f32 %v9425_v31, %v9268_v48  ;;  %v630_v41 = vadd.f32 %v9425_v31, %v9275_v39  ;;  %v638_v20 = vadd.f32 %v9425_v31, %v12821_v15  ;;  %v646_v61 = vadd.f32 %v9425_v31, %v12822_v42  ;;  %v9439_v4 = vpop.permute.xlu1 %609 }
  0xdb   :  { %v688_v37 = vmax.f32 %v624_v11, 0.0  ;;  %v696_v32 = vmax.f32 %v632_v63, 0.0  ;;  %v704_v46 = vmax.f32 %v640_v12, 0.0  ;;  %v712_v8 = vmax.f32 %v648_v44, 0.0 }
  0xdc   :  { %v686_v38 = vmax.f32 %v622_v18, 0.0  ;;  %v694_v24 = vmax.f32 %v630_v41, 0.0  ;;  %v702_v58 = vmax.f32 %v638_v20, 0.0  ;;  %v710_v51 = vmax.f32 %v646_v61, 0.0 }
  0xdd   :  { %v654_v48 = vadd.f32 %v9425_v31, %v550_v6  ;;  %v662_v39 = vadd.f32 %v9425_v31, %v558_v52  ;;  %v488_v7 = vmul.f32 %v12795_v22, %v9398_v45  ;;  %v551_v9 = vadd.f32 %v487_v13, %v359_v34 }
  0xde   :  { %v12823_v62 = vmax.f32 %v9282_v23, 0.0  ;;  %v12824_v54 = vmax.f32 %v9285_v27, 0.0  ;;  %v623_v53 = vadd.f32 %v9439_v4, %v519_v50  ;;  %v631_v11 = vadd.f32 %v9439_v4, %v527_v19 }
  0xdf   :  { %v12825_v63 = vmax.f32 %v9300_v43, 0.0  ;;  %v12826_v52 = vmax.f32 %v9303_v30, 0.0  ;;  %v639_v22 = vadd.f32 %v9439_v4, %v535_v25  ;;  %v647_v23 = vadd.f32 %v9439_v4, %v543_v0 }
  0xe0   :  { %v8018_v33 = vpack.c.bf16 %v686_v38, %v12823_v62  ;;  %v8066_v1 = vpack.c.bf16 %v694_v24, %v12824_v54  ;;  %v687_v27 = vmax.f32 %v623_v53, 0.0  ;;  %v695_v34 = vmax.f32 %v631_v11, 0.0  ;;  %v12827_v38 = vld [vmem:[#allocation61_spill] sm:$0xff]  ;;  %v12828_v24 = vld [vmem:[#allocation10_spill] sm:$0xff] }
  0xe1   :  { %v9453_v12 = vpack.c.bf16 %v702_v58, %v12825_v63  ;;  %v9457_v6 = vpack.c.bf16 %v710_v51, %v12826_v52  ;;  %v718_v13 = vmax.f32 %v654_v48, 0.0  ;;  %v726_v50 = vmax.f32 %v662_v39, 0.0  ;;  %v12829_v51 = vld [vmem:[#allocation56_spill] sm:$0xff]  ;;  %v12834_v52 = vld [vmem:[#allocation26_spill] sm:$0xff] }
  0xe2   :  { %8019 = vmatprep.subr.bf16.mxu1 %v8018_v33  ;;  %8067 = vmatprep.subr.bf16.mxu0 %v8066_v1  ;;  %v703_v19 = vmax.f32 %v639_v22, 0.0  ;;  %v711_v43 = vmax.f32 %v647_v23, 0.0  ;;  %v552_v44 = vadd.f32 %v488_v7, %v360_v10  ;;  %v655_v18 = vadd.f32 %v9439_v4, %v551_v9  ;;  %v12830_v39 = vld [vmem:[#allocation64_spill] sm:$0xff]  ;;  %v12831_v9 = vld [vmem:[#allocation14_spill] sm:$0xff]  ;;  %v9517_v23 = vld [vmem:[%s12442_s3 + $0x18] sm:$0xff] }
  0xe3   :  { %8021 = vmatpush3.bf16.msra.mxu1 %v8018_v33  ;;  %8069 = vmatpush3.bf16.msra.mxu0 %v8066_v1  ;;  %v8022_v30 = vpack.c.bf16 %v688_v37, %v687_v27  ;;  %v8070_v41 = vpack.c.bf16 %v696_v32, %v695_v34  ;;  %v9462_v15 = vpack.c.bf16 %v718_v13, %v717_v3  ;;  %v12835_v27 = vld [vmem:[#allocation20_spill] sm:$0xff]  ;;  %v12836_v13 = vld [vmem:[#allocation21_spill] sm:$0xff] }
  0xe4   :  { %v9464_v25 = vpack.c.bf16 %v726_v50, %v725_v5  ;;  %v9466_v0 = vpack.c.bf16 %v704_v46, %v703_v19  ;;  %v9468_v20 = vpack.c.bf16 %v712_v8, %v711_v43  ;;  %v656_v42 = vadd.f32 %v9420_v35, %v552_v44  ;;  %v9480_v5 = vld [vmem:[%s12442_s3 + $0x8] sm:$0xff]  ;;  %v12837_v19 = vld [vmem:[#allocation27_spill] sm:$0xff]  ;;  %v9525_v44 = vld [vmem:[%s12442_s3 + $0x20] sm:$0xff] }
  0xe5   :  { %v719_v61 = vmax.f32 %v655_v18, 0.0  ;;  %8023 = vmatprep.subr.bf16.mxu1 %v8022_v30  ;;  %8071 = vmatprep.subr.bf16.mxu0 %v8070_v41  ;;  %v175_v10 = vmul.f32 %v8777_v17, %v12819_v29  ;;  %v176_v37 = vmul.f32 %v8777_v17, %v9326_v56  ;;  %v303_v3 = vmul.f32 %v12800_v60, %v9351_v28  ;;  %v9491_v60 = vld [vmem:[%s12442_s3 + $0x10] sm:$0xff] }
  0xe6   :  { %v720_v32 = vmax.f32 %v656_v42, 0.0  ;;  %v495_v46 = vmul.f32 %v12803_v55, %v9377_v57  ;;  %v496_v8 = vmul.f32 %v12803_v55, %v9398_v45  ;;  %v177_v17 = vmul.f32 %v12828_v24, %v12827_v38  ;;  %v12833_v55 = vld [vmem:[#allocation19_spill] sm:$0xff] }
  0xe7   :  { %8025 = vmatpush3.bf16.msra.mxu1 %v8022_v30  ;;  %8073 = vmatpush3.bf16.msra.mxu0 %v8070_v41  ;;  %v367_v58 = vadd.f32 %v303_v3, %v175_v10  ;;  %v368_v48 = vadd.f32 %v12829_v51, %v176_v37  ;;  %v178_v7 = vmul.f32 %v12828_v24, %v12830_v39  ;;  %v12838_v41 = vld [vmem:[#allocation38_spill] sm:$0xff] }
  0xe8   :  { %v185_v62 = vmul.f32 %v12831_v9, %v12827_v38  ;;  %v9498_v33 = vpack.c.bf16 %v720_v32, %v719_v61  ;;  %v369_v54 = vadd.f32 %v12833_v55, %v177_v17  ;;  %v186_v1 = vmul.f32 %v12831_v9, %v12830_v39  ;;  %v12839_v61 = vld [vmem:[#allocation11_spill] sm:$0xff]  ;;  %v12840_v3 = vld [vmem:[#allocation22_spill] sm:$0xff] }
  0xe9   :  { %v180_v53 = vmul.f32 %v12828_v24, %v9108_v2  ;;  %v559_v11 = vadd.f32 %v495_v46, %v367_v58  ;;  %v560_v63 = vadd.f32 %v496_v8, %v368_v48  ;;  %v370_v22 = vadd.f32 %v12834_v52, %v178_v7  ;;  %v12841_v46 = vld [vmem:[#allocation39_spill] sm:$0xff]  ;;  %v12843_v17 = vld [vmem:[#allocation62_spill] sm:$0xff] }
  0xea   :  { %12832 = vst [vmem:[#allocation32_spill] sm:$0xff] %v9498_v33  ;;  %7067 = vmatmul.mubr.msk.f32.vlgmr.msra.gmra.mrb[0].mxu1 %vm921_vm0, %v9480_v5  ;;  %7187 = vmatmul.mubr.msk.f32.vlgmr.msra.gmra.mrb[0].mxu0 %vm921_vm0, %v9480_v5  ;;  %v561_v34 = vadd.f32 %v12835_v27, %v369_v54  ;;  %v377_v50 = vadd.f32 %v12836_v13, %v185_v62  ;;  %v12842_v38 = vld [vmem:[#allocation47_spill] sm:$0xff]  ;;  %v9549_v62 = vld [vmem:[%s12442_s3 + $0x28] sm:$0xff]  ;;  %v12846_v27 = vld [vmem:[#allocation30_spill] sm:$0xff] }
  0xeb   :  { %7069 = vmatprep.mubr.msk.f32.mxu1 %vm921_vm0, %v9491_v60  ;;  %7189 = vmatprep.mubr.msk.f32.mxu0 %vm921_vm0, %v9491_v60  ;;  %v378_v43 = vadd.f32 %v12837_v19, %v186_v1  ;;  %v663_v18 = vadd.f32 %v9439_v4, %v559_v11  ;;  %v664_v30 = vadd.f32 %v9420_v35, %v560_v63  ;;  %v12844_v11 = vld [vmem:[#allocation12_spill] sm:$0xff] }
  0xec   :  { %v562_v42 = vadd.f32 %v12838_v41, %v370_v22  ;;  %v308_v10 = vmul.f32 %v12839_v61, %v9042_v40  ;;  %v665_v37 = vadd.f32 %v9128_v16, %v561_v34  ;;  %v569_v32 = vadd.f32 %v12840_v3, %v377_v50  ;;  %v12849_v41 = vld [vmem:[#allocation48_spill] sm:$0xff] }
  0xed   :  { %v570_v8 = vadd.f32 %v12841_v46, %v378_v43  ;;  %v371_v58 = vadd.f32 %v12843_v17, %v12842_v38  ;;  %v727_v51 = vmax.f32 %v663_v18, 0.0  ;;  %v728_v48 = vmax.f32 %v664_v30, 0.0  ;;  %v12853_v17 = vld [vmem:[#allocation31_spill] sm:$0xff] }
  0xee   :  { %7070 = vmatmul.mubr.msk.f32.gmra.mrb[2].mxu1 %vm921_vm0, %v9517_v23  ;;  %7190 = vmatmul.mubr.msk.f32.gmra.mrb[2].mxu0 %vm921_vm0, %v9517_v23  ;;  %v666_v39 = vadd.f32 %v9137_v59, %v562_v42  ;;  %v372_v7 = vadd.f32 %v308_v10, %v180_v53  ;;  %v729_v55 = vmax.f32 %v665_v37, 0.0  ;;  %v673_v54 = vadd.f32 %v9128_v16, %v569_v32  ;;  %v9558_v53 = vld [vmem:[%s12442_s3 + $0x30] sm:$0xff]  ;;  %v12850_v42 = vld [vmem:[#allocation63_spill] sm:$0xff]  ;;  %v9591_v32 = vld [vmem:[%s12442_s3 + $0x40] sm:$0xff] }
  0xef   :  { %7072 = vmatprep.mubr.msk.f32.mxu1 %vm921_vm0, %v9525_v44  ;;  %7192 = vmatprep.mubr.msk.f32.mxu0 %vm921_vm0, %v9525_v44  ;;  %v674_v1 = vadd.f32 %v9137_v59, %v570_v8  ;;  %v500_v63 = vmul.f32 %v12844_v11, %v9093_v36  ;;  %v9560_v52 = vpack.c.bf16 %v728_v48, %v727_v51  ;;  %v12847_v59 = vld [vmem:[#allocation13_spill] sm:$0xff]  ;;  %v12852_v8 = vld [vmem:[#allocation15_spill] sm:$0xff] }
  0xf0   :  { %v730_v22 = vmax.f32 %v666_v39, 0.0  ;;  %v563_v34 = vadd.f32 %v12846_v27, %v371_v58  ;;  %v188_v13 = vmul.f32 %v12831_v9, %v9108_v2  ;;  %v737_v50 = vmax.f32 %v673_v54, 0.0  ;;  %v12854_v39 = vld [vmem:[#allocation70_spill] sm:$0xff]  ;;  %v12857_v27 = vld [vmem:[#allocation51_spill] sm:$0xff] }
  0xf1   :  { %12845 = vst [vmem:[#allocation33_spill] sm:$0xff] %v9560_v52  ;;  %v738_v16 = vmax.f32 %v674_v1, 0.0  ;;  %v564_v19 = vadd.f32 %v500_v63, %v372_v7  ;;  %v316_v43 = vmul.f32 %v12847_v59, %v9042_v40  ;;  %v379_v10 = vadd.f32 %v12850_v42, %v12849_v41  ;;  %v9583_v40 = vld [vmem:[%s12442_s3 + $0x38] sm:$0xff]  ;;  %v12856_v1 = vld [vmem:[#allocation16_spill] sm:$0xff] }
  0xf2   :  { %7073 = vmatmul.mubr.msk.f32.gmra.mrb[4].mxu1 %vm921_vm0, %v9549_v62  ;;  %7193 = vmatmul.mubr.msk.f32.gmra.mrb[4].mxu0 %vm921_vm0, %v9549_v62  ;;  %v9571_v18 = vpack.c.bf16 %v730_v22, %v729_v55  ;;  %v667_v30 = vadd.f32 %v9279_v47, %v563_v34  ;;  %v508_v38 = vmul.f32 %v12852_v8, %v9093_v36  ;;  %v12855_v55 = vld [vmem:[#allocation73_spill] sm:$0xff] }
  0xf3   :  { %7075 = vmatprep.mubr.msk.f32.mxu1 %vm921_vm0, %v9558_v53  ;;  %7195 = vmatprep.mubr.msk.f32.mxu0 %vm921_vm0, %v9558_v53  ;;  %v9585_v2 = vpack.c.bf16 %v738_v16, %v737_v50  ;;  %v668_v37 = vadd.f32 %v9305_v14, %v564_v19  ;;  %v380_v3 = vadd.f32 %v316_v43, %v188_v13  ;;  %v9617_v13 = vld [vmem:[%s12442_s3 + $0x48] sm:$0xff] }
  0xf4   :  { %12848 = vst [vmem:[#allocation28_spill] sm:$0xff] %v9571_v18  ;;  %v731_v46 = vmax.f32 %v667_v30, 0.0  ;;  %v571_v58 = vadd.f32 %v12853_v17, %v379_v10  ;;  %v181_v51 = vmul.f32 %v12828_v24, %v9150_v26  ;;  %v182_v7 = vmul.f32 %v12828_v24, %v12854_v39  ;;  %v12859_v10 = vld [vmem:[#allocation40_spill] sm:$0xff]  ;;  %v10003_v18 = vld [vmem:[%s12444_s5 + $0xd8] sm:$0xff] }
  0xf5   :  { %12851 = vst [vmem:[#allocation29_spill] sm:$0xff] %v9585_v2  ;;  %v732_v48 = vmax.f32 %v668_v37, 0.0  ;;  %v310_v54 = vmul.f32 %v12839_v61, %v12855_v55  ;;  %v501_v63 = vmul.f32 %v12844_v11, %v12856_v1  ;;  %v572_v36 = vadd.f32 %v508_v38, %v380_v3  ;;  %v9994_v2 = vld [vmem:[%s12444_s5 + $0xd0] sm:$0xff]  ;;  %12898 = vst [vmem:[#allocation20_spill] sm:$0xff] %v10003_v18 }
  0xf6   :  { %7076 = vmatmul.mubr.msk.f32.gmra.mrb[6].mxu1 %vm921_vm0, %v9583_v40  ;;  %7196 = vmatmul.mubr.msk.f32.gmra.mrb[6].mxu0 %vm921_vm0, %v9583_v40  ;;  %v675_v22 = vadd.f32 %v9279_v47, %v571_v58  ;;  %v373_v34 = vadd.f32 %v12857_v27, %v181_v51  ;;  %v189_v19 = vmul.f32 %v12831_v9, %v9150_v26  ;;  %v9626_v47 = vld [vmem:[%s12442_s3 + $0x50] sm:$0xff] }
  0xf7   :  { %7078 = vmatprep.mubr.msk.f32.mxu1 %vm921_vm0, %v9591_v32  ;;  %7198 = vmatprep.mubr.msk.f32.mxu0 %vm921_vm0, %v9591_v32  ;;  %v9619_v50 = vpack.c.bf16 %v732_v48, %v731_v46  ;;  %v374_v16 = vadd.f32 %v310_v54, %v182_v7  ;;  %v676_v43 = vadd.f32 %v9305_v14, %v572_v36  ;;  %v12860_v46 = vld [vmem:[#allocation52_spill] sm:$0xff]  ;;  %v9653_v48 = vld [vmem:[%s12442_s3 + $0x58] sm:$0xff] }
  0xf8   :  { %v739_v30 = vmax.f32 %v675_v22, 0.0  ;;  %v565_v41 = vadd.f32 %v501_v63, %v373_v34  ;;  %v190_v42 = vmul.f32 %v12831_v9, %v12854_v39  ;;  %v318_v3 = vmul.f32 %v12847_v59, %v12855_v55  ;;  %v9659_v54 = vld [vmem:[%s12442_s3 + $0x60] sm:$0xff]  ;;  %v12862_v36 = vld [vmem:[#allocation59_spill] sm:$0xff]  ;;  %v12863_v34 = vld [vmem:[#allocation41_spill] sm:$0xff]  ;;  %12897 = vst [vmem:[#allocation26_spill] sm:$0xff] %v9994_v2 }
  0xf9   :  { %12858 = vst [vmem:[#allocation7_spill] sm:$0xff] %v9619_v50  ;;  %v566_v37 = vadd.f32 %v12859_v10, %v374_v16  ;;  %v381_v38 = vadd.f32 %v12860_v46, %v189_v19  ;;  %v509_v26 = vmul.f32 %v12852_v8, %v12856_v1  ;;  %v740_v14 = vmax.f32 %v676_v43, 0.0  ;;  %v9989_v50 = vld [vmem:[%s12444_s5 + $0xc8] sm:$0xff] }
  0xfa   :  { %7079 = vmatmul.mubr.msk.f32.gmra.mrb[8].mxu1 %vm921_vm0, %v9617_v13  ;;  %7199 = vmatmul.mubr.msk.f32.gmra.mrb[8].mxu0 %vm921_vm0, %v9617_v13  ;;  %v669_v17 = vadd.f32 %v9272_v21, %v565_v41  ;;  %v183_v58 = vmul.f32 %v12828_v24, %v12819_v29  ;;  %v184_v51 = vmul.f32 %v12828_v24, %v9326_v56 }
  0xfb   :  { %7081 = vmatprep.mubr.msk.f32.mxu1 %vm921_vm0, %v9626_v47  ;;  %7201 = vmatprep.mubr.msk.f32.mxu0 %vm921_vm0, %v9626_v47  ;;  %v670_v39 = vadd.f32 %v9425_v31, %v566_v37  ;;  %v382_v7 = vadd.f32 %v318_v3, %v190_v42  ;;  %v573_v55 = vadd.f32 %v509_v26, %v381_v38 }
  0xfc   :  { %v9661_v24 = vpack.c.bf16 %v740_v14, %v739_v30  ;;  %v733_v1 = vmax.f32 %v669_v17, 0.0  ;;  %v311_v63 = vmul.f32 %v12839_v61, %v9351_v28  ;;  %v376_v22 = vadd.f32 %v12862_v36, %v184_v51  ;;  %v12865_v17 = vld [vmem:[#allocation60_spill] sm:$0xff]  ;;  %12896 = vst [vmem:[#allocation19_spill] sm:$0xff] %v9989_v50 }
  0xfd   :  { %v734_v27 = vmax.f32 %v670_v39, 0.0  ;;  %v574_v16 = vadd.f32 %v12863_v34, %v382_v7  ;;  %v677_v19 = vadd.f32 %v9272_v21, %v573_v55  ;;  %v503_v43 = vmul.f32 %v12844_v11, %v9377_v57  ;;  %v9685_v21 = vld [vmem:[%s12442_s3 + $0x68] sm:$0xff]  ;;  %v9740_v34 = vpop.permute.xlu1 %843 }
  0xfe   :  { %12861 = vst [vmem:[#allocation65_spill] sm:$0xff] %v9661_v24  ;;  %7082 = vmatmul.mubr.msk.f32.gmra.mrb[10].mxu1 %vm921_vm0, %v9653_v48  ;;  %7202 = vmatmul.mubr.msk.f32.gmra.mrb[10].mxu0 %vm921_vm0, %v9653_v48  ;;  %v375_v30 = vadd.f32 %v311_v63, %v183_v58  ;;  %v504_v61 = vmul.f32 %v12844_v11, %v9398_v45  ;;  %12870 = vst [vmem:[#allocation9_spill] sm:$0xff] %v9740_v34 }
  0xff   :  { %v191_v41 = vmul.f32 %v12831_v9, %v12819_v29  ;;  %7084 = vmatprep.mubr.msk.f32.mxu1 %vm921_vm0, %v9659_v54  ;;  %7204 = vmatprep.mubr.msk.f32.mxu0 %vm921_vm0, %v9659_v54  ;;  %v9687_v42 = vpack.c.bf16 %v734_v27, %v733_v1  ;;  %v678_v10 = vadd.f32 %v9425_v31, %v574_v16  ;;  %v9695_v29 = vld [vmem:[%s12442_s3 + $0x70] sm:$0xff]  ;;  %v741_v26 = vmax.f32 %v677_v19, 0.0  ;;  %v9734_v27 = vld [vmem:[%s12444_s5] sm:$0xff] }
 0x100   :  { %v192_v11 = vmul.f32 %v12831_v9, %v9326_v56  ;;  %v567_v37 = vadd.f32 %v503_v43, %v375_v30  ;;  %v568_v3 = vadd.f32 %v504_v61, %v376_v22  ;;  %v319_v46 = vmul.f32 %v12847_v59, %v9351_v28 }
 0x101   :  { %12864 = vst [vmem:[#allocation66_spill] sm:$0xff] %v9687_v42  ;;  %v511_v38 = vmul.f32 %v12852_v8, %v9377_v57  ;;  %v742_v14 = vmax.f32 %v678_v10, 0.0  ;;  %v512_v56 = vmul.f32 %v12852_v8, %v9398_v45  ;;  %v9717_v57 = vld [vmem:[%s12442_s3 + $0x78] sm:$0xff] }
 0x102   :  { %v384_v31 = vadd.f32 %v12865_v17, %v192_v11  ;;  %7085 = vmatmul.mubr.msk.f32.gmra.mrb[12].mxu1 %vm921_vm0, %v9685_v21  ;;  %7205 = vmatmul.mubr.msk.f32.gmra.mrb[12].mxu0 %vm921_vm0, %v9685_v21  ;;  %v671_v9 = vadd.f32 %v9439_v4, %v567_v37  ;;  %v672_v28 = vadd.f32 %v9420_v35, %v568_v3 }
 0x103   :  { %v383_v59 = vadd.f32 %v319_v46, %v191_v41  ;;  %7087 = vmatprep.mubr.msk.f32.mxu1 %vm921_vm0, %v9695_v29  ;;  %7207 = vmatprep.mubr.msk.f32.mxu0 %vm921_vm0, %v9695_v29  ;;  %v9719_v45 = vpack.c.bf16 %v742_v14, %v741_v26 }
 0x104   :  { %v576_v8 = vadd.f32 %v512_v56, %v384_v31  ;;  %v735_v58 = vmax.f32 %v671_v9, 0.0  ;;  %v736_v51 = vmax.f32 %v672_v28, 0.0 }
 0x105   :  { %12866 = vst [vmem:[#allocation24_spill] sm:$0xff] %v9719_v45  ;;  %v575_v39 = vadd.f32 %v511_v38, %v383_v59 }
 0x106   :  { %v680_v7 = vadd.f32 %v9420_v35, %v576_v8  ;;  %7088 = vmatmul.mubr.msk.f32.gmra.mrb[14].mxu1 %vm921_vm0, %v9717_v57  ;;  %7208 = vmatmul.mubr.msk.f32.gmra.mrb[14].mxu0 %vm921_vm0, %v9717_v57  ;;  %v9726_v55 = vpack.c.bf16 %v736_v51, %v735_v58  ;;  %v9738_v35 = vpop.permute.xlu0 %848 }
 0x107   :  { %v679_v1 = vadd.f32 %v9439_v4, %v575_v39  ;;  %7122 = vmatprep.mubr.f32.mxu1 %v9734_v27  ;;  %7242 = vmatprep.mubr.f32.mxu0 %v9734_v27  ;;  %12869 = vst [vmem:[#allocation58_spill] sm:$0xff] %v9738_v35  ;;  %v9744_v4 = vpop.permute.xlu1 %853 }
 0x108   :  { %12867 = vst [vmem:[#allocation8_spill] sm:$0xff] %v9726_v55  ;;  %v744_v36 = vmax.f32 %v680_v7, 0.0 }
 0x109   :  { %v743_v63 = vmax.f32 %v679_v1, 0.0 }
 0x10a   :  { %v9742_v16 = vpop.permute.xlu0 %858 }
 0x10b   :  { %v9729_v22 = vpack.c.bf16 %v744_v36, %v743_v63  ;;  %12871 = vst [vmem:[#allocation49_spill] sm:$0xff] %v9742_v16  ;;  %v9748_v43 = vpop.permute.xlu1 %863 }
 0x10d   :  { %12868 = vst [vmem:[#allocation44_spill] sm:$0xff] %v9729_v22 }
 0x10e   :  { %v9746_v19 = vpop.permute.xlu0 %868 }
 0x10f   :  { %v9752_v61 = vpop.permute.xlu1 %873 }
 0x112   :  { %v9750_v30 = vpop.permute.xlu0 %878 }
 0x113   :  { %v9760_v17 = vpop.permute.xlu1 %883 }
 0x116   :  { %v9758_v14 = vpop.permute.xlu0 %888 }
 0x1bd   :  { %v7068_v41 = vpop.f32.mrb[0].mxu1  ;;  %v7188_v10 = vpop.f32.mrb[0].mxu0 }
 0x1be   :  { %v1042_v11 = vadd.f32 %v7068_v41, %v9738_v35  ;;  %v1652_v37 = vadd.f32 %v7188_v10, %v9738_v35  ;;  %v1036_v3 = vpop.f32.mrb[1].mxu1  ;;  %v1646_v46 = vpop.f32.mrb[1].mxu0 }
 0x1bf   :  { %v1037_v38 = vadd.f32 %v1036_v3, %v9740_v34  ;;  %v1647_v26 = vadd.f32 %v1646_v46, %v9740_v34 }
 0x1c0   :  { %v1116_v31 = vmax.f32 %v1042_v11, 0.0  ;;  %v1726_v56 = vmax.f32 %v1652_v37, 0.0 }
 0x1c1   :  { %v1115_v9 = vmax.f32 %v1037_v38, 0.0  ;;  %v1725_v28 = vmax.f32 %v1647_v26, 0.0  ;;  %v7071_v59 = vpop.f32.mrb[2].mxu1  ;;  %v7191_v8 = vpop.f32.mrb[2].mxu0 }
 0x1c2   :  { %v1052_v58 = vadd.f32 %v7071_v59, %v9742_v16  ;;  %v1662_v51 = vadd.f32 %v7191_v8, %v9742_v16  ;;  %v1046_v39 = vpop.f32.mrb[3].mxu1  ;;  %v1656_v7 = vpop.f32.mrb[3].mxu0 }
 0x1c3   :  { %v8026_v1 = vpack.c.bf16 %v1116_v31, %v1115_v9  ;;  %v8074_v63 = vpack.c.bf16 %v1726_v56, %v1725_v28  ;;  %v1047_v36 = vadd.f32 %v1046_v39, %v9744_v4  ;;  %v1657_v41 = vadd.f32 %v1656_v7, %v9744_v4  ;;  %v9772_v39 = vpop.permute.xlu1 %893 }
 0x1c4   :  { %v1118_v10 = vmax.f32 %v1052_v58, 0.0  ;;  %v1728_v3 = vmax.f32 %v1662_v51, 0.0  ;;  %v9770_v51 = vpop.permute.xlu0 %898 }
 0x1c5   :  { %v1117_v11 = vmax.f32 %v1047_v36, 0.0  ;;  %v1727_v37 = vmax.f32 %v1657_v41, 0.0  ;;  %v7074_v46 = vpop.f32.mrb[4].mxu1  ;;  %8027 = vmatprep.subr.bf16.mxu1 %v8026_v1  ;;  %v7194_v38 = vpop.f32.mrb[4].mxu0  ;;  %8075 = vmatprep.subr.bf16.mxu0 %v8074_v63 }
 0x1c6   :  { %v1062_v26 = vadd.f32 %v7074_v46, %v9746_v19  ;;  %v1672_v59 = vadd.f32 %v7194_v38, %v9746_v19  ;;  %v1056_v8 = vpop.f32.mrb[5].mxu1  ;;  %8029 = vmatpush3.bf16.msra.mxu1 %v8026_v1  ;;  %v1666_v31 = vpop.f32.mrb[5].mxu0  ;;  %8077 = vmatpush3.bf16.msra.mxu0 %v8074_v63 }
 0x1c7   :  { %v8030_v56 = vpack.c.bf16 %v1118_v10, %v1117_v11  ;;  %v8078_v9 = vpack.c.bf16 %v1728_v3, %v1727_v37  ;;  %v1057_v28 = vadd.f32 %v1056_v8, %v9748_v43  ;;  %v1667_v58 = vadd.f32 %v1666_v31, %v9748_v43 }
 0x1c8   :  { %v1120_v7 = vmax.f32 %v1062_v26, 0.0  ;;  %v1730_v36 = vmax.f32 %v1672_v59, 0.0 }
 0x1c9   :  { %v1119_v41 = vmax.f32 %v1057_v28, 0.0  ;;  %v1729_v46 = vmax.f32 %v1667_v58, 0.0  ;;  %v7077_v22 = vpop.f32.mrb[6].mxu1  ;;  %8031 = vmatprep.subr.bf16.mxu1 %v8030_v56  ;;  %v7197_v38 = vpop.f32.mrb[6].mxu0  ;;  %8079 = vmatprep.subr.bf16.mxu0 %v8078_v9 }
 0x1ca   :  { %v1072_v1 = vadd.f32 %v7077_v22, %v9750_v30  ;;  %v1682_v63 = vadd.f32 %v7197_v38, %v9750_v30  ;;  %v1066_v10 = vpop.f32.mrb[7].mxu1  ;;  %8033 = vmatpush3.bf16.msra.mxu1 %v8030_v56  ;;  %v1676_v3 = vpop.f32.mrb[7].mxu0  ;;  %8081 = vmatpush3.bf16.msra.mxu0 %v8078_v9 }
 0x1cb   :  { %v8034_v11 = vpack.c.bf16 %v1120_v7, %v1119_v41  ;;  %v8082_v37 = vpack.c.bf16 %v1730_v36, %v1729_v46  ;;  %v1067_v8 = vadd.f32 %v1066_v10, %v9752_v61  ;;  %v1677_v26 = vadd.f32 %v1676_v3, %v9752_v61 }
 0x1cc   :  { %v1122_v59 = vmax.f32 %v1072_v1, 0.0  ;;  %v1732_v31 = vmax.f32 %v1682_v63, 0.0  ;;  %v9782_v1 = vpop.permute.xlu0 %908  ;;  %v9784_v63 = vpop.permute.xlu1 %903 }
 0x1cd   :  { %v1121_v28 = vmax.f32 %v1067_v8, 0.0  ;;  %v1731_v58 = vmax.f32 %v1677_v26, 0.0  ;;  %v7080_v55 = vpop.f32.mrb[8].mxu1  ;;  %8035 = vmatprep.subr.bf16.mxu1 %v8034_v11  ;;  %v7200_v45 = vpop.f32.mrb[8].mxu0  ;;  %8083 = vmatprep.subr.bf16.mxu0 %v8082_v37 }
 0x1ce   :  { %v1082_v22 = vadd.f32 %v7080_v55, %v9758_v14  ;;  %v1692_v56 = vadd.f32 %v7200_v45, %v9758_v14  ;;  %v1076_v38 = vpop.f32.mrb[9].mxu1  ;;  %8037 = vmatpush3.bf16.msra.mxu1 %v8034_v11  ;;  %v1686_v9 = vpop.f32.mrb[9].mxu0  ;;  %8085 = vmatpush3.bf16.msra.mxu0 %v8082_v37 }
 0x1cf   :  { %v8038_v7 = vpack.c.bf16 %v1122_v59, %v1121_v28  ;;  %v8086_v36 = vpack.c.bf16 %v1732_v31, %v1731_v58  ;;  %v1077_v41 = vadd.f32 %v1076_v38, %v9760_v17  ;;  %v1687_v46 = vadd.f32 %v1686_v9, %v9760_v17 }
 0x1d0   :  { %v1124_v10 = vmax.f32 %v1082_v22, 0.0  ;;  %v1734_v3 = vmax.f32 %v1692_v56, 0.0 }
 0x1d1   :  { %v1123_v8 = vmax.f32 %v1077_v41, 0.0  ;;  %v1733_v55 = vmax.f32 %v1687_v46, 0.0  ;;  %v7083_v26 = vpop.f32.mrb[10].mxu1  ;;  %8039 = vmatprep.subr.bf16.mxu1 %v8038_v7  ;;  %v7203_v45 = vpop.f32.mrb[10].mxu0  ;;  %8087 = vmatprep.subr.bf16.mxu0 %v8086_v36 }
 0x1d2   :  { %v1092_v11 = vadd.f32 %v7083_v26, %v9770_v51  ;;  %v1702_v37 = vadd.f32 %v7203_v45, %v9770_v51  ;;  %v1086_v59 = vpop.f32.mrb[11].mxu1  ;;  %8041 = vmatpush3.bf16.msra.mxu1 %v8038_v7  ;;  %v1696_v31 = vpop.f32.mrb[11].mxu0  ;;  %8089 = vmatpush3.bf16.msra.mxu0 %v8086_v36 }
 0x1d3   :  { %v8042_v28 = vpack.c.bf16 %v1124_v10, %v1123_v8  ;;  %v8090_v58 = vpack.c.bf16 %v1734_v3, %v1733_v55  ;;  %v1087_v38 = vadd.f32 %v1086_v59, %v9772_v39  ;;  %v1697_v22 = vadd.f32 %v1696_v31, %v9772_v39 }
 0x1d4   :  { %v1126_v56 = vmax.f32 %v1092_v11, 0.0  ;;  %v1736_v9 = vmax.f32 %v1702_v37, 0.0  ;;  %v9794_v11 = vpop.permute.xlu0 %918  ;;  %v9796_v37 = vpop.permute.xlu1 %913 }
 0x1d5   :  { %v1125_v41 = vmax.f32 %v1087_v38, 0.0  ;;  %v1735_v46 = vmax.f32 %v1697_v22, 0.0  ;;  %v7086_v42 = vpop.f32.mrb[12].mxu1  ;;  %8043 = vmatprep.subr.bf16.mxu1 %v8042_v28  ;;  %v7206_v24 = vpop.f32.mrb[12].mxu0  ;;  %8091 = vmatprep.subr.bf16.mxu0 %v8090_v58 }
 0x1d6   :  { %v1102_v26 = vadd.f32 %v7086_v42, %v9782_v1  ;;  %v1712_v7 = vadd.f32 %v7206_v24, %v9782_v1  ;;  %v1096_v45 = vpop.f32.mrb[13].mxu1  ;;  %8045 = vmatpush3.bf16.msra.mxu1 %v8042_v28  ;;  %v1706_v36 = vpop.f32.mrb[13].mxu0  ;;  %8093 = vmatpush3.bf16.msra.mxu0 %v8090_v58 }
 0x1d7   :  { %v8046_v10 = vpack.c.bf16 %v1126_v56, %v1125_v41  ;;  %v8094_v3 = vpack.c.bf16 %v1736_v9, %v1735_v46  ;;  %v1097_v8 = vadd.f32 %v1096_v45, %v9784_v63  ;;  %v1707_v55 = vadd.f32 %v1706_v36, %v9784_v63 }
 0x1d8   :  { %v1128_v59 = vmax.f32 %v1102_v26, 0.0  ;;  %v1738_v31 = vmax.f32 %v1712_v7, 0.0 }
 0x1d9   :  { %v1127_v38 = vmax.f32 %v1097_v8, 0.0  ;;  %v1737_v42 = vmax.f32 %v1707_v55, 0.0  ;;  %v7089_v22 = vpop.f32.mrb[14].mxu1  ;;  %8047 = vmatprep.subr.bf16.mxu1 %v8046_v10  ;;  %v7209_v24 = vpop.f32.mrb[14].mxu0  ;;  %8095 = vmatprep.subr.bf16.mxu0 %v8094_v3 }
 0x1da   :  { %v1112_v28 = vadd.f32 %v7089_v22, %v9794_v11  ;;  %v1722_v58 = vadd.f32 %v7209_v24, %v9794_v11  ;;  %v1106_v56 = vpop.f32.mrb[15].mxu1  ;;  %8049 = vmatpush3.bf16.msra.mxu1 %v8046_v10  ;;  %v1716_v9 = vpop.f32.mrb[15].mxu0  ;;  %8097 = vmatpush3.bf16.msra.mxu0 %v8094_v3  ;;  %v9805_v10 = vld [vmem:[%s12444_s5 + $0x8] sm:$0xff] }
 0x1db   :  { %v8050_v41 = vpack.c.bf16 %v1128_v59, %v1127_v38  ;;  %v8098_v46 = vpack.c.bf16 %v1738_v31, %v1737_v42  ;;  %v1107_v45 = vadd.f32 %v1106_v56, %v9796_v37  ;;  %v1717_v26 = vadd.f32 %v1716_v9, %v9796_v37  ;;  %v12872_v3 = vld [vmem:[#allocation69_spill] sm:$0xff]  ;;  %v12873_v59 = vld [vmem:[#allocation71_spill] sm:$0xff]  ;;  %v9814_v31 = vld [vmem:[%s12444_s5 + $0x10] sm:$0xff] }
 0x1dc   :  { %v1130_v7 = vmax.f32 %v1112_v28, 0.0  ;;  %v1740_v36 = vmax.f32 %v1722_v58, 0.0  ;;  %v9821_v38 = vld [vmem:[%s12444_s5 + $0x18] sm:$0xff]  ;;  %v9832_v58 = vld [vmem:[%s12444_s5 + $0x20] sm:$0xff]  ;;  %v9839_v56 = vld [vmem:[%s12444_s5 + $0x28] sm:$0xff] }
 0x1dd   :  { %v1129_v8 = vmax.f32 %v1107_v45, 0.0  ;;  %v1739_v55 = vmax.f32 %v1717_v26, 0.0  ;;  %8051 = vmatprep.subr.bf16.mxu1 %v8050_v41  ;;  %8099 = vmatprep.subr.bf16.mxu0 %v8098_v46  ;;  %v12874_v42 = vld [vmem:[#allocation35_spill] sm:$0xff]  ;;  %12876 = vst [vmem:[#allocation50_spill] sm:$0xff] %v9839_v56  ;;  %v9850_v9 = vld [vmem:[%s12444_s5 + $0x30] sm:$0xff]  ;;  %v9905_v45 = vld [vmem:[%s12444_s5 + $0x68] sm:$0xff] }
 0x1de   :  { %8053 = vmatpush3.bf16.msra.mxu1 %v8050_v41  ;;  %8101 = vmatpush3.bf16.msra.mxu0 %v8098_v46  ;;  %v12875_v28 = vld [vmem:[#allocation43_spill] sm:$0xff]  ;;  %12877 = vst [vmem:[#allocation53_spill] sm:$0xff] %v9850_v9  ;;  %v9866_v46 = vld [vmem:[%s12444_s5 + $0x40] sm:$0xff]  ;;  %12884 = vst [vmem:[#allocation36_spill] sm:$0xff] %v9905_v45 }
 0x1df   :  { %v8054_v22 = vpack.c.bf16 %v1130_v7, %v1129_v8  ;;  %v8102_v24 = vpack.c.bf16 %v1740_v36, %v1739_v55  ;;  %v9857_v41 = vld [vmem:[%s12444_s5 + $0x38] sm:$0xff]  ;;  %12879 = vst [vmem:[#allocation25_spill] sm:$0xff] %v9866_v46  ;;  %v9910_v26 = vld [vmem:[%s12444_s5 + $0x70] sm:$0xff]  ;;  %v9924_v36 = vld [vmem:[%s12444_s5 + $0x80] sm:$0xff] }
 0x1e0   :  { %12878 = vst [vmem:[#allocation54_spill] sm:$0xff] %v9857_v41  ;;  %12885 = vst [vmem:[#allocation46_spill] sm:$0xff] %v9910_v26  ;;  %v9919_v7 = vld [vmem:[%s12444_s5 + $0x78] sm:$0xff]  ;;  %v9933_v8 = vld [vmem:[%s12444_s5 + $0x88] sm:$0xff] }
 0x1e1   :  { %8055 = vmatprep.subr.bf16.mxu1 %v8054_v22  ;;  %8103 = vmatprep.subr.bf16.mxu0 %v8102_v24  ;;  %12886 = vst [vmem:[#allocation37_spill] sm:$0xff] %v9919_v7  ;;  %12887 = vst [vmem:[#allocation67_spill] sm:$0xff] %v9924_v36  ;;  %v9938_v55 = vld [vmem:[%s12444_s5 + $0x90] sm:$0xff] }
 0x1e2   :  { %8057 = vmatpush3.bf16.msra.mxu1 %v8054_v22  ;;  %8105 = vmatpush3.bf16.msra.mxu0 %v8102_v24  ;;  %12888 = vst [vmem:[#allocation55_spill] sm:$0xff] %v9933_v8  ;;  %12889 = vst [vmem:[#allocation34_spill] sm:$0xff] %v9938_v55  ;;  %v9947_v22 = vld [vmem:[%s12444_s5 + $0x98] sm:$0xff]  ;;  %v9952_v24 = vld [vmem:[%s12444_s5 + $0xa0] sm:$0xff] }
 0x1e3   :  { %8107 = vmatprep.subr.bf16.mxu1 %v12872_v3  ;;  %8155 = vmatprep.subr.bf16.mxu0 %v12873_v59  ;;  %12890 = vst [vmem:[#allocation17_spill] sm:$0xff] %v9947_v22  ;;  %12891 = vst [vmem:[#allocation61_spill] sm:$0xff] %v9952_v24 }
 0x1e5   :  { %7123 = vmatmul.mubr.f32.vlgmr.msra.gmra.mrb[16].mxu1 %v9805_v10  ;;  %7243 = vmatmul.mubr.f32.vlgmr.msra.gmra.mrb[16].mxu0 %v9805_v10 }
 0x1e6   :  { %8109 = vmatpush3.bf16.msra.mxu1 %v12872_v3  ;;  %8157 = vmatpush3.bf16.msra.mxu0 %v12873_v59  ;;  %v9961_v3 = vld [vmem:[%s12444_s5 + $0xa8] sm:$0xff]  ;;  %v9966_v59 = vld [vmem:[%s12444_s5 + $0xb0] sm:$0xff] }
 0x1e7   :  { %8111 = vmatprep.subr.bf16.mxu1 %v12874_v42  ;;  %8159 = vmatprep.subr.bf16.mxu0 %v12875_v28  ;;  %12892 = vst [vmem:[#allocation10_spill] sm:$0xff] %v9961_v3  ;;  %12893 = vst [vmem:[#allocation56_spill] sm:$0xff] %v9966_v59 }
 0x1e8   :  { %7125 = vmatprep.mubr.f32.mxu1 %v9814_v31  ;;  %7245 = vmatprep.mubr.f32.mxu0 %v9814_v31 }
 0x1e9   :  { %7126 = vmatmul.mubr.f32.gmra.mrb[18].mxu1 %v9821_v38  ;;  %7246 = vmatmul.mubr.f32.gmra.mrb[18].mxu0 %v9821_v38 }
 0x1ea   :  { %8113 = vmatpush3.bf16.msra.mxu1 %v12874_v42  ;;  %8161 = vmatpush3.bf16.msra.mxu0 %v12875_v28  ;;  %v9975_v42 = vld [vmem:[%s12444_s5 + $0xb8] sm:$0xff]  ;;  %v9980_v28 = vld [vmem:[%s12444_s5 + $0xc0] sm:$0xff] }
 0x1eb   :  { %8115 = vmatprep.subr.bf16.mxu1 %v9453_v12  ;;  %8163 = vmatprep.subr.bf16.mxu0 %v9457_v6  ;;  %12894 = vst [vmem:[#allocation64_spill] sm:$0xff] %v9975_v42  ;;  %12895 = vst [vmem:[#allocation14_spill] sm:$0xff] %v9980_v28 }
 0x1ec   :  { %7128 = vmatprep.mubr.f32.mxu1 %v9832_v58  ;;  %7248 = vmatprep.mubr.f32.mxu0 %v9832_v58 }
 0x1ed   :  { %7129 = vmatmul.mubr.f32.gmra.mrb[20].mxu1 %v9839_v56  ;;  %7249 = vmatmul.mubr.f32.gmra.mrb[20].mxu0 %v9839_v56 }
 0x1ee   :  { %8117 = vmatpush3.bf16.msra.mxu1 %v9453_v12  ;;  %8165 = vmatpush3.bf16.msra.mxu0 %v9457_v6  ;;  %v9875_v12 = vld [vmem:[%s12444_s5 + $0x48] sm:$0xff]  ;;  %v9882_v6 = vld [vmem:[%s12444_s5 + $0x50] sm:$0xff] }
 0x1ef   :  { %8119 = vmatprep.subr.bf16.mxu1 %v9466_v0  ;;  %8167 = vmatprep.subr.bf16.mxu0 %v9468_v20  ;;  %12880 = vst [vmem:[#allocation45_spill] sm:$0xff] %v9875_v12  ;;  %12881 = vst [vmem:[#allocation68_spill] sm:$0xff] %v9882_v6 }
 0x1f0   :  { %7131 = vmatprep.mubr.f32.mxu1 %v9850_v9  ;;  %7251 = vmatprep.mubr.f32.mxu0 %v9850_v9 }
 0x1f1   :  { %7132 = vmatmul.mubr.f32.gmra.mrb[22].mxu1 %v9857_v41  ;;  %7252 = vmatmul.mubr.f32.gmra.mrb[22].mxu0 %v9857_v41 }
 0x1f2   :  { %8121 = vmatpush3.bf16.msra.mxu1 %v9466_v0  ;;  %8169 = vmatpush3.bf16.msra.mxu0 %v9468_v20  ;;  %v9891_v0 = vld [vmem:[%s12444_s5 + $0x58] sm:$0xff]  ;;  %v9896_v20 = vld [vmem:[%s12444_s5 + $0x60] sm:$0xff] }
 0x1f3   :  { %7134 = vmatprep.mubr.f32.mxu1 %v9866_v46  ;;  %7254 = vmatprep.mubr.f32.mxu0 %v9866_v46  ;;  %12882 = vst [vmem:[#allocation72_spill] sm:$0xff] %v9891_v0  ;;  %12883 = vst [vmem:[#allocation42_spill] sm:$0xff] %v9896_v20 }
 0x1f5   :  { %7135 = vmatmul.mubr.f32.gmra.mrb[24].mxu1 %v9875_v12  ;;  %7255 = vmatmul.mubr.f32.gmra.mrb[24].mxu0 %v9875_v12 }
 0x1f6   :  { %7137 = vmatprep.mubr.f32.mxu1 %v9882_v6  ;;  %7257 = vmatprep.mubr.f32.mxu0 %v9882_v6 }
 0x1f9   :  { %7138 = vmatmul.mubr.f32.gmra.mrb[26].mxu1 %v9891_v0  ;;  %7258 = vmatmul.mubr.f32.gmra.mrb[26].mxu0 %v9891_v0 }
 0x1fa   :  { %7140 = vmatprep.mubr.f32.mxu1 %v9896_v20  ;;  %7260 = vmatprep.mubr.f32.mxu0 %v9896_v20 }
 0x1fd   :  { %7141 = vmatmul.mubr.f32.gmra.mrb[28].mxu1 %v9905_v45  ;;  %7261 = vmatmul.mubr.f32.gmra.mrb[28].mxu0 %v9905_v45 }
 0x1fe   :  { %7143 = vmatprep.mubr.f32.mxu1 %v9910_v26  ;;  %7263 = vmatprep.mubr.f32.mxu0 %v9910_v26 }
 0x201   :  { %7144 = vmatmul.mubr.f32.gmra.mrb[30].mxu1 %v9919_v7  ;;  %7264 = vmatmul.mubr.f32.gmra.mrb[30].mxu0 %v9919_v7 }
 0x202   :  { %7146 = vmatprep.mubr.f32.mxu1 %v9924_v36  ;;  %7266 = vmatprep.mubr.f32.mxu0 %v9924_v36 }
 0x205   :  { %7147 = vmatmul.mubr.f32.gmra.mrb[32].mxu1 %v9933_v8  ;;  %7267 = vmatmul.mubr.f32.gmra.mrb[32].mxu0 %v9933_v8 }
 0x206   :  { %7149 = vmatprep.mubr.f32.mxu1 %v9938_v55  ;;  %7269 = vmatprep.mubr.f32.mxu0 %v9938_v55 }
 0x209   :  { %7150 = vmatmul.mubr.f32.gmra.mrb[34].mxu1 %v9947_v22  ;;  %7270 = vmatmul.mubr.f32.gmra.mrb[34].mxu0 %v9947_v22 }
 0x20a   :  { %7152 = vmatprep.mubr.f32.mxu1 %v9952_v24  ;;  %7272 = vmatprep.mubr.f32.mxu0 %v9952_v24 }
 0x20d   :  { %7153 = vmatmul.mubr.f32.gmra.mrb[36].mxu1 %v9961_v3  ;;  %7273 = vmatmul.mubr.f32.gmra.mrb[36].mxu0 %v9961_v3 }
 0x20e   :  { %7155 = vmatprep.mubr.f32.mxu1 %v9966_v59  ;;  %7275 = vmatprep.mubr.f32.mxu0 %v9966_v59 }
 0x211   :  { %7156 = vmatmul.mubr.f32.gmra.mrb[38].mxu1 %v9975_v42  ;;  %7276 = vmatmul.mubr.f32.gmra.mrb[38].mxu0 %v9975_v42 }
 0x212   :  { %7158 = vmatprep.mubr.f32.mxu1 %v9980_v28  ;;  %7278 = vmatprep.mubr.f32.mxu0 %v9980_v28  ;;  %v10008_v28 = vld [vmem:[%s12444_s5 + $0xe0] sm:$0xff] }
 0x213   :  { %12899 = vst [vmem:[#allocation21_spill] sm:$0xff] %v10008_v28 }
 0x215   :  { %7159 = vmatmul.mubr.f32.gmra.mrb[40].mxu1 %v9989_v50  ;;  %7279 = vmatmul.mubr.f32.gmra.mrb[40].mxu0 %v9989_v50  ;;  %v10022_v50 = vld [vmem:[%s12444_s5 + $0xf0] sm:$0xff] }
 0x216   :  { %7161 = vmatprep.mubr.f32.mxu1 %v9994_v2  ;;  %7281 = vmatprep.mubr.f32.mxu0 %v9994_v2  ;;  %v10017_v2 = vld [vmem:[%s12444_s5 + $0xe8] sm:$0xff]  ;;  %12901 = vst [vmem:[#allocation38_spill] sm:$0xff] %v10022_v50 }
 0x217   :  { %12900 = vst [vmem:[#allocation27_spill] sm:$0xff] %v10017_v2 }
 0x219   :  { %7162 = vmatmul.mubr.f32.gmra.mrb[42].mxu1 %v10003_v18  ;;  %7282 = vmatmul.mubr.f32.gmra.mrb[42].mxu0 %v10003_v18  ;;  %v10038_v18 = vld [vmem:[%s12442_s3] sm:$0xff] }
 0x21a   :  { %7164 = vmatprep.mubr.f32.mxu1 %v10008_v28  ;;  %7284 = vmatprep.mubr.f32.mxu0 %v10008_v28  ;;  %v10031_v28 = vld [vmem:[%s12444_s5 + $0xf8] sm:$0xff]  ;;  %12903 = vst [vmem:[#allocation22_spill] sm:$0xff] %v10038_v18 }
 0x21b   :  { %12902 = vst [vmem:[#allocation11_spill] sm:$0xff] %v10031_v28 }
 0x21d   :  { %7165 = vmatmul.mubr.f32.gmra.mrb[44].mxu1 %v10017_v2  ;;  %7285 = vmatmul.mubr.f32.gmra.mrb[44].mxu0 %v10017_v2 }
 0x21e   :  { %7167 = vmatprep.mubr.f32.mxu1 %v10022_v50  ;;  %7287 = vmatprep.mubr.f32.mxu0 %v10022_v50 }
 0x221   :  { %7168 = vmatmul.mubr.f32.gmra.mrb[46].mxu1 %v10031_v28  ;;  %7288 = vmatmul.mubr.f32.gmra.mrb[46].mxu0 %v10031_v28 }
 0x222   :  { %7306 = vmatprep.mubr.msk.f32.mxu1 %vm921_vm0, %v10038_v18  ;;  %7426 = vmatprep.mubr.msk.f32.mxu0 %vm921_vm0, %v10038_v18 }
 0x225   :  { %7307 = vmatmul.mubr.msk.f32.vlgmr.msra.gmra.mrb[48].mxu1 %vm921_vm0, %v9480_v5  ;;  %7427 = vmatmul.mubr.msk.f32.vlgmr.msra.gmra.mrb[48].mxu0 %vm921_vm0, %v9480_v5  ;;  %v10106_v5 = vpop.permute.xlu0 %1138 }
 0x226   :  { %7309 = vmatprep.mubr.msk.f32.mxu1 %vm921_vm0, %v9491_v60  ;;  %7429 = vmatprep.mubr.msk.f32.mxu0 %vm921_vm0, %v9491_v60  ;;  %12904 = vst [vmem:[#allocation39_spill] sm:$0xff] %v10106_v5  ;;  %v10108_v60 = vpop.permute.xlu1 %1133 }
 0x227   :  { %12905 = vst [vmem:[#allocation47_spill] sm:$0xff] %v10108_v60 }
 0x229   :  { %7310 = vmatmul.mubr.msk.f32.gmra.mrb[50].mxu1 %vm921_vm0, %v9517_v23  ;;  %7430 = vmatmul.mubr.msk.f32.gmra.mrb[50].mxu0 %vm921_vm0, %v9517_v23 }
 0x22a   :  { %7312 = vmatprep.mubr.msk.f32.mxu1 %vm921_vm0, %v9525_v44  ;;  %7432 = vmatprep.mubr.msk.f32.mxu0 %vm921_vm0, %v9525_v44 }
 0x22d   :  { %7313 = vmatmul.mubr.msk.f32.gmra.mrb[52].mxu1 %vm921_vm0, %v9549_v62  ;;  %7433 = vmatmul.mubr.msk.f32.gmra.mrb[52].mxu0 %vm921_vm0, %v9549_v62 }
 0x22e   :  { %7315 = vmatprep.mubr.msk.f32.mxu1 %vm921_vm0, %v9558_v53  ;;  %7435 = vmatprep.mubr.msk.f32.mxu0 %vm921_vm0, %v9558_v53 }
 0x231   :  { %7316 = vmatmul.mubr.msk.f32.gmra.mrb[54].mxu1 %vm921_vm0, %v9583_v40  ;;  %7436 = vmatmul.mubr.msk.f32.gmra.mrb[54].mxu0 %vm921_vm0, %v9583_v40 }
 0x232   :  { %7318 = vmatprep.mubr.msk.f32.mxu1 %vm921_vm0, %v9591_v32  ;;  %7438 = vmatprep.mubr.msk.f32.mxu0 %vm921_vm0, %v9591_v32 }
 0x235   :  { %7319 = vmatmul.mubr.msk.f32.gmra.mrb[56].mxu1 %vm921_vm0, %v9617_v13  ;;  %7439 = vmatmul.mubr.msk.f32.gmra.mrb[56].mxu0 %vm921_vm0, %v9617_v13 }
 0x236   :  { %7321 = vmatprep.mubr.msk.f32.mxu1 %vm921_vm0, %v9626_v47  ;;  %7441 = vmatprep.mubr.msk.f32.mxu0 %vm921_vm0, %v9626_v47 }
 0x239   :  { %7322 = vmatmul.mubr.msk.f32.gmra.mrb[58].mxu1 %vm921_vm0, %v9653_v48  ;;  %7442 = vmatmul.mubr.msk.f32.gmra.mrb[58].mxu0 %vm921_vm0, %v9653_v48 }
 0x23a   :  { %7324 = vmatprep.mubr.msk.f32.mxu1 %vm921_vm0, %v9659_v54  ;;  %7444 = vmatprep.mubr.msk.f32.mxu0 %vm921_vm0, %v9659_v54 }
 0x23d   :  { %7325 = vmatmul.mubr.msk.f32.gmra.mrb[60].mxu1 %vm921_vm0, %v9685_v21  ;;  %7445 = vmatmul.mubr.msk.f32.gmra.mrb[60].mxu0 %vm921_vm0, %v9685_v21 }
 0x23e   :  { %7327 = vmatprep.mubr.msk.f32.mxu1 %vm921_vm0, %v9695_v29  ;;  %7447 = vmatprep.mubr.msk.f32.mxu0 %vm921_vm0, %v9695_v29 }
 0x241   :  { %7328 = vmatmul.mubr.msk.f32.gmra.mrb[62].mxu1 %vm921_vm0, %v9717_v57  ;;  %7448 = vmatmul.mubr.msk.f32.gmra.mrb[62].mxu0 %vm921_vm0, %v9717_v57  ;;  %v10114_v57 = vpop.permute.xlu0 %1148 }
 0x242   :  { %7362 = vmatprep.mubr.f32.mxu1 %v9734_v27  ;;  %7482 = vmatprep.mubr.f32.mxu0 %v9734_v27  ;;  %12906 = vst [vmem:[#allocation62_spill] sm:$0xff] %v10114_v57  ;;  %v10116_v27 = vpop.permute.xlu1 %1143 }
 0x243   :  { %12907 = vst [vmem:[#allocation12_spill] sm:$0xff] %v10116_v27 }
 0x2b8   :  { %v7124_v23 = vpop.f32.mrb[16].mxu1  ;;  %v7244_v44 = vpop.f32.mrb[16].mxu0 }
 0x2b9   :  { %v1363_v62 = vadd.f32 %v7124_v23, %v10106_v5  ;;  %v1813_v53 = vadd.f32 %v7244_v44, %v10106_v5  ;;  %v1357_v40 = vpop.f32.mrb[17].mxu1  ;;  %v1807_v32 = vpop.f32.mrb[17].mxu0 }
 0x2ba   :  { %v1358_v48 = vadd.f32 %v1357_v40, %v10108_v60  ;;  %v1808_v54 = vadd.f32 %v1807_v32, %v10108_v60 }
 0x2bb   :  { %1968 = vmax.xlane.f32.xlu1 %v1813_v53  ;;  %1518 = vmax.xlane.f32.xlu0 %v1363_v62 }
 0x2bc   :  { %v7127_v13 = vpop.f32.mrb[18].mxu1  ;;  %v7247_v47 = vpop.f32.mrb[18].mxu0 }
 0x2bd   :  { %v1367_v21 = vpop.f32.mrb[19].mxu1  ;;  %v1817_v29 = vpop.f32.mrb[19].mxu0  ;;  %v1373_v5 = vadd.f32 %v7127_v13, %v10114_v57  ;;  %v1823_v60 = vadd.f32 %v7247_v47, %v10114_v57 }
 0x2be   :  { %v1368_v62 = vadd.f32 %v1367_v21, %v10116_v27  ;;  %v1818_v28 = vadd.f32 %v1817_v29, %v10116_v27 }
 0x2bf   :  { %1966 = vmax.xlane.f32.xlu0 %v1808_v54  ;;  %1516 = vmax.xlane.f32.xlu1 %v1358_v48  ;;  %v10122_v54 = vpop.permute.xlu0 %1158  ;;  %v10124_v48 = vpop.permute.xlu1 %1153 }
 0x2c0   :  { %v7130_v23 = vpop.f32.mrb[20].mxu1  ;;  %v7250_v44 = vpop.f32.mrb[20].mxu0  ;;  %12908 = vst [vmem:[#allocation30_spill] sm:$0xff] %v10122_v54  ;;  %12909 = vst [vmem:[#allocation13_spill] sm:$0xff] %v10124_v48 }
 0x2c1   :  { %v1377_v53 = vpop.f32.mrb[21].mxu1  ;;  %v1827_v18 = vpop.f32.mrb[21].mxu0  ;;  %v1383_v42 = vadd.f32 %v7130_v23, %v10122_v54  ;;  %v1833_v27 = vadd.f32 %v7250_v44, %v10122_v54 }
 0x2c2   :  { %v1828_v57 = vadd.f32 %v1827_v18, %v10124_v48 }
 0x2c3   :  { %1520 = vmax.xlane.f32.xlu0 %v1368_v62  ;;  %1522 = vmax.xlane.f32.xlu1 %v1373_v5  ;;  %v1378_v5 = vadd.f32 %v1377_v53, %v10124_v48 }
 0x2c4   :  { %v7133_v40 = vpop.f32.mrb[22].mxu1  ;;  %v7253_v32 = vpop.f32.mrb[22].mxu0 }
 0x2c5   :  { %v1387_v50 = vpop.f32.mrb[23].mxu1  ;;  %v1837_v2 = vpop.f32.mrb[23].mxu0 }
 0x2c7   :  { %1970 = vmax.xlane.f32.xlu0 %v1818_v28  ;;  %1972 = vmax.xlane.f32.xlu1 %v1823_v60  ;;  %v10130_v28 = vpop.permute.xlu0 %1168  ;;  %v10132_v60 = vpop.permute.xlu1 %1163 }
 0x2c8   :  { %v7136_v13 = vpop.f32.mrb[24].mxu1  ;;  %v7256_v21 = vpop.f32.mrb[24].mxu0  ;;  %12910 = vst [vmem:[#allocation48_spill] sm:$0xff] %v10130_v28  ;;  %12911 = vst [vmem:[#allocation63_spill] sm:$0xff] %v10132_v60  ;;  %v1843_v48 = vadd.f32 %v7253_v32, %v10130_v28 }
 0x2c9   :  { %v1397_v62 = vpop.f32.mrb[25].mxu1  ;;  %v1847_v59 = vpop.f32.mrb[25].mxu0 }
 0x2cb   :  { %1524 = vmax.xlane.f32.xlu0 %v1378_v5  ;;  %1526 = vmax.xlane.f32.xlu1 %v1383_v42  ;;  %v1393_v5 = vadd.f32 %v7133_v40, %v10130_v28  ;;  %v1388_v42 = vadd.f32 %v1387_v50, %v10132_v60  ;;  %v10148_v8 = vpop.permute.xlu0 %1178  ;;  %v10150_v40 = vpop.permute.xlu1 %1173 }
 0x2cc   :  { %v7139_v47 = vpop.f32.mrb[26].mxu1  ;;  %v7259_v29 = vpop.f32.mrb[26].mxu0  ;;  %12912 = vst [vmem:[#allocation15_spill] sm:$0xff] %v10148_v8  ;;  %12913 = vst [vmem:[#allocation31_spill] sm:$0xff] %v10150_v40  ;;  %v1398_v32 = vadd.f32 %v1397_v62, %v10150_v40 }
 0x2cd   :  { %v1407_v3 = vpop.f32.mrb[27].mxu1  ;;  %v1857_v24 = vpop.f32.mrb[27].mxu0 }
 0x2cf   :  { %1974 = vmax.xlane.f32.xlu0 %v1828_v57  ;;  %1976 = vmax.xlane.f32.xlu1 %v1833_v27  ;;  %v1838_v57 = vadd.f32 %v1837_v2, %v10132_v60  ;;  %v10174_v62 = vpop.permute.xlu1 %1183 }
 0x2d0   :  { %v7142_v23 = vpop.f32.mrb[28].mxu1  ;;  %v10134_v53 = vpop.f32.mrb[28].mxu0  ;;  %12915 = vst [vmem:[#allocation73_spill] sm:$0xff] %v10174_v62 }
 0x2d1   :  { %v1417_v22 = vpop.f32.mrb[29].mxu1  ;;  %v1867_v55 = vpop.f32.mrb[29].mxu0 }
 0x2d3   :  { %1528 = vmax.xlane.f32.xlu0 %v1388_v42  ;;  %1530 = vmax.xlane.f32.xlu1 %v1393_v5  ;;  %v1403_v42 = vadd.f32 %v7136_v13, %v10148_v8  ;;  %v10172_v13 = vpop.permute.xlu0 %1188 }
 0x2d4   :  { %v10138_v18 = vpop.f32.mrb[30].mxu1  ;;  %v10140_v44 = vpop.f32.mrb[30].mxu0  ;;  %12914 = vst [vmem:[#allocation70_spill] sm:$0xff] %v10172_v13  ;;  %v1413_v45 = vadd.f32 %v7139_v47, %v10172_v13 }
 0x2d5   :  { %v10144_v27 = vpop.f32.mrb[31].mxu1  ;;  %v10146_v54 = vpop.f32.mrb[31].mxu0 }
 0x2d7   :  { %1978 = vmax.xlane.f32.xlu0 %v1838_v57  ;;  %1980 = vmax.xlane.f32.xlu1 %v1843_v48  ;;  %v1853_v48 = vadd.f32 %v7256_v21, %v10148_v8  ;;  %v1848_v57 = vadd.f32 %v1847_v59, %v10150_v40  ;;  %v1408_v21 = vadd.f32 %v1407_v3, %v10174_v62  ;;  %v10196_v47 = vpop.permute.xlu0 %1198  ;;  %v10198_v3 = vpop.permute.xlu1 %1193 }
 0x2d8   :  { %v10152_v50 = vpop.f32.mrb[32].mxu1  ;;  %v10154_v5 = vpop.f32.mrb[32].mxu0  ;;  %12916 = vst [vmem:[#allocation16_spill] sm:$0xff] %v10196_v47  ;;  %12917 = vst [vmem:[#allocation51_spill] sm:$0xff] %v10198_v3  ;;  %v1423_v12 = vadd.f32 %v7142_v23, %v10196_v47 }
 0x2d9   :  { %v10158_v28 = vpop.f32.mrb[33].mxu1  ;;  %v10160_v2 = vpop.f32.mrb[33].mxu0 }
 0x2db   :  { %1532 = vmax.xlane.f32.xlu0 %v1398_v32  ;;  %1534 = vmax.xlane.f32.xlu1 %v1403_v42  ;;  %v10223_v9 = vpop.permute.xlu1 %1203 }
 0x2dc   :  { %v10162_v60 = vpop.f32.mrb[34].mxu1  ;;  %v10164_v36 = vpop.f32.mrb[34].mxu0  ;;  %12919 = vst [vmem:[#allocation52_spill] sm:$0xff] %v10223_v9 }
 0x2dd   :  { %v10168_v7 = vpop.f32.mrb[35].mxu1  ;;  %v10170_v26 = vpop.f32.mrb[35].mxu0 }
 0x2df   :  { %1982 = vmax.xlane.f32.xlu0 %v1848_v57  ;;  %1984 = vmax.xlane.f32.xlu1 %v1853_v48  ;;  %v1863_v48 = vadd.f32 %v7259_v29, %v10172_v13  ;;  %v1858_v57 = vadd.f32 %v1857_v24, %v10174_v62  ;;  %v1418_v29 = vadd.f32 %v1417_v22, %v10198_v3  ;;  %v10221_v22 = vpop.permute.xlu0 %1208 }
 0x2e0   :  { %v10176_v32 = vpop.f32.mrb[36].mxu1  ;;  %v10178_v42 = vpop.f32.mrb[36].mxu0  ;;  %12918 = vst [vmem:[#allocation40_spill] sm:$0xff] %v10221_v22  ;;  %v1433_v52 = vadd.f32 %v10138_v18, %v10221_v22 }
 0x2e1   :  { %v10182_v8 = vpop.f32.mrb[37].mxu1  ;;  %v10184_v59 = vpop.f32.mrb[37].mxu0 }
 0x2e3   :  { %1536 = vmax.xlane.f32.xlu0 %v1408_v21  ;;  %1538 = vmax.xlane.f32.xlu1 %v1413_v45 }
 0x2e4   :  { %v10186_v40 = vpop.f32.mrb[38].mxu1  ;;  %v10188_v20 = vpop.f32.mrb[38].mxu0 }
 0x2e5   :  { %v10192_v0 = vpop.f32.mrb[39].mxu1  ;;  %v10194_v6 = vpop.f32.mrb[39].mxu0 }
 0x2e7   :  { %1986 = vmax.xlane.f32.xlu0 %v1858_v57  ;;  %1988 = vmax.xlane.f32.xlu1 %v1863_v48  ;;  %v1873_v48 = vadd.f32 %v10134_v53, %v10196_v47  ;;  %v1868_v57 = vadd.f32 %v1867_v55, %v10198_v3  ;;  %v1428_v55 = vadd.f32 %v10144_v27, %v10223_v9  ;;  %v10249_v27 = vpop.permute.xlu0 %1218 }
 0x2e8   :  { %v10200_v21 = vpop.f32.mrb[40].mxu1  ;;  %v10202_v45 = vpop.f32.mrb[40].mxu0  ;;  %12928 = vst [vmem:[#allocation75_spill] sm:$0xff] %v10249_v27 }
 0x2e9   :  { %v10206_v13 = vpop.f32.mrb[41].mxu1  ;;  %v10208_v24 = vpop.f32.mrb[41].mxu0 }
 0x2eb   :  { %1540 = vmax.xlane.f32.xlu0 %v1418_v29  ;;  %1542 = vmax.xlane.f32.xlu1 %v1423_v12 }
 0x2ec   :  { %v10210_v62 = vpop.f32.mrb[42].mxu1  ;;  %v10212_v46 = vpop.f32.mrb[42].mxu0 }
 0x2ed   :  { %v10217_v41 = vpop.f32.mrb[43].mxu1  ;;  %v10219_v23 = vpop.f32.mrb[43].mxu0 }
 0x2ef   :  { %1990 = vmax.xlane.f32.xlu0 %v1868_v57  ;;  %1992 = vmax.xlane.f32.xlu1 %v1873_v48  ;;  %v1883_v48 = vadd.f32 %v10140_v44, %v10221_v22 }
 0x2f0   :  { %v10225_v12 = vpop.f32.mrb[44].mxu1  ;;  %v10227_v29 = vpop.f32.mrb[44].mxu0 }
 0x2f1   :  { %12920 = vst [vmem:[#allocation59_spill] sm:$0xff] %v10225_v12  ;;  %12921 = vst [vmem:[#allocation41_spill] sm:$0xff] %v10227_v29  ;;  %v10233_v53 = vpop.f32.mrb[45].mxu1  ;;  %v10235_v3 = vpop.f32.mrb[45].mxu0  ;;  %v1878_v29 = vadd.f32 %v10146_v54, %v10223_v9 }
 0x2f2   :  { %12922 = vst [vmem:[#allocation60_spill] sm:$0xff] %v10233_v53  ;;  %12923 = vst [vmem:[#allocation69_spill] sm:$0xff] %v10235_v3  ;;  %v10251_v53 = vpop.permute.xlu1 %1213 }
 0x2f3   :  { %1544 = vmax.xlane.f32.xlu0 %v1428_v55  ;;  %1546 = vmax.xlane.f32.xlu1 %v1433_v52  ;;  %12929 = vst [vmem:[#allocation76_spill] sm:$0xff] %v10251_v53  ;;  %v1438_v44 = vadd.f32 %v10158_v28, %v10251_v53  ;;  %v1893_v28 = vadd.f32 %v10154_v5, %v10249_v27 }
 0x2f4   :  { %v10237_v47 = vpop.f32.mrb[46].mxu1  ;;  %v10239_v57 = vpop.f32.mrb[46].mxu0 }
 0x2f5   :  { %12924 = vst [vmem:[#allocation71_spill] sm:$0xff] %v10237_v47  ;;  %12925 = vst [vmem:[#allocation35_spill] sm:$0xff] %v10239_v57  ;;  %v10245_v18 = vpop.f32.mrb[47].mxu1  ;;  %v10247_v33 = vpop.f32.mrb[47].mxu0  ;;  %v1443_v57 = vadd.f32 %v10152_v50, %v10249_v27 }
 0x2f6   :  { %12926 = vst [vmem:[#allocation43_spill] sm:$0xff] %v10245_v18  ;;  %12927 = vst [vmem:[#allocation74_spill] sm:$0xff] %v10247_v33 }
 0x2f7   :  { %1994 = vmax.xlane.f32.xlu0 %v1878_v29  ;;  %1996 = vmax.xlane.f32.xlu1 %v1883_v48 }
 0x2f8   :  { %v7308_v52 = vpop.f32.mrb[48].mxu1  ;;  %v7428_v55 = vpop.f32.mrb[48].mxu0 }
 0x2f9   :  { %v2102_v54 = vadd.f32 %v7308_v52, %v9738_v35  ;;  %v2552_v9 = vadd.f32 %v7428_v55, %v9738_v35  ;;  %v2096_v22 = vpop.f32.mrb[49].mxu1  ;;  %v2546_v33 = vpop.f32.mrb[49].mxu0  ;;  %v1888_v52 = vadd.f32 %v10160_v2, %v10251_v53 }
 0x2fa   :  { %v2097_v18 = vadd.f32 %v2096_v22, %v9740_v34  ;;  %v2547_v47 = vadd.f32 %v2546_v33, %v9740_v34 }
 0x2fb   :  { %v2176_v29 = vmax.f32 %v2102_v54, 0.0  ;;  %v2626_v48 = vmax.f32 %v2552_v9, 0.0  ;;  %1548 = vmax.xlane.f32.xlu0 %v1438_v44  ;;  %1550 = vmax.xlane.f32.xlu1 %v1443_v57  ;;  %v10271_v44 = vpop.permute.xlu1 %1223 }
 0x2fc   :  { %v2175_v3 = vmax.f32 %v2097_v18, 0.0  ;;  %v2625_v12 = vmax.f32 %v2547_v47, 0.0  ;;  %v7311_v50 = vpop.f32.mrb[50].mxu1  ;;  %v7431_v56 = vpop.f32.mrb[50].mxu0  ;;  %12931 = vst [vmem:[#allocation78_spill] sm:$0xff] %v10271_v44 }
 0x2fd   :  { %v2112_v55 = vadd.f32 %v7311_v50, %v9742_v16  ;;  %v2562_v22 = vadd.f32 %v7431_v56, %v9742_v16  ;;  %v2106_v35 = vpop.f32.mrb[51].mxu1  ;;  %v2556_v33 = vpop.f32.mrb[51].mxu0 }
 0x2fe   :  { %v8122_v54 = vpack.c.bf16 %v2176_v29, %v2175_v3  ;;  %v8170_v9 = vpack.c.bf16 %v2626_v48, %v2625_v12  ;;  %v2107_v57 = vadd.f32 %v2106_v35, %v9744_v4  ;;  %v2557_v47 = vadd.f32 %v2556_v33, %v9744_v4  ;;  %v10269_v18 = vpop.permute.xlu0 %1228 }
 0x2ff   :  { %12930 = vst [vmem:[#allocation77_spill] sm:$0xff] %v10269_v18  ;;  %v2178_v5 = vmax.f32 %v2112_v55, 0.0  ;;  %v2628_v34 = vmax.f32 %v2562_v22, 0.0  ;;  %1998 = vmax.xlane.f32.xlu0 %v1888_v52  ;;  %2000 = vmax.xlane.f32.xlu1 %v1893_v28  ;;  %v1453_v2 = vadd.f32 %v10162_v60, %v10269_v18  ;;  %v1448_v35 = vadd.f32 %v10168_v7, %v10271_v44 }
 0x300   :  { %v2177_v56 = vmax.f32 %v2107_v57, 0.0  ;;  %v2627_v50 = vmax.f32 %v2557_v47, 0.0  ;;  %v7314_v16 = vpop.f32.mrb[52].mxu1  ;;  %8123 = vmatprep.subr.bf16.mxu1 %v8122_v54  ;;  %v7434_v3 = vpop.f32.mrb[52].mxu0  ;;  %8171 = vmatprep.subr.bf16.mxu0 %v8170_v9  ;;  %v1903_v7 = vadd.f32 %v10164_v36, %v10269_v18 }
 0x301   :  { %v2122_v12 = vadd.f32 %v7314_v16, %v9746_v19  ;;  %v2572_v29 = vadd.f32 %v7434_v3, %v9746_v19  ;;  %v2116_v48 = vpop.f32.mrb[53].mxu1  ;;  %8125 = vmatpush3.bf16.msra.mxu1 %v8122_v54  ;;  %v2566_v52 = vpop.f32.mrb[53].mxu0  ;;  %8173 = vmatpush3.bf16.msra.mxu0 %v8170_v9 }
 0x302   :  { %v8126_v28 = vpack.c.bf16 %v2178_v5, %v2177_v56  ;;  %v8174_v55 = vpack.c.bf16 %v2628_v34, %v2627_v50  ;;  %v2117_v60 = vadd.f32 %v2116_v48, %v9748_v43  ;;  %v2567_v22 = vadd.f32 %v2566_v52, %v9748_v43  ;;  %v10291_v48 = vpop.permute.xlu1 %1233 }
 0x303   :  { %v2180_v33 = vmax.f32 %v2122_v12, 0.0  ;;  %v2630_v57 = vmax.f32 %v2572_v29, 0.0  ;;  %1552 = vmax.xlane.f32.xlu0 %v1448_v35  ;;  %1554 = vmax.xlane.f32.xlu1 %v1453_v2  ;;  %v1898_v34 = vadd.f32 %v10170_v26, %v10271_v44  ;;  %v10289_v29 = vpop.permute.xlu0 %1238  ;;  %12933 = vst [vmem:[#allocation80_spill] sm:$0xff] %v10291_v48 }
 0x304   :  { %v2179_v16 = vmax.f32 %v2117_v60, 0.0  ;;  %v2629_v47 = vmax.f32 %v2567_v22, 0.0  ;;  %v7317_v3 = vpop.f32.mrb[54].mxu1  ;;  %8127 = vmatprep.subr.bf16.mxu1 %v8126_v28  ;;  %v7437_v54 = vpop.f32.mrb[54].mxu0  ;;  %8175 = vmatprep.subr.bf16.mxu0 %v8174_v55  ;;  %12932 = vst [vmem:[#allocation79_spill] sm:$0xff] %v10289_v29  ;;  %v1463_v60 = vadd.f32 %v10176_v32, %v10289_v29 }
 0x305   :  { %v2132_v9 = vadd.f32 %v7317_v3, %v9750_v30  ;;  %v2582_v5 = vadd.f32 %v7437_v54, %v9750_v30  ;;  %v2126_v56 = vpop.f32.mrb[55].mxu1  ;;  %8129 = vmatpush3.bf16.msra.mxu1 %v8126_v28  ;;  %v2576_v50 = vpop.f32.mrb[55].mxu0  ;;  %8177 = vmatpush3.bf16.msra.mxu0 %v8174_v55 }
 0x306   :  { %v8130_v2 = vpack.c.bf16 %v2180_v33, %v2179_v16  ;;  %v8178_v35 = vpack.c.bf16 %v2630_v57, %v2629_v47  ;;  %v2127_v36 = vadd.f32 %v2126_v56, %v9752_v61  ;;  %v2577_v12 = vadd.f32 %v2576_v50, %v9752_v61 }
 0x307   :  { %v2182_v52 = vmax.f32 %v2132_v9, 0.0  ;;  %v2632_v26 = vmax.f32 %v2582_v5, 0.0  ;;  %2002 = vmax.xlane.f32.xlu0 %v1898_v34  ;;  %2004 = vmax.xlane.f32.xlu1 %v1903_v7  ;;  %v1458_v57 = vadd.f32 %v10182_v8, %v10291_v48  ;;  %v1913_v8 = vadd.f32 %v10178_v42, %v10289_v29 }
 0x308   :  { %v2181_v28 = vmax.f32 %v2127_v36, 0.0  ;;  %v2631_v22 = vmax.f32 %v2577_v12, 0.0  ;;  %v7320_v55 = vpop.f32.mrb[56].mxu1  ;;  %8131 = vmatprep.subr.bf16.mxu1 %v8130_v2  ;;  %v7440_v33 = vpop.f32.mrb[56].mxu0  ;;  %8179 = vmatprep.subr.bf16.mxu0 %v8178_v35 }
 0x309   :  { %v2142_v16 = vadd.f32 %v7320_v55, %v9758_v14  ;;  %v2592_v47 = vadd.f32 %v7440_v33, %v9758_v14  ;;  %v2136_v3 = vpop.f32.mrb[57].mxu1  ;;  %8133 = vmatpush3.bf16.msra.mxu1 %v8130_v2  ;;  %v2586_v54 = vpop.f32.mrb[57].mxu0  ;;  %8181 = vmatpush3.bf16.msra.mxu0 %v8178_v35  ;;  %v1908_v35 = vadd.f32 %v10184_v59, %v10291_v48 }
 0x30a   :  { %v8134_v7 = vpack.c.bf16 %v2182_v52, %v2181_v28  ;;  %v8182_v34 = vpack.c.bf16 %v2632_v26, %v2631_v22  ;;  %v2137_v32 = vadd.f32 %v2136_v3, %v9760_v17  ;;  %v2587_v9 = vadd.f32 %v2586_v54, %v9760_v17 }
 0x30b   :  { %v2184_v5 = vmax.f32 %v2142_v16, 0.0  ;;  %v2634_v56 = vmax.f32 %v2592_v47, 0.0  ;;  %1556 = vmax.xlane.f32.xlu0 %v1458_v57  ;;  %1558 = vmax.xlane.f32.xlu1 %v1463_v60  ;;  %v10309_v57 = vpop.permute.xlu0 %1248  ;;  %v10311_v16 = vpop.permute.xlu1 %1243 }
 0x30c   :  { %v2183_v50 = vmax.f32 %v2137_v32, 0.0  ;;  %v2633_v36 = vmax.f32 %v2587_v9, 0.0  ;;  %v7323_v12 = vpop.f32.mrb[58].mxu1  ;;  %8135 = vmatprep.subr.bf16.mxu1 %v8134_v7  ;;  %v7443_v2 = vpop.f32.mrb[58].mxu0  ;;  %8183 = vmatprep.subr.bf16.mxu0 %v8182_v34  ;;  %12934 = vst [vmem:[#allocation81_spill] sm:$0xff] %v10309_v57  ;;  %12935 = vst [vmem:[#allocation82_spill] sm:$0xff] %v10311_v16  ;;  %v1473_v3 = vadd.f32 %v10186_v40, %v10309_v57 }
 0x30d   :  { %v2152_v52 = vadd.f32 %v7323_v12, %v9770_v51  ;;  %v2602_v26 = vadd.f32 %v7443_v2, %v9770_v51  ;;  %v2146_v28 = vpop.f32.mrb[59].mxu1  ;;  %8137 = vmatpush3.bf16.msra.mxu1 %v8134_v7  ;;  %v2596_v22 = vpop.f32.mrb[59].mxu0  ;;  %8185 = vmatpush3.bf16.msra.mxu0 %v8182_v34  ;;  %v1468_v9 = vadd.f32 %v10192_v0, %v10311_v16 }
 0x30e   :  { %v8138_v60 = vpack.c.bf16 %v2184_v5, %v2183_v50  ;;  %v8186_v55 = vpack.c.bf16 %v2634_v56, %v2633_v36  ;;  %v2147_v42 = vadd.f32 %v2146_v28, %v9772_v39  ;;  %v2597_v33 = vadd.f32 %v2596_v22, %v9772_v39 }
 0x30f   :  { %v2186_v47 = vmax.f32 %v2152_v52, 0.0  ;;  %v2636_v59 = vmax.f32 %v2602_v26, 0.0  ;;  %2006 = vmax.xlane.f32.xlu0 %v1908_v35  ;;  %2008 = vmax.xlane.f32.xlu1 %v1913_v8  ;;  %v1923_v0 = vadd.f32 %v10188_v20, %v10309_v57 }
 0x310   :  { %v2185_v54 = vmax.f32 %v2147_v42, 0.0  ;;  %v2635_v7 = vmax.f32 %v2597_v33, 0.0  ;;  %v7326_v34 = vpop.f32.mrb[60].mxu1  ;;  %8139 = vmatprep.subr.bf16.mxu1 %v8138_v60  ;;  %v7446_v32 = vpop.f32.mrb[60].mxu0  ;;  %8187 = vmatprep.subr.bf16.mxu0 %v8186_v55 }
 0x311   :  { %v2162_v5 = vadd.f32 %v7326_v34, %v9782_v1  ;;  %v2612_v56 = vadd.f32 %v7446_v32, %v9782_v1  ;;  %v2156_v50 = vpop.f32.mrb[61].mxu1  ;;  %8141 = vmatpush3.bf16.msra.mxu1 %v8138_v60  ;;  %v2606_v36 = vpop.f32.mrb[61].mxu0  ;;  %8189 = vmatpush3.bf16.msra.mxu0 %v8186_v55  ;;  %v1918_v55 = vadd.f32 %v10194_v6, %v10311_v16 }
 0x312   :  { %v8142_v8 = vpack.c.bf16 %v2186_v47, %v2185_v54  ;;  %v8190_v12 = vpack.c.bf16 %v2636_v59, %v2635_v7  ;;  %v2157_v40 = vadd.f32 %v2156_v50, %v9784_v63  ;;  %v2607_v2 = vadd.f32 %v2606_v36, %v9784_v63  ;;  %v10331_v6 = vpop.permute.xlu1 %1253 }
 0x313   :  { %v2188_v35 = vmax.f32 %v2162_v5, 0.0  ;;  %v2638_v52 = vmax.f32 %v2612_v56, 0.0  ;;  %1560 = vmax.xlane.f32.xlu0 %v1468_v9  ;;  %1562 = vmax.xlane.f32.xlu1 %v1473_v3  ;;  %v10329_v9 = vpop.permute.xlu0 %1258  ;;  %12937 = vst [vmem:[#allocation84_spill] sm:$0xff] %v10331_v6  ;;  %v1478_v36 = vadd.f32 %v10206_v13, %v10331_v6 }
 0x314   :  { %v2187_v26 = vmax.f32 %v2157_v40, 0.0  ;;  %v2637_v28 = vmax.f32 %v2607_v2, 0.0  ;;  %v7329_v22 = vpop.f32.mrb[62].mxu1  ;;  %8143 = vmatprep.subr.bf16.mxu1 %v8142_v8  ;;  %v7449_v60 = vpop.f32.mrb[62].mxu0  ;;  %8191 = vmatprep.subr.bf16.mxu0 %v8190_v12  ;;  %12936 = vst [vmem:[#allocation83_spill] sm:$0xff] %v10329_v9  ;;  %v1483_v50 = vadd.f32 %v10200_v21, %v10329_v9  ;;  %v1933_v40 = vadd.f32 %v10202_v45, %v10329_v9  ;;  %v12938_v21 = vld [vmem:[#allocation23_spill] sm:$0xff] }
 0x315   :  { %v2172_v42 = vadd.f32 %v7329_v22, %v9794_v11  ;;  %v2622_v33 = vadd.f32 %v7449_v60, %v9794_v11  ;;  %v2166_v47 = vpop.f32.mrb[63].mxu1  ;;  %8145 = vmatpush3.bf16.msra.mxu1 %v8142_v8  ;;  %v2616_v59 = vpop.f32.mrb[63].mxu0  ;;  %8193 = vmatpush3.bf16.msra.mxu0 %v8190_v12  ;;  %v1928_v2 = vadd.f32 %v10208_v24, %v10331_v6  ;;  %v12950_v22 = vld [vmem:[#allocation53_spill] sm:$0xff]  ;;  %v12951_v60 = vld [vmem:[#allocation54_spill] sm:$0xff] }
 0x316   :  { %v8146_v3 = vpack.c.bf16 %v2188_v35, %v2187_v26  ;;  %v8194_v54 = vpack.c.bf16 %v2638_v52, %v2637_v28  ;;  %v2167_v20 = vadd.f32 %v2166_v47, %v9796_v37  ;;  %v2617_v7 = vadd.f32 %v2616_v59, %v9796_v37  ;;  %v12939_v35 = vld [vmem:[#allocation18_spill] sm:$0xff]  ;;  %v10347_v52 = vpop.permute.xlu1 %1263  ;;  %v12948_v26 = vld [vmem:[#allocation32_spill] sm:$0xff]  ;;  %v12949_v28 = vld [vmem:[#allocation33_spill] sm:$0xff] }
 0x317   :  { %v2190_v34 = vmax.f32 %v2172_v42, 0.0  ;;  %v2640_v32 = vmax.f32 %v2622_v33, 0.0  ;;  %2010 = vmax.xlane.f32.xlu0 %v1918_v55  ;;  %2012 = vmax.xlane.f32.xlu1 %v1923_v0  ;;  %v10345_v13 = vpop.permute.xlu0 %1268  ;;  %12941 = vst [vmem:[#allocation18_spill] sm:$0xff] %v10347_v52  ;;  %v1488_v24 = vadd.f32 %v10217_v41, %v10347_v52  ;;  %v12942_v0 = vld [vmem:[#allocation57_spill] sm:$0xff]  ;;  %v1938_v41 = vadd.f32 %v10219_v23, %v10347_v52  ;;  %v12947_v23 = vld [vmem:[#allocation60_spill] sm:$0xff] }
 0x318   :  { %v2189_v5 = vmax.f32 %v2167_v20, 0.0  ;;  %v2639_v56 = vmax.f32 %v2617_v7, 0.0  ;;  %8147 = vmatprep.subr.bf16.mxu1 %v8146_v3  ;;  %8195 = vmatprep.subr.bf16.mxu0 %v8194_v54  ;;  %12940 = vst [vmem:[#allocation23_spill] sm:$0xff] %v10345_v13  ;;  %v1493_v45 = vadd.f32 %v10210_v62, %v10345_v13  ;;  %v12953_v55 = vld [vmem:[#allocation69_spill] sm:$0xff]  ;;  %v12959_v7 = vld [vmem:[#allocation43_spill] sm:$0xff] }
 0x319   :  { %8149 = vmatpush3.bf16.msra.mxu1 %v8146_v3  ;;  %8197 = vmatpush3.bf16.msra.mxu0 %v8194_v54  ;;  %v12954_v33 = vld [vmem:[#allocation25_spill] sm:$0xff]  ;;  %v12958_v54 = vld [vmem:[#allocation71_spill] sm:$0xff] }
 0x31a   :  { %v8150_v8 = vpack.c.bf16 %v2190_v34, %v2189_v5  ;;  %v8198_v12 = vpack.c.bf16 %v2640_v32, %v2639_v56  ;;  %v12957_v3 = vld [vmem:[#allocation45_spill] sm:$0xff]  ;;  %v12960_v32 = vld [vmem:[#allocation68_spill] sm:$0xff]  ;;  %v12962_v56 = vld [vmem:[#allocation35_spill] sm:$0xff] }
 0x31b   :  { %1564 = vmax.xlane.f32.xlu0 %v1478_v36  ;;  %1566 = vmax.xlane.f32.xlu1 %v1483_v50  ;;  %v12961_v5 = vld [vmem:[#allocation72_spill] sm:$0xff]  ;;  %v12963_v36 = vld [vmem:[#allocation74_spill] sm:$0xff] }
 0x31c   :  { %8151 = vmatprep.subr.bf16.mxu1 %v8150_v8  ;;  %8199 = vmatprep.subr.bf16.mxu0 %v8198_v12 }
 0x31d   :  { %8153 = vmatpush3.bf16.msra.mxu1 %v8150_v8  ;;  %8201 = vmatpush3.bf16.msra.mxu0 %v8198_v12  ;;  %v12964_v12 = vld [vmem:[#allocation42_spill] sm:$0xff] }
 0x31e   :  { %8203 = vmatprep.subr.bf16.mxu1 %v12938_v21  ;;  %8251 = vmatprep.subr.bf16.mxu0 %v12939_v35 }
 0x31f   :  { %2014 = vmax.xlane.f32.xlu0 %v1928_v2  ;;  %2016 = vmax.xlane.f32.xlu1 %v1933_v40  ;;  %v12965_v40 = vld [vmem:[#allocation36_spill] sm:$0xff]  ;;  %v12966_v2 = vld [vmem:[#allocation46_spill] sm:$0xff] }
 0x320   :  { %7363 = vmatmul.mubr.f32.vlgmr.msra.gmra.mrb[64].mxu1 %v9805_v10  ;;  %7483 = vmatmul.mubr.f32.vlgmr.msra.gmra.mrb[64].mxu0 %v9805_v10  ;;  %v1943_v10 = vadd.f32 %v10212_v46, %v10345_v13  ;;  %v12946_v46 = vld [vmem:[#allocation59_spill] sm:$0xff] }
 0x321   :  { %8205 = vmatpush3.bf16.msra.mxu1 %v12938_v21  ;;  %8253 = vmatpush3.bf16.msra.mxu0 %v12939_v35  ;;  %v12967_v21 = vld [vmem:[#allocation37_spill] sm:$0xff]  ;;  %v12968_v35 = vld [vmem:[#allocation67_spill] sm:$0xff] }
 0x322   :  { %8207 = vmatprep.subr.bf16.mxu1 %v12942_v0  ;;  %8255 = vmatprep.subr.bf16.mxu0 %v9395_v49 }
 0x323   :  { %7365 = vmatprep.mubr.f32.mxu1 %v9814_v31  ;;  %7485 = vmatprep.mubr.f32.mxu0 %v9814_v31  ;;  %v12943_v31 = vld [vmem:[#allocation50_spill] sm:$0xff] }
 0x324   :  { %1568 = vmax.xlane.f32.xlu0 %v1488_v24  ;;  %1570 = vmax.xlane.f32.xlu1 %v1493_v45  ;;  %v12969_v45 = vld [vmem:[#allocation55_spill] sm:$0xff]  ;;  %v12970_v24 = vld [vmem:[#allocation34_spill] sm:$0xff] }
 0x325   :  { %7366 = vmatmul.mubr.f32.gmra.mrb[66].mxu1 %v9821_v38  ;;  %7486 = vmatmul.mubr.f32.gmra.mrb[66].mxu0 %v9821_v38  ;;  %v10375_v38 = vpop.permute.xlu1 %1273 }
 0x326   :  { %8209 = vmatpush3.bf16.msra.mxu1 %v12942_v0  ;;  %8257 = vmatpush3.bf16.msra.mxu0 %v9395_v49  ;;  %v10373_v49 = vpop.permute.xlu0 %1278  ;;  %12945 = vst [vmem:[#allocation50_spill] sm:$0xff] %v10375_v38  ;;  %v1948_v42 = vadd.f32 %v12953_v55, %v10375_v38  ;;  %v12971_v0 = vld [vmem:[#allocation17_spill] sm:$0xff] }
 0x327   :  { %8211 = vmatprep.subr.bf16.mxu1 %v9462_v15  ;;  %8259 = vmatprep.subr.bf16.mxu0 %v9464_v25  ;;  %12944 = vst [vmem:[#allocation57_spill] sm:$0xff] %v10373_v49  ;;  %v1503_v62 = vadd.f32 %v12946_v46, %v10373_v49  ;;  %v12975_v46 = vld [vmem:[#allocation64_spill] sm:$0xff]  ;;  %v10462_v55 = vld [vmem:[%s12442_s3 + $0x8] sm:$0xff] }
 0x328   :  { %7368 = vmatprep.mubr.f32.mxu1 %v9832_v58  ;;  %7488 = vmatprep.mubr.f32.mxu0 %v9832_v58  ;;  %v1498_v58 = vadd.f32 %v12947_v23, %v10375_v38  ;;  %v12977_v23 = vld [vmem:[#allocation19_spill] sm:$0xff]  ;;  %12985 = vst [vmem:[#allocation32_spill] sm:$0xff] %v10462_v55 }
 0x329   :  { %2018 = vmax.xlane.f32.xlu0 %v1938_v41  ;;  %2020 = vmax.xlane.f32.xlu1 %v1943_v10  ;;  %v10399_v59 = vpop.permute.xlu1 %1283  ;;  %v12972_v10 = vld [vmem:[#allocation61_spill] sm:$0xff]  ;;  %v12973_v41 = vld [vmem:[#allocation10_spill] sm:$0xff] }
 0x32a   :  { %7369 = vmatmul.mubr.f32.gmra.mrb[68].mxu1 %v12943_v31  ;;  %7489 = vmatmul.mubr.f32.gmra.mrb[68].mxu0 %v12943_v31  ;;  %v10397_v47 = vpop.permute.xlu0 %1288  ;;  %12956 = vst [vmem:[#allocation60_spill] sm:$0xff] %v10399_v59  ;;  %v1508_v34 = vadd.f32 %v12959_v7, %v10399_v59  ;;  %v1958_v8 = vadd.f32 %v12963_v36, %v10399_v59  ;;  %v12974_v31 = vld [vmem:[#allocation56_spill] sm:$0xff]  ;;  %v10516_v7 = vld [vmem:[%s12442_s3 + $0x38] sm:$0xff]  ;;  %v10570_v36 = vld [vmem:[%s12442_s3 + $0x68] sm:$0xff] }
 0x32b   :  { %8213 = vmatpush3.bf16.msra.mxu1 %v9462_v15  ;;  %8261 = vmatpush3.bf16.msra.mxu0 %v9464_v25  ;;  %v12952_v15 = vld [vmem:[#allocation41_spill] sm:$0xff]  ;;  %12955 = vst [vmem:[#allocation59_spill] sm:$0xff] %v10397_v47  ;;  %v1513_v20 = vadd.f32 %v12958_v54, %v10397_v47  ;;  %v1963_v50 = vadd.f32 %v12962_v56, %v10397_v47  ;;  %12991 = vst [vmem:[#allocation25_spill] sm:$0xff] %v10516_v7  ;;  %v10552_v56 = vld [vmem:[%s12442_s3 + $0x58] sm:$0xff] }
 0x32c   :  { %8215 = vmatprep.subr.bf16.mxu1 %v12948_v26  ;;  %8263 = vmatprep.subr.bf16.mxu0 %v12949_v28  ;;  %v1953_v25 = vadd.f32 %v12952_v15, %v10373_v49  ;;  %v12983_v15 = vld [vmem:[#allocation11_spill] sm:$0xff]  ;;  %v10498_v54 = vld [vmem:[%s12442_s3 + $0x28] sm:$0xff]  ;;  %12995 = vst [vmem:[#allocation68_spill] sm:$0xff] %v10552_v56  ;;  %12997 = vst [vmem:[#allocation35_spill] sm:$0xff] %v10570_v36 }
 0x32d   :  { %7371 = vmatprep.mubr.f32.mxu1 %v12950_v22  ;;  %7491 = vmatprep.mubr.f32.mxu0 %v12950_v22  ;;  %v12981_v22 = vld [vmem:[#allocation27_spill] sm:$0xff]  ;;  %12989 = vst [vmem:[#allocation41_spill] sm:$0xff] %v10498_v54 }
 0x32e   :  { %1572 = vmax.xlane.f32.xlu0 %v1498_v58  ;;  %1574 = vmax.xlane.f32.xlu1 %v1503_v62  ;;  %v12976_v62 = vld [vmem:[#allocation14_spill] sm:$0xff] }
 0x32f   :  { %7372 = vmatmul.mubr.f32.gmra.mrb[70].mxu1 %v12951_v60  ;;  %7492 = vmatmul.mubr.f32.gmra.mrb[70].mxu0 %v12951_v60  ;;  %v12978_v58 = vld [vmem:[#allocation26_spill] sm:$0xff] }
 0x330   :  { %8217 = vmatpush3.bf16.msra.mxu1 %v12948_v26  ;;  %8265 = vmatpush3.bf16.msra.mxu0 %v12949_v28  ;;  %v12979_v26 = vld [vmem:[#allocation20_spill] sm:$0xff]  ;;  %v12980_v28 = vld [vmem:[#allocation21_spill] sm:$0xff]  ;;  %v12982_v60 = vld [vmem:[#allocation38_spill] sm:$0xff] }
 0x331   :  { %7374 = vmatprep.mubr.f32.mxu1 %v12954_v33  ;;  %7494 = vmatprep.mubr.f32.mxu0 %v12954_v33  ;;  %v10480_v33 = vld [vmem:[%s12442_s3 + $0x18] sm:$0xff] }
 0x332   :  { %2022 = vmax.xlane.f32.xlu0 %v1948_v42  ;;  %2024 = vmax.xlane.f32.xlu1 %v1953_v25  ;;  %v12984_v25 = vld [vmem:[#allocation22_spill] sm:$0xff]  ;;  %12987 = vst [vmem:[#allocation53_spill] sm:$0xff] %v10480_v33 }
 0x333   :  { %7375 = vmatmul.mubr.f32.gmra.mrb[72].mxu1 %v12957_v3  ;;  %7495 = vmatmul.mubr.f32.gmra.mrb[72].mxu0 %v12957_v3  ;;  %v10471_v42 = vld [vmem:[%s12442_s3 + $0x10] sm:$0xff]  ;;  %v10489_v3 = vld [vmem:[%s12442_s3 + $0x20] sm:$0xff] }
 0x334   :  { %7377 = vmatprep.mubr.f32.mxu1 %v12960_v32  ;;  %7497 = vmatprep.mubr.f32.mxu0 %v12960_v32  ;;  %12986 = vst [vmem:[#allocation33_spill] sm:$0xff] %v10471_v42  ;;  %12988 = vst [vmem:[#allocation54_spill] sm:$0xff] %v10489_v3  ;;  %v10534_v32 = vld [vmem:[%s12442_s3 + $0x48] sm:$0xff] }
 0x335   :  { %12993 = vst [vmem:[#allocation71_spill] sm:$0xff] %v10534_v32 }
 0x336   :  { %1576 = vmax.xlane.f32.xlu0 %v1508_v34  ;;  %1578 = vmax.xlane.f32.xlu1 %v1513_v20  ;;  %v10507_v20 = vld [vmem:[%s12442_s3 + $0x30] sm:$0xff]  ;;  %v10525_v34 = vld [vmem:[%s12442_s3 + $0x40] sm:$0xff] }
 0x337   :  { %7378 = vmatmul.mubr.f32.gmra.mrb[74].mxu1 %v12961_v5  ;;  %7498 = vmatmul.mubr.f32.gmra.mrb[74].mxu0 %v12961_v5  ;;  %12990 = vst [vmem:[#allocation69_spill] sm:$0xff] %v10507_v20  ;;  %12992 = vst [vmem:[#allocation45_spill] sm:$0xff] %v10525_v34  ;;  %v10543_v5 = vld [vmem:[%s12442_s3 + $0x50] sm:$0xff] }
 0x338   :  { %7380 = vmatprep.mubr.f32.mxu1 %v12964_v12  ;;  %7500 = vmatprep.mubr.f32.mxu0 %v12964_v12  ;;  %12994 = vst [vmem:[#allocation43_spill] sm:$0xff] %v10543_v5  ;;  %v10588_v12 = vld [vmem:[%s12442_s3 + $0x78] sm:$0xff] }
 0x339   :  { %12999 = vst [vmem:[#allocation42_spill] sm:$0xff] %v10588_v12 }
 0x33a   :  { %2026 = vmax.xlane.f32.xlu0 %v1958_v8  ;;  %2028 = vmax.xlane.f32.xlu1 %v1963_v50  ;;  %v10561_v50 = vld [vmem:[%s12442_s3 + $0x60] sm:$0xff]  ;;  %v10579_v8 = vld [vmem:[%s12442_s3 + $0x70] sm:$0xff] }
 0x33b   :  { %7381 = vmatmul.mubr.f32.gmra.mrb[76].mxu1 %v12965_v40  ;;  %7501 = vmatmul.mubr.f32.gmra.mrb[76].mxu0 %v12965_v40  ;;  %12996 = vst [vmem:[#allocation72_spill] sm:$0xff] %v10561_v50  ;;  %12998 = vst [vmem:[#allocation74_spill] sm:$0xff] %v10579_v8  ;;  %v10597_v40 = vld [vmem:[%s12444_s5] sm:$0xff] }
 0x33c   :  { %7383 = vmatprep.mubr.f32.mxu1 %v12966_v2  ;;  %7503 = vmatprep.mubr.f32.mxu0 %v12966_v2  ;;  %13000 = vst [vmem:[#allocation36_spill] sm:$0xff] %v10597_v40 }
 0x33f   :  { %7384 = vmatmul.mubr.f32.gmra.mrb[78].mxu1 %v12967_v21  ;;  %7504 = vmatmul.mubr.f32.gmra.mrb[78].mxu0 %v12967_v21 }
 0x340   :  { %7386 = vmatprep.mubr.f32.mxu1 %v12968_v35  ;;  %7506 = vmatprep.mubr.f32.mxu0 %v12968_v35  ;;  %v13001_v35 = vld [vmem:[#allocation39_spill] sm:$0xff] }
 0x343   :  { %7387 = vmatmul.mubr.f32.gmra.mrb[80].mxu1 %v12969_v45  ;;  %7507 = vmatmul.mubr.f32.gmra.mrb[80].mxu0 %v12969_v45 }
 0x344   :  { %7389 = vmatprep.mubr.f32.mxu1 %v12970_v24  ;;  %7509 = vmatprep.mubr.f32.mxu0 %v12970_v24 }
 0x347   :  { %7390 = vmatmul.mubr.f32.gmra.mrb[82].mxu1 %v12971_v0  ;;  %7510 = vmatmul.mubr.f32.gmra.mrb[82].mxu0 %v12971_v0 }
 0x348   :  { %7392 = vmatprep.mubr.f32.mxu1 %v12972_v10  ;;  %7512 = vmatprep.mubr.f32.mxu0 %v12972_v10  ;;  %v13002_v10 = vld [vmem:[#allocation47_spill] sm:$0xff] }
 0x34b   :  { %7513 = vmatmul.mubr.f32.gmra.mrb[84].mxu0 %v12973_v41  ;;  %7393 = vmatmul.mubr.f32.gmra.mrb[84].mxu1 %v12973_v41 }
 0x34c   :  { %7395 = vmatprep.mubr.f32.mxu1 %v12974_v31  ;;  %7515 = vmatprep.mubr.f32.mxu0 %v12974_v31 }
 0x34f   :  { %7516 = vmatmul.mubr.f32.gmra.mrb[86].mxu0 %v12975_v46  ;;  %7396 = vmatmul.mubr.f32.gmra.mrb[86].mxu1 %v12975_v46 }
 0x350   :  { %7398 = vmatprep.mubr.f32.mxu1 %v12976_v62  ;;  %7518 = vmatprep.mubr.f32.mxu0 %v12976_v62 }
 0x353   :  { %7399 = vmatmul.mubr.f32.gmra.mrb[88].mxu1 %v12977_v23  ;;  %7519 = vmatmul.mubr.f32.gmra.mrb[88].mxu0 %v12977_v23 }
 0x354   :  { %7401 = vmatprep.mubr.f32.mxu1 %v12978_v58  ;;  %7521 = vmatprep.mubr.f32.mxu0 %v12978_v58 }
 0x357   :  { %7402 = vmatmul.mubr.f32.gmra.mrb[90].mxu1 %v12979_v26  ;;  %7522 = vmatmul.mubr.f32.gmra.mrb[90].mxu0 %v12979_v26 }
 0x358   :  { %7404 = vmatprep.mubr.f32.mxu1 %v12980_v28  ;;  %7524 = vmatprep.mubr.f32.mxu0 %v12980_v28  ;;  %v13003_v28 = vld [vmem:[#allocation62_spill] sm:$0xff] }
 0x35b   :  { %7405 = vmatmul.mubr.f32.gmra.mrb[92].mxu1 %v12981_v22  ;;  %7525 = vmatmul.mubr.f32.gmra.mrb[92].mxu0 %v12981_v22 }
 0x35c   :  { %7407 = vmatprep.mubr.f32.mxu1 %v12982_v60  ;;  %7527 = vmatprep.mubr.f32.mxu0 %v12982_v60  ;;  %v13004_v60 = vld [vmem:[#allocation12_spill] sm:$0xff] }
 0x35f   :  { %7408 = vmatmul.mubr.f32.gmra.mrb[94].mxu1 %v12983_v15  ;;  %7528 = vmatmul.mubr.f32.gmra.mrb[94].mxu0 %v12983_v15 }
 0x360   :  { %7546 = vmatprep.mubr.msk.f32.mxu1 %vm921_vm0, %v12984_v25  ;;  %7666 = vmatprep.mubr.msk.f32.mxu0 %vm921_vm0, %v12984_v25 }
 0x363   :  { %7547 = vmatmul.mubr.msk.f32.vlgmr.msra.gmra.mrb[96].mxu1 %vm921_vm0, %v10462_v55  ;;  %7667 = vmatmul.mubr.msk.f32.vlgmr.msra.gmra.mrb[96].mxu0 %vm921_vm0, %v10462_v55 }
 0x364   :  { %7549 = vmatprep.mubr.msk.f32.mxu1 %vm921_vm0, %v10471_v42  ;;  %7669 = vmatprep.mubr.msk.f32.mxu0 %vm921_vm0, %v10471_v42 }
 0x367   :  { %7550 = vmatmul.mubr.msk.f32.gmra.mrb[98].mxu1 %vm921_vm0, %v10480_v33  ;;  %7670 = vmatmul.mubr.msk.f32.gmra.mrb[98].mxu0 %vm921_vm0, %v10480_v33 }
 0x368   :  { %7552 = vmatprep.mubr.msk.f32.mxu1 %vm921_vm0, %v10489_v3  ;;  %7672 = vmatprep.mubr.msk.f32.mxu0 %vm921_vm0, %v10489_v3 }
 0x36b   :  { %7553 = vmatmul.mubr.msk.f32.gmra.mrb[100].mxu1 %vm921_vm0, %v10498_v54  ;;  %7673 = vmatmul.mubr.msk.f32.gmra.mrb[100].mxu0 %vm921_vm0, %v10498_v54 }
 0x36c   :  { %7555 = vmatprep.mubr.msk.f32.mxu1 %vm921_vm0, %v10507_v20  ;;  %7675 = vmatprep.mubr.msk.f32.mxu0 %vm921_vm0, %v10507_v20 }
 0x36f   :  { %7556 = vmatmul.mubr.msk.f32.gmra.mrb[102].mxu1 %vm921_vm0, %v10516_v7  ;;  %7676 = vmatmul.mubr.msk.f32.gmra.mrb[102].mxu0 %vm921_vm0, %v10516_v7 }
 0x370   :  { %7558 = vmatprep.mubr.msk.f32.mxu1 %vm921_vm0, %v10525_v34  ;;  %7678 = vmatprep.mubr.msk.f32.mxu0 %vm921_vm0, %v10525_v34  ;;  %v13012_v34 = vld [vmem:[#allocation31_spill] sm:$0xff] }
 0x373   :  { %7559 = vmatmul.mubr.msk.f32.gmra.mrb[104].mxu1 %vm921_vm0, %v10534_v32  ;;  %7679 = vmatmul.mubr.msk.f32.gmra.mrb[104].mxu0 %vm921_vm0, %v10534_v32 }
 0x374   :  { %7561 = vmatprep.mubr.msk.f32.mxu1 %vm921_vm0, %v10543_v5  ;;  %7681 = vmatprep.mubr.msk.f32.mxu0 %vm921_vm0, %v10543_v5 }
 0x377   :  { %7562 = vmatmul.mubr.msk.f32.gmra.mrb[106].mxu1 %vm921_vm0, %v10552_v56  ;;  %7682 = vmatmul.mubr.msk.f32.gmra.mrb[106].mxu0 %vm921_vm0, %v10552_v56 }
 0x378   :  { %7564 = vmatprep.mubr.msk.f32.mxu1 %vm921_vm0, %v10561_v50  ;;  %7684 = vmatprep.mubr.msk.f32.mxu0 %vm921_vm0, %v10561_v50  ;;  %v13008_v50 = vld [vmem:[#allocation63_spill] sm:$0xff] }
 0x37b   :  { %7565 = vmatmul.mubr.msk.f32.gmra.mrb[108].mxu1 %vm921_vm0, %v10570_v36  ;;  %7685 = vmatmul.mubr.msk.f32.gmra.mrb[108].mxu0 %vm921_vm0, %v10570_v36 }
 0x37c   :  { %7567 = vmatprep.mubr.msk.f32.mxu1 %vm921_vm0, %v10579_v8  ;;  %7687 = vmatprep.mubr.msk.f32.mxu0 %vm921_vm0, %v10579_v8 }
 0x37f   :  { %7568 = vmatmul.mubr.msk.f32.gmra.mrb[110].mxu1 %vm921_vm0, %v10588_v12  ;;  %7688 = vmatmul.mubr.msk.f32.gmra.mrb[110].mxu0 %vm921_vm0, %v10588_v12 }
 0x380   :  { %7602 = vmatprep.mubr.f32.mxu1 %v10597_v40  ;;  %7722 = vmatprep.mubr.f32.mxu0 %v10597_v40 }
 0x3f3   :  { %v7364_v2 = vpop.f32.mrb[64].mxu1  ;;  %v7484_v21 = vpop.f32.mrb[64].mxu0 }
 0x3f4   :  { %v2263_v45 = vadd.f32 %v7364_v2, %v13001_v35  ;;  %v2257_v24 = vpop.f32.mrb[65].mxu1  ;;  %v2707_v0 = vpop.f32.mrb[65].mxu0  ;;  %v2713_v31 = vadd.f32 %v7484_v21, %v13001_v35  ;;  %v13006_v35 = vld [vmem:[#allocation13_spill] sm:$0xff] }
 0x3f5   :  { %v2258_v41 = vadd.f32 %v2257_v24, %v13002_v10  ;;  %v2708_v23 = vadd.f32 %v2707_v0, %v13002_v10 }
 0x3f6   :  { %2418 = vmax.xlane.f32.xlu1 %v2263_v45 }
 0x3f7   :  { %2416 = vmax.xlane.f32.xlu0 %v2258_v41 }
 0x3f8   :  { %v7367_v46 = vpop.f32.mrb[66].mxu1  ;;  %v7487_v62 = vpop.f32.mrb[66].mxu0 }
 0x3f9   :  { %v2267_v58 = vpop.f32.mrb[67].mxu1  ;;  %v2717_v26 = vpop.f32.mrb[67].mxu0  ;;  %v2273_v22 = vadd.f32 %v7367_v46, %v13003_v28  ;;  %v2723_v21 = vadd.f32 %v7487_v62, %v13003_v28 }
 0x3fa   :  { %2868 = vmax.xlane.f32.xlu1 %v2713_v31  ;;  %v2268_v15 = vadd.f32 %v2267_v58, %v13004_v60  ;;  %v2718_v45 = vadd.f32 %v2717_v26, %v13004_v60 }
 0x3fb   :  { %2866 = vmax.xlane.f32.xlu0 %v2708_v23  ;;  %v13005_v23 = vld [vmem:[#allocation30_spill] sm:$0xff] }
 0x3fd   :  { %v7370_v25 = vpop.f32.mrb[68].mxu1  ;;  %v7490_v2 = vpop.f32.mrb[68].mxu0 }
 0x3fe   :  { %v2277_v40 = vpop.f32.mrb[69].mxu1  ;;  %v2727_v24 = vpop.f32.mrb[69].mxu0  ;;  %2422 = vmax.xlane.f32.xlu1 %v2273_v22  ;;  %v2283_v46 = vadd.f32 %v7370_v25, %v13005_v23  ;;  %v2733_v62 = vadd.f32 %v7490_v2, %v13005_v23 }
 0x3ff   :  { %2420 = vmax.xlane.f32.xlu0 %v2268_v15  ;;  %v2278_v58 = vadd.f32 %v2277_v40, %v13006_v35  ;;  %v2728_v26 = vadd.f32 %v2727_v24, %v13006_v35  ;;  %v10622_v23 = vpop.xlane.xlu1 %1968 }
 0x400   :  { %13010 = vst [vmem:[#allocation46_spill] sm:$0xff] %v10622_v23 }
 0x402   :  { %v7373_v41 = vpop.f32.mrb[70].mxu1  ;;  %v7493_v0 = vpop.f32.mrb[70].mxu0  ;;  %2872 = vmax.xlane.f32.xlu1 %v2723_v21 }
 0x403   :  { %v2287_v10 = vpop.f32.mrb[71].mxu1  ;;  %v2737_v31 = vpop.f32.mrb[71].mxu0  ;;  %2870 = vmax.xlane.f32.xlu0 %v2718_v45  ;;  %v13007_v45 = vld [vmem:[#allocation48_spill] sm:$0xff] }
 0x404   :  { %v2293_v25 = vadd.f32 %v7373_v41, %v13007_v45  ;;  %v2288_v40 = vadd.f32 %v2287_v10, %v13008_v50  ;;  %v2743_v2 = vadd.f32 %v7493_v0, %v13007_v45  ;;  %v2738_v24 = vadd.f32 %v2737_v31, %v13008_v50  ;;  %v13009_v41 = vld [vmem:[#allocation15_spill] sm:$0xff]  ;;  %v10648_v54 = vpop.xlane.xlu1 %1516 }
 0x405   :  { %13015 = vst [vmem:[#allocation55_spill] sm:$0xff] %v10648_v54 }
 0x406   :  { %v7376_v12 = vpop.f32.mrb[72].mxu1  ;;  %v7496_v8 = vpop.f32.mrb[72].mxu0  ;;  %2426 = vmax.xlane.f32.xlu1 %v2283_v46 }
 0x407   :  { %v2297_v36 = vpop.f32.mrb[73].mxu1  ;;  %v2747_v22 = vpop.f32.mrb[73].mxu0  ;;  %2424 = vmax.xlane.f32.xlu0 %v2278_v58  ;;  %v2303_v10 = vadd.f32 %v7376_v12, %v13009_v41 }
 0x408   :  { %v2748_v12 = vadd.f32 %v2747_v22, %v13012_v34  ;;  %v10672_v55 = vpop.xlane.xlu1 %1522 }
 0x409   :  { %13019 = vst [vmem:[#allocation17_spill] sm:$0xff] %v10672_v55 }
 0x40a   :  { %v7379_v15 = vpop.f32.mrb[74].mxu1  ;;  %v7499_v60 = vpop.f32.mrb[74].mxu0  ;;  %2876 = vmax.xlane.f32.xlu1 %v2733_v62 }
 0x40b   :  { %v2307_v21 = vpop.f32.mrb[75].mxu1  ;;  %v2757_v28 = vpop.f32.mrb[75].mxu0  ;;  %2874 = vmax.xlane.f32.xlu0 %v2728_v26 }
 0x40c   :  { %v10696_v49 = vpop.xlane.xlu1 %1972 }
 0x40d   :  { %13025 = vst [vmem:[#allocation64_spill] sm:$0xff] %v10696_v49 }
 0x40e   :  { %v7382_v56 = vpop.f32.mrb[76].mxu1  ;;  %v7502_v5 = vpop.f32.mrb[76].mxu0  ;;  %2430 = vmax.xlane.f32.xlu1 %v2293_v25 }
 0x40f   :  { %v2317_v46 = vpop.f32.mrb[77].mxu1  ;;  %v2767_v32 = vpop.f32.mrb[77].mxu0  ;;  %2428 = vmax.xlane.f32.xlu0 %v2288_v40  ;;  %v2298_v40 = vadd.f32 %v2297_v36, %v13012_v34 }
 0x410   :  { %v10624_v25 = vpop.xlane.xlu0 %1518 }
 0x411   :  { %13011 = vst [vmem:[#allocation37_spill] sm:$0xff] %v10624_v25 }
 0x412   :  { %v7385_v58 = vpop.f32.mrb[78].mxu1  ;;  %v10617_v35 = vpop.f32.mrb[78].mxu0  ;;  %2880 = vmax.xlane.f32.xlu1 %v2743_v2 }
 0x413   :  { %v2327_v62 = vpop.f32.mrb[79].mxu1  ;;  %v10619_v26 = vpop.f32.mrb[79].mxu0  ;;  %2878 = vmax.xlane.f32.xlu0 %v2738_v24  ;;  %v2753_v24 = vadd.f32 %v7496_v8, %v13009_v41 }
 0x414   :  { %v10646_v20 = vpop.xlane.xlu0 %1966 }
 0x415   :  { %13014 = vst [vmem:[#allocation67_spill] sm:$0xff] %v10646_v20 }
 0x416   :  { %v10627_v7 = vpop.f32.mrb[80].mxu1  ;;  %v10629_v0 = vpop.f32.mrb[80].mxu0  ;;  %2434 = vmax.xlane.f32.xlu1 %v2303_v10  ;;  %v13013_v10 = vld [vmem:[#allocation70_spill] sm:$0xff] }
 0x417   :  { %v10631_v31 = vpop.f32.mrb[81].mxu1  ;;  %v10633_v2 = vpop.f32.mrb[81].mxu0  ;;  %2432 = vmax.xlane.f32.xlu0 %v2298_v40  ;;  %v2313_v45 = vadd.f32 %v7379_v15, %v13013_v10  ;;  %v13016_v40 = vld [vmem:[#allocation73_spill] sm:$0xff] }
 0x418   :  { %v2308_v8 = vadd.f32 %v2307_v21, %v13016_v40  ;;  %v2758_v15 = vadd.f32 %v2757_v28, %v13016_v40  ;;  %v10670_v42 = vpop.xlane.xlu0 %1520 }
 0x419   :  { %13018 = vst [vmem:[#allocation34_spill] sm:$0xff] %v10670_v42 }
 0x41a   :  { %v10637_v50 = vpop.f32.mrb[82].mxu1  ;;  %v10639_v23 = vpop.f32.mrb[82].mxu0  ;;  %2884 = vmax.xlane.f32.xlu1 %v2753_v24 }
 0x41b   :  { %v10641_v36 = vpop.f32.mrb[83].mxu1  ;;  %v10643_v25 = vpop.f32.mrb[83].mxu0  ;;  %2882 = vmax.xlane.f32.xlu0 %v2748_v12  ;;  %v2763_v12 = vadd.f32 %v7499_v60, %v13013_v10 }
 0x41c   :  { %v10694_v38 = vpop.xlane.xlu0 %1970 }
 0x41d   :  { %13024 = vst [vmem:[#allocation56_spill] sm:$0xff] %v10694_v38 }
 0x41e   :  { %v10651_v41 = vpop.f32.mrb[84].mxu1  ;;  %v10653_v22 = vpop.f32.mrb[84].mxu0  ;;  %2438 = vmax.xlane.f32.xlu1 %v2313_v45  ;;  %v13017_v45 = vld [vmem:[#allocation16_spill] sm:$0xff] }
 0x41f   :  { %v10655_v34 = vpop.f32.mrb[85].mxu1  ;;  %v10657_v24 = vpop.f32.mrb[85].mxu0  ;;  %2436 = vmax.xlane.f32.xlu0 %v2308_v8  ;;  %v2323_v33 = vadd.f32 %v7382_v56, %v13017_v45  ;;  %v13020_v8 = vld [vmem:[#allocation51_spill] sm:$0xff] }
 0x420   :  { %v2318_v60 = vadd.f32 %v2317_v46, %v13020_v8  ;;  %v2768_v56 = vadd.f32 %v2767_v32, %v13020_v8 }
 0x422   :  { %v10661_v3 = vpop.f32.mrb[86].mxu1  ;;  %v10663_v20 = vpop.f32.mrb[86].mxu0  ;;  %2888 = vmax.xlane.f32.xlu1 %v2763_v12 }
 0x423   :  { %v10665_v21 = vpop.f32.mrb[87].mxu1  ;;  %v10667_v54 = vpop.f32.mrb[87].mxu0  ;;  %2886 = vmax.xlane.f32.xlu0 %v2758_v15  ;;  %v2773_v15 = vadd.f32 %v7502_v5, %v13017_v45 }
 0x426   :  { %v10675_v10 = vpop.f32.mrb[88].mxu1  ;;  %v10677_v28 = vpop.f32.mrb[88].mxu0  ;;  %2442 = vmax.xlane.f32.xlu1 %v2323_v33  ;;  %v13023_v33 = vld [vmem:[#allocation40_spill] sm:$0xff] }
 0x427   :  { %v10679_v40 = vpop.f32.mrb[89].mxu1  ;;  %v10681_v12 = vpop.f32.mrb[89].mxu0  ;;  %2440 = vmax.xlane.f32.xlu0 %v2318_v60  ;;  %v2333_v47 = vadd.f32 %v7385_v58, %v13023_v33  ;;  %v13026_v60 = vld [vmem:[#allocation52_spill] sm:$0xff] }
 0x428   :  { %v2328_v5 = vadd.f32 %v2327_v62, %v13026_v60  ;;  %v2778_v58 = vadd.f32 %v10619_v26, %v13026_v60 }
 0x42a   :  { %v10685_v59 = vpop.f32.mrb[90].mxu1  ;;  %v10687_v42 = vpop.f32.mrb[90].mxu0  ;;  %2892 = vmax.xlane.f32.xlu1 %v2773_v15 }
 0x42b   :  { %13021 = vst [vmem:[#allocation61_spill] sm:$0xff] %v10687_v42  ;;  %v10689_v46 = vpop.f32.mrb[91].mxu1  ;;  %v10691_v55 = vpop.f32.mrb[91].mxu0  ;;  %2890 = vmax.xlane.f32.xlu0 %v2768_v56  ;;  %v2783_v56 = vadd.f32 %v10617_v35, %v13023_v33  ;;  %v2338_v35 = vadd.f32 %v10631_v31, %v10251_v53  ;;  %v13037_v33 = vld [vmem:[#allocation58_spill] sm:$0xff]  ;;  %v2788_v31 = vadd.f32 %v10633_v2, %v10251_v53 }
 0x42c   :  { %13022 = vst [vmem:[#allocation10_spill] sm:$0xff] %v10691_v55 }
 0x42e   :  { %v10699_v45 = vpop.f32.mrb[92].mxu1  ;;  %v10701_v32 = vpop.f32.mrb[92].mxu0  ;;  %2446 = vmax.xlane.f32.xlu1 %v2333_v47  ;;  %v2343_v47 = vadd.f32 %v10627_v7, %v10249_v27  ;;  %v2793_v7 = vadd.f32 %v10629_v0, %v10249_v27 }
 0x42f   :  { %13027 = vst [vmem:[#allocation14_spill] sm:$0xff] %v10699_v45  ;;  %13028 = vst [vmem:[#allocation19_spill] sm:$0xff] %v10701_v32  ;;  %v10703_v8 = vpop.f32.mrb[93].mxu1  ;;  %v10705_v15 = vpop.f32.mrb[93].mxu0  ;;  %2444 = vmax.xlane.f32.xlu0 %v2328_v5 }
 0x430   :  { %13029 = vst [vmem:[#allocation26_spill] sm:$0xff] %v10703_v8  ;;  %13030 = vst [vmem:[#allocation20_spill] sm:$0xff] %v10705_v15  ;;  %v10721_v5 = vpop.xlane.xlu0 %1524  ;;  %v10723_v15 = vpop.xlane.xlu1 %1526 }
 0x431   :  { %13035 = vst [vmem:[#allocation22_spill] sm:$0xff] %v10721_v5  ;;  %13036 = vst [vmem:[#allocation85_spill] sm:$0xff] %v10723_v15 }
 0x432   :  { %v10711_v38 = vpop.f32.mrb[94].mxu1  ;;  %v10713_v49 = vpop.f32.mrb[94].mxu0  ;;  %2896 = vmax.xlane.f32.xlu1 %v2783_v56 }
 0x433   :  { %13031 = vst [vmem:[#allocation21_spill] sm:$0xff] %v10711_v38  ;;  %13032 = vst [vmem:[#allocation27_spill] sm:$0xff] %v10713_v49  ;;  %v10715_v62 = vpop.f32.mrb[95].mxu1  ;;  %v10717_v32 = vpop.f32.mrb[95].mxu0  ;;  %2894 = vmax.xlane.f32.xlu0 %v2778_v58  ;;  %v13038_v58 = vld [vmem:[#allocation9_spill] sm:$0xff] }
 0x434   :  { %13033 = vst [vmem:[#allocation38_spill] sm:$0xff] %v10715_v62  ;;  %13034 = vst [vmem:[#allocation11_spill] sm:$0xff] %v10717_v32 }
 0x436   :  { %v7548_v26 = vpop.f32.mrb[96].mxu1  ;;  %v7668_v60 = vpop.f32.mrb[96].mxu0  ;;  %2450 = vmax.xlane.f32.xlu1 %v2343_v47 }
 0x437   :  { %v3002_v56 = vadd.f32 %v7548_v26, %v13037_v33  ;;  %v3452_v49 = vadd.f32 %v7668_v60, %v13037_v33  ;;  %v2996_v62 = vpop.f32.mrb[97].mxu1  ;;  %v3446_v32 = vpop.f32.mrb[97].mxu0  ;;  %2448 = vmax.xlane.f32.xlu0 %v2338_v35  ;;  %v13039_v60 = vld [vmem:[#allocation49_spill] sm:$0xff] }
 0x438   :  { %v2997_v5 = vadd.f32 %v2996_v62, %v13038_v58  ;;  %v3447_v15 = vadd.f32 %v3446_v32, %v13038_v58 }
 0x439   :  { %v3076_v38 = vmax.f32 %v3002_v56, 0.0  ;;  %v3526_v8 = vmax.f32 %v3452_v49, 0.0  ;;  %v10739_v56 = vpop.xlane.xlu0 %1974  ;;  %v10741_v49 = vpop.xlane.xlu1 %1976 }
 0x43a   :  { %v3075_v47 = vmax.f32 %v2997_v5, 0.0  ;;  %v3525_v45 = vmax.f32 %v3447_v15, 0.0  ;;  %v7551_v26 = vpop.f32.mrb[98].mxu1  ;;  %v7671_v55 = vpop.f32.mrb[98].mxu0  ;;  %2900 = vmax.xlane.f32.xlu1 %v2793_v7  ;;  %13040 = vst [vmem:[#allocation9_spill] sm:$0xff] %v10739_v56  ;;  %13041 = vst [vmem:[#allocation86_spill] sm:$0xff] %v10741_v49  ;;  %v2353_v7 = vadd.f32 %v10637_v50, %v10269_v18 }
 0x43b   :  { %v3012_v33 = vadd.f32 %v7551_v26, %v13039_v60  ;;  %v3462_v35 = vadd.f32 %v7671_v55, %v13039_v60  ;;  %v3006_v42 = vpop.f32.mrb[99].mxu1  ;;  %v3456_v0 = vpop.f32.mrb[99].mxu0  ;;  %2898 = vmax.xlane.f32.xlu0 %v2788_v31 }
 0x43c   :  { %v8218_v62 = vpack.c.bf16 %v3076_v38, %v3075_v47  ;;  %v8266_v27 = vpack.c.bf16 %v3526_v8, %v3525_v45  ;;  %v3007_v32 = vadd.f32 %v3006_v42, %v9744_v4  ;;  %v3457_v2 = vadd.f32 %v3456_v0, %v9744_v4 }
 0x43d   :  { %v3078_v15 = vmax.f32 %v3012_v33, 0.0  ;;  %v3528_v5 = vmax.f32 %v3462_v35, 0.0  ;;  %v2348_v38 = vadd.f32 %v10641_v36, %v10271_v44  ;;  %v2803_v36 = vadd.f32 %v10639_v23, %v10269_v18 }
 0x43e   :  { %v3077_v26 = vmax.f32 %v3007_v32, 0.0  ;;  %v3527_v55 = vmax.f32 %v3457_v2, 0.0  ;;  %v7554_v60 = vpop.f32.mrb[100].mxu1  ;;  %8219 = vmatprep.subr.bf16.mxu1 %v8218_v62  ;;  %v7674_v31 = vpop.f32.mrb[100].mxu0  ;;  %8267 = vmatprep.subr.bf16.mxu0 %v8266_v27 }
 0x43f   :  { %v3022_v42 = vadd.f32 %v7554_v60, %v9746_v19  ;;  %v3472_v45 = vadd.f32 %v7674_v31, %v9746_v19  ;;  %v3016_v8 = vpop.f32.mrb[101].mxu1  ;;  %8221 = vmatpush3.bf16.msra.mxu1 %v8218_v62  ;;  %v3466_v33 = vpop.f32.mrb[101].mxu0  ;;  %8269 = vmatpush3.bf16.msra.mxu0 %v8266_v27  ;;  %v2798_v27 = vadd.f32 %v10643_v25, %v10271_v44 }
 0x440   :  { %v8222_v47 = vpack.c.bf16 %v3078_v15, %v3077_v26  ;;  %v8270_v35 = vpack.c.bf16 %v3528_v5, %v3527_v55  ;;  %v3017_v50 = vadd.f32 %v3016_v8, %v9748_v43  ;;  %v3467_v0 = vadd.f32 %v3466_v33, %v9748_v43  ;;  %2454 = vmax.xlane.f32.xlu1 %v2353_v7  ;;  %v10761_v8 = vpop.xlane.xlu1 %1530 }
 0x441   :  { %v3080_v32 = vmax.f32 %v3022_v42, 0.0  ;;  %v3530_v2 = vmax.f32 %v3472_v45, 0.0  ;;  %2452 = vmax.xlane.f32.xlu0 %v2348_v38  ;;  %v10759_v45 = vpop.xlane.xlu0 %1528  ;;  %13043 = vst [vmem:[#allocation88_spill] sm:$0xff] %v10761_v8 }
 0x442   :  { %v3079_v60 = vmax.f32 %v3017_v50, 0.0  ;;  %v3529_v49 = vmax.f32 %v3467_v0, 0.0  ;;  %v7557_v31 = vpop.f32.mrb[102].mxu1  ;;  %8223 = vmatprep.subr.bf16.mxu1 %v8222_v47  ;;  %v7677_v62 = vpop.f32.mrb[102].mxu0  ;;  %8271 = vmatprep.subr.bf16.mxu0 %v8270_v35  ;;  %13042 = vst [vmem:[#allocation87_spill] sm:$0xff] %v10759_v45  ;;  %v2363_v50 = vadd.f32 %v10651_v41, %v10289_v29 }
 0x443   :  { %v3032_v15 = vadd.f32 %v7557_v31, %v9750_v30  ;;  %v3482_v5 = vadd.f32 %v7677_v62, %v9750_v30  ;;  %v3026_v7 = vpop.f32.mrb[103].mxu1  ;;  %8225 = vmatpush3.bf16.msra.mxu1 %v8222_v47  ;;  %v3476_v26 = vpop.f32.mrb[103].mxu0  ;;  %8273 = vmatpush3.bf16.msra.mxu0 %v8270_v35 }
 0x444   :  { %v8226_v55 = vpack.c.bf16 %v3080_v32, %v3079_v60  ;;  %v8274_v38 = vpack.c.bf16 %v3530_v2, %v3529_v49  ;;  %v3027_v23 = vadd.f32 %v3026_v7, %v9752_v61  ;;  %v3477_v42 = vadd.f32 %v3476_v26, %v9752_v61  ;;  %2904 = vmax.xlane.f32.xlu1 %v2803_v36 }
 0x445   :  { %v3082_v25 = vmax.f32 %v3032_v15, 0.0  ;;  %v3532_v33 = vmax.f32 %v3482_v5, 0.0  ;;  %2902 = vmax.xlane.f32.xlu0 %v2798_v27  ;;  %v2358_v32 = vadd.f32 %v10655_v34, %v10291_v48  ;;  %v2813_v34 = vadd.f32 %v10653_v22, %v10289_v29 }
 0x446   :  { %v3081_v47 = vmax.f32 %v3027_v23, 0.0  ;;  %v3531_v0 = vmax.f32 %v3477_v42, 0.0  ;;  %v7560_v35 = vpop.f32.mrb[104].mxu1  ;;  %8227 = vmatprep.subr.bf16.mxu1 %v8226_v55  ;;  %v7680_v49 = vpop.f32.mrb[104].mxu0  ;;  %8275 = vmatprep.subr.bf16.mxu0 %v8274_v38 }
 0x447   :  { %v3042_v2 = vadd.f32 %v7560_v35, %v9758_v14  ;;  %v3492_v36 = vadd.f32 %v7680_v49, %v9758_v14  ;;  %v3036_v60 = vpop.f32.mrb[105].mxu1  ;;  %8229 = vmatpush3.bf16.msra.mxu1 %v8226_v55  ;;  %v3486_v31 = vpop.f32.mrb[105].mxu0  ;;  %8277 = vmatpush3.bf16.msra.mxu0 %v8274_v38  ;;  %v2808_v38 = vadd.f32 %v10657_v24, %v10291_v48 }
 0x448   :  { %v8230_v62 = vpack.c.bf16 %v3082_v25, %v3081_v47  ;;  %v8278_v27 = vpack.c.bf16 %v3532_v33, %v3531_v0  ;;  %v3037_v41 = vadd.f32 %v3036_v60, %v9760_v17  ;;  %v3487_v15 = vadd.f32 %v3486_v31, %v9760_v17  ;;  %2458 = vmax.xlane.f32.xlu1 %v2363_v50 }
 0x449   :  { %v3084_v5 = vmax.f32 %v3042_v2, 0.0  ;;  %v3534_v7 = vmax.f32 %v3492_v36, 0.0  ;;  %2456 = vmax.xlane.f32.xlu0 %v2358_v32  ;;  %v10779_v32 = vpop.xlane.xlu0 %1978  ;;  %v10781_v2 = vpop.xlane.xlu1 %1980  ;;  %v2373_v60 = vadd.f32 %v10661_v3, %v10309_v57 }
 0x44a   :  { %v3083_v26 = vmax.f32 %v3037_v41, 0.0  ;;  %v3533_v23 = vmax.f32 %v3487_v15, 0.0  ;;  %v7563_v42 = vpop.f32.mrb[106].mxu1  ;;  %8231 = vmatprep.subr.bf16.mxu1 %v8230_v62  ;;  %v7683_v55 = vpop.f32.mrb[106].mxu0  ;;  %8279 = vmatprep.subr.bf16.mxu0 %v8278_v27  ;;  %13044 = vst [vmem:[#allocation89_spill] sm:$0xff] %v10779_v32  ;;  %13045 = vst [vmem:[#allocation90_spill] sm:$0xff] %v10781_v2  ;;  %v2368_v15 = vadd.f32 %v10665_v21, %v10311_v16 }
 0x44b   :  { %v3052_v25 = vadd.f32 %v7563_v42, %v9770_v51  ;;  %v3502_v33 = vadd.f32 %v7683_v55, %v9770_v51  ;;  %v3046_v50 = vpop.f32.mrb[107].mxu1  ;;  %8233 = vmatpush3.bf16.msra.mxu1 %v8230_v62  ;;  %v3496_v47 = vpop.f32.mrb[107].mxu0  ;;  %8281 = vmatpush3.bf16.msra.mxu0 %v8278_v27  ;;  %v2823_v21 = vadd.f32 %v10663_v20, %v10309_v57 }
 0x44c   :  { %v8234_v0 = vpack.c.bf16 %v3084_v5, %v3083_v26  ;;  %v8282_v35 = vpack.c.bf16 %v3534_v7, %v3533_v23  ;;  %v3047_v22 = vadd.f32 %v3046_v50, %v9772_v39  ;;  %v3497_v49 = vadd.f32 %v3496_v47, %v9772_v39  ;;  %2908 = vmax.xlane.f32.xlu1 %v2813_v34 }
 0x44d   :  { %v3086_v24 = vmax.f32 %v3052_v25, 0.0  ;;  %v3536_v36 = vmax.f32 %v3502_v33, 0.0  ;;  %2906 = vmax.xlane.f32.xlu0 %v2808_v38 }
 0x44e   :  { %v3085_v31 = vmax.f32 %v3047_v22, 0.0  ;;  %v3535_v62 = vmax.f32 %v3497_v49, 0.0  ;;  %v7566_v27 = vpop.f32.mrb[108].mxu1  ;;  %8235 = vmatprep.subr.bf16.mxu1 %v8234_v0  ;;  %v7686_v41 = vpop.f32.mrb[108].mxu0  ;;  %8283 = vmatprep.subr.bf16.mxu0 %v8282_v35 }
 0x44f   :  { %v3062_v5 = vadd.f32 %v7566_v27, %v9782_v1  ;;  %v3512_v7 = vadd.f32 %v7686_v41, %v9782_v1  ;;  %v3056_v34 = vpop.f32.mrb[109].mxu1  ;;  %8237 = vmatpush3.bf16.msra.mxu1 %v8234_v0  ;;  %v3506_v26 = vpop.f32.mrb[109].mxu0  ;;  %8285 = vmatpush3.bf16.msra.mxu0 %v8282_v35  ;;  %v2818_v35 = vadd.f32 %v10667_v54, %v10311_v16 }
 0x450   :  { %v8238_v23 = vpack.c.bf16 %v3086_v24, %v3085_v31  ;;  %v8286_v42 = vpack.c.bf16 %v3536_v36, %v3535_v62  ;;  %v3057_v3 = vadd.f32 %v3056_v34, %v9784_v63  ;;  %v3507_v55 = vadd.f32 %v3506_v26, %v9784_v63  ;;  %2462 = vmax.xlane.f32.xlu1 %v2373_v60  ;;  %v10797_v60 = vpop.xlane.xlu1 %1534  ;;  %v10801_v41 = vpop.xlane.xlu0 %1532 }
 0x451   :  { %v3088_v38 = vmax.f32 %v3062_v5, 0.0  ;;  %v3538_v25 = vmax.f32 %v3512_v7, 0.0  ;;  %2460 = vmax.xlane.f32.xlu0 %v2368_v15  ;;  %13046 = vst [vmem:[#allocation91_spill] sm:$0xff] %v10797_v60  ;;  %13047 = vst [vmem:[#allocation92_spill] sm:$0xff] %v10801_v41  ;;  %v2383_v5 = vadd.f32 %v10675_v10, %v10329_v9  ;;  %v2378_v26 = vadd.f32 %v10679_v40, %v10331_v6  ;;  %v13050_v40 = vld [vmem:[#allocation28_spill] sm:$0xff] }
 0x452   :  { %v3087_v33 = vmax.f32 %v3057_v3, 0.0  ;;  %v3537_v50 = vmax.f32 %v3507_v55, 0.0  ;;  %v7569_v47 = vpop.f32.mrb[110].mxu1  ;;  %8239 = vmatprep.subr.bf16.mxu1 %v8238_v23  ;;  %v7689_v0 = vpop.f32.mrb[110].mxu0  ;;  %8287 = vmatprep.subr.bf16.mxu0 %v8286_v42  ;;  %v2833_v10 = vadd.f32 %v10677_v28, %v10329_v9 }
 0x453   :  { %v3072_v22 = vadd.f32 %v7569_v47, %v9794_v11  ;;  %v3522_v49 = vadd.f32 %v7689_v0, %v9794_v11  ;;  %v3066_v24 = vpop.f32.mrb[111].mxu1  ;;  %8241 = vmatpush3.bf16.msra.mxu1 %v8238_v23  ;;  %v3516_v36 = vpop.f32.mrb[111].mxu0  ;;  %8289 = vmatpush3.bf16.msra.mxu0 %v8286_v42  ;;  %v2388_v0 = vadd.f32 %v10689_v46, %v10347_v52  ;;  %v13056_v46 = vld [vmem:[#allocation61_spill] sm:$0xff] }
 0x454   :  { %v8242_v20 = vpack.c.bf16 %v3088_v38, %v3087_v33  ;;  %v8290_v31 = vpack.c.bf16 %v3538_v25, %v3537_v50  ;;  %v3067_v62 = vadd.f32 %v3066_v24, %v9796_v37  ;;  %v3517_v27 = vadd.f32 %v3516_v36, %v9796_v37  ;;  %2912 = vmax.xlane.f32.xlu1 %v2823_v21  ;;  %v10807_v3 = vpop.xlane.xlu1 %1984  ;;  %v10809_v55 = vpop.xlane.xlu0 %1982  ;;  %v13051_v25 = vld [vmem:[#allocation29_spill] sm:$0xff]  ;;  %v13053_v33 = vld [vmem:[#allocation7_spill] sm:$0xff]  ;;  %v13058_v24 = vld [vmem:[#allocation24_spill] sm:$0xff] }
 0x455   :  { %v3090_v54 = vmax.f32 %v3072_v22, 0.0  ;;  %v3540_v15 = vmax.f32 %v3522_v49, 0.0  ;;  %2910 = vmax.xlane.f32.xlu0 %v2818_v35  ;;  %13048 = vst [vmem:[#allocation93_spill] sm:$0xff] %v10807_v3  ;;  %13049 = vst [vmem:[#allocation94_spill] sm:$0xff] %v10809_v55  ;;  %v2828_v38 = vadd.f32 %v10681_v12, %v10331_v6  ;;  %v8430_v21 = vld [vmem:[%s12444_s5 + $0x8] sm:$0xff]  ;;  %v2393_v12 = vadd.f32 %v10685_v59, %v10345_v13  ;;  %v8431_v35 = vld [vmem:[%s12444_s5 + $0x10] sm:$0xff] }
 0x456   :  { %v3089_v7 = vmax.f32 %v3067_v62, 0.0  ;;  %v3539_v34 = vmax.f32 %v3517_v27, 0.0  ;;  %8243 = vmatprep.subr.bf16.mxu1 %v8242_v20  ;;  %8291 = vmatprep.subr.bf16.mxu0 %v8290_v31  ;;  %v13054_v50 = vld [vmem:[#allocation65_spill] sm:$0xff]  ;;  %v8432_v59 = vld [vmem:[%s12444_s5 + $0x18] sm:$0xff]  ;;  %v2843_v22 = vadd.f32 %v13056_v46, %v10345_v13  ;;  %v13057_v49 = vld [vmem:[#allocation66_spill] sm:$0xff] }
 0x457   :  { %8245 = vmatpush3.bf16.msra.mxu1 %v8242_v20  ;;  %8293 = vmatpush3.bf16.msra.mxu0 %v8290_v31  ;;  %v13060_v20 = vld [vmem:[#allocation10_spill] sm:$0xff]  ;;  %v8433_v62 = vld [vmem:[%s12444_s5 + $0x20] sm:$0xff] }
 0x458   :  { %v8246_v23 = vpack.c.bf16 %v3090_v54, %v3089_v7  ;;  %v8294_v42 = vpack.c.bf16 %v3540_v15, %v3539_v34  ;;  %2466 = vmax.xlane.f32.xlu1 %v2383_v5  ;;  %v10822_v28 = vpop.xlane.xlu1 %1538  ;;  %v10828_v47 = vpop.xlane.xlu0 %1536  ;;  %v2838_v31 = vadd.f32 %v13060_v20, %v10347_v52  ;;  %v8434_v54 = vld [vmem:[%s12444_s5 + $0x28] sm:$0xff]  ;;  %v13063_v5 = vld [vmem:[#allocation14_spill] sm:$0xff]  ;;  %v13064_v34 = vld [vmem:[#allocation8_spill] sm:$0xff] }
 0x459   :  { %2464 = vmax.xlane.f32.xlu0 %v2378_v26  ;;  %13052 = vst [vmem:[#allocation28_spill] sm:$0xff] %v10822_v28  ;;  %13055 = vst [vmem:[#allocation29_spill] sm:$0xff] %v10828_v47  ;;  %v13062_v15 = vld [vmem:[#allocation57_spill] sm:$0xff]  ;;  %v13065_v26 = vld [vmem:[#allocation44_spill] sm:$0xff] }
 0x45a   :  { %8247 = vmatprep.subr.bf16.mxu1 %v8246_v23  ;;  %8295 = vmatprep.subr.bf16.mxu0 %v8294_v42  ;;  %v2403_v7 = vadd.f32 %v13063_v5, %v13062_v15  ;;  %v8439_v20 = vld [vmem:[%s12444_s5 + $0x50] sm:$0xff] }
 0x45b   :  { %8249 = vmatpush3.bf16.msra.mxu1 %v8246_v23  ;;  %8297 = vmatpush3.bf16.msra.mxu0 %v8294_v42  ;;  %v13066_v23 = vld [vmem:[#allocation50_spill] sm:$0xff] }
 0x45c   :  { %8299 = vmatprep.subr.bf16.mxu1 %v13050_v40  ;;  %8347 = vmatprep.subr.bf16.mxu0 %v13051_v25  ;;  %v10844_v36 = vpop.xlane.xlu1 %1988  ;;  %v10851_v27 = vpop.xlane.xlu0 %1986  ;;  %v13067_v42 = vld [vmem:[#allocation26_spill] sm:$0xff] }
 0x45d   :  { %2916 = vmax.xlane.f32.xlu1 %v2833_v10  ;;  %2914 = vmax.xlane.f32.xlu0 %v2828_v38  ;;  %13059 = vst [vmem:[#allocation7_spill] sm:$0xff] %v10844_v36  ;;  %13061 = vst [vmem:[#allocation65_spill] sm:$0xff] %v10851_v27  ;;  %v2398_v10 = vadd.f32 %v13067_v42, %v13066_v23  ;;  %v8435_v38 = vld [vmem:[%s12444_s5 + $0x30] sm:$0xff]  ;;  %v8441_v42 = vld [vmem:[%s12444_s5 + $0x60] sm:$0xff] }
 0x45e   :  { %7603 = vmatmul.mubr.f32.vlgmr.msra.gmra.mrb[112].mxu1 %v8430_v21  ;;  %7723 = vmatmul.mubr.f32.vlgmr.msra.gmra.mrb[112].mxu0 %v8430_v21 }
 0x45f   :  { %8301 = vmatpush3.bf16.msra.mxu1 %v13050_v40  ;;  %8349 = vmatpush3.bf16.msra.mxu0 %v13051_v25  ;;  %v8436_v25 = vld [vmem:[%s12444_s5 + $0x38] sm:$0xff] }
 0x460   :  { %8303 = vmatprep.subr.bf16.mxu1 %v13053_v33  ;;  %8351 = vmatprep.subr.bf16.mxu0 %v13054_v50  ;;  %v10867_v40 = vpop.xlane.xlu1 %1542  ;;  %v10872_v21 = vpop.xlane.xlu0 %1540 }
 0x461   :  { %7605 = vmatprep.mubr.f32.mxu1 %v8431_v35  ;;  %7725 = vmatprep.mubr.f32.mxu0 %v8431_v35  ;;  %13068 = vst [vmem:[#allocation61_spill] sm:$0xff] %v10867_v40  ;;  %13069 = vst [vmem:[#allocation66_spill] sm:$0xff] %v10872_v21  ;;  %v8437_v35 = vld [vmem:[%s12444_s5 + $0x40] sm:$0xff] }
 0x462   :  { %2470 = vmax.xlane.f32.xlu1 %v2393_v12  ;;  %7606 = vmatmul.mubr.f32.gmra.mrb[114].mxu1 %v8432_v59  ;;  %v13070_v12 = vld [vmem:[#allocation19_spill] sm:$0xff] }
 0x463   :  { %7726 = vmatmul.mubr.f32.gmra.mrb[114].mxu0 %v8432_v59  ;;  %2468 = vmax.xlane.f32.xlu0 %v2388_v0  ;;  %v8438_v59 = vld [vmem:[%s12444_s5 + $0x48] sm:$0xff] }
 0x464   :  { %8305 = vmatpush3.bf16.msra.mxu1 %v13053_v33  ;;  %8353 = vmatpush3.bf16.msra.mxu0 %v13054_v50  ;;  %v2853_v33 = vadd.f32 %v13070_v12, %v13062_v15  ;;  %v13071_v50 = vld [vmem:[#allocation20_spill] sm:$0xff]  ;;  %v10886_v46 = vpop.xlane.xlu1 %1992  ;;  %v8442_v12 = vld [vmem:[%s12444_s5 + $0x68] sm:$0xff] }
 0x465   :  { %8307 = vmatprep.subr.bf16.mxu1 %v13057_v49  ;;  %8355 = vmatprep.subr.bf16.mxu0 %v13058_v24  ;;  %v2848_v0 = vadd.f32 %v13071_v50, %v13066_v23  ;;  %13072 = vst [vmem:[#allocation24_spill] sm:$0xff] %v10886_v46  ;;  %v8443_v50 = vld [vmem:[%s12444_s5 + $0x70] sm:$0xff] }
 0x466   :  { %7608 = vmatprep.mubr.f32.mxu1 %v8433_v62  ;;  %7728 = vmatprep.mubr.f32.mxu0 %v8433_v62  ;;  %v13076_v62 = vld [vmem:[#allocation60_spill] sm:$0xff] }
 0x467   :  { %2920 = vmax.xlane.f32.xlu1 %v2843_v22  ;;  %7609 = vmatmul.mubr.f32.gmra.mrb[116].mxu1 %v8434_v54  ;;  %v13073_v22 = vld [vmem:[#allocation59_spill] sm:$0xff] }
 0x468   :  { %7729 = vmatmul.mubr.f32.gmra.mrb[116].mxu0 %v8434_v54  ;;  %2918 = vmax.xlane.f32.xlu0 %v2838_v31  ;;  %v10893_v31 = vpop.xlane.xlu0 %1990  ;;  %v13077_v54 = vld [vmem:[#allocation38_spill] sm:$0xff] }
 0x469   :  { %8309 = vmatpush3.bf16.msra.mxu1 %v13057_v49  ;;  %8357 = vmatpush3.bf16.msra.mxu0 %v13058_v24  ;;  %v13074_v49 = vld [vmem:[#allocation21_spill] sm:$0xff]  ;;  %13075 = vst [vmem:[#allocation10_spill] sm:$0xff] %v10893_v31  ;;  %v2408_v5 = vadd.f32 %v13077_v54, %v13076_v62  ;;  %v13149_v31 = vld [vmem:[#allocation39_spill] sm:$0xff] }
 0x46a   :  { %8311 = vmatprep.subr.bf16.mxu1 %v13064_v34  ;;  %8359 = vmatprep.subr.bf16.mxu0 %v13065_v26  ;;  %v2413_v24 = vadd.f32 %v13074_v49, %v13073_v22  ;;  %v8447_v49 = vld [vmem:[%s12444_s5 + $0x90] sm:$0xff]  ;;  %v8450_v54 = vld [vmem:[%s12444_s5 + $0xa8] sm:$0xff] }
 0x46b   :  { %7611 = vmatprep.mubr.f32.mxu1 %v8435_v38  ;;  %7731 = vmatprep.mubr.f32.mxu0 %v8435_v38 }
 0x46c   :  { %2474 = vmax.xlane.f32.xlu1 %v2403_v7  ;;  %7612 = vmatmul.mubr.f32.gmra.mrb[118].mxu1 %v8436_v25  ;;  %v8440_v7 = vld [vmem:[%s12444_s5 + $0x58] sm:$0xff] }
 0x46d   :  { %7732 = vmatmul.mubr.f32.gmra.mrb[118].mxu0 %v8436_v25  ;;  %2472 = vmax.xlane.f32.xlu0 %v2398_v10  ;;  %v13079_v10 = vld [vmem:[#allocation11_spill] sm:$0xff]  ;;  %v10907_v25 = vpop.xlane.xlu1 %1546 }
 0x46e   :  { %8313 = vmatpush3.bf16.msra.mxu1 %v13064_v34  ;;  %8361 = vmatpush3.bf16.msra.mxu0 %v13065_v26  ;;  %v13078_v34 = vld [vmem:[#allocation27_spill] sm:$0xff]  ;;  %v2858_v38 = vadd.f32 %v13079_v10, %v13076_v62  ;;  %13080 = vst [vmem:[#allocation14_spill] sm:$0xff] %v10907_v25 }
 0x46f   :  { %7614 = vmatprep.mubr.f32.mxu1 %v8437_v35  ;;  %7734 = vmatprep.mubr.f32.mxu0 %v8437_v35  ;;  %v2863_v26 = vadd.f32 %v13078_v34, %v13073_v22  ;;  %v8445_v35 = vld [vmem:[%s12444_s5 + $0x80] sm:$0xff]  ;;  %v8456_v10 = vld [vmem:[%s12444_s5 + $0xd8] sm:$0xff] }
 0x470   :  { %2924 = vmax.xlane.f32.xlu1 %v2853_v33  ;;  %7615 = vmatmul.mubr.f32.gmra.mrb[120].mxu1 %v8438_v59  ;;  %v10912_v33 = vpop.xlane.xlu0 %1544  ;;  %v8453_v34 = vld [vmem:[%s12444_s5 + $0xc0] sm:$0xff] }
 0x471   :  { %7735 = vmatmul.mubr.f32.gmra.mrb[120].mxu0 %v8438_v59  ;;  %2922 = vmax.xlane.f32.xlu0 %v2848_v0  ;;  %13081 = vst [vmem:[#allocation8_spill] sm:$0xff] %v10912_v33  ;;  %v8444_v0 = vld [vmem:[%s12444_s5 + $0x78] sm:$0xff]  ;;  %v8446_v59 = vld [vmem:[%s12444_s5 + $0x88] sm:$0xff] }
 0x472   :  { %7617 = vmatprep.mubr.f32.mxu1 %v8439_v20  ;;  %7737 = vmatprep.mubr.f32.mxu0 %v8439_v20  ;;  %v8449_v20 = vld [vmem:[%s12444_s5 + $0xa0] sm:$0xff] }
 0x474   :  { %2478 = vmax.xlane.f32.xlu1 %v2413_v24  ;;  %7618 = vmatmul.mubr.f32.gmra.mrb[122].mxu1 %v8440_v7  ;;  %v8448_v24 = vld [vmem:[%s12444_s5 + $0x98] sm:$0xff] }
 0x475   :  { %7738 = vmatmul.mubr.f32.gmra.mrb[122].mxu0 %v8440_v7  ;;  %2476 = vmax.xlane.f32.xlu0 %v2408_v5  ;;  %v8451_v5 = vld [vmem:[%s12444_s5 + $0xb0] sm:$0xff]  ;;  %v8452_v7 = vld [vmem:[%s12444_s5 + $0xb8] sm:$0xff] }
 0x476   :  { %7620 = vmatprep.mubr.f32.mxu1 %v8441_v42  ;;  %7740 = vmatprep.mubr.f32.mxu0 %v8441_v42  ;;  %v8455_v42 = vld [vmem:[%s12444_s5 + $0xd0] sm:$0xff] }
 0x478   :  { %2928 = vmax.xlane.f32.xlu1 %v2863_v26  ;;  %7621 = vmatmul.mubr.f32.gmra.mrb[124].mxu1 %v8442_v12  ;;  %v8454_v26 = vld [vmem:[%s12444_s5 + $0xc8] sm:$0xff] }
 0x479   :  { %7741 = vmatmul.mubr.f32.gmra.mrb[124].mxu0 %v8442_v12  ;;  %2926 = vmax.xlane.f32.xlu0 %v2858_v38  ;;  %v8457_v38 = vld [vmem:[%s12444_s5 + $0xe0] sm:$0xff]  ;;  %v8458_v12 = vld [vmem:[%s12444_s5 + $0xe8] sm:$0xff] }
 0x47a   :  { %7623 = vmatprep.mubr.f32.mxu1 %v8443_v50  ;;  %7743 = vmatprep.mubr.f32.mxu0 %v8443_v50  ;;  %v8459_v50 = vld [vmem:[%s12444_s5 + $0xf0] sm:$0xff] }
 0x47c   :  { %7624 = vmatmul.mubr.f32.gmra.mrb[126].mxu1 %v8444_v0 }
 0x47d   :  { %7744 = vmatmul.mubr.f32.gmra.mrb[126].mxu0 %v8444_v0  ;;  %7626 = vmatprep.mubr.f32.mxu1 %v8445_v35  ;;  %v10965_v0 = vpop.xlane.xlu1 %1996 }
 0x47e   :  { %7746 = vmatprep.mubr.f32.mxu0 %v8445_v35  ;;  %13082 = vst [vmem:[#allocation44_spill] sm:$0xff] %v10965_v0  ;;  %v8460_v35 = vld [vmem:[%s12444_s5 + $0xf8] sm:$0xff] }
 0x480   :  { %7627 = vmatmul.mubr.f32.gmra.mrb[128].mxu1 %v8446_v59 }
 0x481   :  { %7747 = vmatmul.mubr.f32.gmra.mrb[128].mxu0 %v8446_v59  ;;  %7629 = vmatprep.mubr.f32.mxu1 %v8447_v49  ;;  %v8461_v59 = vld [vmem:[%s12442_s3] sm:$0xff] }
 0x482   :  { %7749 = vmatprep.mubr.f32.mxu0 %v8447_v49  ;;  %v10975_v49 = vpop.xlane.xlu0 %1994 }
 0x483   :  { %13083 = vst [vmem:[#allocation26_spill] sm:$0xff] %v10975_v49 }
 0x484   :  { %7630 = vmatmul.mubr.f32.gmra.mrb[130].mxu1 %v8448_v24 }
 0x485   :  { %7750 = vmatmul.mubr.f32.gmra.mrb[130].mxu0 %v8448_v24  ;;  %7632 = vmatprep.mubr.f32.mxu1 %v8449_v20  ;;  %v13084_v24 = vld [vmem:[#allocation32_spill] sm:$0xff] }
 0x486   :  { %7752 = vmatprep.mubr.f32.mxu0 %v8449_v20  ;;  %v13085_v20 = vld [vmem:[#allocation33_spill] sm:$0xff] }
 0x488   :  { %7633 = vmatmul.mubr.f32.gmra.mrb[132].mxu1 %v8450_v54 }
 0x489   :  { %7753 = vmatmul.mubr.f32.gmra.mrb[132].mxu0 %v8450_v54  ;;  %7635 = vmatprep.mubr.f32.mxu1 %v8451_v5  ;;  %v10983_v54 = vpop.xlane.xlu1 %1550 }
 0x48a   :  { %7755 = vmatprep.mubr.f32.mxu0 %v8451_v5  ;;  %13086 = vst [vmem:[#allocation19_spill] sm:$0xff] %v10983_v54  ;;  %v13087_v5 = vld [vmem:[#allocation53_spill] sm:$0xff] }
 0x48c   :  { %7636 = vmatmul.mubr.f32.gmra.mrb[134].mxu1 %v8452_v7 }
 0x48d   :  { %7756 = vmatmul.mubr.f32.gmra.mrb[134].mxu0 %v8452_v7  ;;  %7638 = vmatprep.mubr.f32.mxu1 %v8453_v34  ;;  %v10989_v7 = vpop.xlane.xlu0 %1548 }
 0x48e   :  { %7758 = vmatprep.mubr.f32.mxu0 %v8453_v34  ;;  %13088 = vst [vmem:[#allocation20_spill] sm:$0xff] %v10989_v7  ;;  %v13089_v34 = vld [vmem:[#allocation54_spill] sm:$0xff] }
 0x490   :  { %7639 = vmatmul.mubr.f32.gmra.mrb[136].mxu1 %v8454_v26 }
 0x491   :  { %7759 = vmatmul.mubr.f32.gmra.mrb[136].mxu0 %v8454_v26  ;;  %7641 = vmatprep.mubr.f32.mxu1 %v8455_v42  ;;  %v10997_v26 = vpop.xlane.xlu1 %2000 }
 0x492   :  { %7761 = vmatprep.mubr.f32.mxu0 %v8455_v42  ;;  %13090 = vst [vmem:[#allocation21_spill] sm:$0xff] %v10997_v26  ;;  %v13091_v42 = vld [vmem:[#allocation41_spill] sm:$0xff] }
 0x494   :  { %7642 = vmatmul.mubr.f32.gmra.mrb[138].mxu1 %v8456_v10 }
 0x495   :  { %7762 = vmatmul.mubr.f32.gmra.mrb[138].mxu0 %v8456_v10  ;;  %7644 = vmatprep.mubr.f32.mxu1 %v8457_v38  ;;  %v13092_v10 = vld [vmem:[#allocation69_spill] sm:$0xff] }
 0x496   :  { %7764 = vmatprep.mubr.f32.mxu0 %v8457_v38  ;;  %v11007_v38 = vpop.xlane.xlu0 %1998 }
 0x497   :  { %13093 = vst [vmem:[#allocation38_spill] sm:$0xff] %v11007_v38 }
 0x498   :  { %7645 = vmatmul.mubr.f32.gmra.mrb[140].mxu1 %v8458_v12 }
 0x499   :  { %7765 = vmatmul.mubr.f32.gmra.mrb[140].mxu0 %v8458_v12  ;;  %7647 = vmatprep.mubr.f32.mxu1 %v8459_v50  ;;  %v13094_v12 = vld [vmem:[#allocation25_spill] sm:$0xff] }
 0x49a   :  { %7767 = vmatprep.mubr.f32.mxu0 %v8459_v50  ;;  %v13095_v50 = vld [vmem:[#allocation45_spill] sm:$0xff] }
 0x49c   :  { %7648 = vmatmul.mubr.f32.gmra.mrb[142].mxu1 %v8460_v35 }
 0x49d   :  { %7768 = vmatmul.mubr.f32.gmra.mrb[142].mxu0 %v8460_v35  ;;  %7786 = vmatprep.mubr.msk.f32.mxu1 %vm921_vm0, %v8461_v59  ;;  %v11015_v35 = vpop.xlane.xlu1 %1554 }
 0x49e   :  { %7906 = vmatprep.mubr.msk.f32.mxu0 %vm921_vm0, %v8461_v59  ;;  %13096 = vst [vmem:[#allocation27_spill] sm:$0xff] %v11015_v35  ;;  %v13097_v59 = vld [vmem:[#allocation71_spill] sm:$0xff] }
 0x4a0   :  { %7787 = vmatmul.mubr.msk.f32.vlgmr.msra.gmra.mrb[144].mxu1 %vm921_vm0, %v13084_v24 }
 0x4a1   :  { %7907 = vmatmul.mubr.msk.f32.vlgmr.msra.gmra.mrb[144].mxu0 %vm921_vm0, %v13084_v24  ;;  %7789 = vmatprep.mubr.msk.f32.mxu1 %vm921_vm0, %v13085_v20  ;;  %v11021_v24 = vpop.xlane.xlu0 %1552 }
 0x4a2   :  { %7909 = vmatprep.mubr.msk.f32.mxu0 %vm921_vm0, %v13085_v20  ;;  %13098 = vst [vmem:[#allocation11_spill] sm:$0xff] %v11021_v24  ;;  %v13099_v20 = vld [vmem:[#allocation43_spill] sm:$0xff] }
 0x4a4   :  { %7790 = vmatmul.mubr.msk.f32.gmra.mrb[146].mxu1 %vm921_vm0, %v13087_v5 }
 0x4a5   :  { %7910 = vmatmul.mubr.msk.f32.gmra.mrb[146].mxu0 %vm921_vm0, %v13087_v5  ;;  %7792 = vmatprep.mubr.msk.f32.mxu1 %vm921_vm0, %v13089_v34  ;;  %v11029_v5 = vpop.xlane.xlu1 %2004 }
 0x4a6   :  { %7912 = vmatprep.mubr.msk.f32.mxu0 %vm921_vm0, %v13089_v34  ;;  %13100 = vst [vmem:[#allocation32_spill] sm:$0xff] %v11029_v5  ;;  %v13101_v34 = vld [vmem:[#allocation68_spill] sm:$0xff] }
 0x4a8   :  { %7793 = vmatmul.mubr.msk.f32.gmra.mrb[148].mxu1 %vm921_vm0, %v13091_v42 }
 0x4a9   :  { %7913 = vmatmul.mubr.msk.f32.gmra.mrb[148].mxu0 %vm921_vm0, %v13091_v42  ;;  %7795 = vmatprep.mubr.msk.f32.mxu1 %vm921_vm0, %v13092_v10  ;;  %v13102_v42 = vld [vmem:[#allocation72_spill] sm:$0xff] }
 0x4aa   :  { %7915 = vmatprep.mubr.msk.f32.mxu0 %vm921_vm0, %v13092_v10  ;;  %v11039_v10 = vpop.xlane.xlu0 %2002 }
 0x4ab   :  { %13103 = vst [vmem:[#allocation33_spill] sm:$0xff] %v11039_v10 }
 0x4ac   :  { %7796 = vmatmul.mubr.msk.f32.gmra.mrb[150].mxu1 %vm921_vm0, %v13094_v12 }
 0x4ad   :  { %7916 = vmatmul.mubr.msk.f32.gmra.mrb[150].mxu0 %vm921_vm0, %v13094_v12  ;;  %7798 = vmatprep.mubr.msk.f32.mxu1 %vm921_vm0, %v13095_v50  ;;  %v13104_v12 = vld [vmem:[#allocation35_spill] sm:$0xff] }
 0x4ae   :  { %7918 = vmatprep.mubr.msk.f32.mxu0 %vm921_vm0, %v13095_v50  ;;  %v13105_v50 = vld [vmem:[#allocation74_spill] sm:$0xff] }
 0x4b0   :  { %7799 = vmatmul.mubr.msk.f32.gmra.mrb[152].mxu1 %vm921_vm0, %v13097_v59 }
 0x4b1   :  { %7919 = vmatmul.mubr.msk.f32.gmra.mrb[152].mxu0 %vm921_vm0, %v13097_v59  ;;  %7801 = vmatprep.mubr.msk.f32.mxu1 %vm921_vm0, %v13099_v20  ;;  %v11047_v59 = vpop.xlane.xlu1 %1558 }
 0x4b2   :  { %7921 = vmatprep.mubr.msk.f32.mxu0 %vm921_vm0, %v13099_v20  ;;  %13106 = vst [vmem:[#allocation53_spill] sm:$0xff] %v11047_v59  ;;  %v13107_v20 = vld [vmem:[#allocation42_spill] sm:$0xff] }
 0x4b4   :  { %7802 = vmatmul.mubr.msk.f32.gmra.mrb[154].mxu1 %vm921_vm0, %v13101_v34 }
 0x4b5   :  { %7922 = vmatmul.mubr.msk.f32.gmra.mrb[154].mxu0 %vm921_vm0, %v13101_v34  ;;  %7804 = vmatprep.mubr.msk.f32.mxu1 %vm921_vm0, %v13102_v42  ;;  %v11053_v34 = vpop.xlane.xlu0 %1556 }
 0x4b6   :  { %7924 = vmatprep.mubr.msk.f32.mxu0 %vm921_vm0, %v13102_v42  ;;  %13108 = vst [vmem:[#allocation54_spill] sm:$0xff] %v11053_v34  ;;  %v13109_v42 = vld [vmem:[#allocation36_spill] sm:$0xff] }
 0x4b8   :  { %7805 = vmatmul.mubr.msk.f32.gmra.mrb[156].mxu1 %vm921_vm0, %v13104_v12 }
 0x4b9   :  { %7925 = vmatmul.mubr.msk.f32.gmra.mrb[156].mxu0 %vm921_vm0, %v13104_v12  ;;  %7807 = vmatprep.mubr.msk.f32.mxu1 %vm921_vm0, %v13105_v50  ;;  %v11059_v12 = vpop.xlane.xlu1 %2008  ;;  %v11061_v5 = vpop.xlane.xlu0 %2006 }
 0x4ba   :  { %7927 = vmatprep.mubr.msk.f32.mxu0 %vm921_vm0, %v13105_v50  ;;  %13110 = vst [vmem:[#allocation41_spill] sm:$0xff] %v11059_v12  ;;  %13111 = vst [vmem:[#allocation69_spill] sm:$0xff] %v11061_v5 }
 0x4bc   :  { %7808 = vmatmul.mubr.msk.f32.gmra.mrb[158].mxu1 %vm921_vm0, %v13107_v20 }
 0x4bd   :  { %7928 = vmatmul.mubr.msk.f32.gmra.mrb[158].mxu0 %vm921_vm0, %v13107_v20  ;;  %7842 = vmatprep.mubr.f32.mxu1 %v13109_v42  ;;  %v11063_v59 = vpop.xlane.xlu1 %1562  ;;  %v11065_v35 = vpop.xlane.xlu0 %1560  ;;  %vm6298_vm0 = vcmask 1040384  }
 0x4be   :  { %7962 = vmatprep.mubr.f32.mxu0 %v13109_v42  ;;  %13112 = vst [vmem:[#allocation25_spill] sm:$0xff] %v11063_v59  ;;  %13113 = vst [vmem:[#allocation45_spill] sm:$0xff] %v11065_v35 }
 0x4c1   :  { %v11067_v50 = vpop.xlane.xlu1 %2012  ;;  %v11069_v10 = vpop.xlane.xlu0 %2010 }
 0x4c2   :  { %13114 = vst [vmem:[#allocation71_spill] sm:$0xff] %v11067_v50  ;;  %13115 = vst [vmem:[#allocation43_spill] sm:$0xff] %v11069_v10 }
 0x4c5   :  { %v11071_v34 = vpop.xlane.xlu1 %1566  ;;  %v11073_v24 = vpop.xlane.xlu0 %1564 }
 0x4c6   :  { %13116 = vst [vmem:[#allocation68_spill] sm:$0xff] %v11071_v34  ;;  %13117 = vst [vmem:[#allocation72_spill] sm:$0xff] %v11073_v24 }
 0x4c9   :  { %v11075_v20 = vpop.xlane.xlu1 %2016  ;;  %v11077_v26 = vpop.xlane.xlu0 %2014 }
 0x4ca   :  { %13118 = vst [vmem:[#allocation35_spill] sm:$0xff] %v11075_v20  ;;  %13119 = vst [vmem:[#allocation74_spill] sm:$0xff] %v11077_v26 }
 0x4cd   :  { %v11079_v42 = vpop.xlane.xlu1 %1570  ;;  %v11081_v12 = vpop.xlane.xlu0 %1568 }
 0x4ce   :  { %13120 = vst [vmem:[#allocation42_spill] sm:$0xff] %v11079_v42  ;;  %13121 = vst [vmem:[#allocation36_spill] sm:$0xff] %v11081_v12 }
 0x4d1   :  { %v11083_v5 = vpop.xlane.xlu1 %2020  ;;  %v11085_v59 = vpop.xlane.xlu0 %2018 }
 0x4d2   :  { %13122 = vst [vmem:[#allocation95_spill] sm:$0xff] %v11083_v5  ;;  %13123 = vst [vmem:[#allocation96_spill] sm:$0xff] %v11085_v59 }
 0x4d5   :  { %v11087_v35 = vpop.xlane.xlu1 %1574  ;;  %v11089_v50 = vpop.xlane.xlu0 %1572 }
 0x4d6   :  { %13124 = vst [vmem:[#allocation97_spill] sm:$0xff] %v11087_v35  ;;  %13125 = vst [vmem:[#allocation98_spill] sm:$0xff] %v11089_v50 }
 0x4d9   :  { %v11091_v10 = vpop.xlane.xlu1 %2024  ;;  %v11093_v34 = vpop.xlane.xlu0 %2022 }
 0x4da   :  { %13126 = vst [vmem:[#allocation99_spill] sm:$0xff] %v11091_v10  ;;  %13127 = vst [vmem:[#allocation100_spill] sm:$0xff] %v11093_v34 }
 0x4dd   :  { %v11095_v24 = vpop.xlane.xlu1 %1578  ;;  %v11097_v20 = vpop.xlane.xlu0 %1576 }
 0x4de   :  { %13128 = vst [vmem:[#allocation101_spill] sm:$0xff] %v11095_v24  ;;  %13129 = vst [vmem:[#allocation102_spill] sm:$0xff] %v11097_v20 }
 0x4e1   :  { %v11099_v26 = vpop.xlane.xlu1 %2028  ;;  %v11101_v42 = vpop.xlane.xlu0 %2026 }
 0x4e2   :  { %13130 = vst [vmem:[#allocation103_spill] sm:$0xff] %v11099_v26  ;;  %13131 = vst [vmem:[#allocation104_spill] sm:$0xff] %v11101_v42 }
 0x4e5   :  { %v11103_v12 = vpop.xlane.xlu1 %2418  ;;  %v11105_v5 = vpop.xlane.xlu0 %2416 }
 0x4e6   :  { %13132 = vst [vmem:[#allocation105_spill] sm:$0xff] %v11103_v12  ;;  %13133 = vst [vmem:[#allocation106_spill] sm:$0xff] %v11105_v5 }
 0x4e9   :  { %v11107_v59 = vpop.xlane.xlu1 %2868  ;;  %v11109_v35 = vpop.xlane.xlu0 %2866 }
 0x4ea   :  { %13134 = vst [vmem:[#allocation107_spill] sm:$0xff] %v11107_v59  ;;  %13135 = vst [vmem:[#allocation108_spill] sm:$0xff] %v11109_v35 }
 0x4ed   :  { %v11111_v50 = vpop.xlane.xlu1 %2422  ;;  %v11113_v10 = vpop.xlane.xlu0 %2420 }
 0x4ee   :  { %13136 = vst [vmem:[#allocation109_spill] sm:$0xff] %v11111_v50  ;;  %13137 = vst [vmem:[#allocation110_spill] sm:$0xff] %v11113_v10 }
 0x4f1   :  { %v11115_v34 = vpop.xlane.xlu1 %2872  ;;  %v11117_v24 = vpop.xlane.xlu0 %2870 }
 0x4f2   :  { %13138 = vst [vmem:[#allocation111_spill] sm:$0xff] %v11115_v34  ;;  %13139 = vst [vmem:[#allocation112_spill] sm:$0xff] %v11117_v24  ;;  %v13154_v24 = vld [vmem:[#allocation62_spill] sm:$0xff] }
 0x4f5   :  { %v11119_v20 = vpop.xlane.xlu1 %2426  ;;  %v11121_v26 = vpop.xlane.xlu0 %2424 }
 0x4f6   :  { %13140 = vst [vmem:[#allocation113_spill] sm:$0xff] %v11119_v20  ;;  %13141 = vst [vmem:[#allocation114_spill] sm:$0xff] %v11121_v26 }
 0x4f9   :  { %v11123_v42 = vpop.xlane.xlu1 %2876  ;;  %v11125_v38 = vpop.xlane.xlu0 %2874 }
 0x4fa   :  { %13142 = vst [vmem:[#allocation115_spill] sm:$0xff] %v11123_v42  ;;  %13143 = vst [vmem:[#allocation116_spill] sm:$0xff] %v11125_v38  ;;  %v13151_v42 = vld [vmem:[#allocation47_spill] sm:$0xff] }
 0x4fd   :  { %v11127_v54 = vpop.xlane.xlu1 %2430  ;;  %v11129_v7 = vpop.xlane.xlu0 %2428 }
 0x4fe   :  { %13144 = vst [vmem:[#allocation117_spill] sm:$0xff] %v11127_v54  ;;  %13145 = vst [vmem:[#allocation118_spill] sm:$0xff] %v11129_v7 }
 0x501   :  { %v11131_v0 = vpop.xlane.xlu1 %2880  ;;  %v11133_v49 = vpop.xlane.xlu0 %2878 }
 0x502   :  { %13146 = vst [vmem:[#allocation119_spill] sm:$0xff] %v11131_v0  ;;  %13147 = vst [vmem:[#allocation120_spill] sm:$0xff] %v11133_v49 }
 0x505   :  { %v11135_v25 = vpop.xlane.xlu1 %2434  ;;  %v11138_v26 = vpop.xlane.xlu0 %2432 }
 0x506   :  { %13148 = vst [vmem:[#allocation121_spill] sm:$0xff] %v11135_v25  ;;  %13150 = vst [vmem:[#allocation122_spill] sm:$0xff] %v11138_v26 }
 0x509   :  { %v11142_v49 = vpop.xlane.xlu1 %2884 }
 0x50a   :  { %13152 = vst [vmem:[#allocation123_spill] sm:$0xff] %v11142_v49 }
 0x531   :  { %v7604_v33 = vpop.f32.mrb[112].mxu1  ;;  %v7724_v46 = vpop.f32.mrb[112].mxu0 }
 0x532   :  { %v3163_v20 = vadd.f32 %v7604_v33, %v13149_v31  ;;  %v3157_v34 = vpop.f32.mrb[113].mxu1  ;;  %v3607_v50 = vpop.f32.mrb[113].mxu0  ;;  %v3613_v7 = vadd.f32 %v7724_v46, %v13149_v31 }
 0x533   :  { %v3158_v38 = vadd.f32 %v3157_v34, %v13151_v42  ;;  %v3608_v25 = vadd.f32 %v3607_v50, %v13151_v42  ;;  %v11145_v33 = vpop.xlane.xlu0 %2882  ;;  %v13155_v34 = vld [vmem:[#allocation12_spill] sm:$0xff]  ;;  %v11149_v46 = vpop.xlane.xlu1 %2438 }
 0x534   :  { %3318 = vmax.xlane.f32.xlu1 %v3163_v20  ;;  %13153 = vst [vmem:[#allocation124_spill] sm:$0xff] %v11145_v33  ;;  %13156 = vst [vmem:[#allocation125_spill] sm:$0xff] %v11149_v46 }
 0x535   :  { %v7607_v54 = vpop.f32.mrb[114].mxu1  ;;  %3316 = vmax.xlane.f32.xlu0 %v3158_v38 }
 0x536   :  { %v7727_v0 = vpop.f32.mrb[114].mxu0  ;;  %v3167_v40 = vpop.f32.mrb[115].mxu1  ;;  %v3173_v26 = vadd.f32 %v7607_v54, %v13154_v24 }
 0x537   :  { %v3617_v36 = vpop.f32.mrb[115].mxu0  ;;  %v3168_v20 = vadd.f32 %v3167_v40, %v13155_v34  ;;  %v3623_v31 = vadd.f32 %v7727_v0, %v13154_v24  ;;  %v11152_v50 = vpop.xlane.xlu0 %2436  ;;  %v13158_v40 = vld [vmem:[#allocation30_spill] sm:$0xff] }
 0x538   :  { %3768 = vmax.xlane.f32.xlu1 %v3613_v7  ;;  %13157 = vst [vmem:[#allocation126_spill] sm:$0xff] %v11152_v50  ;;  %v3618_v7 = vadd.f32 %v3617_v36, %v13155_v34  ;;  %v11156_v5 = vpop.xlane.xlu1 %2888 }
 0x539   :  { %3766 = vmax.xlane.f32.xlu0 %v3608_v25  ;;  %13159 = vst [vmem:[#allocation127_spill] sm:$0xff] %v11156_v5 }
 0x53a   :  { %v7610_v10 = vpop.f32.mrb[116].mxu1 }
 0x53b   :  { %v7730_v35 = vpop.f32.mrb[116].mxu0  ;;  %v3177_v38 = vpop.f32.mrb[117].mxu1  ;;  %v3183_v33 = vadd.f32 %v7610_v10, %v13158_v40 }
 0x53c   :  { %v3627_v59 = vpop.f32.mrb[117].mxu0  ;;  %3322 = vmax.xlane.f32.xlu1 %v3173_v26  ;;  %v13160_v26 = vld [vmem:[#allocation13_spill] sm:$0xff]  ;;  %v11159_v0 = vpop.xlane.xlu0 %2886  ;;  %v3633_v36 = vadd.f32 %v7730_v35, %v13158_v40 }
 0x53d   :  { %3320 = vmax.xlane.f32.xlu0 %v3168_v20  ;;  %v3178_v12 = vadd.f32 %v3177_v38, %v13160_v26  ;;  %13161 = vst [vmem:[#allocation128_spill] sm:$0xff] %v11159_v0  ;;  %v11163_v10 = vpop.xlane.xlu1 %2442  ;;  %v13163_v38 = vld [vmem:[#allocation48_spill] sm:$0xff] }
 0x53e   :  { %13162 = vst [vmem:[#allocation129_spill] sm:$0xff] %v11163_v10 }
 0x53f   :  { %v7613_v42 = vpop.f32.mrb[118].mxu1 }
 0x540   :  { %v7733_v25 = vpop.f32.mrb[118].mxu0  ;;  %v3187_v49 = vpop.f32.mrb[119].mxu1  ;;  %3772 = vmax.xlane.f32.xlu1 %v3623_v31  ;;  %v3628_v31 = vadd.f32 %v3627_v59, %v13160_v26  ;;  %v3193_v27 = vadd.f32 %v7613_v42, %v13163_v38 }
 0x541   :  { %v3637_v54 = vpop.f32.mrb[119].mxu0  ;;  %3770 = vmax.xlane.f32.xlu0 %v3618_v7  ;;  %v11166_v28 = vpop.xlane.xlu0 %2440  ;;  %v3643_v59 = vadd.f32 %v7733_v25, %v13163_v38 }
 0x542   :  { %13164 = vst [vmem:[#allocation130_spill] sm:$0xff] %v11166_v28  ;;  %v11170_v26 = vpop.xlane.xlu1 %2892 }
 0x543   :  { %v7616_v46 = vpop.f32.mrb[120].mxu1  ;;  %13166 = vst [vmem:[#allocation131_spill] sm:$0xff] %v11170_v26 }
 0x544   :  { %v7736_v20 = vpop.f32.mrb[120].mxu0  ;;  %v3197_v21 = vpop.f32.mrb[121].mxu1  ;;  %3326 = vmax.xlane.f32.xlu1 %v3183_v33  ;;  %v13165_v33 = vld [vmem:[#allocation63_spill] sm:$0xff] }
 0x545   :  { %v3647_v24 = vpop.f32.mrb[121].mxu0  ;;  %3324 = vmax.xlane.f32.xlu0 %v3178_v12  ;;  %v3188_v0 = vadd.f32 %v3187_v49, %v13165_v33  ;;  %v11177_v10 = vpop.xlane.xlu0 %2890 }
 0x546   :  { %13167 = vst [vmem:[#allocation132_spill] sm:$0xff] %v11177_v10 }
 0x547   :  { %v7619_v34 = vpop.f32.mrb[122].mxu1 }
 0x548   :  { %v7739_v7 = vpop.f32.mrb[122].mxu0  ;;  %v3207_v50 = vpop.f32.mrb[123].mxu1  ;;  %3776 = vmax.xlane.f32.xlu1 %v3633_v36  ;;  %v3638_v36 = vadd.f32 %v3637_v54, %v13165_v33 }
 0x549   :  { %v3657_v5 = vpop.f32.mrb[123].mxu0  ;;  %3774 = vmax.xlane.f32.xlu0 %v3628_v31  ;;  %v11189_v33 = vpop.xlane.xlu1 %2446 }
 0x54a   :  { %13170 = vst [vmem:[#allocation133_spill] sm:$0xff] %v11189_v33  ;;  %v11194_v10 = vpop.xlane.xlu0 %2444 }
 0x54b   :  { %v7622_v3 = vpop.f32.mrb[124].mxu1  ;;  %13171 = vst [vmem:[#allocation134_spill] sm:$0xff] %v11194_v10 }
 0x54c   :  { %v7742_v12 = vpop.f32.mrb[124].mxu0  ;;  %v3217_v47 = vpop.f32.mrb[125].mxu1  ;;  %3330 = vmax.xlane.f32.xlu1 %v3193_v27  ;;  %v13168_v27 = vld [vmem:[#allocation15_spill] sm:$0xff] }
 0x54d   :  { %v3667_v35 = vpop.f32.mrb[125].mxu0  ;;  %3328 = vmax.xlane.f32.xlu0 %v3188_v0  ;;  %v3203_v28 = vadd.f32 %v7616_v46, %v13168_v27  ;;  %v13169_v0 = vld [vmem:[#allocation31_spill] sm:$0xff]  ;;  %v11206_v41 = vpop.xlane.xlu1 %2896 }
 0x54e   :  { %v3198_v55 = vadd.f32 %v3197_v21, %v13169_v0  ;;  %v3648_v46 = vadd.f32 %v3647_v24, %v13169_v0  ;;  %13173 = vst [vmem:[#allocation135_spill] sm:$0xff] %v11206_v41  ;;  %v11215_v0 = vpop.xlane.xlu0 %2894 }
 0x54f   :  { %v11173_v40 = vpop.f32.mrb[126].mxu1  ;;  %13175 = vst [vmem:[#allocation136_spill] sm:$0xff] %v11215_v0 }
 0x550   :  { %v11175_v31 = vpop.f32.mrb[126].mxu0  ;;  %v3227_v42 = vpop.f32.mrb[127].mxu1  ;;  %3780 = vmax.xlane.f32.xlu1 %v3643_v59  ;;  %v3653_v59 = vadd.f32 %v7736_v20, %v13168_v27 }
 0x551   :  { %v11179_v49 = vpop.f32.mrb[127].mxu0  ;;  %3778 = vmax.xlane.f32.xlu0 %v3638_v36  ;;  %v11227_v8 = vpop.xlane.xlu1 %2450 }
 0x552   :  { %13176 = vst [vmem:[#allocation137_spill] sm:$0xff] %v11227_v8  ;;  %v11232_v56 = vpop.xlane.xlu0 %2448 }
 0x553   :  { %v11183_v25 = vpop.f32.mrb[128].mxu1  ;;  %13178 = vst [vmem:[#allocation138_spill] sm:$0xff] %v11232_v56 }
 0x554   :  { %v11185_v38 = vpop.f32.mrb[128].mxu0  ;;  %v11187_v54 = vpop.f32.mrb[129].mxu1  ;;  %3334 = vmax.xlane.f32.xlu1 %v3203_v28  ;;  %v13172_v28 = vld [vmem:[#allocation70_spill] sm:$0xff] }
 0x555   :  { %v11191_v26 = vpop.f32.mrb[129].mxu0  ;;  %3332 = vmax.xlane.f32.xlu0 %v3198_v55  ;;  %v3213_v33 = vadd.f32 %v7619_v34, %v13172_v28  ;;  %v13174_v55 = vld [vmem:[#allocation73_spill] sm:$0xff]  ;;  %v11244_v8 = vpop.xlane.xlu1 %2900 }
 0x556   :  { %v3208_v20 = vadd.f32 %v3207_v50, %v13174_v55  ;;  %v3658_v34 = vadd.f32 %v3657_v5, %v13174_v55  ;;  %13180 = vst [vmem:[#allocation139_spill] sm:$0xff] %v11244_v8  ;;  %v11253_v22 = vpop.xlane.xlu0 %2898 }
 0x557   :  { %v11197_v36 = vpop.f32.mrb[130].mxu1  ;;  %13182 = vst [vmem:[#allocation141_spill] sm:$0xff] %v11253_v22 }
 0x558   :  { %v11199_v21 = vpop.f32.mrb[130].mxu0  ;;  %v11201_v60 = vpop.f32.mrb[131].mxu1  ;;  %3784 = vmax.xlane.f32.xlu1 %v3653_v59  ;;  %v3663_v59 = vadd.f32 %v7739_v7, %v13172_v28 }
 0x559   :  { %v11203_v2 = vpop.f32.mrb[131].mxu0  ;;  %3782 = vmax.xlane.f32.xlu0 %v3648_v46  ;;  %v11266_v15 = vpop.xlane.xlu1 %2454 }
 0x55a   :  { %13189 = vst [vmem:[#allocation146_spill] sm:$0xff] %v11266_v15  ;;  %v11272_v22 = vpop.xlane.xlu0 %2452  ;;  %v13196_v15 = vld [vmem:[#allocation75_spill] sm:$0xff] }
 0x55b   :  { %v11209_v27 = vpop.f32.mrb[132].mxu1  ;;  %13191 = vst [vmem:[#allocation148_spill] sm:$0xff] %v11272_v22 }
 0x55c   :  { %v11211_v10 = vpop.f32.mrb[132].mxu0  ;;  %v11213_v24 = vpop.f32.mrb[133].mxu1  ;;  %3338 = vmax.xlane.f32.xlu1 %v3213_v33  ;;  %v13177_v33 = vld [vmem:[#allocation16_spill] sm:$0xff] }
 0x55d   :  { %v11217_v32 = vpop.f32.mrb[133].mxu0  ;;  %3336 = vmax.xlane.f32.xlu0 %v3208_v20  ;;  %v3223_v0 = vadd.f32 %v7622_v3, %v13177_v33  ;;  %v13179_v20 = vld [vmem:[#allocation51_spill] sm:$0xff] }
 0x55e   :  { %v3218_v7 = vadd.f32 %v3217_v47, %v13179_v20  ;;  %v3668_v3 = vadd.f32 %v3667_v35, %v13179_v20 }
 0x55f   :  { %v11221_v46 = vpop.f32.mrb[134].mxu1 }
 0x560   :  { %v11223_v41 = vpop.f32.mrb[134].mxu0  ;;  %v11225_v50 = vpop.f32.mrb[135].mxu1  ;;  %3788 = vmax.xlane.f32.xlu1 %v3663_v59  ;;  %v3673_v59 = vadd.f32 %v7742_v12, %v13177_v33  ;;  %v13185_v12 = vld [vmem:[#allocation52_spill] sm:$0xff] }
 0x561   :  { %v11229_v45 = vpop.f32.mrb[135].mxu0  ;;  %3786 = vmax.xlane.f32.xlu0 %v3658_v34  ;;  %v3228_v33 = vadd.f32 %v3227_v42, %v13185_v12 }
 0x563   :  { %v11235_v28 = vpop.f32.mrb[136].mxu1 }
 0x564   :  { %v11237_v5 = vpop.f32.mrb[136].mxu0  ;;  %v11239_v55 = vpop.f32.mrb[137].mxu1  ;;  %3342 = vmax.xlane.f32.xlu1 %v3223_v0  ;;  %v13184_v0 = vld [vmem:[#allocation40_spill] sm:$0xff] }
 0x565   :  { %v11241_v62 = vpop.f32.mrb[137].mxu0  ;;  %3340 = vmax.xlane.f32.xlu0 %v3218_v7  ;;  %v3233_v7 = vadd.f32 %v11173_v40, %v13184_v0  ;;  %v3678_v40 = vadd.f32 %v11179_v49, %v13185_v12  ;;  %v13198_v49 = vld [vmem:[#allocation58_spill] sm:$0xff] }
 0x567   :  { %v11247_v34 = vpop.f32.mrb[138].mxu1 }
 0x568   :  { %v11249_v56 = vpop.f32.mrb[138].mxu0  ;;  %v11251_v47 = vpop.f32.mrb[139].mxu1  ;;  %3792 = vmax.xlane.f32.xlu1 %v3673_v59 }
 0x569   :  { %13181 = vst [vmem:[#allocation140_spill] sm:$0xff] %v11249_v56  ;;  %v11255_v23 = vpop.f32.mrb[139].mxu0  ;;  %3790 = vmax.xlane.f32.xlu0 %v3668_v3  ;;  %v3683_v3 = vadd.f32 %v11175_v31, %v13184_v0  ;;  %v3238_v31 = vadd.f32 %v11187_v54, %v10251_v53 }
 0x56a   :  { %13183 = vst [vmem:[#allocation142_spill] sm:$0xff] %v11255_v23 }
 0x56b   :  { %v11260_v8 = vpop.f32.mrb[140].mxu1 }
 0x56c   :  { %13186 = vst [vmem:[#allocation143_spill] sm:$0xff] %v11260_v8  ;;  %v11262_v35 = vpop.f32.mrb[140].mxu0  ;;  %v11264_v20 = vpop.f32.mrb[141].mxu1  ;;  %3346 = vmax.xlane.f32.xlu1 %v3233_v7 }
 0x56d   :  { %13187 = vst [vmem:[#allocation144_spill] sm:$0xff] %v11262_v35  ;;  %13188 = vst [vmem:[#allocation145_spill] sm:$0xff] %v11264_v20  ;;  %v11268_v59 = vpop.f32.mrb[141].mxu0  ;;  %3344 = vmax.xlane.f32.xlu0 %v3228_v33  ;;  %v3243_v33 = vadd.f32 %v11183_v25, %v13196_v15  ;;  %v3693_v25 = vadd.f32 %v11185_v38, %v13196_v15 }
 0x56e   :  { %13190 = vst [vmem:[#allocation147_spill] sm:$0xff] %v11268_v59  ;;  %v11286_v59 = vpop.xlane.xlu1 %2904 }
 0x56f   :  { %v11276_v42 = vpop.f32.mrb[142].mxu1  ;;  %13197 = vst [vmem:[#allocation153_spill] sm:$0xff] %v11286_v59 }
 0x570   :  { %13192 = vst [vmem:[#allocation149_spill] sm:$0xff] %v11276_v42  ;;  %v11278_v8 = vpop.f32.mrb[142].mxu0  ;;  %v11280_v35 = vpop.f32.mrb[143].mxu1  ;;  %3796 = vmax.xlane.f32.xlu1 %v3683_v3 }
 0x571   :  { %13193 = vst [vmem:[#allocation150_spill] sm:$0xff] %v11278_v8  ;;  %13194 = vst [vmem:[#allocation151_spill] sm:$0xff] %v11280_v35  ;;  %v11282_v7 = vpop.f32.mrb[143].mxu0  ;;  %3794 = vmax.xlane.f32.xlu0 %v3678_v40  ;;  %v11291_v8 = vpop.xlane.xlu0 %2902 }
 0x572   :  { %13195 = vst [vmem:[#allocation152_spill] sm:$0xff] %v11282_v7  ;;  %13199 = vst [vmem:[#allocation58_spill] sm:$0xff] %v11291_v8  ;;  %v13200_v8 = vld [vmem:[#allocation49_spill] sm:$0xff] }
 0x573   :  { %v7788_v0 = vpop.f32.mrb[144].mxu1 }
 0x574   :  { %v3902_v12 = vadd.f32 %v7788_v0, %v13198_v49  ;;  %v7908_v22 = vpop.f32.mrb[144].mxu0  ;;  %v3896_v42 = vpop.f32.mrb[145].mxu1  ;;  %3350 = vmax.xlane.f32.xlu1 %v3243_v33  ;;  %v3688_v0 = vadd.f32 %v11191_v26, %v10251_v53 }
 0x575   :  { %v4352_v3 = vadd.f32 %v7908_v22, %v13198_v49  ;;  %v3897_v40 = vadd.f32 %v3896_v42, %v13038_v58  ;;  %v4346_v7 = vpop.f32.mrb[145].mxu0  ;;  %3348 = vmax.xlane.f32.xlu0 %v3238_v31  ;;  %v11301_v42 = vpop.xlane.xlu1 %2458 }
 0x576   :  { %v3976_v59 = vmax.f32 %v3902_v12, 0.0  ;;  %v4347_v54 = vadd.f32 %v4346_v7, %v13038_v58 }
 0x577   :  { %v4426_v35 = vmax.f32 %v4352_v3, 0.0  ;;  %v3975_v20 = vmax.f32 %v3897_v40, 0.0  ;;  %v7791_v33 = vpop.f32.mrb[146].mxu1  ;;  %v11306_v40 = vpop.xlane.xlu0 %2456 }
 0x578   :  { %v4425_v23 = vmax.f32 %v4347_v54, 0.0  ;;  %v3912_v56 = vadd.f32 %v7791_v33, %v13200_v8  ;;  %v7911_v22 = vpop.f32.mrb[146].mxu0  ;;  %v3906_v49 = vpop.f32.mrb[147].mxu1  ;;  %3800 = vmax.xlane.f32.xlu1 %v3693_v25  ;;  %v3253_v54 = vadd.f32 %v11197_v36, %v10269_v18 }
 0x579   :  { %v8314_v31 = vpack.c.bf16 %v3976_v59, %v3975_v20  ;;  %v4362_v38 = vadd.f32 %v7911_v22, %v13200_v8  ;;  %v3907_v12 = vadd.f32 %v3906_v49, %v9744_v4  ;;  %v4356_v58 = vpop.f32.mrb[147].mxu0  ;;  %3798 = vmax.xlane.f32.xlu0 %v3688_v0  ;;  %v3248_v8 = vadd.f32 %v11201_v60, %v10271_v44  ;;  %v11316_v60 = vpop.xlane.xlu1 %2908 }
 0x57a   :  { %v8362_v7 = vpack.c.bf16 %v4426_v35, %v4425_v23  ;;  %v3978_v26 = vmax.f32 %v3912_v56, 0.0  ;;  %v4357_v3 = vadd.f32 %v4356_v58, %v9744_v4 }
 0x57b   :  { %v4428_v33 = vmax.f32 %v4362_v38, 0.0  ;;  %v3977_v25 = vmax.f32 %v3907_v12, 0.0  ;;  %v7794_v53 = vpop.f32.mrb[148].mxu1  ;;  %8315 = vmatprep.subr.bf16.mxu1 %v8314_v31 }
 0x57c   :  { %v4427_v20 = vmax.f32 %v4357_v3, 0.0  ;;  %v3922_v59 = vadd.f32 %v7794_v53, %v9746_v19  ;;  %v7914_v0 = vpop.f32.mrb[148].mxu0  ;;  %8363 = vmatprep.subr.bf16.mxu0 %v8362_v7  ;;  %v3916_v56 = vpop.f32.mrb[149].mxu1  ;;  %8317 = vmatpush3.bf16.msra.mxu1 %v8314_v31  ;;  %v3703_v53 = vadd.f32 %v11199_v21, %v10269_v18  ;;  %v13249_v18 = vld [vmem:[#allocation91_spill] sm:$0xff] }
 0x57d   :  { %v8318_v4 = vpack.c.bf16 %v3978_v26, %v3977_v25  ;;  %v4372_v23 = vadd.f32 %v7914_v0, %v9746_v19  ;;  %v3917_v35 = vadd.f32 %v3916_v56, %v9748_v43  ;;  %v4366_v36 = vpop.f32.mrb[149].mxu0  ;;  %8365 = vmatpush3.bf16.msra.mxu0 %v8362_v7  ;;  %3354 = vmax.xlane.f32.xlu1 %v3253_v54 }
 0x57e   :  { %v8366_v22 = vpack.c.bf16 %v4428_v33, %v4427_v20  ;;  %v3980_v49 = vmax.f32 %v3922_v59, 0.0  ;;  %v4367_v38 = vadd.f32 %v4366_v36, %v9748_v43  ;;  %3352 = vmax.xlane.f32.xlu0 %v3248_v8  ;;  %v3698_v19 = vadd.f32 %v11203_v2, %v10271_v44  ;;  %v11323_v43 = vpop.xlane.xlu0 %2906  ;;  %v8490_v44 = vld [vmem:[%s12444_s5 + $0xe8] sm:$0xff] }
 0x57f   :  { %v4430_v12 = vmax.f32 %v4372_v23, 0.0  ;;  %v3979_v31 = vmax.f32 %v3917_v35, 0.0  ;;  %v7797_v58 = vpop.f32.mrb[150].mxu1  ;;  %8319 = vmatprep.subr.bf16.mxu1 %v8318_v4  ;;  %v3263_v0 = vadd.f32 %v11209_v27, %v10289_v29 }
 0x580   :  { %v4429_v26 = vmax.f32 %v4367_v38, 0.0  ;;  %v3932_v7 = vadd.f32 %v7797_v58, %v9750_v30  ;;  %v7917_v3 = vpop.f32.mrb[150].mxu0  ;;  %8367 = vmatprep.subr.bf16.mxu0 %v8366_v22  ;;  %v3926_v54 = vpop.f32.mrb[151].mxu1  ;;  %8321 = vmatpush3.bf16.msra.mxu1 %v8318_v4 }
 0x581   :  { %v8322_v33 = vpack.c.bf16 %v3980_v49, %v3979_v31  ;;  %v4382_v25 = vadd.f32 %v7917_v3, %v9750_v30  ;;  %v3927_v21 = vadd.f32 %v3926_v54, %v9752_v61  ;;  %v4376_v8 = vpop.f32.mrb[151].mxu0  ;;  %8369 = vmatpush3.bf16.msra.mxu0 %v8366_v22  ;;  %3804 = vmax.xlane.f32.xlu1 %v3703_v53 }
 0x582   :  { %v8370_v20 = vpack.c.bf16 %v4430_v12, %v4429_v26  ;;  %v3982_v59 = vmax.f32 %v3932_v7, 0.0  ;;  %v4377_v2 = vadd.f32 %v4376_v8, %v9752_v61  ;;  %3802 = vmax.xlane.f32.xlu0 %v3698_v19  ;;  %v3258_v30 = vadd.f32 %v11213_v24, %v10291_v48  ;;  %v11335_v12 = vpop.xlane.xlu1 %2462  ;;  %v11338_v19 = vpop.xlane.xlu0 %2460 }
 0x583   :  { %v4432_v56 = vmax.f32 %v4382_v25, 0.0  ;;  %v3981_v4 = vmax.f32 %v3927_v21, 0.0  ;;  %v7800_v23 = vpop.f32.mrb[152].mxu1  ;;  %8323 = vmatprep.subr.bf16.mxu1 %v8322_v33  ;;  %v3713_v26 = vadd.f32 %v11211_v10, %v10289_v29  ;;  %v3708_v54 = vadd.f32 %v11217_v32, %v10291_v48  ;;  %v13248_v29 = vld [vmem:[#allocation90_spill] sm:$0xff] }
 0x584   :  { %v4431_v35 = vmax.f32 %v4377_v2, 0.0  ;;  %v3942_v36 = vadd.f32 %v7800_v23, %v9758_v14  ;;  %v7920_v22 = vpop.f32.mrb[152].mxu0  ;;  %8371 = vmatprep.subr.bf16.mxu0 %v8370_v20  ;;  %v3936_v49 = vpop.f32.mrb[153].mxu1  ;;  %8325 = vmatpush3.bf16.msra.mxu1 %v8322_v33  ;;  %v3273_v32 = vadd.f32 %v11221_v46, %v10309_v57 }
 0x585   :  { %v8326_v38 = vpack.c.bf16 %v3982_v59, %v3981_v4  ;;  %v4392_v61 = vadd.f32 %v7920_v22, %v9758_v14  ;;  %v3937_v53 = vadd.f32 %v3936_v49, %v9760_v17  ;;  %v4386_v27 = vpop.f32.mrb[153].mxu0  ;;  %8373 = vmatpush3.bf16.msra.mxu0 %v8370_v20  ;;  %3358 = vmax.xlane.f32.xlu1 %v3263_v0 }
 0x586   :  { %v8374_v31 = vpack.c.bf16 %v4432_v56, %v4431_v35  ;;  %v3984_v58 = vmax.f32 %v3942_v36, 0.0  ;;  %v4387_v24 = vadd.f32 %v4386_v27, %v9760_v17  ;;  %3356 = vmax.xlane.f32.xlu0 %v3258_v30  ;;  %v11357_v27 = vpop.xlane.xlu0 %2910 }
 0x587   :  { %v4434_v7 = vmax.f32 %v4392_v61, 0.0  ;;  %v3983_v3 = vmax.f32 %v3937_v53, 0.0  ;;  %v7803_v14 = vpop.f32.mrb[154].mxu1  ;;  %8327 = vmatprep.subr.bf16.mxu1 %v8326_v38 }
 0x588   :  { %v4433_v33 = vmax.f32 %v4387_v24, 0.0  ;;  %v3952_v25 = vadd.f32 %v7803_v14, %v9770_v51  ;;  %v7923_v21 = vpop.f32.mrb[154].mxu0  ;;  %8375 = vmatprep.subr.bf16.mxu0 %v8374_v31  ;;  %v3946_v8 = vpop.f32.mrb[155].mxu1  ;;  %8329 = vmatpush3.bf16.msra.mxu1 %v8326_v38  ;;  %v3723_v24 = vadd.f32 %v11223_v41, %v10309_v57 }
 0x589   :  { %v8330_v17 = vpack.c.bf16 %v3984_v58, %v3983_v3  ;;  %v4402_v20 = vadd.f32 %v7923_v21, %v9770_v51  ;;  %v3947_v59 = vadd.f32 %v3946_v8, %v9772_v39  ;;  %v4396_v10 = vpop.f32.mrb[155].mxu0  ;;  %8377 = vmatpush3.bf16.msra.mxu0 %v8374_v31  ;;  %3808 = vmax.xlane.f32.xlu1 %v3713_v26  ;;  %v11353_v38 = vpop.xlane.xlu1 %2912 }
 0x58a   :  { %v8378_v2 = vpack.c.bf16 %v4434_v7, %v4433_v33  ;;  %v3986_v0 = vmax.f32 %v3952_v25, 0.0  ;;  %v4397_v56 = vadd.f32 %v4396_v10, %v9772_v39  ;;  %3806 = vmax.xlane.f32.xlu0 %v3708_v54  ;;  %v3268_v51 = vadd.f32 %v11225_v50, %v10311_v16  ;;  %13201 = vst [vmem:[#allocation49_spill] sm:$0xff] %v11353_v38 }
 0x58b   :  { %v4436_v4 = vmax.f32 %v4402_v20, 0.0  ;;  %v3985_v23 = vmax.f32 %v3947_v59, 0.0  ;;  %v7806_v30 = vpop.f32.mrb[156].mxu1  ;;  %8331 = vmatprep.subr.bf16.mxu1 %v8330_v17  ;;  %v3283_v10 = vadd.f32 %v11235_v28, %v10329_v9  ;;  %v3728_v28 = vadd.f32 %v11241_v62, %v10331_v6 }
 0x58c   :  { %v4435_v35 = vmax.f32 %v4397_v56, 0.0  ;;  %v3962_v36 = vadd.f32 %v7806_v30, %v9782_v1  ;;  %v7926_v22 = vpop.f32.mrb[156].mxu0  ;;  %8379 = vmatprep.subr.bf16.mxu0 %v8378_v2  ;;  %v3956_v49 = vpop.f32.mrb[157].mxu1  ;;  %8333 = vmatpush3.bf16.msra.mxu1 %v8330_v17  ;;  %v3288_v62 = vadd.f32 %v11251_v47, %v10347_v52 }
 0x58d   :  { %v8334_v39 = vpack.c.bf16 %v3986_v0, %v3985_v23  ;;  %v4412_v61 = vadd.f32 %v7926_v22, %v9782_v1  ;;  %v3957_v46 = vadd.f32 %v3956_v49, %v9784_v63  ;;  %v4406_v53 = vpop.f32.mrb[157].mxu0  ;;  %8381 = vmatpush3.bf16.msra.mxu0 %v8378_v2  ;;  %3362 = vmax.xlane.f32.xlu1 %v3273_v32  ;;  %v11372_v56 = vpop.xlane.xlu0 %2464  ;;  %v8464_v49 = vld [vmem:[%s12444_s5 + $0x18] sm:$0xff] }
 0x58e   :  { %v8382_v50 = vpack.c.bf16 %v4436_v4, %v4435_v35  ;;  %v3988_v31 = vmax.f32 %v3962_v36, 0.0  ;;  %v4407_v58 = vadd.f32 %v4406_v53, %v9784_v63  ;;  %3360 = vmax.xlane.f32.xlu0 %v3268_v51  ;;  %v3718_v1 = vadd.f32 %v11229_v45, %v10311_v16  ;;  %v11368_v45 = vpop.xlane.xlu1 %2466  ;;  %v8463_v35 = vld [vmem:[%s12444_s5 + $0x10] sm:$0xff]  ;;  %v13208_v53 = vld [vmem:[#allocation57_spill] sm:$0xff] }
 0x58f   :  { %v4438_v26 = vmax.f32 %v4412_v61, 0.0  ;;  %v3987_v7 = vmax.f32 %v3957_v46, 0.0  ;;  %v7809_v3 = vpop.f32.mrb[158].mxu1  ;;  %8335 = vmatprep.subr.bf16.mxu1 %v8334_v39  ;;  %13202 = vst [vmem:[#allocation154_spill] sm:$0xff] %v11368_v45  ;;  %v3733_v23 = vadd.f32 %v11237_v5, %v10329_v9  ;;  %v3293_v51 = vadd.f32 %v11247_v34, %v10345_v13  ;;  %v8462_v5 = vld [vmem:[%s12444_s5 + $0x8] sm:$0xff]  ;;  %v13205_v34 = vld [vmem:[#allocation140_spill] sm:$0xff] }
 0x590   :  { %v4437_v14 = vmax.f32 %v4407_v58, 0.0  ;;  %v3972_v54 = vadd.f32 %v7809_v3, %v9794_v11  ;;  %v7929_v33 = vpop.f32.mrb[158].mxu0  ;;  %8383 = vmatprep.subr.bf16.mxu0 %v8382_v50  ;;  %v3966_v25 = vpop.f32.mrb[159].mxu1  ;;  %8337 = vmatpush3.bf16.msra.mxu1 %v8334_v39  ;;  %v3743_v22 = vadd.f32 %v13205_v34, %v10345_v13  ;;  %v13207_v39 = vld [vmem:[#allocation142_spill] sm:$0xff]  ;;  %v8465_v46 = vld [vmem:[%s12444_s5 + $0x20] sm:$0xff]  ;;  %v8466_v58 = vld [vmem:[%s12444_s5 + $0x28] sm:$0xff] }
 0x591   :  { %v8338_v21 = vpack.c.bf16 %v3988_v31, %v3987_v7  ;;  %v4422_v63 = vadd.f32 %v7929_v33, %v9794_v11  ;;  %v3967_v8 = vadd.f32 %v3966_v25, %v9796_v37  ;;  %v4416_v41 = vpop.f32.mrb[159].mxu0  ;;  %8385 = vmatpush3.bf16.msra.mxu0 %v8382_v50  ;;  %3812 = vmax.xlane.f32.xlu1 %v3723_v24  ;;  %v13209_v50 = vld [vmem:[#allocation143_spill] sm:$0xff]  ;;  %v13210_v24 = vld [vmem:[#allocation50_spill] sm:$0xff] }
 0x592   :  { %v8386_v17 = vpack.c.bf16 %v4438_v26, %v4437_v14  ;;  %v3990_v20 = vmax.f32 %v3972_v54, 0.0  ;;  %v4417_v59 = vadd.f32 %v4416_v41, %v9796_v37  ;;  %3810 = vmax.xlane.f32.xlu0 %v3718_v1  ;;  %v3278_v11 = vadd.f32 %v11239_v55, %v10331_v6  ;;  %v11380_v30 = vpop.xlane.xlu1 %2916  ;;  %v11382_v55 = vpop.xlane.xlu0 %2914  ;;  %v13211_v26 = vld [vmem:[#allocation145_spill] sm:$0xff]  ;;  %v8467_v3 = vld [vmem:[%s12444_s5 + $0x30] sm:$0xff]  ;;  %v13214_v54 = vld [vmem:[#allocation144_spill] sm:$0xff] }
 0x593   :  { %v4440_v2 = vmax.f32 %v4422_v63, 0.0  ;;  %v3989_v0 = vmax.f32 %v3967_v8, 0.0  ;;  %8339 = vmatprep.subr.bf16.mxu1 %v8338_v21  ;;  %13203 = vst [vmem:[#allocation155_spill] sm:$0xff] %v11380_v30  ;;  %v3738_v61 = vadd.f32 %v13207_v39, %v10347_v52  ;;  %v3303_v31 = vadd.f32 %v13209_v50, %v13208_v53  ;;  %v8468_v25 = vld [vmem:[%s12444_s5 + $0x38] sm:$0xff]  ;;  %v8469_v8 = vld [vmem:[%s12444_s5 + $0x40] sm:$0xff] }
 0x594   :  { %v4439_v32 = vmax.f32 %v4417_v59, 0.0  ;;  %8387 = vmatprep.subr.bf16.mxu0 %v8386_v17  ;;  %8341 = vmatpush3.bf16.msra.mxu1 %v8338_v21  ;;  %v3298_v7 = vadd.f32 %v13211_v26, %v13210_v24  ;;  %v3753_v33 = vadd.f32 %v13214_v54, %v13208_v53  ;;  %v13215_v21 = vld [vmem:[#allocation147_spill] sm:$0xff]  ;;  %v8477_v50 = vld [vmem:[%s12444_s5 + $0x80] sm:$0xff]  ;;  %v8478_v26 = vld [vmem:[%s12444_s5 + $0x88] sm:$0xff] }
 0x595   :  { %v8342_v4 = vpack.c.bf16 %v3990_v20, %v3989_v0  ;;  %8389 = vmatpush3.bf16.msra.mxu0 %v8386_v17  ;;  %3366 = vmax.xlane.f32.xlu1 %v3283_v10  ;;  %v3748_v63 = vadd.f32 %v13215_v21, %v13210_v24  ;;  %v13217_v17 = vld [vmem:[#allocation59_spill] sm:$0xff]  ;;  %v13218_v20 = vld [vmem:[#allocation149_spill] sm:$0xff]  ;;  %v13220_v0 = vld [vmem:[#allocation60_spill] sm:$0xff] }
 0x596   :  { %v8390_v37 = vpack.c.bf16 %v4440_v2, %v4439_v32  ;;  %3364 = vmax.xlane.f32.xlu0 %v3278_v11  ;;  %v11394_v36 = vpop.xlane.xlu1 %2470  ;;  %v11401_v47 = vpop.xlane.xlu0 %2468  ;;  %v3313_v59 = vadd.f32 %v13218_v20, %v13217_v17  ;;  %v8470_v10 = vld [vmem:[%s12444_s5 + $0x48] sm:$0xff]  ;;  %v13221_v11 = vld [vmem:[#allocation151_spill] sm:$0xff]  ;;  %v13231_v21 = vld [vmem:[#allocation6_spill] sm:$0xff] }
 0x597   :  { %8343 = vmatprep.subr.bf16.mxu1 %v8342_v4  ;;  %13204 = vst [vmem:[#allocation156_spill] sm:$0xff] %v11394_v36  ;;  %13206 = vst [vmem:[#allocation140_spill] sm:$0xff] %v11401_v47  ;;  %v3308_v32 = vadd.f32 %v13221_v11, %v13220_v0  ;;  %v8480_v20 = vld [vmem:[%s12444_s5 + $0x98] sm:$0xff]  ;;  %v8481_v11 = vld [vmem:[%s12444_s5 + $0xa0] sm:$0xff] }
 0x598   :  { %8391 = vmatprep.subr.bf16.mxu0 %v8390_v37  ;;  %8345 = vmatpush3.bf16.msra.mxu1 %v8342_v4  ;;  %v8471_v4 = vld [vmem:[%s12444_s5 + $0x50] sm:$0xff]  ;;  %v13240_v52 = vld [vmem:[#allocation64_spill] sm:$0xff] }
 0x599   :  { %8393 = vmatpush3.bf16.msra.mxu0 %v8390_v37  ;;  %3816 = vmax.xlane.f32.xlu1 %v3733_v23  ;;  %v13222_v37 = vld [vmem:[#allocation150_spill] sm:$0xff] }
 0x59a   :  { %3814 = vmax.xlane.f32.xlu0 %v3728_v28  ;;  %v11418_v1 = vpop.xlane.xlu1 %2920  ;;  %v11420_v14 = vpop.xlane.xlu0 %2918  ;;  %v3763_v23 = vadd.f32 %v13222_v37, %v13217_v17  ;;  %v8472_v28 = vld [vmem:[%s12444_s5 + $0x58] sm:$0xff] }
 0x59b   :  { %7843 = vmatmul.mubr.f32.vlgmr.msra.gmra.mrb[160].mxu1 %v8462_v5  ;;  %13212 = vst [vmem:[#allocation142_spill] sm:$0xff] %v11418_v1  ;;  %13213 = vst [vmem:[#allocation143_spill] sm:$0xff] %v11420_v14  ;;  %v13263_v14 = vld [vmem:[#allocation61_spill] sm:$0xff] }
 0x59c   :  { %7963 = vmatmul.mubr.f32.vlgmr.msra.gmra.mrb[160].mxu0 %v8462_v5  ;;  %7845 = vmatprep.mubr.f32.mxu1 %v8463_v35 }
 0x59d   :  { %7965 = vmatprep.mubr.f32.mxu0 %v8463_v35  ;;  %3370 = vmax.xlane.f32.xlu1 %v3293_v51  ;;  %v13223_v51 = vld [vmem:[#allocation152_spill] sm:$0xff] }
 0x59e   :  { %3368 = vmax.xlane.f32.xlu0 %v3288_v62  ;;  %v11432_v41 = vpop.xlane.xlu1 %2474  ;;  %v11439_v2 = vpop.xlane.xlu0 %2472  ;;  %v3758_v5 = vadd.f32 %v13223_v51, %v13220_v0  ;;  %v8473_v62 = vld [vmem:[%s12444_s5 + $0x60] sm:$0xff] }
 0x59f   :  { %7846 = vmatmul.mubr.f32.gmra.mrb[162].mxu1 %v8464_v49  ;;  %13216 = vst [vmem:[#allocation145_spill] sm:$0xff] %v11432_v41  ;;  %13219 = vst [vmem:[#allocation144_spill] sm:$0xff] %v11439_v2  ;;  %v13255_v41 = vld [vmem:[#allocation66_spill] sm:$0xff] }
 0x5a0   :  { %7966 = vmatmul.mubr.f32.gmra.mrb[162].mxu0 %v8464_v49  ;;  %7848 = vmatprep.mubr.f32.mxu1 %v8465_v46  ;;  %v8475_v49 = vld [vmem:[%s12444_s5 + $0x70] sm:$0xff] }
 0x5a1   :  { %7968 = vmatprep.mubr.f32.mxu0 %v8465_v46  ;;  %3820 = vmax.xlane.f32.xlu1 %v3743_v22  ;;  %v8474_v22 = vld [vmem:[%s12444_s5 + $0x68] sm:$0xff] }
 0x5a2   :  { %3818 = vmax.xlane.f32.xlu0 %v3738_v61  ;;  %v11456_v35 = vpop.xlane.xlu1 %2924  ;;  %v11458_v34 = vpop.xlane.xlu0 %2922  ;;  %v8476_v61 = vld [vmem:[%s12444_s5 + $0x78] sm:$0xff] }
 0x5a3   :  { %7849 = vmatmul.mubr.f32.gmra.mrb[164].mxu1 %v8466_v58  ;;  %13224 = vst [vmem:[#allocation147_spill] sm:$0xff] %v11456_v35  ;;  %13225 = vst [vmem:[#allocation149_spill] sm:$0xff] %v11458_v34  ;;  %v13254_v35 = vld [vmem:[#allocation65_spill] sm:$0xff]  ;;  %v13261_v34 = vld [vmem:[#allocation112_spill] sm:$0xff] }
 0x5a4   :  { %7969 = vmatmul.mubr.f32.gmra.mrb[164].mxu0 %v8466_v58  ;;  %7851 = vmatprep.mubr.f32.mxu1 %v8467_v3 }
 0x5a5   :  { %7971 = vmatprep.mubr.f32.mxu0 %v8467_v3  ;;  %3374 = vmax.xlane.f32.xlu1 %v3303_v31  ;;  %v13228_v31 = vlaneseq  ;;  %v8479_v3 = vld [vmem:[%s12444_s5 + $0x90] sm:$0xff] }
 0x5a6   :  { %3372 = vmax.xlane.f32.xlu0 %v3298_v7  ;;  %v11466_v39 = vpop.xlane.xlu1 %2478  ;;  %v11471_v46 = vpop.xlane.xlu0 %2476 }
 0x5a7   :  { %7852 = vmatmul.mubr.f32.gmra.mrb[166].mxu1 %v8468_v25  ;;  %13226 = vst [vmem:[#allocation151_spill] sm:$0xff] %v11466_v39  ;;  %13227 = vst [vmem:[#allocation150_spill] sm:$0xff] %v11471_v46  ;;  %v11477_v58 = vand.u32 127, %v13228_v31  ;;  %v8483_v31 = vld [vmem:[%s12444_s5 + $0xb0] sm:$0xff] }
 0x5a8   :  { %7972 = vmatmul.mubr.f32.gmra.mrb[166].mxu0 %v8468_v25  ;;  %7854 = vmatprep.mubr.f32.mxu1 %v8469_v8 }
 0x5a9   :  { %7974 = vmatprep.mubr.f32.mxu0 %v8469_v8  ;;  %3824 = vmax.xlane.f32.xlu1 %v3753_v33  ;;  %v4775_v7 = vadd.s32 4294967280, %v11477_v58  ;;  %v4768_v54 = vadd.s32 4294967288, %v11477_v58  ;;  %v4782_v8 = vadd.s32 4294967272, %v11477_v58  ;;  %v4796_v37 = vadd.s32 4294967256, %v11477_v58 }
 0x5aa   :  { %3822 = vmax.xlane.f32.xlu0 %v3748_v63  ;;  %v11487_v33 = vpop.xlane.xlu1 %2928  ;;  %v11489_v25 = vpop.xlane.xlu0 %2926  ;;  %v11493_v63 = vsub.s32 %v11477_v58, %v13231_v21  ;;  %v4859_v39 = vadd.s32 4294967184, %v11477_v58 }
 0x5ab   :  { %7855 = vmatmul.mubr.f32.gmra.mrb[168].mxu1 %v8470_v10  ;;  %13229 = vst [vmem:[#allocation152_spill] sm:$0xff] %v11487_v33  ;;  %13230 = vst [vmem:[#allocation157_spill] sm:$0xff] %v11489_v25 }
 0x5ac   :  { %7975 = vmatmul.mubr.f32.gmra.mrb[168].mxu0 %v8470_v10  ;;  %7857 = vmatprep.mubr.f32.mxu1 %v8471_v4  ;;  %v4789_v10 = vadd.s32 4294967264, %v11477_v58 }
 0x5ad   :  { %7977 = vmatprep.mubr.f32.mxu0 %v8471_v4  ;;  %3378 = vmax.xlane.f32.xlu1 %v3313_v59  ;;  %v11500_v59 = vsub.s32 %v4775_v7, %v13231_v21 }
 0x5ae   :  { %3376 = vmax.xlane.f32.xlu0 %v3308_v32  ;;  %v11507_v32 = vsub.s32 %v4768_v54, %v13231_v21  ;;  %v13235_v54 = vld [vmem:[#allocation67_spill] sm:$0xff] }
 0x5af   :  { %7858 = vmatmul.mubr.f32.gmra.mrb[170].mxu1 %v8472_v28  ;;  %v5382_v36 = vrot.slane %v13261_v34, %v11500_v59 }
 0x5b0   :  { %7978 = vmatmul.mubr.f32.gmra.mrb[170].mxu0 %v8472_v28  ;;  %7860 = vmatprep.mubr.f32.mxu1 %v8473_v62  ;;  %v13232_v28 = vld [vmem:[#allocation55_spill] sm:$0xff] }
 0x5b1   :  { %7980 = vmatprep.mubr.f32.mxu0 %v8473_v62  ;;  %3828 = vmax.xlane.f32.xlu1 %v3763_v23  ;;  %v4767_v51 = vrot.slane %v13232_v28, %v11493_v63  ;;  %v4803_v62 = vadd.s32 4294967248, %v11477_v58 }
 0x5b2   :  { %3826 = vmax.xlane.f32.xlu0 %v3758_v5  ;;  %v11517_v5 = vsub.s32 %v4782_v8, %v13231_v21  ;;  %v4989_v8 = vrot.slane %v13235_v54, %v11493_v63  ;;  %v13238_v54 = vld [vmem:[#allocation46_spill] sm:$0xff] }
 0x5b3   :  { %7861 = vmatmul.mubr.f32.gmra.mrb[172].mxu1 %v8474_v22  ;;  %v11549_v0 = vsub.s32 %v4803_v62, %v13231_v21  ;;  %v4993_v17 = vrot.slane %v13238_v54, %v11507_v32  ;;  %v8485_v62 = vld [vmem:[%s12444_s5 + $0xc0] sm:$0xff] }
 0x5b4   :  { %7981 = vmatmul.mubr.f32.gmra.mrb[172].mxu0 %v8474_v22  ;;  %7863 = vmatprep.mubr.f32.mxu1 %v8475_v49  ;;  %v8482_v22 = vld [vmem:[%s12444_s5 + $0xa8] sm:$0xff]  ;;  %v5003_v13 = vrot.slane %v13240_v52, %v11517_v5  ;;  %v8487_v52 = vld [vmem:[%s12444_s5 + $0xd0] sm:$0xff] }
 0x5b5   :  { %7983 = vmatprep.mubr.f32.mxu0 %v8475_v49  ;;  %v13233_v49 = vld [vmem:[#allocation34_spill] sm:$0xff]  ;;  %v4994_v54 = vsel %vm4773_vm1, %v4993_v17, %v4989_v8  ;;  %v8486_v17 = vld [vmem:[%s12444_s5 + $0xc8] sm:$0xff] }
 0x5b7   :  { %7864 = vmatmul.mubr.f32.gmra.mrb[174].mxu1 %v8476_v61 }
 0x5b8   :  { %7984 = vmatmul.mubr.f32.gmra.mrb[174].mxu0 %v8476_v61  ;;  %7866 = vmatprep.mubr.f32.mxu1 %v8477_v50  ;;  %v4779_v61 = vrot.slane %v13233_v49, %v11500_v59 }
 0x5b9   :  { %7986 = vmatprep.mubr.f32.mxu0 %v8477_v50  ;;  %v11526_v50 = vsub.s32 %v4789_v10, %v13231_v21  ;;  %v4810_v10 = vadd.s32 4294967240, %v11477_v58 }
 0x5bb   :  { %7867 = vmatmul.mubr.f32.gmra.mrb[176].mxu1 %v8478_v26 }
 0x5bc   :  { %7987 = vmatmul.mubr.f32.gmra.mrb[176].mxu0 %v8478_v26  ;;  %7869 = vmatprep.mubr.f32.mxu1 %v8479_v3  ;;  %v13234_v26 = vld [vmem:[#allocation37_spill] sm:$0xff] }
 0x5bd   :  { %7989 = vmatprep.mubr.f32.mxu0 %v8479_v3  ;;  %v4772_v7 = vrot.slane %v13234_v26, %v11507_v32  ;;  %v13237_v26 = vld [vmem:[#allocation56_spill] sm:$0xff] }
 0x5bf   :  { %7870 = vmatmul.mubr.f32.gmra.mrb[178].mxu1 %v8480_v20  ;;  %v4774_v28 = vsel %vm4773_vm1, %v4772_v7, %v4767_v51  ;;  %v13239_v51 = vld [vmem:[#allocation22_spill] sm:$0xff] }
 0x5c0   :  { %7990 = vmatmul.mubr.f32.gmra.mrb[178].mxu0 %v8480_v20  ;;  %7872 = vmatprep.mubr.f32.mxu1 %v8481_v11  ;;  %v11538_v20 = vsub.s32 %v4796_v37, %v13231_v21  ;;  %v8484_v37 = vld [vmem:[%s12444_s5 + $0xb8] sm:$0xff]  ;;  %v4781_v24 = vsel %vm12704_vm2, %v4779_v61, %v4774_v28  ;;  %v4793_v7 = vrot.slane %v13239_v51, %v11526_v50  ;;  %v4824_v28 = vadd.s32 4294967224, %v11477_v58 }
 0x5c1   :  { %7992 = vmatprep.mubr.f32.mxu0 %v8481_v11  ;;  %v11509_v4 = vpop.xlane.xlu1 %3318  ;;  %v11567_v61 = vsub.s32 %v4810_v10, %v13231_v21  ;;  %v13242_v10 = vld [vmem:[#allocation9_spill] sm:$0xff] }
 0x5c2   :  { %v11512_v23 = vpop.xlane.xlu0 %3316  ;;  %v5008_v9 = vrot.slane %v13242_v10, %v11526_v50 }
 0x5c3   :  { %7873 = vmatmul.mubr.f32.gmra.mrb[180].mxu1 %v8482_v22 }
 0x5c4   :  { %7993 = vmatmul.mubr.f32.gmra.mrb[180].mxu0 %v8482_v22  ;;  %7875 = vmatprep.mubr.f32.mxu1 %v8483_v31  ;;  %v13236_v22 = vld [vmem:[#allocation17_spill] sm:$0xff] }
 0x5c5   :  { %7995 = vmatprep.mubr.f32.mxu0 %v8483_v31  ;;  %v11533_v3 = vpop.xlane.xlu1 %3768  ;;  %v4786_v49 = vrot.slane %v13236_v22, %v11517_v5  ;;  %v4998_v31 = vrot.slane %v13237_v26, %v11500_v59  ;;  %v4817_v22 = vadd.s32 4294967232, %v11477_v58 }
 0x5c6   :  { %v11541_v11 = vpop.xlane.xlu0 %3766 }
 0x5c7   :  { %7876 = vmatmul.mubr.f32.gmra.mrb[182].mxu1 %v8484_v37  ;;  %v4999_v53 = vsel %vm12704_vm2, %v4998_v31, %v4994_v54  ;;  %v11590_v31 = vsub.s32 %v4817_v22, %v13231_v21  ;;  %v4831_v54 = vadd.s32 4294967216, %v11477_v58  ;;  %v13245_v22 = vld [vmem:[#allocation88_spill] sm:$0xff] }
 0x5c8   :  { %7996 = vmatmul.mubr.f32.gmra.mrb[182].mxu0 %v8484_v37  ;;  %7878 = vmatprep.mubr.f32.mxu1 %v8485_v62  ;;  %v4788_v37 = vsel %vm4787_vm3, %v4786_v49, %v4781_v24  ;;  %v13243_v24 = vld [vmem:[#allocation87_spill] sm:$0xff]  ;;  %v4814_v57 = vrot.slane %v13245_v22, %v11567_v61 }
 0x5c9   :  { %7998 = vmatprep.mubr.f32.mxu0 %v8485_v62  ;;  %v11563_v26 = vpop.xlane.xlu1 %3322  ;;  %v13241_v62 = vld [vmem:[#allocation85_spill] sm:$0xff]  ;;  %v4795_v8 = vsel %vm12705_vm4, %v4793_v7, %v4788_v37  ;;  %v4807_v49 = vrot.slane %v13243_v24, %v11549_v0  ;;  %v11596_v37 = vsub.s32 %v4824_v28, %v13231_v21  ;;  %v13244_v24 = vld [vmem:[#allocation86_spill] sm:$0xff]  ;;  %v11619_v22 = vsub.s32 %v4831_v54, %v13231_v21 }
 0x5ca   :  { %v11570_v51 = vpop.xlane.xlu0 %3320  ;;  %v4800_v6 = vrot.slane %v13241_v62, %v11538_v20  ;;  %v5013_v16 = vrot.slane %v13244_v24, %v11538_v20  ;;  %v4852_v54 = vadd.s32 4294967192, %v11477_v58 }
 0x5cb   :  { %7879 = vmatmul.mubr.f32.gmra.mrb[184].mxu1 %v8486_v17  ;;  %v4828_v15 = vrot.slane %v13249_v18, %v11596_v37  ;;  %v5038_v25 = vrot.slane %v13254_v35, %v11619_v22  ;;  %v13260_v35 = vld [vmem:[#allocation110_spill] sm:$0xff] }
 0x5cc   :  { %7999 = vmatmul.mubr.f32.gmra.mrb[184].mxu0 %v8486_v17  ;;  %7881 = vmatprep.mubr.f32.mxu1 %v8487_v52  ;;  %v5004_v17 = vsel %vm4787_vm3, %v5003_v13, %v4999_v53  ;;  %v4802_v10 = vsel %vm4801_vm5, %v4800_v6, %v4795_v8  ;;  %v13246_v13 = vld [vmem:[#allocation89_spill] sm:$0xff]  ;;  %v8489_v6 = vld [vmem:[%s12444_s5 + $0xe0] sm:$0xff] }
 0x5cd   :  { %8001 = vmatprep.mubr.f32.mxu0 %v8487_v52  ;;  %v11593_v7 = vpop.xlane.xlu1 %3772  ;;  %v8488_v52 = vld [vmem:[%s12444_s5 + $0xd8] sm:$0xff]  ;;  %v5009_v28 = vsel %vm12705_vm4, %v5008_v9, %v5004_v17  ;;  %v4809_v48 = vsel %vm12708_vm6, %v4807_v49, %v4802_v10  ;;  %v5018_v53 = vrot.slane %v13246_v13, %v11549_v0  ;;  %v13247_v8 = vld [vmem:[#allocation92_spill] sm:$0xff]  ;;  %v4838_v9 = vadd.s32 4294967208, %v11477_v58 }
 0x5ce   :  { %v11598_v62 = vpop.xlane.xlu0 %3770  ;;  %v4821_v24 = vrot.slane %v13247_v8, %v11590_v31  ;;  %v4845_v49 = vadd.s32 4294967200, %v11477_v58  ;;  %v4816_v13 = vsel %vm12706_vm7, %v4814_v57, %v4809_v48  ;;  %v5023_v8 = vrot.slane %v13248_v29, %v11567_v61  ;;  %v8491_v29 = vld [vmem:[%s12444_s5 + $0xf0] sm:$0xff]  ;;  %v13251_v57 = vld [vmem:[#allocation29_spill] sm:$0xff] }
 0x5cf   :  { %7882 = vmatmul.mubr.f32.gmra.mrb[186].mxu1 %v8488_v52  ;;  %v4835_v33 = vrot.slane %v13251_v57, %v11619_v22 }
 0x5d0   :  { %8002 = vmatmul.mubr.f32.gmra.mrb[186].mxu0 %v8488_v52  ;;  %7884 = vmatprep.mubr.f32.mxu1 %v8489_v6  ;;  %v5014_v52 = vsel %vm4801_vm5, %v5013_v16, %v5009_v28  ;;  %v13250_v16 = vld [vmem:[#allocation94_spill] sm:$0xff]  ;;  %v4823_v48 = vsel %vm12707_vm8, %v4821_v24, %v4816_v13  ;;  %v11658_v24 = vsub.s32 %v4852_v54, %v13231_v21  ;;  %v13253_v54 = vld [vmem:[#allocation28_spill] sm:$0xff] }
 0x5d1   :  { %8004 = vmatprep.mubr.f32.mxu0 %v8489_v6  ;;  %v11623_v17 = vpop.xlane.xlu1 %3326  ;;  %v5019_v6 = vsel %vm12708_vm6, %v5018_v53, %v5014_v52  ;;  %v5028_v28 = vrot.slane %v13250_v16, %v11590_v31  ;;  %v11647_v53 = vsub.s32 %v4838_v9, %v13231_v21  ;;  %v11650_v52 = vsub.s32 %v4845_v49, %v13231_v21  ;;  %v8492_v9 = vld [vmem:[%s12444_s5 + $0xf8] sm:$0xff]  ;;  %s8520_s5 = smov [#allocation3]  }
 0x5d2   :  { %v11625_v10 = vpop.xlane.xlu0 %3324  ;;  %v5024_v16 = vsel %vm12706_vm7, %v5023_v8, %v5019_v6  ;;  %v4830_v49 = vsel %vm12700_vm9, %v4828_v15, %v4823_v48  ;;  %v4856_v45 = vrot.slane %v13263_v14, %v11658_v24  ;;  %v13265_v14 = vld [vmem:[#allocation116_spill] sm:$0xff]  ;;  %s6338_s18 = sshll.u32 %s8520_s5, 4  ;;  %s6339_s18 = int_to_ptr.vmem [resolvable:$true] %s6338_s18 }
 0x5d3   :  { %7885 = vmatmul.mubr.f32.gmra.mrb[188].mxu1 %v8490_v44  ;;  %v5029_v13 = vsel %vm12707_vm8, %v5028_v28, %v5024_v16  ;;  %v4837_v8 = vsel %vm12699_vm10, %v4835_v33, %v4830_v49  ;;  %v4842_v6 = vrot.slane %v13253_v54, %v11647_v53  ;;  %v4849_v46 = vrot.slane %v13255_v41, %v11650_v52  ;;  %v13256_v28 = vld [vmem:[#allocation105_spill] sm:$0xff]  ;;  %v13257_v16 = vld [vmem:[#allocation106_spill] sm:$0xff]  ;;  %v13259_v49 = vld [vmem:[#allocation108_spill] sm:$0xff]  ;;  %s8493_s6 = scalar_lea.vmem %s6339_s18, 256  ;;  %p8498_p1 = scmp.lt.s32.totalorder %s6339_s18, %s6339_s18 }
 0x5d4   :  { %8005 = vmatmul.mubr.f32.gmra.mrb[188].mxu0 %v8490_v44  ;;  %7887 = vmatprep.mubr.f32.mxu1 %v8491_v29  ;;  %v5185_v48 = vrot.slane %v13256_v28, %v11507_v32  ;;  %v5373_v54 = vrot.slane %v13259_v49, %v11493_v63  ;;  %v5190_v41 = vrot.slane %v13260_v35, %v11500_v59  ;;  %v13262_v49 = vld [vmem:[#allocation7_spill] sm:$0xff]  ;;  %p8494_p0 = scmp.ne.s32.totalorder %s6339_s18, %s8493_s6  ;;  %p8499_p2 = scmp.lt.s32.totalorder %s8493_s6, %s8493_s6 }
 0x5d5   :  { %8007 = vmatprep.mubr.f32.mxu0 %v8491_v29  ;;  %v11652_v18 = vpop.xlane.xlu1 %3776  ;;  %v13252_v29 = vld [vmem:[#allocation93_spill] sm:$0xff]  ;;  %v11692_v28 = vsub.s32 %v4859_v39, %v13231_v21  ;;  %v4844_v2 = vsel %vm12702_vm11, %v4842_v6, %v4837_v8  ;;  %v5043_v30 = vrot.slane %v13262_v49, %v11647_v53  ;;  %v13264_v8 = vld [vmem:[#allocation114_spill] sm:$0xff]  ;;  %v5392_v49 = vrot.slane %v13265_v14, %v11526_v50 }
 0x5d6   :  { %v11654_v44 = vpop.xlane.xlu0 %3774  ;;  %v5033_v57 = vrot.slane %v13252_v29, %v11596_v37  ;;  %v5181_v29 = vrot.slane %v13257_v16, %v11493_v63  ;;  %v4866_v16 = vadd.s32 4294967176, %v11477_v58  ;;  %v4851_v47 = vsel %vm12701_vm12, %v4849_v46, %v4844_v2  ;;  %v13267_v2 = vld [vmem:[#allocation111_spill] sm:$0xff]  ;;  %p8500_p3 = por %p8499_p2, %p8498_p1 }
 0x5d7   :  { %7888 = vmatmul.mubr.f32.gmra.mrb[190].mxu1 %v8492_v9  ;;  %v5200_v6 = vrot.slane %v13264_v8, %v11526_v50  ;;  %v5387_v46 = vrot.slane %v13267_v2, %v11517_v5  ;;  %v13272_v2 = vld [vmem:[#allocation115_spill] sm:$0xff] }
 0x5d8   :  { %8008 = vmatmul.mubr.f32.gmra.mrb[190].mxu0 %v8492_v9  ;;  %v13258_v9 = vld [vmem:[#allocation107_spill] sm:$0xff]  ;;  %v5186_v39 = vsel %vm4773_vm1, %v5185_v48, %v5181_v29  ;;  %v5569_v48 = vrot.slane %v11509_v4, %v11507_v32  ;;  %v5565_v29 = vrot.slane %v11512_v23, %v11493_v63  ;;  %v13269_v4 = vld [vmem:[#allocation113_spill] sm:$0xff]  ;;  %p8501_p4 = pnand %p8500_p3, %p8494_p0 }
 0x5d9   :  { %v11675_v15 = vpop.xlane.xlu1 %3330  ;;  %v5377_v33 = vrot.slane %v13258_v9, %v11507_v32  ;;  %v5034_v9 = vsel %vm12700_vm9, %v5033_v57, %v5029_v13  ;;  %v5191_v13 = vsel %vm12704_vm2, %v5190_v41, %v5186_v39  ;;  %v5574_v41 = vrot.slane %v11570_v51, %v11500_v59  ;;  %v13270_v51 = vld [vmem:[#allocation118_spill] sm:$0xff] }
 0x5da   :  { %v11685_v1 = vpop.xlane.xlu0 %3328  ;;  %v5039_v34 = vsel %vm12699_vm10, %v5038_v25, %v5034_v9  ;;  %v13266_v25 = vld [vmem:[#allocation109_spill] sm:$0xff]  ;;  %v5205_v14 = vrot.slane %v13269_v4, %v11538_v20  ;;  %v5766_v4 = vrot.slane %v11598_v62, %v11500_v59 }
 0x5db   :  { %v5378_v58 = vsel %vm4773_vm1, %v5377_v33, %v5373_v54  ;;  %v5195_v9 = vrot.slane %v13266_v25, %v11517_v5  ;;  %v11725_v33 = vsel %vm4857_vm13, %v4856_v45, %v4851_v47  ;;  %v11728_v54 = vsub.s32 %v4866_v16, %v13231_v21 }
 0x5dc   :  { %v5383_v57 = vsel %vm12704_vm2, %v5382_v36, %v5378_v58  ;;  %v5044_v36 = vsel %vm12702_vm11, %v5043_v30, %v5039_v34  ;;  %v13268_v58 = vld [vmem:[#allocation10_spill] sm:$0xff]  ;;  %v5210_v16 = vrot.slane %v13270_v51, %v11549_v0  ;;  %v13271_v34 = vld [vmem:[#allocation120_spill] sm:$0xff]  ;;  %v5579_v51 = vrot.slane %v11563_v26, %v11517_v5 }
 0x5dd   :  { %v11701_v35 = vpop.xlane.xlu1 %3780  ;;  %v5048_v8 = vrot.slane %v13268_v58, %v11650_v52  ;;  %v5196_v23 = vsel %vm4787_vm3, %v5195_v9, %v5191_v13  ;;  %v5388_v30 = vsel %vm4787_vm3, %v5387_v46, %v5383_v57  ;;  %v5402_v25 = vrot.slane %v13271_v34, %v11549_v0 }
 0x5de   :  { %v11707_v38 = vpop.xlane.xlu0 %3778  ;;  %v5201_v47 = vsel %vm12705_vm4, %v5200_v6, %v5196_v23  ;;  %v5393_v21 = vsel %vm12705_vm4, %v5392_v49, %v5388_v30  ;;  %v5397_v58 = vrot.slane %v13272_v2, %v11538_v20  ;;  %v5570_v13 = vsel %vm4773_vm1, %v5569_v48, %v5565_v29  ;;  %v13273_v49 = vld [vmem:[#allocation24_spill] sm:$0xff] }
 0x5df   :  { %v5761_v57 = vrot.slane %v11533_v3, %v11507_v32  ;;  %v5757_v6 = vrot.slane %v11541_v11, %v11493_v63  ;;  %v5575_v46 = vsel %vm12704_vm2, %v5574_v41, %v5570_v13  ;;  %v5584_v23 = vrot.slane %v11625_v10, %v11526_v50  ;;  %v13274_v48 = vld [vmem:[#allocation8_spill] sm:$0xff]  ;;  %v13275_v10 = vld [vmem:[#allocation122_spill] sm:$0xff] }
 0x5e0   :  { %v4863_v29 = vrot.slane %v13274_v48, %v11692_v28  ;;  %v5206_v3 = vsel %vm4801_vm5, %v5205_v14, %v5201_v47  ;;  %v5398_v11 = vsel %vm4801_vm5, %v5397_v58, %v5393_v21  ;;  %v5220_v2 = vrot.slane %v13275_v10, %v11590_v31  ;;  %v13276_v13 = vld [vmem:[#allocation124_spill] sm:$0xff]  ;;  %v13277_v14 = vld [vmem:[#allocation117_spill] sm:$0xff]  ;;  %v13278_v21 = vld [vmem:[#allocation119_spill] sm:$0xff] }
 0x5e1   :  { %v11732_v39 = vpop.xlane.xlu1 %3334  ;;  %v5211_v41 = vsel %vm12708_vm6, %v5210_v16, %v5206_v3  ;;  %v5403_v62 = vsel %vm12708_vm6, %v5402_v25, %v5398_v11  ;;  %v5412_v9 = vrot.slane %v13276_v13, %v11590_v31  ;;  %v5215_v47 = vrot.slane %v13277_v14, %v11567_v61 }
 0x5e2   :  { %v11740_v45 = vpop.xlane.xlu0 %3332  ;;  %v5407_v58 = vrot.slane %v13278_v21, %v11567_v61  ;;  %v5762_v26 = vsel %vm4773_vm1, %v5761_v57, %v5757_v6  ;;  %v5580_v48 = vsel %vm4787_vm3, %v5579_v51, %v5575_v46  ;;  %v5776_v3 = vrot.slane %v11654_v44, %v11526_v50 }
 0x5e3   :  { %v5767_v16 = vsel %vm12704_vm2, %v5766_v4, %v5762_v26  ;;  %v5585_v25 = vsel %vm12705_vm4, %v5584_v23, %v5580_v48  ;;  %v5594_v11 = vrot.slane %v11685_v1, %v11549_v0  ;;  %v5216_v13 = vsel %vm12706_vm7, %v5215_v47, %v5211_v41  ;;  %v13279_v4 = vld [vmem:[#allocation121_spill] sm:$0xff]  ;;  %v13280_v1 = vld [vmem:[#allocation123_spill] sm:$0xff]  ;;  %v13281_v41 = vld [vmem:[#allocation126_spill] sm:$0xff] }
 0x5e4   :  { %v5408_v14 = vsel %vm12706_vm7, %v5407_v58, %v5403_v62  ;;  %v5771_v57 = vrot.slane %v11593_v7, %v11517_v5  ;;  %v5589_v6 = vrot.slane %v11623_v17, %v11538_v20  ;;  %v5225_v23 = vrot.slane %v13279_v4, %v11596_v37  ;;  %v13282_v47 = vld [vmem:[#allocation128_spill] sm:$0xff]  ;;  %v13283_v4 = vld [vmem:[#allocation14_spill] sm:$0xff] }
 0x5e5   :  { %v11762_v30 = vpop.xlane.xlu1 %3784  ;;  %v5221_v44 = vsel %vm12707_vm8, %v5220_v2, %v5216_v13  ;;  %v5417_v51 = vrot.slane %v13280_v1, %v11596_v37  ;;  %v5413_v21 = vsel %vm12707_vm8, %v5412_v9, %v5408_v14  ;;  %v5230_v62 = vrot.slane %v13281_v41, %v11619_v22 }
 0x5e6   :  { %v11770_v34 = vpop.xlane.xlu0 %3782  ;;  %v5422_v7 = vrot.slane %v13282_v47, %v11619_v22  ;;  %v5772_v58 = vsel %vm4787_vm3, %v5771_v57, %v5767_v16  ;;  %v5590_v17 = vsel %vm4801_vm5, %v5589_v6, %v5585_v25  ;;  %v5786_v2 = vrot.slane %v11707_v38, %v11549_v0 }
 0x5e7   :  { %v5777_v26 = vsel %vm12705_vm4, %v5776_v3, %v5772_v58  ;;  %v5595_v48 = vsel %vm12708_vm6, %v5594_v11, %v5590_v17  ;;  %v5604_v9 = vrot.slane %v11740_v45, %v11590_v31  ;;  %v5049_v14 = vsel %vm12701_vm12, %v5048_v8, %v5044_v36  ;;  %v13284_v11 = vld [vmem:[#allocation125_spill] sm:$0xff] }
 0x5e8   :  { %v4870_v1 = vrot.slane %v13283_v4, %v11728_v54  ;;  %v5781_v16 = vrot.slane %v11652_v18, %v11538_v20  ;;  %v5599_v25 = vrot.slane %v11675_v15, %v11567_v61  ;;  %v4865_v38 = vsel %vm4864_vm14, %v4863_v29, %v11725_v33 }
 0x5e9   :  { %v11790_v10 = vpop.xlane.xlu1 %3338  ;;  %v5235_v45 = vrot.slane %v13284_v11, %v11647_v53  ;;  %v5226_v57 = vsel %vm12700_vm9, %v5225_v23, %v5221_v44  ;;  %v5418_v36 = vsel %vm12700_vm9, %v5417_v51, %v5413_v21  ;;  %v5796_v33 = vrot.slane %v11770_v34, %v11590_v31  ;;  %v13285_v44 = vld [vmem:[#allocation127_spill] sm:$0xff]  ;;  %v13286_v21 = vld [vmem:[#allocation130_spill] sm:$0xff] }
 0x5ea   :  { %v3337_v46 = vpop.xlane.xlu0 %3336  ;;  %v5231_v8 = vsel %vm12699_vm10, %v5230_v62, %v5226_v57  ;;  %v5423_v6 = vsel %vm12699_vm10, %v5422_v7, %v5418_v36  ;;  %v5782_v18 = vsel %vm4801_vm5, %v5781_v16, %v5777_v26  ;;  %v5600_v41 = vsel %vm12706_vm7, %v5599_v25, %v5595_v48  ;;  %v13288_v48 = vld [vmem:[#allocation26_spill] sm:$0xff] }
 0x5eb   :  { %v5787_v15 = vsel %vm12708_vm6, %v5786_v2, %v5782_v18  ;;  %v5605_v47 = vsel %vm12707_vm8, %v5604_v9, %v5600_v41  ;;  %v5614_v29 = vrot.slane %v3337_v46, %v11619_v22  ;;  %v5427_v51 = vrot.slane %v13285_v44, %v11647_v53  ;;  %v13289_v9 = vld [vmem:[#allocation132_spill] sm:$0xff]  ;;  %v13290_v36 = vld [vmem:[#allocation134_spill] sm:$0xff] }
 0x5ec   :  { %v5240_v62 = vrot.slane %v13286_v21, %v11650_v52  ;;  %v5791_v7 = vrot.slane %v11701_v35, %v11567_v61  ;;  %v5609_v58 = vrot.slane %v11732_v39, %v11596_v37  ;;  %v13287_v26 = vrot.slane %v13273_v49, %v11658_v24  ;;  %v13291_v41 = vld [vmem:[#allocation44_spill] sm:$0xff]  ;;  %v13294_v21 = vld [vmem:[#allocation131_spill] sm:$0xff] }
 0x5ed   :  { %v11816_v13 = vpop.xlane.xlu1 %3788  ;;  %v4872_v46 = vsel %vm4871_vm15, %v4870_v1, %v4865_v38  ;;  %v5058_v2 = vrot.slane %v13288_v48, %v11692_v28  ;;  %v5432_v4 = vrot.slane %v13289_v9, %v11650_v52  ;;  %v5236_v35 = vsel %vm12702_vm11, %v5235_v45, %v5231_v8 }
 0x5ee   :  { %v3787_v3 = vpop.xlane.xlu0 %3786  ;;  %v5054_v34 = vsel %vm4857_vm13, %v13287_v26, %v5049_v14  ;;  %v5428_v16 = vsel %vm12702_vm11, %v5427_v51, %v5423_v6  ;;  %v5792_v39 = vsel %vm12706_vm7, %v5791_v7, %v5787_v15  ;;  %v5610_v25 = vsel %vm12700_vm9, %v5609_v58, %v5605_v47 }
 0x5ef   :  { %v5797_v49 = vsel %vm12707_vm8, %v5796_v33, %v5792_v39  ;;  %v5615_v14 = vsel %vm12699_vm10, %v5614_v29, %v5610_v25  ;;  %v5806_v1 = vrot.slane %v3787_v3, %v11619_v22  ;;  %v5241_v57 = vsel %vm12701_vm12, %v5240_v62, %v5236_v35  ;;  %v13292_v3 = vld [vmem:[#allocation129_spill] sm:$0xff]  ;;  %v13293_v29 = vld [vmem:[#allocation136_spill] sm:$0xff] }
 0x5f0   :  { %v5250_v45 = vrot.slane %v13290_v36, %v11692_v28  ;;  %v5801_v8 = vrot.slane %v11762_v30, %v11596_v37  ;;  %v5619_v6 = vrot.slane %v11790_v10, %v11647_v53  ;;  %v5063_v15 = vrot.slane %v13291_v41, %v11728_v54  ;;  %v13295_v39 = vld [vmem:[#allocation133_spill] sm:$0xff] }
 0x5f1   :  { %v3343_v23 = vpop.xlane.xlu1 %3342  ;;  %v5245_v47 = vrot.slane %v13292_v3, %v11658_v24  ;;  %v5433_v33 = vsel %vm12701_vm12, %v5432_v4, %v5428_v16  ;;  %v5442_v44 = vrot.slane %v13293_v29, %v11692_v28  ;;  %v5059_v51 = vsel %vm4864_vm14, %v5058_v2, %v5054_v34 }
 0x5f2   :  { %v3341_v17 = vpop.xlane.xlu0 %3340  ;;  %v5437_v30 = vrot.slane %v13294_v21, %v11658_v24  ;;  %v5802_v62 = vsel %vm12700_vm9, %v5801_v8, %v5797_v49  ;;  %v5620_v10 = vsel %vm12702_vm11, %v5619_v6, %v5615_v14  ;;  %v5811_v2 = vrot.slane %v11816_v13, %v11647_v53 }
 0x5f3   :  { %v5624_v38 = vrot.slane %v3341_v17, %v11650_v52  ;;  %v5246_v7 = vsel %vm4857_vm13, %v5245_v47, %v5241_v57  ;;  %v5807_v58 = vsel %vm12699_vm10, %v5806_v1, %v5802_v62  ;;  %v5629_v4 = vrot.slane %v3343_v23, %v11658_v24  ;;  %v13296_v1 = vld [vmem:[#allocation135_spill] sm:$0xff] }
 0x5f4   :  { %v5251_v9 = vsel %vm4864_vm14, %v5250_v45, %v5246_v7  ;;  %v5438_v34 = vsel %vm4857_vm13, %v5437_v30, %v5433_v33  ;;  %v5064_v16 = vsel %vm4871_vm15, %v5063_v15, %v5059_v51  ;;  %v5255_v25 = vrot.slane %v13295_v39, %v11728_v54 }
 0x5f5   :  { %v3793_v11 = vpop.xlane.xlu1 %3792  ;;  %v5625_v17 = vsel %vm12701_vm12, %v5624_v38, %v5620_v10  ;;  %v5443_v49 = vsel %vm4864_vm14, %v5442_v44, %v5438_v34  ;;  %vm6301_vm10 = vcmask 1041408   ;;  %v5447_v38 = vrot.slane %v13296_v1, %v11728_v54 }
 0x5f6   :  { %v3791_v18 = vpop.xlane.xlu0 %3790  ;;  %v5812_v57 = vsel %vm12702_vm11, %v5811_v2, %v5807_v58  ;;  %v5630_v13 = vsel %vm4857_vm13, %v5629_v4, %v5625_v17  ;;  %v5256_v23 = vsel %vm4871_vm15, %v5255_v25, %v5251_v9  ;;  %vm6304_vm9 = vcmask 1042432   ;;  %v13297_v25 = vld [vmem:[#allocation20_spill] sm:$0xff] }
 0x5f7   :  { %v5816_v26 = vrot.slane %v3791_v18, %v11650_v52  ;;  %v5448_v18 = vsel %vm4871_vm15, %v5447_v38, %v5443_v49  ;;  %v5821_v41 = vrot.slane %v3793_v11, %v11658_v24  ;;  %v6299_v47 = vsel %vm6298_vm0, %v4872_v46, %v5064_v16 }
 0x5f8   :  { %v6302_v44 = vsel %vm6301_vm10, %v6299_v47, %v5256_v23  ;;  %vm12703_vm11 = vcmask 1044480   ;;  %v4876_v49 = vrot.slane %v13297_v25, %v11493_v63  ;;  %v13300_v23 = vld [vmem:[#allocation21_spill] sm:$0xff] }
 0x5f9   :  { %v3347_v48 = vpop.xlane.xlu1 %3346  ;;  %v5817_v36 = vsel %vm12701_vm12, %v5816_v26, %v5812_v57  ;;  %vm6307_vm12 = vcmask 1043456   ;;  %v6305_v21 = vsel %vm6304_vm9, %v6302_v44, %v5448_v18  ;;  %v13299_v57 = vld [vmem:[#allocation38_spill] sm:$0xff]  ;;  %v13303_v44 = vld [vmem:[#allocation27_spill] sm:$0xff]  ;;  %v13307_v25 = vld [vmem:[#allocation53_spill] sm:$0xff] }
 0x5fa   :  { %v3345_v35 = vpop.xlane.xlu0 %3344  ;;  %v5639_v45 = vrot.slane %v3347_v48, %v11728_v54  ;;  %v5822_v51 = vsel %vm4857_vm13, %v5821_v41, %v5817_v36  ;;  %v5072_v36 = vrot.slane %v13300_v23, %v11507_v32 }
 0x5fb   :  { %v5634_v14 = vrot.slane %v3345_v35, %v11692_v28 }
 0x5fd   :  { %v5635_v8 = vsel %vm4864_vm14, %v5634_v14, %v5630_v13  ;;  %v3797_v6 = vpop.xlane.xlu1 %3796  ;;  %v13298_v14 = vld [vmem:[#allocation19_spill] sm:$0xff]  ;;  %v5068_v13 = vrot.slane %v13299_v57, %v11493_v63  ;;  %v13308_v57 = vld [vmem:[#allocation41_spill] sm:$0xff] }
 0x5fe   :  { %v5831_v15 = vrot.slane %v3797_v6, %v11728_v54  ;;  %v3795_v3 = vpop.xlane.xlu0 %3794  ;;  %v5640_v33 = vsel %vm4871_vm15, %v5639_v45, %v5635_v8  ;;  %v4880_v1 = vrot.slane %v13298_v14, %v11507_v32  ;;  %v13301_v45 = vld [vmem:[#allocation11_spill] sm:$0xff]  ;;  %v13302_v6 = vld [vmem:[#allocation33_spill] sm:$0xff] }
 0x5ff   :  { %v5826_v29 = vrot.slane %v3795_v3, %v11692_v28  ;;  %v6308_v7 = vsel %vm6307_vm12, %v6305_v21, %v5640_v33  ;;  %v4885_v8 = vrot.slane %v13301_v45, %v11500_v59  ;;  %v5077_v18 = vrot.slane %v13302_v6, %v11500_v59  ;;  %v13310_v45 = vld [vmem:[#allocation43_spill] sm:$0xff] }
 0x601   :  { %v5827_v30 = vsel %vm4864_vm14, %v5826_v29, %v5822_v51  ;;  %v3351_v11 = vpop.xlane.xlu1 %3350  ;;  %v4881_v29 = vsel %vm4773_vm1, %v4880_v1, %v4876_v49  ;;  %v4890_v51 = vrot.slane %v13303_v44, %v11517_v5  ;;  %v4900_v49 = vrot.slane %v13307_v25, %v11538_v20  ;;  %v13316_v25 = vld [vmem:[#allocation139_spill] sm:$0xff] }
 0x602   :  { %v5832_v62 = vsel %vm4871_vm15, %v5831_v15, %v5827_v30  ;;  %v5648_v10 = vrot.slane %v3351_v11, %v11507_v32  ;;  %v3349_v46 = vpop.xlane.xlu0 %3348  ;;  %v5073_v30 = vsel %vm4773_vm1, %v5072_v36, %v5068_v13  ;;  %v4886_v11 = vsel %vm12704_vm2, %v4885_v8, %v4881_v29  ;;  %v13309_v13 = vld [vmem:[#allocation45_spill] sm:$0xff] }
 0x603   :  { %v5644_v58 = vrot.slane %v3349_v46, %v11493_v63  ;;  %v11921_v17 = vsel %vm12703_vm11, %v6308_v7, %v5832_v62  ;;  %v13304_v62 = vld [vmem:[#allocation32_spill] sm:$0xff]  ;;  %v13305_v46 = vld [vmem:[#allocation54_spill] sm:$0xff]  ;;  %v4905_v23 = vrot.slane %v13309_v13, %v11549_v0  ;;  %v5097_v8 = vrot.slane %v13310_v45, %v11549_v0 }
 0x604   :  { %v4895_v7 = vrot.slane %v13305_v46, %v11526_v50  ;;  %v13319_v13 = vld [vmem:[#allocation68_spill] sm:$0xff]  ;;  %vm13322_vm11 = vcmask 654912  }
 0x605   :  { %v5649_v26 = vsel %vm4773_vm1, %v5648_v10, %v5644_v58  ;;  %v3801_v48 = vpop.xlane.xlu1 %3800  ;;  %v5082_v10 = vrot.slane %v13304_v62, %v11517_v5  ;;  %v5078_v58 = vsel %vm12704_vm2, %v5077_v18, %v5073_v30 }
 0x606   :  { %v5840_v9 = vrot.slane %v3801_v48, %v11507_v32  ;;  %v3799_v34 = vpop.xlane.xlu0 %3798 }
 0x607   :  { %v5836_v2 = vrot.slane %v3799_v34, %v11493_v63  ;;  %v5083_v1 = vsel %vm4787_vm3, %v5082_v10, %v5078_v58  ;;  %v13313_v10 = vld [vmem:[#allocation72_spill] sm:$0xff] }
 0x608   :  { %v4915_v46 = vrot.slane %v13313_v10, %v11590_v31  ;;  %v13323_v10 = vld [vmem:[#allocation146_spill] sm:$0xff] }
 0x609   :  { %v5841_v4 = vsel %vm4773_vm1, %v5840_v9, %v5836_v2 }
 0x60a   :  { %v3355_v35 = vpop.xlane.xlu1 %3354 }
 0x60b   :  { %v5658_v16 = vrot.slane %v3355_v35, %v11517_v5  ;;  %v3353_v39 = vpop.xlane.xlu0 %3352 }
 0x60c   :  { %v5653_v38 = vrot.slane %v3353_v39, %v11500_v59  ;;  %v4891_v39 = vsel %vm4787_vm3, %v4890_v51, %v4886_v11 }
 0x60e   :  { %v5654_v41 = vsel %vm12704_vm2, %v5653_v38, %v5649_v26  ;;  %v3805_v15 = vpop.xlane.xlu1 %3804  ;;  %v13306_v26 = vld [vmem:[#allocation69_spill] sm:$0xff]  ;;  %v4896_v38 = vsel %vm12705_vm4, %v4895_v7, %v4891_v39 }
 0x60f   :  { %v5850_v3 = vrot.slane %v3805_v15, %v11517_v5  ;;  %v3803_v47 = vpop.xlane.xlu0 %3802  ;;  %v5659_v33 = vsel %vm4787_vm3, %v5658_v16, %v5654_v41  ;;  %v5087_v48 = vrot.slane %v13306_v26, %v11526_v50  ;;  %v13314_v26 = vld [vmem:[#allocation137_spill] sm:$0xff] }
 0x610   :  { %v5845_v21 = vrot.slane %v3803_v47, %v11500_v59  ;;  %v4901_v47 = vsel %vm4801_vm5, %v4900_v49, %v4896_v38  ;;  %v5456_v49 = vrot.slane %v13316_v25, %v11507_v32 }
 0x611   :  { %v5088_v36 = vsel %vm12705_vm4, %v5087_v48, %v5083_v1  ;;  %v4906_v51 = vsel %vm12708_vm6, %v4905_v23, %v4901_v47  ;;  %v5264_v48 = vrot.slane %v13314_v26, %v11507_v32  ;;  %v4920_v23 = vrot.slane %v13319_v13, %v11596_v37  ;;  %v13324_v26 = vld [vmem:[#allocation35_spill] sm:$0xff] }
 0x612   :  { %v5846_v9 = vsel %vm12704_vm2, %v5845_v21, %v5841_v4  ;;  %v3359_v34 = vpop.xlane.xlu1 %3358  ;;  %v5092_v4 = vrot.slane %v13308_v57, %v11538_v20  ;;  %v13311_v21 = vld [vmem:[#allocation25_spill] sm:$0xff] }
 0x613   :  { %v5668_v2 = vrot.slane %v3359_v34, %v11538_v20  ;;  %v3357_v35 = vpop.xlane.xlu0 %3356  ;;  %v5851_v16 = vsel %vm4787_vm3, %v5850_v3, %v5846_v9  ;;  %v4910_v30 = vrot.slane %v13311_v21, %v11567_v61  ;;  %v13315_v9 = vld [vmem:[#allocation138_spill] sm:$0xff] }
 0x614   :  { %v5663_v14 = vrot.slane %v3357_v35, %v11526_v50  ;;  %v5093_v44 = vsel %vm4801_vm5, %v5092_v4, %v5088_v36  ;;  %v5260_v34 = vrot.slane %v13315_v9, %v11493_v63  ;;  %v13320_v36 = vld [vmem:[#allocation58_spill] sm:$0xff]  ;;  %v13325_v9 = vld [vmem:[#allocation36_spill] sm:$0xff] }
 0x615   :  { %v5098_v11 = vsel %vm12708_vm6, %v5097_v8, %v5093_v44  ;;  %v4911_v4 = vsel %vm12706_vm7, %v4910_v30, %v4906_v51  ;;  %v5461_v45 = vrot.slane %v13320_v36, %v11500_v59  ;;  %v5284_v36 = vrot.slane %v11301_v42, %v11538_v20 }
 0x616   :  { %v5664_v6 = vsel %vm12705_vm4, %v5663_v14, %v5659_v33  ;;  %v3809_v18 = vpop.xlane.xlu1 %3808  ;;  %v13312_v33 = vld [vmem:[#allocation71_spill] sm:$0xff]  ;;  %v13317_v14 = vld [vmem:[#allocation141_spill] sm:$0xff] }
 0x617   :  { %v5860_v41 = vrot.slane %v3809_v18, %v11538_v20  ;;  %v3807_v15 = vpop.xlane.xlu0 %3806  ;;  %v5669_v3 = vsel %vm4801_vm5, %v5668_v2, %v5664_v6  ;;  %v5102_v62 = vrot.slane %v13312_v33, %v11567_v61  ;;  %v5452_v1 = vrot.slane %v13317_v14, %v11493_v63 }
 0x618   :  { %v5855_v29 = vrot.slane %v3807_v15, %v11526_v50  ;;  %v4916_v6 = vsel %vm12707_vm8, %v4915_v46, %v4911_v4  ;;  %v13321_v15 = vld [vmem:[#allocation74_spill] sm:$0xff]  ;;  %v5274_v46 = vrot.slane %v13323_v10, %v11517_v5  ;;  %v5289_v4 = vrot.slane %v11338_v19, %v11549_v0 }
 0x619   :  { %v5103_v8 = vsel %vm12706_vm7, %v5102_v62, %v5098_v11  ;;  %v5107_v47 = vrot.slane %v13321_v15, %v11590_v31  ;;  %v5457_v30 = vsel %vm4773_vm1, %v5456_v49, %v5452_v1  ;;  %v5279_v11 = vrot.slane %v11306_v40, %v11526_v50  ;;  %v13326_v40 = vld [vmem:[#allocation153_spill] sm:$0xff] }
 0x61a   :  { %v5856_v7 = vsel %vm12705_vm4, %v5855_v29, %v5851_v16  ;;  %v3363_v58 = vpop.xlane.xlu1 %3362  ;;  %v13318_v16 = vld [vmem:[#allocation148_spill] sm:$0xff]  ;;  %v5265_v29 = vsel %vm4773_vm1, %v5264_v48, %v5260_v34  ;;  %v4921_v62 = vsel %vm13322_vm11, %v4920_v23, %v4916_v6  ;;  %v5112_v48 = vrot.slane %v13324_v26, %v11596_v37 }
 0x61b   :  { %v5678_v2 = vrot.slane %v3363_v58, %v11567_v61  ;;  %v3361_v35 = vpop.xlane.xlu0 %3360  ;;  %v5861_v39 = vsel %vm4801_vm5, %v5860_v41, %v5856_v7  ;;  %v5269_v38 = vrot.slane %v13318_v16, %v11500_v59  ;;  %v5462_v7 = vsel %vm12704_vm2, %v5461_v45, %v5457_v30 }
 0x61c   :  { %v5673_v57 = vrot.slane %v3361_v35, %v11549_v0  ;;  %v5471_v58 = vrot.slane %v11323_v43, %v11526_v50  ;;  %v4925_v34 = vrot.slane %v13325_v9, %v11619_v22  ;;  %v5108_v49 = vsel %vm12707_vm8, %v5107_v47, %v5103_v8  ;;  %v13329_v47 = vld [vmem:[#allocation96_spill] sm:$0xff] }
 0x61d   :  { %v5270_v33 = vsel %vm12704_vm2, %v5269_v38, %v5265_v29  ;;  %v5481_v8 = vrot.slane %v11357_v27, %v11549_v0  ;;  %v5113_v6 = vsel %vm13322_vm11, %v5112_v48, %v5108_v49  ;;  %vm13328_vm2 = vcmask 720512  }
 0x61e   :  { %v5674_v18 = vsel %vm12708_vm6, %v5673_v57, %v5669_v3  ;;  %v3813_v41 = vpop.xlane.xlu1 %3812  ;;  %v5275_v14 = vsel %vm4787_vm3, %v5274_v46, %v5270_v33  ;;  %v5476_v19 = vrot.slane %v11316_v60, %v11538_v20  ;;  %v5117_v29 = vrot.slane %v13329_v47, %v11619_v22  ;;  %v13332_v46 = vld [vmem:[#allocation95_spill] sm:$0xff] }
 0x61f   :  { %v5870_v44 = vrot.slane %v3813_v41, %v11567_v61  ;;  %v3811_v51 = vpop.xlane.xlu0 %3810  ;;  %v5679_v21 = vsel %vm12706_vm7, %v5678_v2, %v5674_v18  ;;  %v5466_v2 = vrot.slane %v13326_v40, %v11517_v5  ;;  %v5280_v38 = vsel %vm12705_vm4, %v5279_v11, %v5275_v14  ;;  %v13336_v14 = vld [vmem:[#allocation140_spill] sm:$0xff] }
 0x620   :  { %v5865_v3 = vrot.slane %v3811_v51, %v11549_v0  ;;  %v4926_v18 = vsel %vm13328_vm2, %v4925_v34, %v4921_v62  ;;  %v5285_v42 = vsel %vm4801_vm5, %v5284_v36, %v5280_v38  ;;  %v5299_v60 = vrot.slane %v11372_v56, %v11590_v31  ;;  %v13334_v56 = vld [vmem:[#allocation49_spill] sm:$0xff] }
 0x621   :  { %v5467_v57 = vsel %vm4787_vm3, %v5466_v2, %v5462_v7  ;;  %v5290_v30 = vsel %vm12708_vm6, %v5289_v4, %v5285_v42  ;;  %vm13331_vm2 = vcmask 786112   ;;  %v5491_v10 = vrot.slane %v11382_v55, %v11590_v31 }
 0x622   :  { %v5866_v35 = vsel %vm12708_vm6, %v5865_v3, %v5861_v39  ;;  %v3367_v25 = vpop.xlane.xlu1 %3366  ;;  %v13327_v39 = vld [vmem:[#allocation42_spill] sm:$0xff]  ;;  %v5472_v45 = vsel %vm12705_vm4, %v5471_v58, %v5467_v57  ;;  %vm13330_vm4 = vmmov %vm13322_vm11  ;;  %v5294_v3 = vrot.slane %v11335_v12, %v11567_v61  ;;  %v5122_v7 = vrot.slane %v13332_v46, %v11647_v53 }
 0x623   :  { %v5688_v1 = vrot.slane %v3367_v25, %v11596_v37  ;;  %v3365_v16 = vpop.xlane.xlu0 %3364  ;;  %v5871_v43 = vsel %vm12706_vm7, %v5870_v44, %v5866_v35  ;;  %v4930_v23 = vrot.slane %v13327_v39, %v11647_v53  ;;  %v5477_v33 = vsel %vm4801_vm5, %v5476_v19, %v5472_v45  ;;  %v13333_v58 = vld [vmem:[#allocation98_spill] sm:$0xff]  ;;  %v13339_v39 = vld [vmem:[#allocation143_spill] sm:$0xff]  ;;  %v13341_v45 = vld [vmem:[#allocation100_spill] sm:$0xff] }
 0x624   :  { %v5683_v13 = vrot.slane %v3365_v16, %v11590_v31  ;;  %v5482_v62 = vsel %vm12708_vm6, %v5481_v8, %v5477_v33  ;;  %v4935_v26 = vrot.slane %v13333_v58, %v11650_v52  ;;  %v5486_v48 = vrot.slane %v13334_v56, %v11567_v61  ;;  %v13338_v57 = vld [vmem:[#allocation154_spill] sm:$0xff]  ;;  %v13348_v33 = vld [vmem:[#allocation144_spill] sm:$0xff]  ;;  %v13353_v58 = vld [vmem:[#allocation99_spill] sm:$0xff] }
 0x625   :  { %v4931_v11 = vsel %vm13331_vm2, %v4930_v23, %v4926_v18  ;;  %v5295_v12 = vsel %vm12706_vm7, %v5294_v3, %v5290_v30  ;;  %v5304_v4 = vrot.slane %v13338_v57, %v11596_v37  ;;  %v5501_v23 = vrot.slane %v13339_v39, %v11619_v22  ;;  %v13354_v56 = vld [vmem:[#allocation142_spill] sm:$0xff] }
 0x626   :  { %v5684_v41 = vsel %vm12707_vm8, %v5683_v13, %v5679_v21  ;;  %v3817_v15 = vpop.xlane.xlu1 %3816  ;;  %v5300_v25 = vsel %vm12707_vm8, %v5299_v60, %v5295_v12  ;;  %v5487_v49 = vsel %vm12706_vm7, %v5486_v48, %v5482_v62  ;;  %vm13340_vm2 = vcmask 851712  }
 0x627   :  { %v5880_v44 = vrot.slane %v3817_v15, %v11596_v37  ;;  %v3815_v51 = vpop.xlane.xlu0 %3814  ;;  %v5689_v27 = vsel %vm13330_vm4, %v5688_v1, %v5684_v41  ;;  %vm13335_vm4 = vcmask 720512   ;;  %v5309_v1 = vrot.slane %v13336_v14, %v11619_v22 }
 0x628   :  { %v5875_v21 = vrot.slane %v3815_v51, %v11590_v31  ;;  %v5118_v40 = vsel %vm13335_vm4, %v5117_v29, %v5113_v6  ;;  %v5492_v13 = vsel %vm12707_vm8, %v5491_v10, %v5487_v49  ;;  %v4936_v36 = vsel %vm13340_vm2, %v4935_v26, %v4931_v11  ;;  %v13342_v6 = vld [vmem:[#allocation155_spill] sm:$0xff]  ;;  %vm13346_vm6 = vmmov %vm13335_vm4  ;;  %v13349_v11 = vld [vmem:[#allocation156_spill] sm:$0xff] }
 0x629   :  { %v5127_v8 = vrot.slane %v13341_v45, %v11650_v52  ;;  %v5496_v18 = vrot.slane %v13342_v6, %v11596_v37  ;;  %vm13344_vm7 = vcmask 654912   ;;  %v5319_v60 = vrot.slane %v13348_v33, %v11650_v52  ;;  %v13351_v10 = vld [vmem:[#allocation149_spill] sm:$0xff] }
 0x62a   :  { %v5876_v9 = vsel %vm12707_vm8, %v5875_v21, %v5871_v43  ;;  %v3371_v34 = vpop.xlane.xlu1 %3370  ;;  %v13337_v43 = vld [vmem:[#allocation97_spill] sm:$0xff]  ;;  %v5305_v47 = vsel %vm13344_vm7, %v5304_v4, %v5300_v25  ;;  %vm13347_vm2 = vmmov %vm13344_vm7  ;;  %v5314_v3 = vrot.slane %v13349_v11, %v11647_v53  ;;  %v5511_v46 = vrot.slane %v13351_v10, %v11650_v52 }
 0x62b   :  { %v5698_v2 = vrot.slane %v3371_v34, %v11647_v53  ;;  %v3369_v35 = vpop.xlane.xlu0 %3368  ;;  %v5881_v55 = vsel %vm13322_vm11, %v5880_v44, %v5876_v9  ;;  %v4940_v38 = vrot.slane %v13337_v43, %v11658_v24  ;;  %vm13343_vm11 = vcmask 786112   ;;  %vm13350_vm7 = vmmov %vm13335_vm4  ;;  %v13363_v4 = vld [vmem:[#allocation145_spill] sm:$0xff] }
 0x62c   :  { %v5693_v16 = vrot.slane %v3369_v35, %v11619_v22  ;;  %v5123_v15 = vsel %vm13343_vm11, %v5122_v7, %v5118_v40  ;;  %vm13345_vm8 = vmmov %vm13343_vm11  ;;  %v5310_v51 = vsel %vm13346_vm6, %v5309_v1, %v5305_v47  ;;  %v5497_v30 = vsel %vm13347_vm2, %v5496_v18, %v5492_v13  ;;  %v13356_v40 = vld [vmem:[#allocation104_spill] sm:$0xff]  ;;  %v13367_v18 = vld [vmem:[#allocation147_spill] sm:$0xff] }
 0x62d   :  { %v5502_v62 = vsel %vm13350_vm7, %v5501_v23, %v5497_v30  ;;  %v5132_v26 = vrot.slane %v13353_v58, %v11658_v24  ;;  %v5506_v48 = vrot.slane %v13354_v56, %v11647_v53  ;;  %vm13355_vm6 = vmmov %vm13335_vm4  ;;  %v5137_v12 = vrot.slane %v13356_v40, %v11692_v28  ;;  %v13365_v23 = vld [vmem:[#allocation157_spill] sm:$0xff]  ;;  %v13371_v58 = vld [vmem:[#allocation152_spill] sm:$0xff] }
 0x62e   :  { %v5694_v19 = vsel %vm13335_vm4, %v5693_v16, %v5689_v27  ;;  %v3821_v41 = vpop.xlane.xlu1 %3820  ;;  %v4941_v27 = vsel %vm4857_vm13, %v4940_v38, %v4936_v36  ;;  %vm13357_vm4 = vmmov %vm13343_vm11  ;;  %v13361_v16 = vld [vmem:[#allocation150_spill] sm:$0xff]  ;;  %v5324_v13 = vrot.slane %v13363_v4, %v11658_v24  ;;  %v5521_v36 = vrot.slane %v13365_v23, %v11692_v28  ;;  %v13369_v33 = vld [vmem:[#allocation101_spill] sm:$0xff] }
 0x62f   :  { %v5890_v29 = vrot.slane %v3821_v41, %v11647_v53  ;;  %v3819_v42 = vpop.xlane.xlu0 %3818  ;;  %v5699_v44 = vsel %vm13345_vm8, %v5698_v2, %v5694_v19  ;;  %vm13352_vm8 = vcmask 851712   ;;  %v5315_v2 = vsel %vm13357_vm4, %v5314_v3, %v5310_v51  ;;  %vm13358_vm11 = vmmov %vm13357_vm4  ;;  %v13362_v38 = vld [vmem:[#allocation102_spill] sm:$0xff] }
 0x630   :  { %v5885_v21 = vrot.slane %v3819_v42, %v11619_v22  ;;  %v5128_v7 = vsel %vm13352_vm8, %v5127_v8, %v5123_v15  ;;  %vm13359_vm2 = vmmov %vm13352_vm8  ;;  %v5329_v43 = vrot.slane %v13361_v16, %v11692_v28  ;;  %v4945_v57 = vrot.slane %v13362_v38, %v11692_v28  ;;  %v13366_v8 = vld [vmem:[#allocation103_spill] sm:$0xff] }
 0x631   :  { %v5320_v14 = vsel %vm13359_vm2, %v5319_v60, %v5315_v2  ;;  %vm13360_vm7 = vmmov %vm13357_vm4  ;;  %v5133_v45 = vsel %vm4857_vm13, %v5132_v26, %v5128_v7  ;;  %v5142_v6 = vrot.slane %v13366_v8, %v11728_v54  ;;  %v5516_v19 = vrot.slane %v13367_v18, %v11658_v24 }
 0x632   :  { %v5886_v9 = vsel %vm13355_vm6, %v5885_v21, %v5881_v55  ;;  %v3375_v34 = vpop.xlane.xlu1 %3374  ;;  %v5507_v1 = vsel %vm13360_vm7, %v5506_v48, %v5502_v62  ;;  %vm13364_vm8 = vmmov %vm13359_vm2  ;;  %v5138_v47 = vsel %vm4864_vm14, %v5137_v12, %v5133_v45  ;;  %v4950_v60 = vrot.slane %v13369_v33, %v11728_v54  ;;  %v13370_v62 = vld [vmem:[#allocation151_spill] sm:$0xff] }
 0x633   :  { %v5708_v35 = vrot.slane %v3375_v34, %v11658_v24  ;;  %v3373_v25 = vpop.xlane.xlu0 %3372  ;;  %v5891_v49 = vsel %vm13358_vm11, %v5890_v29, %v5886_v9  ;;  %v5512_v39 = vsel %vm13364_vm8, %v5511_v46, %v5507_v1  ;;  %vm13368_vm6 = vmmov %vm13359_vm2  ;;  %v5325_v29 = vsel %vm4857_vm13, %v5324_v13, %v5320_v14  ;;  %v13374_v45 = vld [vmem:[#allocation39_spill] sm:$0xff] }
 0x634   :  { %v5703_v55 = vrot.slane %v3373_v25, %v11650_v52  ;;  %v5330_v21 = vsel %vm4864_vm14, %v5329_v43, %v5325_v29  ;;  %v5517_v11 = vsel %vm4857_vm13, %v5516_v19, %v5512_v39  ;;  %v5334_v10 = vrot.slane %v13370_v62, %v11728_v54  ;;  %vm13372_vm4 = vmmov %vm13359_vm2  ;;  %v13377_v62 = vld [vmem:[#allocation12_spill] sm:$0xff] }
 0x635   :  { %v5522_v46 = vsel %vm4864_vm14, %v5521_v36, %v5517_v11  ;;  %v5143_v7 = vsel %vm4871_vm15, %v5142_v6, %v5138_v47  ;;  %v5526_v26 = vrot.slane %v13371_v58, %v11728_v54  ;;  %v13375_v47 = vld [vmem:[#allocation47_spill] sm:$0xff]  ;;  %vm13410_vm2 = vcmask 458112  }
 0x636   :  { %v5704_v41 = vsel %vm13368_vm6, %v5703_v55, %v5699_v44  ;;  %v3825_v15 = vpop.xlane.xlu1 %3824  ;;  %v4946_v44 = vsel %vm4864_vm14, %v4945_v57, %v4941_v27  ;;  %v5335_v9 = vsel %vm4871_vm15, %v5334_v10, %v5330_v21  ;;  %v13376_v21 = vld [vmem:[#allocation62_spill] sm:$0xff]  ;;  %vm13411_vm7 = vcmask 523712   ;;  %vm13412_vm8 = vmmov %vm13410_vm2 }
 0x637   :  { %v5900_v42 = vrot.slane %v3825_v15, %v11658_v24  ;;  %v3823_v51 = vpop.xlane.xlu0 %3822  ;;  %v5709_v30 = vsel %vm4857_vm13, %v5708_v35, %v5704_v41  ;;  %v4951_v12 = vsel %vm4871_vm15, %v4950_v60, %v4946_v44  ;;  %v5527_v2 = vsel %vm4871_vm15, %v5526_v26, %v5522_v46  ;;  %vm13413_vm6 = vmmov %vm13411_vm7 }
 0x638   :  { %v5895_v3 = vrot.slane %v3823_v51, %v11650_v52  ;;  %v6300_v25 = vsel %vm6298_vm0, %v4951_v12, %v5143_v7  ;;  %vm13373_vm0 = vcmask 1044480  }
 0x639   :  { %v6303_v14 = vsel %vm6301_vm10, %v6300_v25, %v5335_v9 }
 0x63a   :  { %v5896_v56 = vsel %vm13372_vm4, %v5895_v3, %v5891_v49  ;;  %v3379_v48 = vpop.xlane.xlu1 %3378  ;;  %v6306_v16 = vsel %vm6304_vm9, %v6303_v14, %v5527_v2  ;;  %vm13406_vm9 = vcmask 195712   ;;  %vm13414_vm4 = vcmask 589312  }
 0x63b   :  { %v5718_v34 = vrot.slane %v3379_v48, %v11728_v54  ;;  %v3377_v40 = vpop.xlane.xlu0 %3376  ;;  %v5901_v27 = vsel %vm4857_vm13, %v5900_v42, %v5896_v56  ;;  %vm13407_vm10 = vmmov %vm13406_vm9 }
 0x63c   :  { %v5713_v35 = vrot.slane %v3377_v40, %v11692_v28  ;;  %v13378_v40 = vld [vmem:[#allocation30_spill] sm:$0xff] }
 0x63e   :  { %v5714_v49 = vsel %vm4864_vm14, %v5713_v35, %v5709_v30  ;;  %v3829_v1 = vpop.xlane.xlu1 %3828  ;;  %v13379_v35 = vld [vmem:[#allocation13_spill] sm:$0xff] }
 0x63f   :  { %v5719_v43 = vsel %vm4871_vm15, %v5718_v34, %v5714_v49  ;;  %v3827_v55 = vpop.xlane.xlu0 %3826  ;;  %v5910_v4 = vrot.slane %v3829_v1, %v11728_v54 }
 0x640   :  { %v6309_v38 = vsel %vm6307_vm12, %v6306_v16, %v5719_v43  ;;  %v5905_v57 = vrot.slane %v3827_v55, %v11692_v28  ;;  %vm13408_vm12 = vcmask 326912  }
 0x641   :  { %vm13409_vm11 = vmmov %vm13408_vm12 }
 0x642   :  { %v5906_v13 = vsel %vm4864_vm14, %v5905_v57, %v5901_v27 }
 0x643   :  { %v5911_v39 = vsel %vm4871_vm15, %v5910_v4, %v5906_v13  ;;  %v13380_v4 = vld [vmem:[#allocation48_spill] sm:$0xff] }
 0x644   :  { %v12176_v23 = vsel %vm13373_vm0, %v6309_v38, %v5911_v39  ;;  %vm13415_vm0 = vcmask 654912  }
 0x66e   :  { %v7844_v36 = vpop.f32.mrb[160].mxu1 }
 0x66f   :  { %v4063_v8 = vadd.f32 %v7844_v36, %v13374_v45  ;;  %v7964_v6 = vpop.f32.mrb[160].mxu0  ;;  %v4057_v18 = vpop.f32.mrb[161].mxu1 }
 0x670   :  { %v4513_v19 = vadd.f32 %v7964_v6, %v13374_v45  ;;  %v4507_v41 = vpop.f32.mrb[161].mxu0  ;;  %v4058_v30 = vadd.f32 %v4057_v18, %v13375_v47  ;;  %v13381_v45 = vld [vmem:[#allocation63_spill] sm:$0xff] }
 0x671   :  { %4218 = vmax.xlane.f32.xlu1 %v4063_v8  ;;  %v4508_v29 = vadd.f32 %v4507_v41, %v13375_v47 }
 0x672   :  { %4668 = vmax.xlane.f32.xlu0 %v4513_v19  ;;  %v7847_v15 = vpop.f32.mrb[162].mxu1 }
 0x673   :  { %v7967_v42 = vpop.f32.mrb[162].mxu0  ;;  %v4067_v51 = vpop.f32.mrb[163].mxu1  ;;  %v4073_v11 = vadd.f32 %v7847_v15, %v13376_v21 }
 0x674   :  { %v4517_v33 = vpop.f32.mrb[163].mxu0  ;;  %v4068_v10 = vadd.f32 %v4067_v51, %v13377_v62  ;;  %v4523_v58 = vadd.f32 %v7967_v42, %v13376_v21  ;;  %v13382_v51 = vld [vmem:[#allocation15_spill] sm:$0xff] }
 0x675   :  { %4666 = vmax.xlane.f32.xlu1 %v4508_v29  ;;  %v4518_v48 = vadd.f32 %v4517_v33, %v13377_v62  ;;  %v13383_v21 = vld [vmem:[#allocation31_spill] sm:$0xff] }
 0x676   :  { %4216 = vmax.xlane.f32.xlu0 %v4058_v30  ;;  %v7850_v60 = vpop.f32.mrb[164].mxu1 }
 0x677   :  { %v7970_v3 = vpop.f32.mrb[164].mxu0  ;;  %v4077_v44 = vpop.f32.mrb[165].mxu1  ;;  %v4083_v27 = vadd.f32 %v7850_v60, %v13378_v40 }
 0x678   :  { %v4527_v46 = vpop.f32.mrb[165].mxu0  ;;  %v4078_v25 = vadd.f32 %v4077_v44, %v13379_v35  ;;  %v4533_v1 = vadd.f32 %v7970_v3, %v13378_v40  ;;  %v13385_v40 = vld [vmem:[#allocation73_spill] sm:$0xff] }
 0x679   :  { %4222 = vmax.xlane.f32.xlu1 %v4073_v11  ;;  %v4528_v55 = vadd.f32 %v4527_v46, %v13379_v35 }
 0x67a   :  { %4220 = vmax.xlane.f32.xlu0 %v4068_v10  ;;  %v7853_v7 = vpop.f32.mrb[166].mxu1 }
 0x67b   :  { %v7973_v26 = vpop.f32.mrb[166].mxu0  ;;  %v4087_v56 = vpop.f32.mrb[167].mxu1  ;;  %v4093_v13 = vadd.f32 %v7853_v7, %v13380_v4 }
 0x67c   :  { %v4537_v9 = vpop.f32.mrb[167].mxu0  ;;  %v4088_v8 = vadd.f32 %v4087_v56, %v13381_v45  ;;  %v4543_v19 = vadd.f32 %v7973_v26, %v13380_v4  ;;  %v13384_v56 = vld [vmem:[#allocation70_spill] sm:$0xff]  ;;  %v13386_v4 = vld [vmem:[#allocation16_spill] sm:$0xff] }
 0x67d   :  { %4672 = vmax.xlane.f32.xlu1 %v4523_v58  ;;  %v4538_v47 = vadd.f32 %v4537_v9, %v13381_v45 }
 0x67e   :  { %4670 = vmax.xlane.f32.xlu0 %v4518_v48  ;;  %v7856_v34 = vpop.f32.mrb[168].mxu1 }
 0x67f   :  { %v7976_v12 = vpop.f32.mrb[168].mxu0  ;;  %v4097_v2 = vpop.f32.mrb[169].mxu1  ;;  %v4103_v30 = vadd.f32 %v7856_v34, %v13382_v51 }
 0x680   :  { %v4547_v14 = vpop.f32.mrb[169].mxu0  ;;  %v4098_v11 = vadd.f32 %v4097_v2, %v13383_v21  ;;  %v4553_v62 = vadd.f32 %v7976_v12, %v13382_v51 }
 0x681   :  { %4226 = vmax.xlane.f32.xlu1 %v4083_v27  ;;  %v4548_v7 = vadd.f32 %v4547_v14, %v13383_v21 }
 0x682   :  { %4224 = vmax.xlane.f32.xlu0 %v4078_v25  ;;  %v7859_v49 = vpop.f32.mrb[170].mxu1 }
 0x683   :  { %v7979_v16 = vpop.f32.mrb[170].mxu0  ;;  %v4107_v43 = vpop.f32.mrb[171].mxu1  ;;  %v4113_v48 = vadd.f32 %v7859_v49, %v13384_v56 }
 0x684   :  { %v4557_v38 = vpop.f32.mrb[171].mxu0  ;;  %v4108_v27 = vadd.f32 %v4107_v43, %v13385_v40  ;;  %v4563_v35 = vadd.f32 %v7979_v16, %v13384_v56 }
 0x685   :  { %4676 = vmax.xlane.f32.xlu1 %v4533_v1  ;;  %v4558_v1 = vadd.f32 %v4557_v38, %v13385_v40 }
 0x686   :  { %4674 = vmax.xlane.f32.xlu0 %v4528_v55  ;;  %v7862_v57 = vpop.f32.mrb[172].mxu1 }
 0x687   :  { %v7982_v39 = vpop.f32.mrb[172].mxu0  ;;  %v4117_v36 = vpop.f32.mrb[173].mxu1 }
 0x688   :  { %v4567_v6 = vpop.f32.mrb[173].mxu0  ;;  %v4573_v51 = vadd.f32 %v7982_v39, %v13386_v4 }
 0x689   :  { %4230 = vmax.xlane.f32.xlu1 %v4093_v13  ;;  %v4123_v13 = vadd.f32 %v7862_v57, %v13386_v4 }
 0x68a   :  { %4228 = vmax.xlane.f32.xlu0 %v4088_v8  ;;  %v7865_v18 = vpop.f32.mrb[174].mxu1  ;;  %v13387_v8 = vld [vmem:[#allocation51_spill] sm:$0xff] }
 0x68b   :  { %v12193_v41 = vpop.f32.mrb[174].mxu0  ;;  %v4127_v15 = vpop.f32.mrb[175].mxu1  ;;  %v4568_v21 = vadd.f32 %v4567_v6, %v13387_v8 }
 0x68c   :  { %v12196_v29 = vpop.f32.mrb[175].mxu0 }
 0x68d   :  { %4680 = vmax.xlane.f32.xlu1 %v4543_v19  ;;  %v4118_v19 = vadd.f32 %v4117_v36, %v13387_v8 }
 0x68e   :  { %4678 = vmax.xlane.f32.xlu0 %v4538_v47  ;;  %v7868_v42 = vpop.f32.mrb[176].mxu1 }
 0x68f   :  { %v12199_v33 = vpop.f32.mrb[176].mxu0  ;;  %v12201_v60 = vpop.f32.mrb[177].mxu1 }
 0x690   :  { %v4587_v3 = vpop.f32.mrb[177].mxu0 }
 0x691   :  { %4234 = vmax.xlane.f32.xlu1 %v4103_v30 }
 0x692   :  { %4232 = vmax.xlane.f32.xlu0 %v4098_v11  ;;  %v7871_v44 = vpop.f32.mrb[178].mxu1 }
 0x693   :  { %v12205_v10 = vpop.f32.mrb[178].mxu0  ;;  %v12207_v46 = vpop.f32.mrb[179].mxu1 }
 0x694   :  { %v4597_v58 = vpop.f32.mrb[179].mxu0 }
 0x695   :  { %4684 = vmax.xlane.f32.xlu1 %v4553_v62  ;;  %v13388_v62 = vld [vmem:[#allocation40_spill] sm:$0xff] }
 0x696   :  { %4682 = vmax.xlane.f32.xlu0 %v4548_v7  ;;  %v7874_v26 = vpop.f32.mrb[180].mxu1  ;;  %v4133_v7 = vadd.f32 %v7865_v18, %v13388_v62  ;;  %v13391_v18 = vld [vmem:[#allocation76_spill] sm:$0xff] }
 0x697   :  { %v12211_v9 = vpop.f32.mrb[180].mxu0  ;;  %v12213_v34 = vpop.f32.mrb[181].mxu1 }
 0x698   :  { %v4607_v2 = vpop.f32.mrb[181].mxu0 }
 0x699   :  { %4238 = vmax.xlane.f32.xlu1 %v4113_v48  ;;  %v13389_v48 = vld [vmem:[#allocation52_spill] sm:$0xff] }
 0x69a   :  { %4236 = vmax.xlane.f32.xlu0 %v4108_v27  ;;  %v7877_v12 = vpop.f32.mrb[182].mxu1  ;;  %v4128_v40 = vadd.f32 %v4127_v15, %v13389_v48 }
 0x69b   :  { %v12217_v25 = vpop.f32.mrb[182].mxu0  ;;  %v12219_v14 = vpop.f32.mrb[183].mxu1 }
 0x69c   :  { %v4617_v55 = vpop.f32.mrb[183].mxu0 }
 0x69d   :  { %4688 = vmax.xlane.f32.xlu1 %v4563_v35  ;;  %v13390_v35 = vld [vmem:[#allocation75_spill] sm:$0xff] }
 0x69e   :  { %4686 = vmax.xlane.f32.xlu0 %v4558_v1  ;;  %v7880_v49 = vpop.f32.mrb[184].mxu1  ;;  %v4143_v1 = vadd.f32 %v7868_v42, %v13390_v35  ;;  %v4593_v15 = vadd.f32 %v12199_v33, %v13390_v35  ;;  %v4138_v42 = vadd.f32 %v12201_v60, %v13391_v18 }
 0x69f   :  { %v12223_v45 = vpop.f32.mrb[184].mxu0  ;;  %v12225_v43 = vpop.f32.mrb[185].mxu1 }
 0x6a0   :  { %v4627_v47 = vpop.f32.mrb[185].mxu0 }
 0x6a1   :  { %4242 = vmax.xlane.f32.xlu1 %v4123_v13  ;;  %v4578_v13 = vadd.f32 %v12196_v29, %v13389_v48 }
 0x6a2   :  { %4240 = vmax.xlane.f32.xlu0 %v4118_v19  ;;  %v7883_v16 = vpop.f32.mrb[186].mxu1  ;;  %v4588_v19 = vadd.f32 %v4587_v3, %v13391_v18  ;;  %v13394_v3 = vld [vmem:[#allocation79_spill] sm:$0xff] }
 0x6a3   :  { %v12229_v30 = vpop.f32.mrb[186].mxu0  ;;  %v12231_v38 = vpop.f32.mrb[187].mxu1  ;;  %v4163_v48 = vadd.f32 %v7874_v26, %v13394_v3  ;;  %v4613_v60 = vadd.f32 %v12211_v9, %v13394_v3  ;;  %v13397_v26 = vld [vmem:[#allocation82_spill] sm:$0xff] }
 0x6a4   :  { %v4637_v11 = vpop.f32.mrb[187].mxu0  ;;  %v4168_v9 = vadd.f32 %v12219_v14, %v13397_v26 }
 0x6a5   :  { %4692 = vmax.xlane.f32.xlu1 %v4573_v51  ;;  %v13392_v51 = vld [vmem:[#allocation77_spill] sm:$0xff] }
 0x6a6   :  { %4690 = vmax.xlane.f32.xlu0 %v4568_v21  ;;  %v7886_v57 = vpop.f32.mrb[188].mxu1  ;;  %v4153_v21 = vadd.f32 %v7871_v44, %v13392_v51  ;;  %v4603_v29 = vadd.f32 %v12205_v10, %v13392_v51  ;;  %v13395_v44 = vld [vmem:[#allocation80_spill] sm:$0xff] }
 0x6a7   :  { %v12235_v56 = vpop.f32.mrb[188].mxu0  ;;  %v12237_v36 = vpop.f32.mrb[189].mxu1  ;;  %v4608_v35 = vadd.f32 %v4607_v2, %v13395_v44  ;;  %v4158_v10 = vadd.f32 %v12213_v34, %v13395_v44  ;;  %v13398_v2 = vld [vmem:[#allocation83_spill] sm:$0xff] }
 0x6a8   :  { %v4647_v27 = vpop.f32.mrb[189].mxu0  ;;  %v4183_v18 = vadd.f32 %v7880_v49, %v13398_v2  ;;  %v4633_v34 = vadd.f32 %v12223_v45, %v13398_v2  ;;  %v13401_v49 = vld [vmem:[#allocation18_spill] sm:$0xff] }
 0x6a9   :  { %4246 = vmax.xlane.f32.xlu1 %v4133_v7  ;;  %v13393_v7 = vld [vmem:[#allocation78_spill] sm:$0xff]  ;;  %v4638_v51 = vadd.f32 %v4637_v11, %v13401_v49  ;;  %v4188_v45 = vadd.f32 %v12231_v38, %v13401_v49  ;;  %v13404_v11 = vld [vmem:[#allocation59_spill] sm:$0xff] }
 0x6aa   :  { %4244 = vmax.xlane.f32.xlu0 %v4128_v40  ;;  %v7889_v39 = vpop.f32.mrb[190].mxu1  ;;  %v4598_v40 = vadd.f32 %v4597_v58, %v13393_v7  ;;  %v4148_v33 = vadd.f32 %v12207_v46, %v13393_v7  ;;  %v13396_v58 = vld [vmem:[#allocation81_spill] sm:$0xff] }
 0x6ab   :  { %v12241_v4 = vpop.f32.mrb[190].mxu0  ;;  %v4207_v6 = vpop.f32.mrb[191].mxu1  ;;  %v4623_v46 = vadd.f32 %v12217_v25, %v13396_v58  ;;  %v4213_v7 = vadd.f32 %v7889_v39, %v13404_v11 }
 0x6ac   :  { %v4657_v8 = vpop.f32.mrb[191].mxu0 }
 0x6ad   :  { %4250 = vmax.xlane.f32.xlu1 %v4143_v1  ;;  %v4173_v1 = vadd.f32 %v7877_v12, %v13396_v58  ;;  %v13399_v12 = vld [vmem:[#allocation84_spill] sm:$0xff] }
 0x6ae   :  { %4694 = vmax.xlane.f32.xlu0 %v4578_v13  ;;  %v4618_v13 = vadd.f32 %v4617_v55, %v13397_v26  ;;  %v13400_v55 = vld [vmem:[#allocation23_spill] sm:$0xff]  ;;  %v4178_v25 = vadd.f32 %v12225_v43, %v13399_v12 }
 0x6af   :  { %v4643_v14 = vadd.f32 %v12229_v30, %v13400_v55 }
 0x6b1   :  { %4698 = vmax.xlane.f32.xlu1 %v4588_v19  ;;  %v4628_v19 = vadd.f32 %v4627_v47, %v13399_v12  ;;  %v13402_v47 = vld [vmem:[#allocation57_spill] sm:$0xff] }
 0x6b2   :  { %4700 = vmax.xlane.f32.xlu0 %v4593_v15  ;;  %v4193_v15 = vadd.f32 %v7883_v16, %v13400_v55  ;;  %v13403_v16 = vld [vmem:[#allocation50_spill] sm:$0xff]  ;;  %v4653_v43 = vadd.f32 %v12235_v56, %v13402_v47  ;;  %v4583_v56 = vadd.f32 %v12193_v41, %v13388_v62 }
 0x6b3   :  { %v4198_v30 = vadd.f32 %v12237_v36, %v13403_v16 }
 0x6b5   :  { %4254 = vmax.xlane.f32.xlu1 %v4153_v21  ;;  %v4203_v21 = vadd.f32 %v7886_v57, %v13402_v47  ;;  %v13405_v57 = vld [vmem:[#allocation60_spill] sm:$0xff] }
 0x6b6   :  { %4248 = vmax.xlane.f32.xlu0 %v4138_v42  ;;  %v4648_v42 = vadd.f32 %v4647_v27, %v13403_v16  ;;  %v4208_v38 = vadd.f32 %v4207_v6, %v13405_v57  ;;  %v4663_v27 = vadd.f32 %v12241_v4, %v13404_v11 }
 0x6b9   :  { %4702 = vmax.xlane.f32.xlu1 %v4598_v40  ;;  %v4658_v40 = vadd.f32 %v4657_v8, %v13405_v57 }
 0x6ba   :  { %4704 = vmax.xlane.f32.xlu0 %v4603_v29 }
 0x6bd   :  { %4258 = vmax.xlane.f32.xlu1 %v4163_v48 }
 0x6be   :  { %4252 = vmax.xlane.f32.xlu0 %v4148_v33 }
 0x6c1   :  { %4706 = vmax.xlane.f32.xlu1 %v4608_v35 }
 0x6c2   :  { %4708 = vmax.xlane.f32.xlu0 %v4613_v60 }
 0x6c5   :  { %4262 = vmax.xlane.f32.xlu1 %v4173_v1 }
 0x6c6   :  { %4256 = vmax.xlane.f32.xlu0 %v4158_v10 }
 0x6c9   :  { %4710 = vmax.xlane.f32.xlu1 %v4618_v13 }
 0x6ca   :  { %4712 = vmax.xlane.f32.xlu0 %v4623_v46 }
 0x6cd   :  { %4266 = vmax.xlane.f32.xlu1 %v4183_v18 }
 0x6ce   :  { %4260 = vmax.xlane.f32.xlu0 %v4168_v9 }
 0x6d1   :  { %4714 = vmax.xlane.f32.xlu1 %v4628_v19 }
 0x6d2   :  { %4716 = vmax.xlane.f32.xlu0 %v4633_v34 }
 0x6d5   :  { %4270 = vmax.xlane.f32.xlu1 %v4193_v15 }
 0x6d6   :  { %4264 = vmax.xlane.f32.xlu0 %v4178_v25 }
 0x6d9   :  { %4718 = vmax.xlane.f32.xlu1 %v4638_v51 }
 0x6da   :  { %4720 = vmax.xlane.f32.xlu0 %v4643_v14 }
 0x6dd   :  { %4274 = vmax.xlane.f32.xlu1 %v4203_v21 }
 0x6de   :  { %4268 = vmax.xlane.f32.xlu0 %v4188_v45 }
 0x6e1   :  { %4722 = vmax.xlane.f32.xlu1 %v4648_v42 }
 0x6e2   :  { %4724 = vmax.xlane.f32.xlu0 %v4653_v43 }
 0x6e5   :  { %4278 = vmax.xlane.f32.xlu1 %v4213_v7 }
 0x6e6   :  { %4272 = vmax.xlane.f32.xlu0 %v4198_v30 }
 0x6e9   :  { %4726 = vmax.xlane.f32.xlu1 %v4658_v40 }
 0x6ea   :  { %4276 = vmax.xlane.f32.xlu0 %v4208_v38 }
 0x6ed   :  { %4728 = vmax.xlane.f32.xlu1 %v4663_v27 }
 0x6ee   :  { %4696 = vmax.xlane.f32.xlu0 %v4583_v56 }
 0x6fe   :  { %v4219_v39 = vpop.xlane.xlu1 %4218 }
 0x6ff   :  { %v4669_v29 = vpop.xlane.xlu0 %4668  ;;  %v5953_v36 = vrot.slane %v4219_v39, %v11507_v32 }
 0x700   :  { %v6145_v3 = vrot.slane %v4669_v29, %v11507_v32 }
 0x702   :  { %v4667_v48 = vpop.xlane.xlu1 %4666 }
 0x703   :  { %v4217_v8 = vpop.xlane.xlu0 %4216  ;;  %v6141_v6 = vrot.slane %v4667_v48, %v11493_v63 }
 0x704   :  { %v5949_v33 = vrot.slane %v4217_v8, %v11493_v63 }
 0x705   :  { %v6146_v44 = vsel %vm4773_vm1, %v6145_v3, %v6141_v6 }
 0x706   :  { %v5954_v4 = vsel %vm4773_vm1, %v5953_v36, %v5949_v33  ;;  %v4223_v35 = vpop.xlane.xlu1 %4222 }
 0x707   :  { %v4221_v41 = vpop.xlane.xlu0 %4220  ;;  %v5963_v62 = vrot.slane %v4223_v35, %v11517_v5 }
 0x708   :  { %v5958_v60 = vrot.slane %v4221_v41, %v11500_v59 }
 0x70a   :  { %v5959_v58 = vsel %vm13406_vm9, %v5958_v60, %v5954_v4  ;;  %v4673_v1 = vpop.xlane.xlu1 %4672  ;;  %vm13416_vm9 = vmmov %vm13414_vm4 }
 0x70b   :  { %v5964_v10 = vsel %vm4787_vm3, %v5963_v62, %v5959_v58  ;;  %v4671_v26 = vpop.xlane.xlu0 %4670  ;;  %v6155_v13 = vrot.slane %v4673_v1, %v11517_v5 }
 0x70c   :  { %v6150_v46 = vrot.slane %v4671_v26, %v11500_v59 }
 0x70e   :  { %v6151_v2 = vsel %vm13407_vm10, %v6150_v46, %v6146_v44  ;;  %v4227_v18 = vpop.xlane.xlu1 %4226  ;;  %vm13417_vm10 = vmmov %vm13415_vm0 }
 0x70f   :  { %v6156_v9 = vsel %vm4787_vm3, %v6155_v13, %v6151_v2  ;;  %v4225_v12 = vpop.xlane.xlu0 %4224  ;;  %v5973_v19 = vrot.slane %v4227_v18, %v11538_v20 }
 0x710   :  { %v5968_v34 = vrot.slane %v4225_v12, %v11526_v50 }
 0x712   :  { %v5969_v55 = vsel %vm13408_vm12, %v5968_v34, %v5964_v10  ;;  %v4677_v15 = vpop.xlane.xlu1 %4676  ;;  %vm13418_vm12 = vcmask 720512  }
 0x713   :  { %v5974_v25 = vsel %vm4801_vm5, %v5973_v19, %v5969_v55  ;;  %v4675_v49 = vpop.xlane.xlu0 %4674  ;;  %v6165_v51 = vrot.slane %v4677_v15, %v11538_v20 }
 0x714   :  { %v6160_v14 = vrot.slane %v4675_v49, %v11526_v50 }
 0x716   :  { %v6161_v47 = vsel %vm13409_vm11, %v6160_v14, %v6156_v9  ;;  %v4231_v21 = vpop.xlane.xlu1 %4230  ;;  %vm13419_vm11 = vcmask 786112  }
 0x717   :  { %v6166_v45 = vsel %vm4801_vm5, %v6165_v51, %v6161_v47  ;;  %v4229_v16 = vpop.xlane.xlu0 %4228  ;;  %v5983_v42 = vrot.slane %v4231_v21, %v11567_v61 }
 0x718   :  { %v5978_v43 = vrot.slane %v4229_v16, %v11549_v0 }
 0x71a   :  { %v5979_v11 = vsel %vm13410_vm2, %v5978_v43, %v5974_v25  ;;  %v4681_v7 = vpop.xlane.xlu1 %4680  ;;  %vm13420_vm2 = vmmov %vm13418_vm12 }
 0x71b   :  { %v5984_v30 = vsel %vm13411_vm7, %v5983_v42, %v5979_v11  ;;  %v4679_v57 = vpop.xlane.xlu0 %4678  ;;  %v6175_v40 = vrot.slane %v4681_v7, %v11567_v61  ;;  %vm13421_vm7 = vmmov %vm13419_vm11 }
 0x71c   :  { %v6170_v38 = vrot.slane %v4679_v57, %v11549_v0 }
 0x71e   :  { %v6171_v27 = vsel %vm13412_vm8, %v6170_v38, %v6166_v45  ;;  %v4235_v56 = vpop.xlane.xlu1 %4234  ;;  %vm13422_vm8 = vcmask 851712  }
 0x71f   :  { %v6176_v39 = vsel %vm13413_vm6, %v6175_v40, %v6171_v27  ;;  %v4233_v29 = vpop.xlane.xlu0 %4232  ;;  %v5993_v36 = vrot.slane %v4235_v56, %v11596_v37  ;;  %vm13423_vm6 = vmmov %vm13422_vm8 }
 0x720   :  { %v5988_v3 = vrot.slane %v4233_v29, %v11590_v31 }
 0x722   :  { %v5989_v48 = vsel %vm13414_vm4, %v5988_v3, %v5984_v30  ;;  %v4685_v8 = vpop.xlane.xlu1 %4684  ;;  %vm6313_vm4 = vcmask 1045504  }
 0x723   :  { %v5994_v6 = vsel %vm13415_vm0, %v5993_v36, %v5989_v48  ;;  %v4683_v33 = vpop.xlane.xlu0 %4682  ;;  %v6185_v44 = vrot.slane %v4685_v8, %v11596_v37  ;;  %vm13424_vm0 = vcmask 195712  }
 0x724   :  { %v6180_v4 = vrot.slane %v4683_v33, %v11590_v31 }
 0x726   :  { %v6181_v35 = vsel %vm13416_vm9, %v6180_v4, %v6176_v39  ;;  %v4239_v41 = vpop.xlane.xlu1 %4238  ;;  %vm13425_vm9 = vmmov %vm13424_vm0 }
 0x727   :  { %v6186_v62 = vsel %vm13417_vm10, %v6185_v44, %v6181_v35  ;;  %v4237_v60 = vpop.xlane.xlu0 %4236  ;;  %v6003_v58 = vrot.slane %v4239_v41, %v11647_v53  ;;  %vm13426_vm10 = vcmask 326912  }
 0x728   :  { %v5998_v1 = vrot.slane %v4237_v60, %v11619_v22 }
 0x72a   :  { %v5999_v10 = vsel %vm13418_vm12, %v5998_v1, %v5994_v6  ;;  %v4689_v26 = vpop.xlane.xlu1 %4688  ;;  %vm13428_vm12 = vcmask 458112  }
 0x72b   :  { %v6004_v13 = vsel %vm13419_vm11, %v6003_v58, %v5999_v10  ;;  %v4687_v46 = vpop.xlane.xlu0 %4686  ;;  %v6195_v2 = vrot.slane %v4689_v26, %v11647_v53  ;;  %vm13430_vm11 = vcmask 523712  }
 0x72c   :  { %v6190_v18 = vrot.slane %v4687_v46, %v11619_v22 }
 0x72e   :  { %v6191_v9 = vsel %vm13420_vm2, %v6190_v18, %v6186_v62  ;;  %v4243_v12 = vpop.xlane.xlu1 %4242  ;;  %vm13431_vm2 = vcmask 589312  }
 0x72f   :  { %v6196_v19 = vsel %vm13421_vm7, %v6195_v2, %v6191_v9  ;;  %v4241_v34 = vpop.xlane.xlu0 %4240  ;;  %v6013_v55 = vrot.slane %v4243_v12, %v11658_v24  ;;  %vm13432_vm7 = vmmov %vm13430_vm11 }
 0x730   :  { %v6008_v15 = vrot.slane %v4241_v34, %v11650_v52 }
 0x732   :  { %v6009_v25 = vsel %vm13422_vm8, %v6008_v15, %v6004_v13  ;;  %v4693_v49 = vpop.xlane.xlu1 %4692  ;;  %vm13434_vm8 = vcmask 654912  }
 0x733   :  { %v6014_v51 = vsel %vm4857_vm13, %v6013_v55, %v6009_v25  ;;  %v4691_v14 = vpop.xlane.xlu0 %4690  ;;  %v6205_v47 = vrot.slane %v4693_v49, %v11658_v24 }
 0x734   :  { %v6200_v21 = vrot.slane %v4691_v14, %v11650_v52 }
 0x736   :  { %v6201_v45 = vsel %vm13423_vm6, %v6200_v21, %v6196_v19  ;;  %v4247_v16 = vpop.xlane.xlu1 %4246  ;;  %vm13435_vm6 = vcmask 720512  }
 0x737   :  { %v6206_v42 = vsel %vm4857_vm13, %v6205_v47, %v6201_v45  ;;  %v4245_v43 = vpop.xlane.xlu0 %4244  ;;  %v6023_v11 = vrot.slane %v4247_v16, %v11728_v54 }
 0x738   :  { %v6018_v7 = vrot.slane %v4245_v43, %v11692_v28 }
 0x73a   :  { %v6019_v30 = vsel %vm4864_vm14, %v6018_v7, %v6014_v51  ;;  %v4251_v57 = vpop.xlane.xlu1 %4250 }
 0x73b   :  { %v6024_v40 = vsel %vm4871_vm15, %v6023_v11, %v6019_v30  ;;  %v4695_v38 = vpop.xlane.xlu0 %4694  ;;  %v6032_v46 = vrot.slane %v4251_v57, %v11507_v32 }
 0x73c   :  { %v6210_v27 = vrot.slane %v4695_v38, %v11692_v28  ;;  %v12354_v56 = vsel %vm6313_vm4, %v11921_v17, %v6024_v40 }
 0x73e   :  { %v12357_v39 = vsel %vm4864_vm14, %v6210_v27, %v6206_v42  ;;  %v4699_v29 = vpop.xlane.xlu1 %4698 }
 0x73f   :  { %v4701_v36 = vpop.xlane.xlu0 %4700  ;;  %v6220_v18 = vrot.slane %v4699_v29, %v11493_v63 }
 0x740   :  { %v6224_v2 = vrot.slane %v4701_v36, %v11507_v32 }
 0x742   :  { %v4255_v3 = vpop.xlane.xlu1 %4254  ;;  %v6225_v25 = vsel %vm4773_vm1, %v6224_v2, %v6220_v18 }
 0x743   :  { %v4249_v48 = vpop.xlane.xlu0 %4248  ;;  %v6042_v49 = vrot.slane %v4255_v3, %v11517_v5 }
 0x744   :  { %v6028_v10 = vrot.slane %v4249_v48, %v11493_v63 }
 0x746   :  { %v4703_v8 = vpop.xlane.xlu1 %4702  ;;  %v6033_v19 = vsel %vm4773_vm1, %v6032_v46, %v6028_v10  ;;  %vm13427_vm1 = vmmov %vm13426_vm10 }
 0x747   :  { %v4705_v6 = vpop.xlane.xlu0 %4704  ;;  %v6229_v12 = vrot.slane %v4703_v8, %v11500_v59 }
 0x748   :  { %v6234_v51 = vrot.slane %v4705_v6, %v11517_v5 }
 0x749   :  { %v6230_v32 = vsel %vm13425_vm9, %v6229_v12, %v6225_v25  ;;  %vm13437_vm9 = vmmov %vm13435_vm6 }
 0x74a   :  { %v4259_v33 = vpop.xlane.xlu1 %4258  ;;  %v6235_v43 = vsel %vm4787_vm3, %v6234_v51, %v6230_v32 }
 0x74b   :  { %v4253_v44 = vpop.xlane.xlu0 %4252  ;;  %v6052_v16 = vrot.slane %v4259_v33, %v11538_v20 }
 0x74c   :  { %v6037_v26 = vrot.slane %v4253_v44, %v11500_v59 }
 0x74e   :  { %v4707_v4 = vpop.xlane.xlu1 %4706  ;;  %v6038_v34 = vsel %vm13424_vm0, %v6037_v26, %v6033_v19  ;;  %vm13436_vm0 = vmmov %vm13434_vm8 }
 0x74f   :  { %v4709_v35 = vpop.xlane.xlu0 %4708  ;;  %v6239_v63 = vrot.slane %v4707_v4, %v11526_v50  ;;  %v6043_v59 = vsel %vm4787_vm3, %v6042_v49, %v6038_v34  ;;  %vm13429_vm3 = vmmov %vm13428_vm12 }
 0x750   :  { %v6244_v42 = vrot.slane %v4709_v35, %v11538_v20 }
 0x751   :  { %v6240_v5 = vsel %vm13427_vm1, %v6239_v63, %v6235_v43  ;;  %vm13439_vm1 = vcmask 851712  }
 0x752   :  { %v4263_v41 = vpop.xlane.xlu1 %4262  ;;  %v6245_v20 = vsel %vm4801_vm5, %v6244_v42, %v6240_v5 }
 0x753   :  { %v4257_v62 = vpop.xlane.xlu0 %4256  ;;  %v6062_v38 = vrot.slane %v4263_v41, %v11567_v61 }
 0x754   :  { %v6047_v55 = vrot.slane %v4257_v62, %v11526_v50 }
 0x756   :  { %v4711_v60 = vpop.xlane.xlu1 %4710  ;;  %v6048_v47 = vsel %vm13426_vm10, %v6047_v55, %v6043_v59  ;;  %vm13438_vm10 = vcmask 786112  }
 0x757   :  { %v4713_v58 = vpop.xlane.xlu0 %4712  ;;  %v6249_v7 = vrot.slane %v4711_v60, %v11549_v0  ;;  %v6053_v50 = vsel %vm4801_vm5, %v6052_v16, %v6048_v47  ;;  %vm13433_vm5 = vmmov %vm13431_vm2 }
 0x758   :  { %v6254_v27 = vrot.slane %v4713_v58, %v11567_v61 }
 0x759   :  { %v6250_v36 = vsel %vm13429_vm3, %v6249_v7, %v6245_v20  ;;  %vm13441_vm3 = vmmov %vm13439_vm1 }
 0x75a   :  { %v4267_v1 = vpop.xlane.xlu1 %4266  ;;  %v6255_v61 = vsel %vm13432_vm7, %v6254_v27, %v6250_v36 }
 0x75b   :  { %v4261_v17 = vpop.xlane.xlu0 %4260  ;;  %v6072_v33 = vrot.slane %v4267_v1, %v11596_v37 }
 0x75c   :  { %v6057_v21 = vrot.slane %v4261_v17, %v11549_v0 }
 0x75e   :  { %v4715_v13 = vpop.xlane.xlu1 %4714  ;;  %v6058_v30 = vsel %vm13428_vm12, %v6057_v21, %v6053_v50  ;;  %vm13440_vm12 = vmmov %vm13438_vm10 }
 0x75f   :  { %v4717_v9 = vpop.xlane.xlu0 %4716  ;;  %v6259_v3 = vrot.slane %v4715_v13, %v11590_v31  ;;  %v6063_v0 = vsel %vm13430_vm11, %v6062_v38, %v6058_v30  ;;  %vm6316_vm11 = vcmask 1046528  }
 0x760   :  { %v6264_v44 = vrot.slane %v4717_v9, %v11596_v37 }
 0x761   :  { %v6260_v35 = vsel %vm13433_vm5, %v6259_v3, %v6255_v61 }
 0x762   :  { %v4271_v15 = vpop.xlane.xlu1 %4270  ;;  %v6265_v1 = vsel %vm13436_vm0, %v6264_v44, %v6260_v35 }
 0x763   :  { %v4265_v14 = vpop.xlane.xlu0 %4264  ;;  %v6082_v58 = vrot.slane %v4271_v15, %v11647_v53 }
 0x764   :  { %v6067_v57 = vrot.slane %v4265_v14, %v11590_v31 }
 0x766   :  { %v4719_v45 = vpop.xlane.xlu1 %4718  ;;  %v6068_v48 = vsel %vm13431_vm2, %v6067_v57, %v6063_v0 }
 0x767   :  { %v4721_v11 = vpop.xlane.xlu0 %4720  ;;  %v6269_v41 = vrot.slane %v4719_v45, %v11619_v22  ;;  %v6073_v31 = vsel %vm13434_vm8, %v6072_v33, %v6068_v48 }
 0x768   :  { %v6274_v17 = vrot.slane %v4721_v11, %v11647_v53 }
 0x769   :  { %v6270_v37 = vsel %vm13437_vm9, %v6269_v41, %v6265_v1 }
 0x76a   :  { %v4275_v40 = vpop.xlane.xlu1 %4274  ;;  %v6275_v53 = vsel %vm13440_vm12, %v6274_v17, %v6270_v37 }
 0x76b   :  { %v4269_v29 = vpop.xlane.xlu0 %4268  ;;  %v6092_v18 = vrot.slane %v4275_v40, %v11658_v24 }
 0x76c   :  { %v6077_v8 = vrot.slane %v4269_v29, %v11619_v22 }
 0x76e   :  { %v4723_v6 = vpop.xlane.xlu1 %4722  ;;  %v6078_v62 = vsel %vm13435_vm6, %v6077_v8, %v6073_v31 }
 0x76f   :  { %v4725_v4 = vpop.xlane.xlu0 %4724  ;;  %v6279_v26 = vrot.slane %v4723_v6, %v11650_v52  ;;  %v6083_v22 = vsel %vm13438_vm10, %v6082_v58, %v6078_v62 }
 0x770   :  { %v6284_v9 = vrot.slane %v4725_v4, %v11658_v24 }
 0x771   :  { %v6280_v19 = vsel %vm13441_vm3, %v6279_v26, %v6275_v53 }
 0x772   :  { %v4279_v60 = vpop.xlane.xlu1 %4278  ;;  %v6285_v24 = vsel %vm4857_vm13, %v6284_v9, %v6280_v19 }
 0x773   :  { %v4273_v10 = vpop.xlane.xlu0 %4272 }
 0x774   :  { %v6087_v13 = vrot.slane %v4273_v10, %v11650_v52  ;;  %v6102_v52 = vrot.slane %v4279_v60, %v11728_v54 }
 0x776   :  { %v6088_v46 = vsel %vm13439_vm1, %v6087_v13, %v6083_v22  ;;  %v4727_v2 = vpop.xlane.xlu1 %4726 }
 0x777   :  { %v4277_v12 = vpop.xlane.xlu0 %4276  ;;  %v6289_v55 = vrot.slane %v4727_v2, %v11692_v28  ;;  %v6093_v15 = vsel %vm4857_vm13, %v6092_v18, %v6088_v46 }
 0x778   :  { %v6097_v34 = vrot.slane %v4277_v12, %v11692_v28 }
 0x779   :  { %v6290_v63 = vsel %vm4864_vm14, %v6289_v55, %v6285_v24 }
 0x77a   :  { %v6098_v25 = vsel %vm4864_vm14, %v6097_v34, %v6093_v15  ;;  %v4729_v49 = vpop.xlane.xlu1 %4728 }
 0x77b   :  { %v6103_v51 = vsel %vm4871_vm15, %v6102_v52, %v6098_v25  ;;  %v4697_v14 = vpop.xlane.xlu0 %4696  ;;  %v6294_v32 = vrot.slane %v4729_v49, %v11728_v54 }
 0x77c   :  { %v6215_v28 = vrot.slane %v4697_v14, %v11728_v54  ;;  %v6315_v59 = vsel %vm6313_vm4, %v12176_v23, %v6103_v51 }
 0x77d   :  { %v6295_v47 = vsel %vm4871_vm15, %v6294_v32, %v6290_v63 }
 0x77e   :  { %v6216_v21 = vsel %vm4871_vm15, %v6215_v28, %v12357_v39  ;;  %v6318_v45 = vsel %vm6316_vm11, %v6315_v59, %v6295_v47 }
 0x77f   :  { %v6317_v16 = vsel %vm6316_vm11, %v12354_v56, %v6216_v21  ;;  %6331 = vst [vmem:[#allocation3 + $0x8] sm:$0xff] %v6318_v45 }
 0x780   :  { %6330 = vst [vmem:[#allocation3] sm:$0xff] %v6317_v16 }
 0x781   :  { %8504 = shalt.err (!%p8501_p4)
}
 0x782   :  { %s8505_s20 = scalar_lea.hbm %s12446_s7, 256 }
 0x783   :  { %p8506_p5 = scmp.ne.s32.totalorder %s12446_s7, %s8505_s20  ;;  %p8509_p6 = scmp.lt.u32.totalorder %s8505_s20, %s12446_s7 }
 0x785   :  { %p8511_p7 = pnand %p8509_p6, %p8506_p5 }
 0x787   :  { %8514 = shalt.err (!%p8511_p7)
}
 0x788   :  { %6341 = dma.vmem_to_hbm [thread:$0]  %s6339_s18, 256, %s12446_s7, [#allocation4]  }
 0x789   :  { %8515 = dma.done.wait [#allocation4], 256  }
 0x78a   :  { %8516 = vsyncadd [#allocation4], 4294967040 }
 0x78b   :  { %6345 = vsyncpa [#allocation4], 1 }

</bundles_post_ra>
